<compile_context>
chip_gen: v6e
topology: v6e:2x2x1
jax: 0.10.0
libtpu: 0.0.40
codegen_flags: <defaults>
</compile_context>

<pallas_src>
import math

import jax
import jax.numpy as jnp
from jax.experimental import pallas as pl
from jax.experimental.pallas import tpu as pltpu


def _relu(x):
    return jnp.maximum(x, 0.0)


def _round_up(v, m):
    return ((v + m - 1) // m) * m


def tetris_kernel(*refs):
    (screen_ref, piece_ref,
     w1_ref, b1_ref, w2_ref, b2_ref,
     w3_ref, b3_ref, w4_ref, b4_ref, w5_ref, b5_ref,
     w6_ref, b6_ref, w7_ref, b7_ref, w8_ref, b8_ref,
     fc1_wx_ref, fc1_wp_ref, fc1_b_ref) = refs[:21]
    fc_refs = refs[21:-1]          # fc2..fc14 as (w, b) pairs; weights bf16 (128,128)
    o_ref = refs[-1]

    tb = piece_ref.shape[0]                      # batch tile (multiple of 16)
    seq = screen_ref.shape[0] // tb              # 19

    # conv1 (Cin=1, k=1): f32 elementwise broadcast along the 128-lane channel
    # axis, then a single cast to bf16 for the MXU chain.
    a = _relu(screen_ref[...] * w1_ref[...] + b1_ref[...]).astype(jnp.bfloat16)

    # conv2 (k=1): one bf16 matmul with f32 accumulation, M = seq*tb.
    a = _relu(jnp.dot(a, w2_ref[...], preferred_element_type=jnp.float32)
              + b2_ref[...]).astype(jnp.bfloat16)

    # conv3..conv8 (k=3, valid): three shifted bf16 matmuls per layer.  Shifts
    # are multiples of tb rows (tb % 16 == 0 -> bf16 sublane aligned).  conv8's
    # 64 output channels are zero-padded to 128 wrapper-side so every
    # activation stays lane-dense.  The chained sum keeps the tap accumulation
    # in one accumulator (MRB-friendly on v7x).
    for cw_ref, cb_ref in ((w3_ref, b3_ref), (w4_ref, b4_ref), (w5_ref, b5_ref),
                           (w6_ref, b6_ref), (w7_ref, b7_ref), (w8_ref, b8_ref)):
        seq -= 2
        rows = seq * tb
        out = (jnp.dot(a[0:rows, :], cw_ref[0],
                       preferred_element_type=jnp.float32)
               + jnp.dot(a[tb:tb + rows, :], cw_ref[1],
                         preferred_element_type=jnp.float32)
               + jnp.dot(a[2 * tb:2 * tb + rows, :], cw_ref[2],
                         preferred_element_type=jnp.float32)
               + cb_ref[...])
        a = _relu(out).astype(jnp.bfloat16)                          # (seq*tb, 128)

    # fc1: piece contribution once per batch tile + `seq` (=7) bf16 matmuls
    # with M=tb.  fc1_wx is pre-permuted / zero-padded wrapper-side to
    # (7, 128, 128), matching PyTorch's channel-major flatten of conv8's
    # (B, 64, 7) output.
    h32 = (jnp.dot(piece_ref[...].astype(jnp.bfloat16), fc1_wp_ref[...],
                   preferred_element_type=jnp.float32)
           + fc1_b_ref[...])
    for l in range(seq):
        h32 = h32 + jnp.dot(a[l * tb:(l + 1) * tb, :], fc1_wx_ref[l],
                            preferred_element_type=jnp.float32)
    h = _relu(h32)                                                   # (tb, 128) f32

    # fc2 .. fc13 with ReLU, fc14 (lane-padded to 128) linear.  All weights are
    # bf16 (128,128) (64-wide layers zero-padded), biases f32 (1,128).
    n_fc = len(fc_refs) // 2
    for i in range(n_fc):
        h32 = (jnp.dot(h.astype(jnp.bfloat16), fc_refs[2 * i][...],
                       preferred_element_type=jnp.float32)
               + fc_refs[2 * i + 1][...])
        h = _relu(h32) if i < n_fc - 1 else h32
    o_ref[...] = h                                                   # (tb, 128) f32


def init_torch_params(key, n_actions):
    """Deterministic synthetic parameters in PyTorch shape conventions."""
    conv_shapes = [
        (128, 1, 1), (128, 128, 1),
        (128, 128, 3), (128, 128, 3), (128, 128, 3),
        (128, 128, 3), (128, 128, 3), (64, 128, 3),
    ]
    fc_shapes = ([(128, 452)] + [(128, 128)] * 9
                 + [(64, 128), (64, 64), (64, 64), (n_actions, 64)])
    params = {"conv": [], "fc": []}
    for shp in conv_shapes:
        key, k1, k2 = jax.random.split(key, 3)
        scale = 1.0 / math.sqrt(shp[1] * shp[2])
        w = jax.random.normal(k1, shp, jnp.float32) * scale
        b = jax.random.normal(k2, (shp[0],), jnp.float32) * scale
        params["conv"].append((w, b))
    for shp in fc_shapes:
        key, k1, k2 = jax.random.split(key, 3)
        scale = 1.0 / math.sqrt(shp[1])
        w = jax.random.normal(k1, shp, jnp.float32) * scale
        b = jax.random.normal(k2, (shp[0],), jnp.float32) * scale
        params["fc"].append((w, b))
    return params


def tetris_forward_pallas(x, params, tile_b=256):
    """x: (B, 1, 20) float32 -> (B, n_actions) float32."""
    b_, c_, l_ = x.shape
    assert c_ == 1 and l_ == 20, "TetrisNN geometry requires input (B, 1, 20)"
    seq = l_ - 1                                       # 19
    n_actions = params["fc"][-1][0].shape[0]
    bf16 = jnp.bfloat16

    # Batch tiling: TB padded to a multiple of 16 (bf16 sublane alignment of
    # the k*tb conv shifts).  The grid over batch tiles is "parallel" so it
    # shards across TensorCores on v7x.
    tb = min(_round_up(b_, 16), _round_up(tile_b, 16))
    g = (b_ + tb - 1) // tb
    # v7x has two TensorCores: prefer >= 2 batch tiles when the batch is large
    # enough for the split to be worthwhile (costs one extra ~0.35us grid step
    # on single-TC chips).
    if g == 1 and b_ >= 64:
        tb = _round_up((b_ + 1) // 2, 16)
        g = (b_ + tb - 1) // tb
    bp = g * tb

    xp = jnp.pad(x[:, 0, :], ((0, bp - b_), (0, 0)))   # (Bp, 20)
    piece = xp[:, 0:4]                                 # (Bp, 4)
    # screen in (g, seq, tb) row order -> (g*seq*tb, 1); within a tile the row
    # index is l*tb + t, matching the kernel's (L, B) activation layout.
    # TODO(synk): this block lane-pads to 128 in VMEM; a dense (seq, tb) layout
    # would shrink it but needs an in-kernel lane->sublane relayout.
    screen = jnp.transpose(xp[:, 1:].reshape(g, tb, seq), (0, 2, 1))
    screen = screen.reshape(g * seq * tb, 1)

    cw = params["conv"]
    fw = params["fc"]

    wargs = []
    # conv1 (k=1, cin=1): elementwise, kept f32.  Weight (128,1,1) -> row (1,128).
    wargs += [cw[0][0][:, 0, 0].reshape(1, 128), cw[0][1].reshape(1, 128)]
    # conv2 (k=1): (128,128,1) -> (Cin,Cout) bf16.
    wargs += [jnp.transpose(cw[1][0][:, :, 0]).astype(bf16),
              cw[1][1].reshape(1, 128)]
    # conv3..conv7 (k=3): (Cout,Cin,3) -> (3,Cin,Cout) bf16.
    for i in range(2, 7):
        w, b = cw[i]
        wargs += [jnp.transpose(w, (2, 1, 0)).astype(bf16), b.reshape(1, -1)]
    # conv8 (k=3, Cout=64): zero-pad Cout to 128 lanes.
    w8, b8 = cw[7]
    w8t = jnp.transpose(w8, (2, 1, 0))                                # (3,128,64)
    w8p = jnp.zeros((3, 128, 128), jnp.float32).at[:, :, :64].set(w8t)
    b8p = jnp.zeros((1, 128), jnp.float32).at[:, :64].set(b8.reshape(1, -1))
    wargs += [w8p.astype(bf16), b8p]
    # fc1: split flatten-part / piece-part; permute the flatten block so the
    # kernel consumes conv8 output in its (L, B, C) layout; zero-pad the 64
    # channel rows to 128 to match the padded conv8 activation.
    w1, b1 = fw[0]
    wx = jnp.transpose(w1[:, :448].reshape(128, 64, 7), (2, 1, 0))    # (7,64,128)
    wxp = jnp.zeros((7, 128, 128), jnp.float32).at[:, :64, :].set(wx)
    wp = jnp.transpose(w1[:, 448:])                                   # (4,128)
    wargs += [wxp.astype(bf16), wp.astype(bf16), b1.reshape(1, -1)]
    # fc2..fc14: transpose to (in, out), zero-pad every 64-wide dim (and the
    # n_actions output) to 128 so h stays lane-dense; biases zero-padded too.
    for w, b in fw[1:]:
        o_dim, i_dim = w.shape
        wpad = jnp.zeros((128, 128), jnp.float32).at[:i_dim, :o_dim].set(
            jnp.transpose(w))
        bpad = jnp.zeros((1, 128), jnp.float32).at[:, :o_dim].set(
            b.reshape(1, -1))
        wargs += [wpad.astype(bf16), bpad]

    def _full(a):
        # Whole-array VMEM-resident block, constant across the batch grid.
        return pl.BlockSpec(a.shape, lambda gi, _nd=a.ndim: (0,) * _nd)

    in_specs = ([pl.BlockSpec((seq * tb, 1), lambda gi: (gi, 0)),
                 pl.BlockSpec((tb, 4), lambda gi: (gi, 0))]
                + [_full(a) for a in wargs])
    out_spec = pl.BlockSpec((tb, 128), lambda gi: (gi, 0))

    out = pl.pallas_call(
        tetris_kernel,
        out_shape=jax.ShapeDtypeStruct((bp, 128), jnp.float32),
        grid_spec=pltpu.PrefetchScalarGridSpec(
            num_scalar_prefetch=0,
            grid=(g,),
            in_specs=in_specs,
            out_specs=out_spec),
        compiler_params=pltpu.CompilerParams(
            dimension_semantics=("parallel",),
            # Above the 16/32 MiB scoped defaults, below v7x's 64 MiB physical.
            vmem_limit_bytes=48 * 1024 * 1024),
    )(screen, piece, *wargs)
    return out[:b_, :n_actions]


def tetris_forward_ref(x, params, matmul_dtype=jnp.float32):
    """Pure-JAX reference mirroring the PyTorch forward.

    With matmul_dtype=bfloat16 it mirrors the kernel's precision choices
    (bf16 matmul operands, f32 accumulation, f32 bias/ReLU; conv1 stays f32).
    """
    piece = x[:, 0, 0:4]
    a = x[:, :, 1:]

    def conv1d(a, w, b, dt):                   # w: (Cout, Cin, K), a: (B, Cin, L)
        k_sz = w.shape[2]
        lo = a.shape[2] - k_sz + 1
        acc = None
        for k in range(k_sz):
            t = jnp.einsum('bcl,oc->bol',
                           a[:, :, k:k + lo].astype(dt), w[:, :, k].astype(dt),
                           preferred_element_type=jnp.float32,
                           precision=jax.lax.Precision.HIGHEST)
            acc = t if acc is None else acc + t
        return acc + b[None, :, None]

    for li, (w, b) in enumerate(params["conv"]):
        dt = jnp.float32 if li == 0 else matmul_dtype
        a = jax.nn.relu(conv1d(a, w, b, dt))

    h = jnp.concatenate([a.reshape(a.shape[0], -1), piece], axis=1)   # (B, 452)
    n_fc = len(params["fc"])
    for i, (w, b) in enumerate(params["fc"]):
        h = jnp.dot(h.astype(matmul_dtype), w.T.astype(matmul_dtype),
                    preferred_element_type=jnp.float32,
                    precision=jax.lax.Precision.HIGHEST) + b
        if i < n_fc - 1:
            h = jax.nn.relu(h)
    return h


if __name__ == "__main__":
    n_actions = 8
    batch = 2
    seq_len = 20    # conv geometry implies 64*(L-13)+4 == 452  =>  L == 20

    key = jax.random.PRNGKey(0)
    k_params, k_x = jax.random.split(key)
    params = init_torch_params(k_params, n_actions)
    x = jax.random.normal(k_x, (batch, 1, seq_len), jnp.float32)

    out = tetris_forward_pallas(x, params)
    out = jax.block_until_ready(out)

    # Tight check vs. a precision-matched (bf16-operand, f32-accum) reference:
    # validates layout / indexing / conv+flatten wiring.
    ref_bf16 = tetris_forward_ref(x, params, matmul_dtype=jnp.bfloat16)
    if not jnp.allclose(out, ref_bf16, atol=1e-2, rtol=1e-2):
        raise AssertionError(
            f"Pallas output mismatch vs bf16-matched reference: max abs err "
            f"{float(jnp.max(jnp.abs(out - ref_bf16)))}")

    # Loose sanity check vs. the exact f32 PyTorch-equivalent forward: bounds
    # the deliberate bf16-MXU precision budget.
    ref_f32 = tetris_forward_ref(x, params, matmul_dtype=jnp.float32)
    if not jnp.allclose(out, ref_f32, atol=0.25, rtol=0.25):
        raise AssertionError(
            f"Pallas output mismatch vs f32 reference: max abs err "
            f"{float(jnp.max(jnp.abs(out - ref_f32)))}")

    print("KERNEL_OK")
</pallas_src>

<mosaic_0001>
module attributes {stable_mosaic.version = 11 : i64} {
  func.func @tetris_kernel(%arg0: i32, %arg1: memref<304x1xf32, #tpu.memory_space<vmem>>, %arg2: memref<16x4xf32, #tpu.memory_space<vmem>>, %arg3: memref<1x128xf32, #tpu.memory_space<vmem>>, %arg4: memref<1x128xf32, #tpu.memory_space<vmem>>, %arg5: memref<128x128xbf16, #tpu.memory_space<vmem>>, %arg6: memref<1x128xf32, #tpu.memory_space<vmem>>, %arg7: memref<3x128x128xbf16, #tpu.memory_space<vmem>>, %arg8: memref<1x128xf32, #tpu.memory_space<vmem>>, %arg9: memref<3x128x128xbf16, #tpu.memory_space<vmem>>, %arg10: memref<1x128xf32, #tpu.memory_space<vmem>>, %arg11: memref<3x128x128xbf16, #tpu.memory_space<vmem>>, %arg12: memref<1x128xf32, #tpu.memory_space<vmem>>, %arg13: memref<3x128x128xbf16, #tpu.memory_space<vmem>>, %arg14: memref<1x128xf32, #tpu.memory_space<vmem>>, %arg15: memref<3x128x128xbf16, #tpu.memory_space<vmem>>, %arg16: memref<1x128xf32, #tpu.memory_space<vmem>>, %arg17: memref<3x128x128xbf16, #tpu.memory_space<vmem>>, %arg18: memref<1x128xf32, #tpu.memory_space<vmem>>, %arg19: memref<7x128x128xbf16, #tpu.memory_space<vmem>>, %arg20: memref<4x128xbf16, #tpu.memory_space<vmem>>, %arg21: memref<1x128xf32, #tpu.memory_space<vmem>>, %arg22: memref<128x128xbf16, #tpu.memory_space<vmem>>, %arg23: memref<1x128xf32, #tpu.memory_space<vmem>>, %arg24: memref<128x128xbf16, #tpu.memory_space<vmem>>, %arg25: memref<1x128xf32, #tpu.memory_space<vmem>>, %arg26: memref<128x128xbf16, #tpu.memory_space<vmem>>, %arg27: memref<1x128xf32, #tpu.memory_space<vmem>>, %arg28: memref<128x128xbf16, #tpu.memory_space<vmem>>, %arg29: memref<1x128xf32, #tpu.memory_space<vmem>>, %arg30: memref<128x128xbf16, #tpu.memory_space<vmem>>, %arg31: memref<1x128xf32, #tpu.memory_space<vmem>>, %arg32: memref<128x128xbf16, #tpu.memory_space<vmem>>, %arg33: memref<1x128xf32, #tpu.memory_space<vmem>>, %arg34: memref<128x128xbf16, #tpu.memory_space<vmem>>, %arg35: memref<1x128xf32, #tpu.memory_space<vmem>>, %arg36: memref<128x128xbf16, #tpu.memory_space<vmem>>, %arg37: memref<1x128xf32, #tpu.memory_space<vmem>>, %arg38: memref<128x128xbf16, #tpu.memory_space<vmem>>, %arg39: memref<1x128xf32, #tpu.memory_space<vmem>>, %arg40: memref<128x128xbf16, #tpu.memory_space<vmem>>, %arg41: memref<1x128xf32, #tpu.memory_space<vmem>>, %arg42: memref<128x128xbf16, #tpu.memory_space<vmem>>, %arg43: memref<1x128xf32, #tpu.memory_space<vmem>>, %arg44: memref<128x128xbf16, #tpu.memory_space<vmem>>, %arg45: memref<1x128xf32, #tpu.memory_space<vmem>>, %arg46: memref<128x128xbf16, #tpu.memory_space<vmem>>, %arg47: memref<1x128xf32, #tpu.memory_space<vmem>>, %arg48: memref<16x128xf32, #tpu.memory_space<vmem>>) attributes {dimension_semantics = [#tpu.dimension_semantics<parallel>], iteration_bounds = array<i64: 1>, scalar_prefetch = 0 : i64, scratch_operands = 0 : i64, tpu.core_type = #tpu.core_type<tc>, window_params = [{transform_indices = @transform_0, window_bounds = array<i64: 304, 1>}, {transform_indices = @transform_1, window_bounds = array<i64: 16, 4>}, {pipeline_mode = #tpu.pipeline_mode<synchronous>, transform_indices = @transform_2, window_bounds = array<i64: 1, 128>}, {pipeline_mode = #tpu.pipeline_mode<synchronous>, transform_indices = @transform_3, window_bounds = array<i64: 1, 128>}, {pipeline_mode = #tpu.pipeline_mode<synchronous>, transform_indices = @transform_4, window_bounds = array<i64: 128, 128>}, {pipeline_mode = #tpu.pipeline_mode<synchronous>, transform_indices = @transform_5, window_bounds = array<i64: 1, 128>}, {pipeline_mode = #tpu.pipeline_mode<synchronous>, transform_indices = @transform_6, window_bounds = array<i64: 3, 128, 128>}, {pipeline_mode = #tpu.pipeline_mode<synchronous>, transform_indices = @transform_7, window_bounds = array<i64: 1, 128>}, {pipeline_mode = #tpu.pipeline_mode<synchronous>, transform_indices = @transform_8, window_bounds = array<i64: 3, 128, 128>}, {pipeline_mode = #tpu.pipeline_mode<synchronous>, transform_indices = @transform_9, window_bounds = array<i64: 1, 128>}, {pipeline_mode = #tpu.pipeline_mode<synchronous>, transform_indices = @transform_10, window_bounds = array<i64: 3, 128, 128>}, {pipeline_mode = #tpu.pipeline_mode<synchronous>, transform_indices = @transform_11, window_bounds = array<i64: 1, 128>}, {pipeline_mode = #tpu.pipeline_mode<synchronous>, transform_indices = @transform_12, window_bounds = array<i64: 3, 128, 128>}, {pipeline_mode = #tpu.pipeline_mode<synchronous>, transform_indices = @transform_13, window_bounds = array<i64: 1, 128>}, {pipeline_mode = #tpu.pipeline_mode<synchronous>, transform_indices = @transform_14, window_bounds = array<i64: 3, 128, 128>}, {pipeline_mode = #tpu.pipeline_mode<synchronous>, transform_indices = @transform_15, window_bounds = array<i64: 1, 128>}, {pipeline_mode = #tpu.pipeline_mode<synchronous>, transform_indices = @transform_16, window_bounds = array<i64: 3, 128, 128>}, {pipeline_mode = #tpu.pipeline_mode<synchronous>, transform_indices = @transform_17, window_bounds = array<i64: 1, 128>}, {pipeline_mode = #tpu.pipeline_mode<synchronous>, transform_indices = @transform_18, window_bounds = array<i64: 7, 128, 128>}, {pipeline_mode = #tpu.pipeline_mode<synchronous>, transform_indices = @transform_19, window_bounds = array<i64: 4, 128>}, {pipeline_mode = #tpu.pipeline_mode<synchronous>, transform_indices = @transform_20, window_bounds = array<i64: 1, 128>}, {pipeline_mode = #tpu.pipeline_mode<synchronous>, transform_indices = @transform_21, window_bounds = array<i64: 128, 128>}, {pipeline_mode = #tpu.pipeline_mode<synchronous>, transform_indices = @transform_22, window_bounds = array<i64: 1, 128>}, {pipeline_mode = #tpu.pipeline_mode<synchronous>, transform_indices = @transform_23, window_bounds = array<i64: 128, 128>}, {pipeline_mode = #tpu.pipeline_mode<synchronous>, transform_indices = @transform_24, window_bounds = array<i64: 1, 128>}, {pipeline_mode = #tpu.pipeline_mode<synchronous>, transform_indices = @transform_25, window_bounds = array<i64: 128, 128>}, {pipeline_mode = #tpu.pipeline_mode<synchronous>, transform_indices = @transform_26, window_bounds = array<i64: 1, 128>}, {pipeline_mode = #tpu.pipeline_mode<synchronous>, transform_indices = @transform_27, window_bounds = array<i64: 128, 128>}, {pipeline_mode = #tpu.pipeline_mode<synchronous>, transform_indices = @transform_28, window_bounds = array<i64: 1, 128>}, {pipeline_mode = #tpu.pipeline_mode<synchronous>, transform_indices = @transform_29, window_bounds = array<i64: 128, 128>}, {pipeline_mode = #tpu.pipeline_mode<synchronous>, transform_indices = @transform_30, window_bounds = array<i64: 1, 128>}, {pipeline_mode = #tpu.pipeline_mode<synchronous>, transform_indices = @transform_31, window_bounds = array<i64: 128, 128>}, {pipeline_mode = #tpu.pipeline_mode<synchronous>, transform_indices = @transform_32, window_bounds = array<i64: 1, 128>}, {pipeline_mode = #tpu.pipeline_mode<synchronous>, transform_indices = @transform_33, window_bounds = array<i64: 128, 128>}, {pipeline_mode = #tpu.pipeline_mode<synchronous>, transform_indices = @transform_34, window_bounds = array<i64: 1, 128>}, {pipeline_mode = #tpu.pipeline_mode<synchronous>, transform_indices = @transform_35, window_bounds = array<i64: 128, 128>}, {pipeline_mode = #tpu.pipeline_mode<synchronous>, transform_indices = @transform_36, window_bounds = array<i64: 1, 128>}, {pipeline_mode = #tpu.pipeline_mode<synchronous>, transform_indices = @transform_37, window_bounds = array<i64: 128, 128>}, {pipeline_mode = #tpu.pipeline_mode<synchronous>, transform_indices = @transform_38, window_bounds = array<i64: 1, 128>}, {pipeline_mode = #tpu.pipeline_mode<synchronous>, transform_indices = @transform_39, window_bounds = array<i64: 128, 128>}, {pipeline_mode = #tpu.pipeline_mode<synchronous>, transform_indices = @transform_40, window_bounds = array<i64: 1, 128>}, {pipeline_mode = #tpu.pipeline_mode<synchronous>, transform_indices = @transform_41, window_bounds = array<i64: 128, 128>}, {pipeline_mode = #tpu.pipeline_mode<synchronous>, transform_indices = @transform_42, window_bounds = array<i64: 1, 128>}, {pipeline_mode = #tpu.pipeline_mode<synchronous>, transform_indices = @transform_43, window_bounds = array<i64: 128, 128>}, {pipeline_mode = #tpu.pipeline_mode<synchronous>, transform_indices = @transform_44, window_bounds = array<i64: 1, 128>}, {pipeline_mode = #tpu.pipeline_mode<synchronous>, transform_indices = @transform_45, window_bounds = array<i64: 128, 128>}, {pipeline_mode = #tpu.pipeline_mode<synchronous>, transform_indices = @transform_46, window_bounds = array<i64: 1, 128>}, {transform_indices = @transform_47, window_bounds = array<i64: 16, 128>}]} {
    %c0 = arith.constant 0 : index
    %c0_0 = arith.constant 0 : index
    %0 = vector.load %arg1[%c0, %c0_0] : memref<304x1xf32, #tpu.memory_space<vmem>>, vector<304x1xf32>
    %c0_1 = arith.constant 0 : index
    %c0_2 = arith.constant 0 : index
    %1 = vector.load %arg3[%c0_1, %c0_2] : memref<1x128xf32, #tpu.memory_space<vmem>>, vector<1x128xf32>
    %2 = vector.broadcast %0 : vector<304x1xf32> to vector<304x128xf32>
    %3 = vector.broadcast %1 : vector<1x128xf32> to vector<304x128xf32>
    %4 = arith.mulf %2, %3 : vector<304x128xf32>
    %c0_3 = arith.constant 0 : index
    %c0_4 = arith.constant 0 : index
    %5 = vector.load %arg4[%c0_3, %c0_4] : memref<1x128xf32, #tpu.memory_space<vmem>>, vector<1x128xf32>
    %6 = vector.broadcast %5 : vector<1x128xf32> to vector<304x128xf32>
    %7 = arith.addf %4, %6 : vector<304x128xf32>
    %cst = arith.constant 0.000000e+00 : f32
    %8 = vector.broadcast %cst : f32 to vector<304x128xf32>
    %9 = arith.maximumf %7, %8 : vector<304x128xf32>
    %10 = arith.truncf %9 : vector<304x128xf32> to vector<304x128xbf16>
    %c0_5 = arith.constant 0 : index
    %c0_6 = arith.constant 0 : index
    %11 = vector.load %arg5[%c0_5, %c0_6] : memref<128x128xbf16, #tpu.memory_space<vmem>>, vector<128x128xbf16>
    %cst_7 = arith.constant dense<0.000000e+00> : vector<304x128xf32>
    %12 = tpu.matmul %10, %11, %cst_7 {dimension_numbers = #tpu.dot_dimension_numbers<[1], [0], [0], [1], [0, 0, 1, 1], [], []>} : vector<304x128xbf16>, vector<128x128xbf16>, vector<304x128xf32> -> vector<304x128xf32>
    %c0_8 = arith.constant 0 : index
    %c0_9 = arith.constant 0 : index
    %13 = vector.load %arg6[%c0_8, %c0_9] : memref<1x128xf32, #tpu.memory_space<vmem>>, vector<1x128xf32>
    %14 = vector.broadcast %13 : vector<1x128xf32> to vector<304x128xf32>
    %15 = arith.addf %12, %14 : vector<304x128xf32>
    %cst_10 = arith.constant 0.000000e+00 : f32
    %16 = vector.broadcast %cst_10 : f32 to vector<304x128xf32>
    %17 = arith.maximumf %15, %16 : vector<304x128xf32>
    %18 = arith.truncf %17 : vector<304x128xf32> to vector<304x128xbf16>
    %19 = vector.extract_strided_slice %18 {offsets = [0, 0], sizes = [272, 128], strides = [1, 1]} : vector<304x128xbf16> to vector<272x128xbf16>
    %c0_11 = arith.constant 0 : index
    %c0_12 = arith.constant 0 : index
    %c0_13 = arith.constant 0 : index
    %20 = vector.load %arg7[%c0_11, %c0_12, %c0_13] : memref<3x128x128xbf16, #tpu.memory_space<vmem>>, vector<1x128x128xbf16>
    %21 = vector.shape_cast %20 : vector<1x128x128xbf16> to vector<128x128xbf16>
    %cst_14 = arith.constant dense<0.000000e+00> : vector<272x128xf32>
    %22 = tpu.matmul %19, %21, %cst_14 {dimension_numbers = #tpu.dot_dimension_numbers<[1], [0], [0], [1], [0, 0, 1, 1], [], []>} : vector<272x128xbf16>, vector<128x128xbf16>, vector<272x128xf32> -> vector<272x128xf32>
    %23 = vector.extract_strided_slice %18 {offsets = [16, 0], sizes = [272, 128], strides = [1, 1]} : vector<304x128xbf16> to vector<272x128xbf16>
    %c1 = arith.constant 1 : index
    %c0_15 = arith.constant 0 : index
    %c0_16 = arith.constant 0 : index
    %24 = vector.load %arg7[%c1, %c0_15, %c0_16] : memref<3x128x128xbf16, #tpu.memory_space<vmem>>, vector<1x128x128xbf16>
    %25 = vector.shape_cast %24 : vector<1x128x128xbf16> to vector<128x128xbf16>
    %cst_17 = arith.constant dense<0.000000e+00> : vector<272x128xf32>
    %26 = tpu.matmul %23, %25, %cst_17 {dimension_numbers = #tpu.dot_dimension_numbers<[1], [0], [0], [1], [0, 0, 1, 1], [], []>} : vector<272x128xbf16>, vector<128x128xbf16>, vector<272x128xf32> -> vector<272x128xf32>
    %27 = arith.addf %22, %26 : vector<272x128xf32>
    %28 = vector.extract_strided_slice %18 {offsets = [32, 0], sizes = [272, 128], strides = [1, 1]} : vector<304x128xbf16> to vector<272x128xbf16>
    %c2 = arith.constant 2 : index
    %c0_18 = arith.constant 0 : index
    %c0_19 = arith.constant 0 : index
    %29 = vector.load %arg7[%c2, %c0_18, %c0_19] : memref<3x128x128xbf16, #tpu.memory_space<vmem>>, vector<1x128x128xbf16>
    %30 = vector.shape_cast %29 : vector<1x128x128xbf16> to vector<128x128xbf16>
    %cst_20 = arith.constant dense<0.000000e+00> : vector<272x128xf32>
    %31 = tpu.matmul %28, %30, %cst_20 {dimension_numbers = #tpu.dot_dimension_numbers<[1], [0], [0], [1], [0, 0, 1, 1], [], []>} : vector<272x128xbf16>, vector<128x128xbf16>, vector<272x128xf32> -> vector<272x128xf32>
    %32 = arith.addf %27, %31 : vector<272x128xf32>
    %c0_21 = arith.constant 0 : index
    %c0_22 = arith.constant 0 : index
    %33 = vector.load %arg8[%c0_21, %c0_22] : memref<1x128xf32, #tpu.memory_space<vmem>>, vector<1x128xf32>
    %34 = vector.broadcast %33 : vector<1x128xf32> to vector<272x128xf32>
    %35 = arith.addf %32, %34 : vector<272x128xf32>
    %cst_23 = arith.constant 0.000000e+00 : f32
    %36 = vector.broadcast %cst_23 : f32 to vector<272x128xf32>
    %37 = arith.maximumf %35, %36 : vector<272x128xf32>
    %38 = arith.truncf %37 : vector<272x128xf32> to vector<272x128xbf16>
    %39 = vector.extract_strided_slice %38 {offsets = [0, 0], sizes = [240, 128], strides = [1, 1]} : vector<272x128xbf16> to vector<240x128xbf16>
    %c0_24 = arith.constant 0 : index
    %c0_25 = arith.constant 0 : index
    %c0_26 = arith.constant 0 : index
    %40 = vector.load %arg9[%c0_24, %c0_25, %c0_26] : memref<3x128x128xbf16, #tpu.memory_space<vmem>>, vector<1x128x128xbf16>
    %41 = vector.shape_cast %40 : vector<1x128x128xbf16> to vector<128x128xbf16>
    %cst_27 = arith.constant dense<0.000000e+00> : vector<240x128xf32>
    %42 = tpu.matmul %39, %41, %cst_27 {dimension_numbers = #tpu.dot_dimension_numbers<[1], [0], [0], [1], [0, 0, 1, 1], [], []>} : vector<240x128xbf16>, vector<128x128xbf16>, vector<240x128xf32> -> vector<240x128xf32>
    %43 = vector.extract_strided_slice %38 {offsets = [16, 0], sizes = [240, 128], strides = [1, 1]} : vector<272x128xbf16> to vector<240x128xbf16>
    %c1_28 = arith.constant 1 : index
    %c0_29 = arith.constant 0 : index
    %c0_30 = arith.constant 0 : index
    %44 = vector.load %arg9[%c1_28, %c0_29, %c0_30] : memref<3x128x128xbf16, #tpu.memory_space<vmem>>, vector<1x128x128xbf16>
    %45 = vector.shape_cast %44 : vector<1x128x128xbf16> to vector<128x128xbf16>
    %cst_31 = arith.constant dense<0.000000e+00> : vector<240x128xf32>
    %46 = tpu.matmul %43, %45, %cst_31 {dimension_numbers = #tpu.dot_dimension_numbers<[1], [0], [0], [1], [0, 0, 1, 1], [], []>} : vector<240x128xbf16>, vector<128x128xbf16>, vector<240x128xf32> -> vector<240x128xf32>
    %47 = arith.addf %42, %46 : vector<240x128xf32>
    %48 = vector.extract_strided_slice %38 {offsets = [32, 0], sizes = [240, 128], strides = [1, 1]} : vector<272x128xbf16> to vector<240x128xbf16>
    %c2_32 = arith.constant 2 : index
    %c0_33 = arith.constant 0 : index
    %c0_34 = arith.constant 0 : index
    %49 = vector.load %arg9[%c2_32, %c0_33, %c0_34] : memref<3x128x128xbf16, #tpu.memory_space<vmem>>, vector<1x128x128xbf16>
    %50 = vector.shape_cast %49 : vector<1x128x128xbf16> to vector<128x128xbf16>
    %cst_35 = arith.constant dense<0.000000e+00> : vector<240x128xf32>
    %51 = tpu.matmul %48, %50, %cst_35 {dimension_numbers = #tpu.dot_dimension_numbers<[1], [0], [0], [1], [0, 0, 1, 1], [], []>} : vector<240x128xbf16>, vector<128x128xbf16>, vector<240x128xf32> -> vector<240x128xf32>
    %52 = arith.addf %47, %51 : vector<240x128xf32>
    %c0_36 = arith.constant 0 : index
    %c0_37 = arith.constant 0 : index
    %53 = vector.load %arg10[%c0_36, %c0_37] : memref<1x128xf32, #tpu.memory_space<vmem>>, vector<1x128xf32>
    %54 = vector.broadcast %53 : vector<1x128xf32> to vector<240x128xf32>
    %55 = arith.addf %52, %54 : vector<240x128xf32>
    %cst_38 = arith.constant 0.000000e+00 : f32
    %56 = vector.broadcast %cst_38 : f32 to vector<240x128xf32>
    %57 = arith.maximumf %55, %56 : vector<240x128xf32>
    %58 = arith.truncf %57 : vector<240x128xf32> to vector<240x128xbf16>
    %59 = vector.extract_strided_slice %58 {offsets = [0, 0], sizes = [208, 128], strides = [1, 1]} : vector<240x128xbf16> to vector<208x128xbf16>
    %c0_39 = arith.constant 0 : index
    %c0_40 = arith.constant 0 : index
    %c0_41 = arith.constant 0 : index
    %60 = vector.load %arg11[%c0_39, %c0_40, %c0_41] : memref<3x128x128xbf16, #tpu.memory_space<vmem>>, vector<1x128x128xbf16>
    %61 = vector.shape_cast %60 : vector<1x128x128xbf16> to vector<128x128xbf16>
    %cst_42 = arith.constant dense<0.000000e+00> : vector<208x128xf32>
    %62 = tpu.matmul %59, %61, %cst_42 {dimension_numbers = #tpu.dot_dimension_numbers<[1], [0], [0], [1], [0, 0, 1, 1], [], []>} : vector<208x128xbf16>, vector<128x128xbf16>, vector<208x128xf32> -> vector<208x128xf32>
    %63 = vector.extract_strided_slice %58 {offsets = [16, 0], sizes = [208, 128], strides = [1, 1]} : vector<240x128xbf16> to vector<208x128xbf16>
    %c1_43 = arith.constant 1 : index
    %c0_44 = arith.constant 0 : index
    %c0_45 = arith.constant 0 : index
    %64 = vector.load %arg11[%c1_43, %c0_44, %c0_45] : memref<3x128x128xbf16, #tpu.memory_space<vmem>>, vector<1x128x128xbf16>
    %65 = vector.shape_cast %64 : vector<1x128x128xbf16> to vector<128x128xbf16>
    %cst_46 = arith.constant dense<0.000000e+00> : vector<208x128xf32>
    %66 = tpu.matmul %63, %65, %cst_46 {dimension_numbers = #tpu.dot_dimension_numbers<[1], [0], [0], [1], [0, 0, 1, 1], [], []>} : vector<208x128xbf16>, vector<128x128xbf16>, vector<208x128xf32> -> vector<208x128xf32>
    %67 = arith.addf %62, %66 : vector<208x128xf32>
    %68 = vector.extract_strided_slice %58 {offsets = [32, 0], sizes = [208, 128], strides = [1, 1]} : vector<240x128xbf16> to vector<208x128xbf16>
    %c2_47 = arith.constant 2 : index
    %c0_48 = arith.constant 0 : index
    %c0_49 = arith.constant 0 : index
    %69 = vector.load %arg11[%c2_47, %c0_48, %c0_49] : memref<3x128x128xbf16, #tpu.memory_space<vmem>>, vector<1x128x128xbf16>
    %70 = vector.shape_cast %69 : vector<1x128x128xbf16> to vector<128x128xbf16>
    %cst_50 = arith.constant dense<0.000000e+00> : vector<208x128xf32>
    %71 = tpu.matmul %68, %70, %cst_50 {dimension_numbers = #tpu.dot_dimension_numbers<[1], [0], [0], [1], [0, 0, 1, 1], [], []>} : vector<208x128xbf16>, vector<128x128xbf16>, vector<208x128xf32> -> vector<208x128xf32>
    %72 = arith.addf %67, %71 : vector<208x128xf32>
    %c0_51 = arith.constant 0 : index
    %c0_52 = arith.constant 0 : index
    %73 = vector.load %arg12[%c0_51, %c0_52] : memref<1x128xf32, #tpu.memory_space<vmem>>, vector<1x128xf32>
    %74 = vector.broadcast %73 : vector<1x128xf32> to vector<208x128xf32>
    %75 = arith.addf %72, %74 : vector<208x128xf32>
    %cst_53 = arith.constant 0.000000e+00 : f32
    %76 = vector.broadcast %cst_53 : f32 to vector<208x128xf32>
    %77 = arith.maximumf %75, %76 : vector<208x128xf32>
    %78 = arith.truncf %77 : vector<208x128xf32> to vector<208x128xbf16>
    %79 = vector.extract_strided_slice %78 {offsets = [0, 0], sizes = [176, 128], strides = [1, 1]} : vector<208x128xbf16> to vector<176x128xbf16>
    %c0_54 = arith.constant 0 : index
    %c0_55 = arith.constant 0 : index
    %c0_56 = arith.constant 0 : index
    %80 = vector.load %arg13[%c0_54, %c0_55, %c0_56] : memref<3x128x128xbf16, #tpu.memory_space<vmem>>, vector<1x128x128xbf16>
    %81 = vector.shape_cast %80 : vector<1x128x128xbf16> to vector<128x128xbf16>
    %cst_57 = arith.constant dense<0.000000e+00> : vector<176x128xf32>
    %82 = tpu.matmul %79, %81, %cst_57 {dimension_numbers = #tpu.dot_dimension_numbers<[1], [0], [0], [1], [0, 0, 1, 1], [], []>} : vector<176x128xbf16>, vector<128x128xbf16>, vector<176x128xf32> -> vector<176x128xf32>
    %83 = vector.extract_strided_slice %78 {offsets = [16, 0], sizes = [176, 128], strides = [1, 1]} : vector<208x128xbf16> to vector<176x128xbf16>
    %c1_58 = arith.constant 1 : index
    %c0_59 = arith.constant 0 : index
    %c0_60 = arith.constant 0 : index
    %84 = vector.load %arg13[%c1_58, %c0_59, %c0_60] : memref<3x128x128xbf16, #tpu.memory_space<vmem>>, vector<1x128x128xbf16>
    %85 = vector.shape_cast %84 : vector<1x128x128xbf16> to vector<128x128xbf16>
    %cst_61 = arith.constant dense<0.000000e+00> : vector<176x128xf32>
    %86 = tpu.matmul %83, %85, %cst_61 {dimension_numbers = #tpu.dot_dimension_numbers<[1], [0], [0], [1], [0, 0, 1, 1], [], []>} : vector<176x128xbf16>, vector<128x128xbf16>, vector<176x128xf32> -> vector<176x128xf32>
    %87 = arith.addf %82, %86 : vector<176x128xf32>
    %88 = vector.extract_strided_slice %78 {offsets = [32, 0], sizes = [176, 128], strides = [1, 1]} : vector<208x128xbf16> to vector<176x128xbf16>
    %c2_62 = arith.constant 2 : index
    %c0_63 = arith.constant 0 : index
    %c0_64 = arith.constant 0 : index
    %89 = vector.load %arg13[%c2_62, %c0_63, %c0_64] : memref<3x128x128xbf16, #tpu.memory_space<vmem>>, vector<1x128x128xbf16>
    %90 = vector.shape_cast %89 : vector<1x128x128xbf16> to vector<128x128xbf16>
    %cst_65 = arith.constant dense<0.000000e+00> : vector<176x128xf32>
    %91 = tpu.matmul %88, %90, %cst_65 {dimension_numbers = #tpu.dot_dimension_numbers<[1], [0], [0], [1], [0, 0, 1, 1], [], []>} : vector<176x128xbf16>, vector<128x128xbf16>, vector<176x128xf32> -> vector<176x128xf32>
    %92 = arith.addf %87, %91 : vector<176x128xf32>
    %c0_66 = arith.constant 0 : index
    %c0_67 = arith.constant 0 : index
    %93 = vector.load %arg14[%c0_66, %c0_67] : memref<1x128xf32, #tpu.memory_space<vmem>>, vector<1x128xf32>
    %94 = vector.broadcast %93 : vector<1x128xf32> to vector<176x128xf32>
    %95 = arith.addf %92, %94 : vector<176x128xf32>
    %cst_68 = arith.constant 0.000000e+00 : f32
    %96 = vector.broadcast %cst_68 : f32 to vector<176x128xf32>
    %97 = arith.maximumf %95, %96 : vector<176x128xf32>
    %98 = arith.truncf %97 : vector<176x128xf32> to vector<176x128xbf16>
    %99 = vector.extract_strided_slice %98 {offsets = [0, 0], sizes = [144, 128], strides = [1, 1]} : vector<176x128xbf16> to vector<144x128xbf16>
    %c0_69 = arith.constant 0 : index
    %c0_70 = arith.constant 0 : index
    %c0_71 = arith.constant 0 : index
    %100 = vector.load %arg15[%c0_69, %c0_70, %c0_71] : memref<3x128x128xbf16, #tpu.memory_space<vmem>>, vector<1x128x128xbf16>
    %101 = vector.shape_cast %100 : vector<1x128x128xbf16> to vector<128x128xbf16>
    %cst_72 = arith.constant dense<0.000000e+00> : vector<144x128xf32>
    %102 = tpu.matmul %99, %101, %cst_72 {dimension_numbers = #tpu.dot_dimension_numbers<[1], [0], [0], [1], [0, 0, 1, 1], [], []>} : vector<144x128xbf16>, vector<128x128xbf16>, vector<144x128xf32> -> vector<144x128xf32>
    %103 = vector.extract_strided_slice %98 {offsets = [16, 0], sizes = [144, 128], strides = [1, 1]} : vector<176x128xbf16> to vector<144x128xbf16>
    %c1_73 = arith.constant 1 : index
    %c0_74 = arith.constant 0 : index
    %c0_75 = arith.constant 0 : index
    %104 = vector.load %arg15[%c1_73, %c0_74, %c0_75] : memref<3x128x128xbf16, #tpu.memory_space<vmem>>, vector<1x128x128xbf16>
    %105 = vector.shape_cast %104 : vector<1x128x128xbf16> to vector<128x128xbf16>
    %cst_76 = arith.constant dense<0.000000e+00> : vector<144x128xf32>
    %106 = tpu.matmul %103, %105, %cst_76 {dimension_numbers = #tpu.dot_dimension_numbers<[1], [0], [0], [1], [0, 0, 1, 1], [], []>} : vector<144x128xbf16>, vector<128x128xbf16>, vector<144x128xf32> -> vector<144x128xf32>
    %107 = arith.addf %102, %106 : vector<144x128xf32>
    %108 = vector.extract_strided_slice %98 {offsets = [32, 0], sizes = [144, 128], strides = [1, 1]} : vector<176x128xbf16> to vector<144x128xbf16>
    %c2_77 = arith.constant 2 : index
    %c0_78 = arith.constant 0 : index
    %c0_79 = arith.constant 0 : index
    %109 = vector.load %arg15[%c2_77, %c0_78, %c0_79] : memref<3x128x128xbf16, #tpu.memory_space<vmem>>, vector<1x128x128xbf16>
    %110 = vector.shape_cast %109 : vector<1x128x128xbf16> to vector<128x128xbf16>
    %cst_80 = arith.constant dense<0.000000e+00> : vector<144x128xf32>
    %111 = tpu.matmul %108, %110, %cst_80 {dimension_numbers = #tpu.dot_dimension_numbers<[1], [0], [0], [1], [0, 0, 1, 1], [], []>} : vector<144x128xbf16>, vector<128x128xbf16>, vector<144x128xf32> -> vector<144x128xf32>
    %112 = arith.addf %107, %111 : vector<144x128xf32>
    %c0_81 = arith.constant 0 : index
    %c0_82 = arith.constant 0 : index
    %113 = vector.load %arg16[%c0_81, %c0_82] : memref<1x128xf32, #tpu.memory_space<vmem>>, vector<1x128xf32>
    %114 = vector.broadcast %113 : vector<1x128xf32> to vector<144x128xf32>
    %115 = arith.addf %112, %114 : vector<144x128xf32>
    %cst_83 = arith.constant 0.000000e+00 : f32
    %116 = vector.broadcast %cst_83 : f32 to vector<144x128xf32>
    %117 = arith.maximumf %115, %116 : vector<144x128xf32>
    %118 = arith.truncf %117 : vector<144x128xf32> to vector<144x128xbf16>
    %119 = vector.extract_strided_slice %118 {offsets = [0, 0], sizes = [112, 128], strides = [1, 1]} : vector<144x128xbf16> to vector<112x128xbf16>
    %c0_84 = arith.constant 0 : index
    %c0_85 = arith.constant 0 : index
    %c0_86 = arith.constant 0 : index
    %120 = vector.load %arg17[%c0_84, %c0_85, %c0_86] : memref<3x128x128xbf16, #tpu.memory_space<vmem>>, vector<1x128x128xbf16>
    %121 = vector.shape_cast %120 : vector<1x128x128xbf16> to vector<128x128xbf16>
    %cst_87 = arith.constant dense<0.000000e+00> : vector<112x128xf32>
    %122 = tpu.matmul %119, %121, %cst_87 {dimension_numbers = #tpu.dot_dimension_numbers<[1], [0], [0], [1], [0, 0, 1, 1], [], []>} : vector<112x128xbf16>, vector<128x128xbf16>, vector<112x128xf32> -> vector<112x128xf32>
    %123 = vector.extract_strided_slice %118 {offsets = [16, 0], sizes = [112, 128], strides = [1, 1]} : vector<144x128xbf16> to vector<112x128xbf16>
    %c1_88 = arith.constant 1 : index
    %c0_89 = arith.constant 0 : index
    %c0_90 = arith.constant 0 : index
    %124 = vector.load %arg17[%c1_88, %c0_89, %c0_90] : memref<3x128x128xbf16, #tpu.memory_space<vmem>>, vector<1x128x128xbf16>
    %125 = vector.shape_cast %124 : vector<1x128x128xbf16> to vector<128x128xbf16>
    %cst_91 = arith.constant dense<0.000000e+00> : vector<112x128xf32>
    %126 = tpu.matmul %123, %125, %cst_91 {dimension_numbers = #tpu.dot_dimension_numbers<[1], [0], [0], [1], [0, 0, 1, 1], [], []>} : vector<112x128xbf16>, vector<128x128xbf16>, vector<112x128xf32> -> vector<112x128xf32>
    %127 = arith.addf %122, %126 : vector<112x128xf32>
    %128 = vector.extract_strided_slice %118 {offsets = [32, 0], sizes = [112, 128], strides = [1, 1]} : vector<144x128xbf16> to vector<112x128xbf16>
    %c2_92 = arith.constant 2 : index
    %c0_93 = arith.constant 0 : index
    %c0_94 = arith.constant 0 : index
    %129 = vector.load %arg17[%c2_92, %c0_93, %c0_94] : memref<3x128x128xbf16, #tpu.memory_space<vmem>>, vector<1x128x128xbf16>
    %130 = vector.shape_cast %129 : vector<1x128x128xbf16> to vector<128x128xbf16>
    %cst_95 = arith.constant dense<0.000000e+00> : vector<112x128xf32>
    %131 = tpu.matmul %128, %130, %cst_95 {dimension_numbers = #tpu.dot_dimension_numbers<[1], [0], [0], [1], [0, 0, 1, 1], [], []>} : vector<112x128xbf16>, vector<128x128xbf16>, vector<112x128xf32> -> vector<112x128xf32>
    %132 = arith.addf %127, %131 : vector<112x128xf32>
    %c0_96 = arith.constant 0 : index
    %c0_97 = arith.constant 0 : index
    %133 = vector.load %arg18[%c0_96, %c0_97] : memref<1x128xf32, #tpu.memory_space<vmem>>, vector<1x128xf32>
    %134 = vector.broadcast %133 : vector<1x128xf32> to vector<112x128xf32>
    %135 = arith.addf %132, %134 : vector<112x128xf32>
    %cst_98 = arith.constant 0.000000e+00 : f32
    %136 = vector.broadcast %cst_98 : f32 to vector<112x128xf32>
    %137 = arith.maximumf %135, %136 : vector<112x128xf32>
    %138 = arith.truncf %137 : vector<112x128xf32> to vector<112x128xbf16>
    %c0_99 = arith.constant 0 : index
    %c0_100 = arith.constant 0 : index
    %139 = vector.load %arg2[%c0_99, %c0_100] : memref<16x4xf32, #tpu.memory_space<vmem>>, vector<16x4xf32>
    %140 = arith.truncf %139 : vector<16x4xf32> to vector<16x4xbf16>
    %c0_101 = arith.constant 0 : index
    %c0_102 = arith.constant 0 : index
    %141 = vector.load %arg20[%c0_101, %c0_102] : memref<4x128xbf16, #tpu.memory_space<vmem>>, vector<4x128xbf16>
    %cst_103 = arith.constant dense<0.000000e+00> : vector<16x128xf32>
    %142 = tpu.matmul %140, %141, %cst_103 {dimension_numbers = #tpu.dot_dimension_numbers<[1], [0], [0], [1], [0, 0, 1, 1], [], []>} : vector<16x4xbf16>, vector<4x128xbf16>, vector<16x128xf32> -> vector<16x128xf32>
    %c0_104 = arith.constant 0 : index
    %c0_105 = arith.constant 0 : index
    %143 = vector.load %arg21[%c0_104, %c0_105] : memref<1x128xf32, #tpu.memory_space<vmem>>, vector<1x128xf32>
    %144 = vector.broadcast %143 : vector<1x128xf32> to vector<16x128xf32>
    %145 = arith.addf %142, %144 : vector<16x128xf32>
    %146 = vector.extract_strided_slice %138 {offsets = [0, 0], sizes = [16, 128], strides = [1, 1]} : vector<112x128xbf16> to vector<16x128xbf16>
    %c0_106 = arith.constant 0 : index
    %c0_107 = arith.constant 0 : index
    %c0_108 = arith.constant 0 : index
    %147 = vector.load %arg19[%c0_106, %c0_107, %c0_108] : memref<7x128x128xbf16, #tpu.memory_space<vmem>>, vector<1x128x128xbf16>
    %148 = vector.shape_cast %147 : vector<1x128x128xbf16> to vector<128x128xbf16>
    %cst_109 = arith.constant dense<0.000000e+00> : vector<16x128xf32>
    %149 = tpu.matmul %146, %148, %cst_109 {dimension_numbers = #tpu.dot_dimension_numbers<[1], [0], [0], [1], [0, 0, 1, 1], [], []>} : vector<16x128xbf16>, vector<128x128xbf16>, vector<16x128xf32> -> vector<16x128xf32>
    %150 = arith.addf %145, %149 : vector<16x128xf32>
    %151 = vector.extract_strided_slice %138 {offsets = [16, 0], sizes = [16, 128], strides = [1, 1]} : vector<112x128xbf16> to vector<16x128xbf16>
    %c1_110 = arith.constant 1 : index
    %c0_111 = arith.constant 0 : index
    %c0_112 = arith.constant 0 : index
    %152 = vector.load %arg19[%c1_110, %c0_111, %c0_112] : memref<7x128x128xbf16, #tpu.memory_space<vmem>>, vector<1x128x128xbf16>
    %153 = vector.shape_cast %152 : vector<1x128x128xbf16> to vector<128x128xbf16>
    %cst_113 = arith.constant dense<0.000000e+00> : vector<16x128xf32>
    %154 = tpu.matmul %151, %153, %cst_113 {dimension_numbers = #tpu.dot_dimension_numbers<[1], [0], [0], [1], [0, 0, 1, 1], [], []>} : vector<16x128xbf16>, vector<128x128xbf16>, vector<16x128xf32> -> vector<16x128xf32>
    %155 = arith.addf %150, %154 : vector<16x128xf32>
    %156 = vector.extract_strided_slice %138 {offsets = [32, 0], sizes = [16, 128], strides = [1, 1]} : vector<112x128xbf16> to vector<16x128xbf16>
    %c2_114 = arith.constant 2 : index
    %c0_115 = arith.constant 0 : index
    %c0_116 = arith.constant 0 : index
    %157 = vector.load %arg19[%c2_114, %c0_115, %c0_116] : memref<7x128x128xbf16, #tpu.memory_space<vmem>>, vector<1x128x128xbf16>
    %158 = vector.shape_cast %157 : vector<1x128x128xbf16> to vector<128x128xbf16>
    %cst_117 = arith.constant dense<0.000000e+00> : vector<16x128xf32>
    %159 = tpu.matmul %156, %158, %cst_117 {dimension_numbers = #tpu.dot_dimension_numbers<[1], [0], [0], [1], [0, 0, 1, 1], [], []>} : vector<16x128xbf16>, vector<128x128xbf16>, vector<16x128xf32> -> vector<16x128xf32>
    %160 = arith.addf %155, %159 : vector<16x128xf32>
    %161 = vector.extract_strided_slice %138 {offsets = [48, 0], sizes = [16, 128], strides = [1, 1]} : vector<112x128xbf16> to vector<16x128xbf16>
    %c3 = arith.constant 3 : index
    %c0_118 = arith.constant 0 : index
    %c0_119 = arith.constant 0 : index
    %162 = vector.load %arg19[%c3, %c0_118, %c0_119] : memref<7x128x128xbf16, #tpu.memory_space<vmem>>, vector<1x128x128xbf16>
    %163 = vector.shape_cast %162 : vector<1x128x128xbf16> to vector<128x128xbf16>
    %cst_120 = arith.constant dense<0.000000e+00> : vector<16x128xf32>
    %164 = tpu.matmul %161, %163, %cst_120 {dimension_numbers = #tpu.dot_dimension_numbers<[1], [0], [0], [1], [0, 0, 1, 1], [], []>} : vector<16x128xbf16>, vector<128x128xbf16>, vector<16x128xf32> -> vector<16x128xf32>
    %165 = arith.addf %160, %164 : vector<16x128xf32>
    %166 = vector.extract_strided_slice %138 {offsets = [64, 0], sizes = [16, 128], strides = [1, 1]} : vector<112x128xbf16> to vector<16x128xbf16>
    %c4 = arith.constant 4 : index
    %c0_121 = arith.constant 0 : index
    %c0_122 = arith.constant 0 : index
    %167 = vector.load %arg19[%c4, %c0_121, %c0_122] : memref<7x128x128xbf16, #tpu.memory_space<vmem>>, vector<1x128x128xbf16>
    %168 = vector.shape_cast %167 : vector<1x128x128xbf16> to vector<128x128xbf16>
    %cst_123 = arith.constant dense<0.000000e+00> : vector<16x128xf32>
    %169 = tpu.matmul %166, %168, %cst_123 {dimension_numbers = #tpu.dot_dimension_numbers<[1], [0], [0], [1], [0, 0, 1, 1], [], []>} : vector<16x128xbf16>, vector<128x128xbf16>, vector<16x128xf32> -> vector<16x128xf32>
    %170 = arith.addf %165, %169 : vector<16x128xf32>
    %171 = vector.extract_strided_slice %138 {offsets = [80, 0], sizes = [16, 128], strides = [1, 1]} : vector<112x128xbf16> to vector<16x128xbf16>
    %c5 = arith.constant 5 : index
    %c0_124 = arith.constant 0 : index
    %c0_125 = arith.constant 0 : index
    %172 = vector.load %arg19[%c5, %c0_124, %c0_125] : memref<7x128x128xbf16, #tpu.memory_space<vmem>>, vector<1x128x128xbf16>
    %173 = vector.shape_cast %172 : vector<1x128x128xbf16> to vector<128x128xbf16>
    %cst_126 = arith.constant dense<0.000000e+00> : vector<16x128xf32>
    %174 = tpu.matmul %171, %173, %cst_126 {dimension_numbers = #tpu.dot_dimension_numbers<[1], [0], [0], [1], [0, 0, 1, 1], [], []>} : vector<16x128xbf16>, vector<128x128xbf16>, vector<16x128xf32> -> vector<16x128xf32>
    %175 = arith.addf %170, %174 : vector<16x128xf32>
    %176 = vector.extract_strided_slice %138 {offsets = [96, 0], sizes = [16, 128], strides = [1, 1]} : vector<112x128xbf16> to vector<16x128xbf16>
    %c6 = arith.constant 6 : index
    %c0_127 = arith.constant 0 : index
    %c0_128 = arith.constant 0 : index
    %177 = vector.load %arg19[%c6, %c0_127, %c0_128] : memref<7x128x128xbf16, #tpu.memory_space<vmem>>, vector<1x128x128xbf16>
    %178 = vector.shape_cast %177 : vector<1x128x128xbf16> to vector<128x128xbf16>
    %cst_129 = arith.constant dense<0.000000e+00> : vector<16x128xf32>
    %179 = tpu.matmul %176, %178, %cst_129 {dimension_numbers = #tpu.dot_dimension_numbers<[1], [0], [0], [1], [0, 0, 1, 1], [], []>} : vector<16x128xbf16>, vector<128x128xbf16>, vector<16x128xf32> -> vector<16x128xf32>
    %180 = arith.addf %175, %179 : vector<16x128xf32>
    %cst_130 = arith.constant 0.000000e+00 : f32
    %181 = vector.broadcast %cst_130 : f32 to vector<16x128xf32>
    %182 = arith.maximumf %180, %181 : vector<16x128xf32>
    %183 = arith.truncf %182 : vector<16x128xf32> to vector<16x128xbf16>
    %c0_131 = arith.constant 0 : index
    %c0_132 = arith.constant 0 : index
    %184 = vector.load %arg22[%c0_131, %c0_132] : memref<128x128xbf16, #tpu.memory_space<vmem>>, vector<128x128xbf16>
    %cst_133 = arith.constant dense<0.000000e+00> : vector<16x128xf32>
    %185 = tpu.matmul %183, %184, %cst_133 {dimension_numbers = #tpu.dot_dimension_numbers<[1], [0], [0], [1], [0, 0, 1, 1], [], []>} : vector<16x128xbf16>, vector<128x128xbf16>, vector<16x128xf32> -> vector<16x128xf32>
    %c0_134 = arith.constant 0 : index
    %c0_135 = arith.constant 0 : index
    %186 = vector.load %arg23[%c0_134, %c0_135] : memref<1x128xf32, #tpu.memory_space<vmem>>, vector<1x128xf32>
    %187 = vector.broadcast %186 : vector<1x128xf32> to vector<16x128xf32>
    %188 = arith.addf %185, %187 : vector<16x128xf32>
    %cst_136 = arith.constant 0.000000e+00 : f32
    %189 = vector.broadcast %cst_136 : f32 to vector<16x128xf32>
    %190 = arith.maximumf %188, %189 : vector<16x128xf32>
    %191 = arith.truncf %190 : vector<16x128xf32> to vector<16x128xbf16>
    %c0_137 = arith.constant 0 : index
    %c0_138 = arith.constant 0 : index
    %192 = vector.load %arg24[%c0_137, %c0_138] : memref<128x128xbf16, #tpu.memory_space<vmem>>, vector<128x128xbf16>
    %cst_139 = arith.constant dense<0.000000e+00> : vector<16x128xf32>
    %193 = tpu.matmul %191, %192, %cst_139 {dimension_numbers = #tpu.dot_dimension_numbers<[1], [0], [0], [1], [0, 0, 1, 1], [], []>} : vector<16x128xbf16>, vector<128x128xbf16>, vector<16x128xf32> -> vector<16x128xf32>
    %c0_140 = arith.constant 0 : index
    %c0_141 = arith.constant 0 : index
    %194 = vector.load %arg25[%c0_140, %c0_141] : memref<1x128xf32, #tpu.memory_space<vmem>>, vector<1x128xf32>
    %195 = vector.broadcast %194 : vector<1x128xf32> to vector<16x128xf32>
    %196 = arith.addf %193, %195 : vector<16x128xf32>
    %cst_142 = arith.constant 0.000000e+00 : f32
    %197 = vector.broadcast %cst_142 : f32 to vector<16x128xf32>
    %198 = arith.maximumf %196, %197 : vector<16x128xf32>
    %199 = arith.truncf %198 : vector<16x128xf32> to vector<16x128xbf16>
    %c0_143 = arith.constant 0 : index
    %c0_144 = arith.constant 0 : index
    %200 = vector.load %arg26[%c0_143, %c0_144] : memref<128x128xbf16, #tpu.memory_space<vmem>>, vector<128x128xbf16>
    %cst_145 = arith.constant dense<0.000000e+00> : vector<16x128xf32>
    %201 = tpu.matmul %199, %200, %cst_145 {dimension_numbers = #tpu.dot_dimension_numbers<[1], [0], [0], [1], [0, 0, 1, 1], [], []>} : vector<16x128xbf16>, vector<128x128xbf16>, vector<16x128xf32> -> vector<16x128xf32>
    %c0_146 = arith.constant 0 : index
    %c0_147 = arith.constant 0 : index
    %202 = vector.load %arg27[%c0_146, %c0_147] : memref<1x128xf32, #tpu.memory_space<vmem>>, vector<1x128xf32>
    %203 = vector.broadcast %202 : vector<1x128xf32> to vector<16x128xf32>
    %204 = arith.addf %201, %203 : vector<16x128xf32>
    %cst_148 = arith.constant 0.000000e+00 : f32
    %205 = vector.broadcast %cst_148 : f32 to vector<16x128xf32>
    %206 = arith.maximumf %204, %205 : vector<16x128xf32>
    %207 = arith.truncf %206 : vector<16x128xf32> to vector<16x128xbf16>
    %c0_149 = arith.constant 0 : index
    %c0_150 = arith.constant 0 : index
    %208 = vector.load %arg28[%c0_149, %c0_150] : memref<128x128xbf16, #tpu.memory_space<vmem>>, vector<128x128xbf16>
    %cst_151 = arith.constant dense<0.000000e+00> : vector<16x128xf32>
    %209 = tpu.matmul %207, %208, %cst_151 {dimension_numbers = #tpu.dot_dimension_numbers<[1], [0], [0], [1], [0, 0, 1, 1], [], []>} : vector<16x128xbf16>, vector<128x128xbf16>, vector<16x128xf32> -> vector<16x128xf32>
    %c0_152 = arith.constant 0 : index
    %c0_153 = arith.constant 0 : index
    %210 = vector.load %arg29[%c0_152, %c0_153] : memref<1x128xf32, #tpu.memory_space<vmem>>, vector<1x128xf32>
    %211 = vector.broadcast %210 : vector<1x128xf32> to vector<16x128xf32>
    %212 = arith.addf %209, %211 : vector<16x128xf32>
    %cst_154 = arith.constant 0.000000e+00 : f32
    %213 = vector.broadcast %cst_154 : f32 to vector<16x128xf32>
    %214 = arith.maximumf %212, %213 : vector<16x128xf32>
    %215 = arith.truncf %214 : vector<16x128xf32> to vector<16x128xbf16>
    %c0_155 = arith.constant 0 : index
    %c0_156 = arith.constant 0 : index
    %216 = vector.load %arg30[%c0_155, %c0_156] : memref<128x128xbf16, #tpu.memory_space<vmem>>, vector<128x128xbf16>
    %cst_157 = arith.constant dense<0.000000e+00> : vector<16x128xf32>
    %217 = tpu.matmul %215, %216, %cst_157 {dimension_numbers = #tpu.dot_dimension_numbers<[1], [0], [0], [1], [0, 0, 1, 1], [], []>} : vector<16x128xbf16>, vector<128x128xbf16>, vector<16x128xf32> -> vector<16x128xf32>
    %c0_158 = arith.constant 0 : index
    %c0_159 = arith.constant 0 : index
    %218 = vector.load %arg31[%c0_158, %c0_159] : memref<1x128xf32, #tpu.memory_space<vmem>>, vector<1x128xf32>
    %219 = vector.broadcast %218 : vector<1x128xf32> to vector<16x128xf32>
    %220 = arith.addf %217, %219 : vector<16x128xf32>
    %cst_160 = arith.constant 0.000000e+00 : f32
    %221 = vector.broadcast %cst_160 : f32 to vector<16x128xf32>
    %222 = arith.maximumf %220, %221 : vector<16x128xf32>
    %223 = arith.truncf %222 : vector<16x128xf32> to vector<16x128xbf16>
    %c0_161 = arith.constant 0 : index
    %c0_162 = arith.constant 0 : index
    %224 = vector.load %arg32[%c0_161, %c0_162] : memref<128x128xbf16, #tpu.memory_space<vmem>>, vector<128x128xbf16>
    %cst_163 = arith.constant dense<0.000000e+00> : vector<16x128xf32>
    %225 = tpu.matmul %223, %224, %cst_163 {dimension_numbers = #tpu.dot_dimension_numbers<[1], [0], [0], [1], [0, 0, 1, 1], [], []>} : vector<16x128xbf16>, vector<128x128xbf16>, vector<16x128xf32> -> vector<16x128xf32>
    %c0_164 = arith.constant 0 : index
    %c0_165 = arith.constant 0 : index
    %226 = vector.load %arg33[%c0_164, %c0_165] : memref<1x128xf32, #tpu.memory_space<vmem>>, vector<1x128xf32>
    %227 = vector.broadcast %226 : vector<1x128xf32> to vector<16x128xf32>
    %228 = arith.addf %225, %227 : vector<16x128xf32>
    %cst_166 = arith.constant 0.000000e+00 : f32
    %229 = vector.broadcast %cst_166 : f32 to vector<16x128xf32>
    %230 = arith.maximumf %228, %229 : vector<16x128xf32>
    %231 = arith.truncf %230 : vector<16x128xf32> to vector<16x128xbf16>
    %c0_167 = arith.constant 0 : index
    %c0_168 = arith.constant 0 : index
    %232 = vector.load %arg34[%c0_167, %c0_168] : memref<128x128xbf16, #tpu.memory_space<vmem>>, vector<128x128xbf16>
    %cst_169 = arith.constant dense<0.000000e+00> : vector<16x128xf32>
    %233 = tpu.matmul %231, %232, %cst_169 {dimension_numbers = #tpu.dot_dimension_numbers<[1], [0], [0], [1], [0, 0, 1, 1], [], []>} : vector<16x128xbf16>, vector<128x128xbf16>, vector<16x128xf32> -> vector<16x128xf32>
    %c0_170 = arith.constant 0 : index
    %c0_171 = arith.constant 0 : index
    %234 = vector.load %arg35[%c0_170, %c0_171] : memref<1x128xf32, #tpu.memory_space<vmem>>, vector<1x128xf32>
    %235 = vector.broadcast %234 : vector<1x128xf32> to vector<16x128xf32>
    %236 = arith.addf %233, %235 : vector<16x128xf32>
    %cst_172 = arith.constant 0.000000e+00 : f32
    %237 = vector.broadcast %cst_172 : f32 to vector<16x128xf32>
    %238 = arith.maximumf %236, %237 : vector<16x128xf32>
    %239 = arith.truncf %238 : vector<16x128xf32> to vector<16x128xbf16>
    %c0_173 = arith.constant 0 : index
    %c0_174 = arith.constant 0 : index
    %240 = vector.load %arg36[%c0_173, %c0_174] : memref<128x128xbf16, #tpu.memory_space<vmem>>, vector<128x128xbf16>
    %cst_175 = arith.constant dense<0.000000e+00> : vector<16x128xf32>
    %241 = tpu.matmul %239, %240, %cst_175 {dimension_numbers = #tpu.dot_dimension_numbers<[1], [0], [0], [1], [0, 0, 1, 1], [], []>} : vector<16x128xbf16>, vector<128x128xbf16>, vector<16x128xf32> -> vector<16x128xf32>
    %c0_176 = arith.constant 0 : index
    %c0_177 = arith.constant 0 : index
    %242 = vector.load %arg37[%c0_176, %c0_177] : memref<1x128xf32, #tpu.memory_space<vmem>>, vector<1x128xf32>
    %243 = vector.broadcast %242 : vector<1x128xf32> to vector<16x128xf32>
    %244 = arith.addf %241, %243 : vector<16x128xf32>
    %cst_178 = arith.constant 0.000000e+00 : f32
    %245 = vector.broadcast %cst_178 : f32 to vector<16x128xf32>
    %246 = arith.maximumf %244, %245 : vector<16x128xf32>
    %247 = arith.truncf %246 : vector<16x128xf32> to vector<16x128xbf16>
    %c0_179 = arith.constant 0 : index
    %c0_180 = arith.constant 0 : index
    %248 = vector.load %arg38[%c0_179, %c0_180] : memref<128x128xbf16, #tpu.memory_space<vmem>>, vector<128x128xbf16>
    %cst_181 = arith.constant dense<0.000000e+00> : vector<16x128xf32>
    %249 = tpu.matmul %247, %248, %cst_181 {dimension_numbers = #tpu.dot_dimension_numbers<[1], [0], [0], [1], [0, 0, 1, 1], [], []>} : vector<16x128xbf16>, vector<128x128xbf16>, vector<16x128xf32> -> vector<16x128xf32>
    %c0_182 = arith.constant 0 : index
    %c0_183 = arith.constant 0 : index
    %250 = vector.load %arg39[%c0_182, %c0_183] : memref<1x128xf32, #tpu.memory_space<vmem>>, vector<1x128xf32>
    %251 = vector.broadcast %250 : vector<1x128xf32> to vector<16x128xf32>
    %252 = arith.addf %249, %251 : vector<16x128xf32>
    %cst_184 = arith.constant 0.000000e+00 : f32
    %253 = vector.broadcast %cst_184 : f32 to vector<16x128xf32>
    %254 = arith.maximumf %252, %253 : vector<16x128xf32>
    %255 = arith.truncf %254 : vector<16x128xf32> to vector<16x128xbf16>
    %c0_185 = arith.constant 0 : index
    %c0_186 = arith.constant 0 : index
    %256 = vector.load %arg40[%c0_185, %c0_186] : memref<128x128xbf16, #tpu.memory_space<vmem>>, vector<128x128xbf16>
    %cst_187 = arith.constant dense<0.000000e+00> : vector<16x128xf32>
    %257 = tpu.matmul %255, %256, %cst_187 {dimension_numbers = #tpu.dot_dimension_numbers<[1], [0], [0], [1], [0, 0, 1, 1], [], []>} : vector<16x128xbf16>, vector<128x128xbf16>, vector<16x128xf32> -> vector<16x128xf32>
    %c0_188 = arith.constant 0 : index
    %c0_189 = arith.constant 0 : index
    %258 = vector.load %arg41[%c0_188, %c0_189] : memref<1x128xf32, #tpu.memory_space<vmem>>, vector<1x128xf32>
    %259 = vector.broadcast %258 : vector<1x128xf32> to vector<16x128xf32>
    %260 = arith.addf %257, %259 : vector<16x128xf32>
    %cst_190 = arith.constant 0.000000e+00 : f32
    %261 = vector.broadcast %cst_190 : f32 to vector<16x128xf32>
    %262 = arith.maximumf %260, %261 : vector<16x128xf32>
    %263 = arith.truncf %262 : vector<16x128xf32> to vector<16x128xbf16>
    %c0_191 = arith.constant 0 : index
    %c0_192 = arith.constant 0 : index
    %264 = vector.load %arg42[%c0_191, %c0_192] : memref<128x128xbf16, #tpu.memory_space<vmem>>, vector<128x128xbf16>
    %cst_193 = arith.constant dense<0.000000e+00> : vector<16x128xf32>
    %265 = tpu.matmul %263, %264, %cst_193 {dimension_numbers = #tpu.dot_dimension_numbers<[1], [0], [0], [1], [0, 0, 1, 1], [], []>} : vector<16x128xbf16>, vector<128x128xbf16>, vector<16x128xf32> -> vector<16x128xf32>
    %c0_194 = arith.constant 0 : index
    %c0_195 = arith.constant 0 : index
    %266 = vector.load %arg43[%c0_194, %c0_195] : memref<1x128xf32, #tpu.memory_space<vmem>>, vector<1x128xf32>
    %267 = vector.broadcast %266 : vector<1x128xf32> to vector<16x128xf32>
    %268 = arith.addf %265, %267 : vector<16x128xf32>
    %cst_196 = arith.constant 0.000000e+00 : f32
    %269 = vector.broadcast %cst_196 : f32 to vector<16x128xf32>
    %270 = arith.maximumf %268, %269 : vector<16x128xf32>
    %271 = arith.truncf %270 : vector<16x128xf32> to vector<16x128xbf16>
    %c0_197 = arith.constant 0 : index
    %c0_198 = arith.constant 0 : index
    %272 = vector.load %arg44[%c0_197, %c0_198] : memref<128x128xbf16, #tpu.memory_space<vmem>>, vector<128x128xbf16>
    %cst_199 = arith.constant dense<0.000000e+00> : vector<16x128xf32>
    %273 = tpu.matmul %271, %272, %cst_199 {dimension_numbers = #tpu.dot_dimension_numbers<[1], [0], [0], [1], [0, 0, 1, 1], [], []>} : vector<16x128xbf16>, vector<128x128xbf16>, vector<16x128xf32> -> vector<16x128xf32>
    %c0_200 = arith.constant 0 : index
    %c0_201 = arith.constant 0 : index
    %274 = vector.load %arg45[%c0_200, %c0_201] : memref<1x128xf32, #tpu.memory_space<vmem>>, vector<1x128xf32>
    %275 = vector.broadcast %274 : vector<1x128xf32> to vector<16x128xf32>
    %276 = arith.addf %273, %275 : vector<16x128xf32>
    %cst_202 = arith.constant 0.000000e+00 : f32
    %277 = vector.broadcast %cst_202 : f32 to vector<16x128xf32>
    %278 = arith.maximumf %276, %277 : vector<16x128xf32>
    %279 = arith.truncf %278 : vector<16x128xf32> to vector<16x128xbf16>
    %c0_203 = arith.constant 0 : index
    %c0_204 = arith.constant 0 : index
    %280 = vector.load %arg46[%c0_203, %c0_204] : memref<128x128xbf16, #tpu.memory_space<vmem>>, vector<128x128xbf16>
    %cst_205 = arith.constant dense<0.000000e+00> : vector<16x128xf32>
    %281 = tpu.matmul %279, %280, %cst_205 {dimension_numbers = #tpu.dot_dimension_numbers<[1], [0], [0], [1], [0, 0, 1, 1], [], []>} : vector<16x128xbf16>, vector<128x128xbf16>, vector<16x128xf32> -> vector<16x128xf32>
    %c0_206 = arith.constant 0 : index
    %c0_207 = arith.constant 0 : index
    %282 = vector.load %arg47[%c0_206, %c0_207] : memref<1x128xf32, #tpu.memory_space<vmem>>, vector<1x128xf32>
    %283 = vector.broadcast %282 : vector<1x128xf32> to vector<16x128xf32>
    %284 = arith.addf %281, %283 : vector<16x128xf32>
    %c0_208 = arith.constant 0 : index
    %c0_209 = arith.constant 0 : index
    %285 = vector.load %arg48[%c0_208, %c0_209] : memref<16x128xf32, #tpu.memory_space<vmem>>, vector<16x128xf32>
    tpu.vector_store %arg48[%c0_208, %c0_209], %284 {strides = array<i32>} : memref<16x128xf32, #tpu.memory_space<vmem>>, vector<16x128xf32>,
    return
  }
  func.func @transform_0(%arg0: i32) -> (i32, i32) {
    %c0_i32 = arith.constant 0 : i32
    %c0_i32_0 = arith.constant 0 : i32
    return %arg0, %c0_i32 : i32, i32
  }
  func.func @transform_1(%arg0: i32) -> (i32, i32) {
    %c0_i32 = arith.constant 0 : i32
    %c0_i32_0 = arith.constant 0 : i32
    return %arg0, %c0_i32 : i32, i32
  }
  func.func @transform_2(%arg0: i32) -> (i32, i32) {
    %c0_i32 = arith.constant 0 : i32
    %c0_i32_0 = arith.constant 0 : i32
    %c0_i32_1 = arith.constant 0 : i32
    return %c0_i32, %c0_i32_0 : i32, i32
  }
  func.func @transform_3(%arg0: i32) -> (i32, i32) {
    %c0_i32 = arith.constant 0 : i32
    %c0_i32_0 = arith.constant 0 : i32
    %c0_i32_1 = arith.constant 0 : i32
    return %c0_i32, %c0_i32_0 : i32, i32
  }
  func.func @transform_4(%arg0: i32) -> (i32, i32) {
    %c0_i32 = arith.constant 0 : i32
    %c0_i32_0 = arith.constant 0 : i32
    %c0_i32_1 = arith.constant 0 : i32
    return %c0_i32, %c0_i32_0 : i32, i32
  }
  func.func @transform_5(%arg0: i32) -> (i32, i32) {
    %c0_i32 = arith.constant 0 : i32
    %c0_i32_0 = arith.constant 0 : i32
    %c0_i32_1 = arith.constant 0 : i32
    return %c0_i32, %c0_i32_0 : i32, i32
  }
  func.func @transform_6(%arg0: i32) -> (i32, i32, i32) {
    %c0_i32 = arith.constant 0 : i32
    %c0_i32_0 = arith.constant 0 : i32
    %c0_i32_1 = arith.constant 0 : i32
    %c0_i32_2 = arith.constant 0 : i32
    return %c0_i32, %c0_i32_0, %c0_i32_1 : i32, i32, i32
  }
  func.func @transform_7(%arg0: i32) -> (i32, i32) {
    %c0_i32 = arith.constant 0 : i32
    %c0_i32_0 = arith.constant 0 : i32
    %c0_i32_1 = arith.constant 0 : i32
    return %c0_i32, %c0_i32_0 : i32, i32
  }
  func.func @transform_8(%arg0: i32) -> (i32, i32, i32) {
    %c0_i32 = arith.constant 0 : i32
    %c0_i32_0 = arith.constant 0 : i32
    %c0_i32_1 = arith.constant 0 : i32
    %c0_i32_2 = arith.constant 0 : i32
    return %c0_i32, %c0_i32_0, %c0_i32_1 : i32, i32, i32
  }
  func.func @transform_9(%arg0: i32) -> (i32, i32) {
    %c0_i32 = arith.constant 0 : i32
    %c0_i32_0 = arith.constant 0 : i32
    %c0_i32_1 = arith.constant 0 : i32
    return %c0_i32, %c0_i32_0 : i32, i32
  }
  func.func @transform_10(%arg0: i32) -> (i32, i32, i32) {
    %c0_i32 = arith.constant 0 : i32
    %c0_i32_0 = arith.constant 0 : i32
    %c0_i32_1 = arith.constant 0 : i32
    %c0_i32_2 = arith.constant 0 : i32
    return %c0_i32, %c0_i32_0, %c0_i32_1 : i32, i32, i32
  }
  func.func @transform_11(%arg0: i32) -> (i32, i32) {
    %c0_i32 = arith.constant 0 : i32
    %c0_i32_0 = arith.constant 0 : i32
    %c0_i32_1 = arith.constant 0 : i32
    return %c0_i32, %c0_i32_0 : i32, i32
  }
  func.func @transform_12(%arg0: i32) -> (i32, i32, i32) {
    %c0_i32 = arith.constant 0 : i32
    %c0_i32_0 = arith.constant 0 : i32
    %c0_i32_1 = arith.constant 0 : i32
    %c0_i32_2 = arith.constant 0 : i32
    return %c0_i32, %c0_i32_0, %c0_i32_1 : i32, i32, i32
  }
  func.func @transform_13(%arg0: i32) -> (i32, i32) {
    %c0_i32 = arith.constant 0 : i32
    %c0_i32_0 = arith.constant 0 : i32
    %c0_i32_1 = arith.constant 0 : i32
    return %c0_i32, %c0_i32_0 : i32, i32
  }
  func.func @transform_14(%arg0: i32) -> (i32, i32, i32) {
    %c0_i32 = arith.constant 0 : i32
    %c0_i32_0 = arith.constant 0 : i32
    %c0_i32_1 = arith.constant 0 : i32
    %c0_i32_2 = arith.constant 0 : i32
    return %c0_i32, %c0_i32_0, %c0_i32_1 : i32, i32, i32
  }
  func.func @transform_15(%arg0: i32) -> (i32, i32) {
    %c0_i32 = arith.constant 0 : i32
    %c0_i32_0 = arith.constant 0 : i32
    %c0_i32_1 = arith.constant 0 : i32
    return %c0_i32, %c0_i32_0 : i32, i32
  }
  func.func @transform_16(%arg0: i32) -> (i32, i32, i32) {
    %c0_i32 = arith.constant 0 : i32
    %c0_i32_0 = arith.constant 0 : i32
    %c0_i32_1 = arith.constant 0 : i32
    %c0_i32_2 = arith.constant 0 : i32
    return %c0_i32, %c0_i32_0, %c0_i32_1 : i32, i32, i32
  }
  func.func @transform_17(%arg0: i32) -> (i32, i32) {
    %c0_i32 = arith.constant 0 : i32
    %c0_i32_0 = arith.constant 0 : i32
    %c0_i32_1 = arith.constant 0 : i32
    return %c0_i32, %c0_i32_0 : i32, i32
  }
  func.func @transform_18(%arg0: i32) -> (i32, i32, i32) {
    %c0_i32 = arith.constant 0 : i32
    %c0_i32_0 = arith.constant 0 : i32
    %c0_i32_1 = arith.constant 0 : i32
    %c0_i32_2 = arith.constant 0 : i32
    return %c0_i32, %c0_i32_0, %c0_i32_1 : i32, i32, i32
  }
  func.func @transform_19(%arg0: i32) -> (i32, i32) {
    %c0_i32 = arith.constant 0 : i32
    %c0_i32_0 = arith.constant 0 : i32
    %c0_i32_1 = arith.constant 0 : i32
    return %c0_i32, %c0_i32_0 : i32, i32
  }
  func.func @transform_20(%arg0: i32) -> (i32, i32) {
    %c0_i32 = arith.constant 0 : i32
    %c0_i32_0 = arith.constant 0 : i32
    %c0_i32_1 = arith.constant 0 : i32
    return %c0_i32, %c0_i32_0 : i32, i32
  }
  func.func @transform_21(%arg0: i32) -> (i32, i32) {
    %c0_i32 = arith.constant 0 : i32
    %c0_i32_0 = arith.constant 0 : i32
    %c0_i32_1 = arith.constant 0 : i32
    return %c0_i32, %c0_i32_0 : i32, i32
  }
  func.func @transform_22(%arg0: i32) -> (i32, i32) {
    %c0_i32 = arith.constant 0 : i32
    %c0_i32_0 = arith.constant 0 : i32
    %c0_i32_1 = arith.constant 0 : i32
    return %c0_i32, %c0_i32_0 : i32, i32
  }
  func.func @transform_23(%arg0: i32) -> (i32, i32) {
    %c0_i32 = arith.constant 0 : i32
    %c0_i32_0 = arith.constant 0 : i32
    %c0_i32_1 = arith.constant 0 : i32
    return %c0_i32, %c0_i32_0 : i32, i32
  }
  func.func @transform_24(%arg0: i32) -> (i32, i32) {
    %c0_i32 = arith.constant 0 : i32
    %c0_i32_0 = arith.constant 0 : i32
    %c0_i32_1 = arith.constant 0 : i32
    return %c0_i32, %c0_i32_0 : i32, i32
  }
  func.func @transform_25(%arg0: i32) -> (i32, i32) {
    %c0_i32 = arith.constant 0 : i32
    %c0_i32_0 = arith.constant 0 : i32
    %c0_i32_1 = arith.constant 0 : i32
    return %c0_i32, %c0_i32_0 : i32, i32
  }
  func.func @transform_26(%arg0: i32) -> (i32, i32) {
    %c0_i32 = arith.constant 0 : i32
    %c0_i32_0 = arith.constant 0 : i32
    %c0_i32_1 = arith.constant 0 : i32
    return %c0_i32, %c0_i32_0 : i32, i32
  }
  func.func @transform_27(%arg0: i32) -> (i32, i32) {
    %c0_i32 = arith.constant 0 : i32
    %c0_i32_0 = arith.constant 0 : i32
    %c0_i32_1 = arith.constant 0 : i32
    return %c0_i32, %c0_i32_0 : i32, i32
  }
  func.func @transform_28(%arg0: i32) -> (i32, i32) {
    %c0_i32 = arith.constant 0 : i32
    %c0_i32_0 = arith.constant 0 : i32
    %c0_i32_1 = arith.constant 0 : i32
    return %c0_i32, %c0_i32_0 : i32, i32
  }
  func.func @transform_29(%arg0: i32) -> (i32, i32) {
    %c0_i32 = arith.constant 0 : i32
    %c0_i32_0 = arith.constant 0 : i32
    %c0_i32_1 = arith.constant 0 : i32
    return %c0_i32, %c0_i32_0 : i32, i32
  }
  func.func @transform_30(%arg0: i32) -> (i32, i32) {
    %c0_i32 = arith.constant 0 : i32
    %c0_i32_0 = arith.constant 0 : i32
    %c0_i32_1 = arith.constant 0 : i32
    return %c0_i32, %c0_i32_0 : i32, i32
  }
  func.func @transform_31(%arg0: i32) -> (i32, i32) {
    %c0_i32 = arith.constant 0 : i32
    %c0_i32_0 = arith.constant 0 : i32
    %c0_i32_1 = arith.constant 0 : i32
    return %c0_i32, %c0_i32_0 : i32, i32
  }
  func.func @transform_32(%arg0: i32) -> (i32, i32) {
    %c0_i32 = arith.constant 0 : i32
    %c0_i32_0 = arith.constant 0 : i32
    %c0_i32_1 = arith.constant 0 : i32
    return %c0_i32, %c0_i32_0 : i32, i32
  }
  func.func @transform_33(%arg0: i32) -> (i32, i32) {
    %c0_i32 = arith.constant 0 : i32
    %c0_i32_0 = arith.constant 0 : i32
    %c0_i32_1 = arith.constant 0 : i32
    return %c0_i32, %c0_i32_0 : i32, i32
  }
  func.func @transform_34(%arg0: i32) -> (i32, i32) {
    %c0_i32 = arith.constant 0 : i32
    %c0_i32_0 = arith.constant 0 : i32
    %c0_i32_1 = arith.constant 0 : i32
    return %c0_i32, %c0_i32_0 : i32, i32
  }
  func.func @transform_35(%arg0: i32) -> (i32, i32) {
    %c0_i32 = arith.constant 0 : i32
    %c0_i32_0 = arith.constant 0 : i32
    %c0_i32_1 = arith.constant 0 : i32
    return %c0_i32, %c0_i32_0 : i32, i32
  }
  func.func @transform_36(%arg0: i32) -> (i32, i32) {
    %c0_i32 = arith.constant 0 : i32
    %c0_i32_0 = arith.constant 0 : i32
    %c0_i32_1 = arith.constant 0 : i32
    return %c0_i32, %c0_i32_0 : i32, i32
  }
  func.func @transform_37(%arg0: i32) -> (i32, i32) {
    %c0_i32 = arith.constant 0 : i32
    %c0_i32_0 = arith.constant 0 : i32
    %c0_i32_1 = arith.constant 0 : i32
    return %c0_i32, %c0_i32_0 : i32, i32
  }
  func.func @transform_38(%arg0: i32) -> (i32, i32) {
    %c0_i32 = arith.constant 0 : i32
    %c0_i32_0 = arith.constant 0 : i32
    %c0_i32_1 = arith.constant 0 : i32
    return %c0_i32, %c0_i32_0 : i32, i32
  }
  func.func @transform_39(%arg0: i32) -> (i32, i32) {
    %c0_i32 = arith.constant 0 : i32
    %c0_i32_0 = arith.constant 0 : i32
    %c0_i32_1 = arith.constant 0 : i32
    return %c0_i32, %c0_i32_0 : i32, i32
  }
  func.func @transform_40(%arg0: i32) -> (i32, i32) {
    %c0_i32 = arith.constant 0 : i32
    %c0_i32_0 = arith.constant 0 : i32
    %c0_i32_1 = arith.constant 0 : i32
    return %c0_i32, %c0_i32_0 : i32, i32
  }
  func.func @transform_41(%arg0: i32) -> (i32, i32) {
    %c0_i32 = arith.constant 0 : i32
    %c0_i32_0 = arith.constant 0 : i32
    %c0_i32_1 = arith.constant 0 : i32
    return %c0_i32, %c0_i32_0 : i32, i32
  }
  func.func @transform_42(%arg0: i32) -> (i32, i32) {
    %c0_i32 = arith.constant 0 : i32
    %c0_i32_0 = arith.constant 0 : i32
    %c0_i32_1 = arith.constant 0 : i32
    return %c0_i32, %c0_i32_0 : i32, i32
  }
  func.func @transform_43(%arg0: i32) -> (i32, i32) {
    %c0_i32 = arith.constant 0 : i32
    %c0_i32_0 = arith.constant 0 : i32
    %c0_i32_1 = arith.constant 0 : i32
    return %c0_i32, %c0_i32_0 : i32, i32
  }
  func.func @transform_44(%arg0: i32) -> (i32, i32) {
    %c0_i32 = arith.constant 0 : i32
    %c0_i32_0 = arith.constant 0 : i32
    %c0_i32_1 = arith.constant 0 : i32
    return %c0_i32, %c0_i32_0 : i32, i32
  }
  func.func @transform_45(%arg0: i32) -> (i32, i32) {
    %c0_i32 = arith.constant 0 : i32
    %c0_i32_0 = arith.constant 0 : i32
    %c0_i32_1 = arith.constant 0 : i32
    return %c0_i32, %c0_i32_0 : i32, i32
  }
  func.func @transform_46(%arg0: i32) -> (i32, i32) {
    %c0_i32 = arith.constant 0 : i32
    %c0_i32_0 = arith.constant 0 : i32
    %c0_i32_1 = arith.constant 0 : i32
    return %c0_i32, %c0_i32_0 : i32, i32
  }
  func.func @transform_47(%arg0: i32) -> (i32, i32) {
    %c0_i32 = arith.constant 0 : i32
    %c0_i32_0 = arith.constant 0 : i32
    return %arg0, %c0_i32 : i32, i32
  }
}

</mosaic_0001>

<bundles_post_ra>
// kernel: tpu_custom_call.1
= control target key start
LH: loop header
LB: loop body
LE: loop exit
PB: predicated region body
PF: predicated region fallthrough
CT: control target
= control target key end

     0   :  { %s11429_s6 = smov 1   ;;  %s11430_s10 = smov 2   ;;  %s14029_s0 = inlined_call_operand.smem [shape: u32[48], index: -1, kind: input, shape index: {}] }
   0x1   :  { %s11525_s5 = sld [smem:[%s14029_s0]]   ;;  %s11431_s14 = smov 3  }
   0x2   :  { %s11530_s9 = sld [smem:[%s14029_s0 + %s11429_s6]]   ;;  %s11432_s18 = smov 4  }
   0x3   :  { %s11535_s13 = sld [smem:[%s14029_s0 + %s11430_s10]]   ;;  %s11433_s22 = smov 5  }
   0x4   :  { %s11540_s17 = sld [smem:[%s14029_s0 + %s11431_s14]]   ;;  %s11434_s26 = smov 6  }
   0x5   :  { %s11545_s21 = sld [smem:[%s14029_s0 + %s11432_s18]]   ;;  %s11435_s30 = smov 7  }
   0x6   :  { %s11550_s25 = sld [smem:[%s14029_s0 + %s11433_s22]]   ;;  %s11436_s4 = smov 8  }
   0x7   :  { %14039 = sst [smem:[#allocation72_spill]] %s11525_s5  ;;  %s11437_s10 = smov 9  }
   0x8   :  { %14040 = sst [smem:[#allocation73_spill]] %s11530_s9  ;;  %s11438_s15 = smov 10  }
   0x9   :  { %14041 = sst [smem:[#allocation74_spill]] %s11535_s13  ;;  %s11439_s20 = smov 11  }
   0xa   :  { %14042 = sst [smem:[#allocation75_spill]] %s11540_s17  ;;  %s11441_s1 = smov 13  }
   0xb   :  { %14043 = sst [smem:[#allocation76_spill]] %s11545_s21  ;;  %s11442_s7 = smov 14  }
   0xc   :  { %s11555_s29 = sld [smem:[%s14029_s0 + %s11434_s26]]   ;;  %s11440_s26 = smov 12  }
   0xd   :  { %s11560_s3 = sld [smem:[%s14029_s0 + %s11435_s30]]   ;;  %s11444_s22 = smov 16  }
   0xe   :  { %s11565_s8 = sld [smem:[%s14029_s0 + %s11436_s4]]   ;;  %s11445_s28 = smov 17  }
   0xf   :  { %s11570_s14 = sld [smem:[%s14029_s0 + %s11437_s10]]  }
  0x10   :  { %s11575_s19 = sld [smem:[%s14029_s0 + %s11438_s15]]   ;;  %s11443_s15 = smov 15  }
  0x11   :  { %s11580_s24 = sld [smem:[%s14029_s0 + %s11439_s20]]  }
  0x12   :  { %14044 = sst [smem:[#allocation77_spill]] %s11555_s29 }
  0x13   :  { %14045 = sst [smem:[#allocation78_spill]] %s11560_s3 }
  0x14   :  { %s11585_s30 = sld [smem:[%s14029_s0 + %s11440_s26]]  }
  0x15   :  { %14046 = sst [smem:[#allocation79_spill]] %s11570_s14 }
  0x16   :  { %s11590_s6 = sld [smem:[%s14029_s0 + %s11441_s1]]  }
  0x17   :  { %14047 = sst [smem:[#allocation80_spill]] %s11580_s24 }
  0x18   :  { %s11595_s12 = sld [smem:[%s14029_s0 + %s11442_s7]]   ;;  %s11446_s7 = smov 18  }
  0x19   :  { %s11600_s20 = sld [smem:[%s14029_s0 + %s11443_s15]]   ;;  %s11447_s15 = smov 19  }
  0x1a   :  { %s11605_s27 = sld [smem:[%s14029_s0 + %s11444_s22]]   ;;  %s11448_s22 = smov 20  }
  0x1b   :  { %s11610_s4 = sld [smem:[%s14029_s0 + %s11445_s28]]   ;;  %s11449_s28 = smov 21  }
  0x1c   :  { %14048 = sst [smem:[#allocation81_spill]] %s11590_s6 }
  0x1d   :  { %s11615_s9 = sld [smem:[%s14029_s0 + %s11446_s7]]   ;;  %s11450_s7 = smov 22  }
  0x1e   :  { %s11620_s29 = sld [smem:[%s14029_s0 + %s11447_s15]]   ;;  %s11451_s15 = smov 23  }
  0x1f   :  { %14049 = sst [smem:[#allocation82_spill]] %s11600_s20 }
  0x20   :  { %s11625_s13 = sld [smem:[%s14029_s0 + %s11448_s22]]   ;;  %s11452_s22 = smov 24  }
  0x21   :  { %14050 = sst [smem:[#allocation83_spill]] %s11610_s4 }
  0x22   :  { %s11630_s21 = sld [smem:[%s14029_s0 + %s11449_s28]]   ;;  %s11453_s28 = smov 25  }
  0x23   :  { %s11635_s5 = sld [smem:[%s14029_s0 + %s11450_s7]]   ;;  %s11454_s7 = smov 26  }
  0x24   :  { %14051 = sst [smem:[#allocation84_spill]] %s11620_s29 }
  0x25   :  { %s11640_s29 = sld [smem:[%s14029_s0 + %s11451_s15]]   ;;  %s11455_s15 = smov 27  }
  0x26   :  { %14052 = sst [smem:[#allocation85_spill]] %s11625_s13 }
  0x27   :  { %s11645_s13 = sld [smem:[%s14029_s0 + %s11452_s22]]   ;;  %s11456_s22 = smov 28  }
  0x28   :  { %14053 = sst [smem:[#allocation86_spill]] %s11630_s21 }
  0x29   :  { %s11650_s21 = sld [smem:[%s14029_s0 + %s11453_s28]]   ;;  %s11457_s28 = smov 29  }
  0x2a   :  { %s11655_s4 = sld [smem:[%s14029_s0 + %s11454_s7]]   ;;  %s11458_s7 = smov 30  }
  0x2b   :  { %14054 = sst [smem:[#allocation87_spill]] %s11640_s29 }
  0x2c   :  { %s11660_s29 = sld [smem:[%s14029_s0 + %s11455_s15]]   ;;  %s11459_s15 = smov 31  }
  0x2d   :  { %s11665_s20 = sld [smem:[%s14029_s0 + %s11456_s22]]   ;;  %s11460_s22 = smov 32  }
  0x2e   :  { %s11675_s6 = sld [smem:[%s14029_s0 + %s11458_s7]]   ;;  %s11462_s7 = smov 34  }
  0x2f   :  { %14055 = sst [smem:[#allocation88_spill]] %s11650_s21 }
  0x30   :  { %s11670_s21 = sld [smem:[%s14029_s0 + %s11457_s28]]   ;;  %s11461_s28 = smov 33  }
  0x31   :  { %s11685_s24 = sld [smem:[%s14029_s0 + %s11460_s22]]   ;;  %s11464_s22 = smov 36  }
  0x32   :  { %14056 = sst [smem:[#allocation89_spill]] %s11660_s29 }
  0x33   :  { %s11680_s29 = sld [smem:[%s14029_s0 + %s11459_s15]]   ;;  %s11463_s15 = smov 35  }
  0x34   :  { %s11695_s14 = sld [smem:[%s14029_s0 + %s11462_s7]]   ;;  %s11466_s7 = smov 38  }
  0x35   :  { %s11705_s3 = sld [smem:[%s14029_s0 + %s11464_s22]]   ;;  %s11468_s22 = smov 40  }
  0x36   :  { %14057 = sst [smem:[#allocation90_spill]] %s11670_s21 }
  0x37   :  { %s11690_s21 = sld [smem:[%s14029_s0 + %s11461_s28]]   ;;  %s11465_s28 = smov 37  }
  0x39   :  { %14058 = sst [smem:[#allocation91_spill]] %s11680_s29 }
  0x3a   :  { %14060 = sst [smem:[#allocation93_spill]] %s11695_s14 }
  0x3b   :  { %s11700_s29 = sld [smem:[%s14029_s0 + %s11463_s15]]   ;;  %s11467_s15 = smov 39  }
  0x3c   :  { %14061 = sst [smem:[#allocation94_spill]] %s11705_s3 }
  0x3d   :  { %14059 = sst [smem:[#allocation92_spill]] %s11690_s21 }
  0x3e   :  { %s11710_s21 = sld [smem:[%s14029_s0 + %s11465_s28]]   ;;  %s11469_s28 = smov 41  }
  0x3f   :  { %s11715_s14 = sld [smem:[%s14029_s0 + %s11466_s7]]   ;;  %s11470_s7 = smov 42  }
  0x40   :  { %s11720_s17 = sld [smem:[%s14029_s0 + %s11467_s15]]   ;;  %s11471_s15 = smov 43  }
  0x41   :  { %s11725_s3 = sld [smem:[%s14029_s0 + %s11468_s22]]   ;;  %s11472_s22 = smov 44  }
  0x44   :  { %14062 = sst [smem:[#allocation95_spill]] %s11710_s21 }
  0x45   :  { %14063 = sst [smem:[#allocation96_spill]] %s11715_s14 }
  0x46   :  { %14064 = sst [smem:[#allocation97_spill]] %s11720_s17 }
  0x47   :  { %14065 = sst [smem:[#allocation98_spill]] %s11725_s3 }
  0x48   :  { %s11730_s21 = sld [smem:[%s14029_s0 + %s11469_s28]]   ;;  %s11473_s28 = smov 45  }
  0x49   :  { %s11735_s14 = sld [smem:[%s14029_s0 + %s11470_s7]]   ;;  %s11474_s7 = smov 46  }
  0x4a   :  { %s11740_s17 = sld [smem:[%s14029_s0 + %s11471_s15]]   ;;  %s11475_s15 = smov 47  }
  0x4b   :  { %s11745_s3 = sld [smem:[%s14029_s0 + %s11472_s22]]  }
  0x4e   :  { %14066 = sst [smem:[#allocation99_spill]] %s11730_s21 }
  0x4f   :  { %14067 = sst [smem:[#allocation100_spill]] %s11735_s14 }
  0x50   :  { %14068 = sst [smem:[#allocation101_spill]] %s11740_s17 }
  0x51   :  { %s11750_s21 = sld [smem:[%s14029_s0 + %s11473_s28]]  }
  0x52   :  { %s11755_s14 = sld [smem:[%s14029_s0 + %s11474_s7]]  }
  0x53   :  { %s11760_s17 = sld [smem:[%s14029_s0 + %s11475_s15]]  }
  0x54   :  { %100 = vsyncpa [#allocation3], 0 }
  0x55   :  { %101 = vsyncpa [#allocation6], 0 }
  0x56   :  { %102 = vsyncpa [#allocation9], 0 }
  0x57   :  { %103 = vsyncpa [#allocation12], 0 }
  0x58   :  { %104 = vsyncpa [#allocation15], 0 }
  0x59   :  { %105 = vsyncpa [#allocation18], 0 }
  0x5a   :  { %106 = vsyncpa [#allocation21], 0 }
  0x5b   :  { %107 = vsyncpa [#allocation24], 0 }
  0x5c   :  { %108 = vsyncpa [#allocation27], 0 }
  0x5d   :  { %109 = vsyncpa [#allocation30], 0 }
  0x5e   :  { %110 = vsyncpa [#allocation33], 0 }
  0x5f   :  { %111 = vsyncpa [#allocation36], 0 }
  0x60   :  { %112 = vsyncpa [#allocation39], 0 }
  0x61   :  { %113 = vsyncpa [#allocation42], 0 }
  0x62   :  { %114 = vsyncpa [#allocation45], 0 }
  0x63   :  { %115 = vsyncpa [#allocation48], 0 }
  0x64   :  { %116 = vsyncpa [#allocation51], 0 }
  0x65   :  { %117 = vsyncpa [#allocation4], 0  ;;  %s11476_s0 = smov [#allocation5]   ;;  %s11477_s23 = smov [#allocation8]  }
  0x66   :  { %s142_s22 = sshll.u32 %s11476_s0, 4  ;;  %s163_s26 = sshll.u32 %s11477_s23, 4  ;;  %s143_s22 = int_to_ptr.vmem [resolvable:$true] %s142_s22  ;;  %s164_s26 = int_to_ptr.vmem [resolvable:$true] %s163_s26 }
  0x67   :  { %s10721_s28 = scalar_lea.vmem %s143_s22, 16  ;;  %s10725_s1 = scalar_lea.vmem %s143_s22, 32 }
  0x68   :  { %p10722_p0 = scmp.ne.s32.totalorder %s143_s22, %s10721_s28  ;;  %p10726_p1 = scmp.lt.s32.totalorder %s143_s22, %s143_s22 }
  0x69   :  { %p10727_p2 = scmp.lt.s32.totalorder %s10725_s1, %s10721_s28 }
  0x6b   :  { %p10728_p3 = por %p10727_p2, %p10726_p1 }
  0x6d   :  { %p10729_p4 = pnand %p10728_p3, %p10722_p0 }
  0x6f   :  { %10732 = shalt.err (!%p10729_p4)
}
  0x70   :  { %145 = dma.hbm_to_vmem [thread:$0]  %s11550_s25, 16, %s143_s22, [#allocation6]  }
  0x71   :  { %s10741_s2 = scalar_lea.vmem %s164_s26, 3072  ;;  %p10746_p6 = scmp.lt.s32.totalorder %s164_s26, %s164_s26 }
  0x72   :  { %p10742_p5 = scmp.ne.s32.totalorder %s164_s26, %s10741_s2  ;;  %p10747_p7 = scmp.lt.s32.totalorder %s10741_s2, %s10741_s2 }
  0x74   :  { %p10748_p8 = por %p10747_p7, %p10746_p6 }
  0x76   :  { %p10749_p9 = pnand %p10748_p8, %p10742_p5 }
  0x78   :  { %10752 = shalt.err (!%p10749_p9)
}
  0x79   :  { %s11478_s7 = smov 64   ;;  %s11479_s10 = smov 4  }
  0x7a   :  { %169 = dma.hbm_to_vmem [thread:$0]  %s11565_s8, 3072, %s164_s26, [#allocation9], %s11478_s7, %s11478_s7, %s11479_s10  }
  0x7b   :  { %s11480_s11 = smov [#allocation11]   ;;  %s11481_s16 = smov [#allocation14]  }
  0x7c   :  { %s185_s15 = sshll.u32 %s11480_s11, 4  ;;  %s207_s18 = sshll.u32 %s11481_s16, 4  ;;  %s186_s15 = int_to_ptr.vmem [resolvable:$true] %s185_s15  ;;  %s208_s18 = int_to_ptr.vmem [resolvable:$true] %s207_s18 }
  0x7d   :  { %s10761_s25 = scalar_lea.vmem %s186_s15, 3072  ;;  %p10766_p11 = scmp.lt.s32.totalorder %s186_s15, %s186_s15 }
  0x7e   :  { %p10762_p10 = scmp.ne.s32.totalorder %s186_s15, %s10761_s25  ;;  %p10767_p12 = scmp.lt.s32.totalorder %s10761_s25, %s10761_s25 }
  0x80   :  { %p10768_p13 = por %p10767_p12, %p10766_p11 }
  0x82   :  { %p10769_p0 = pnand %p10768_p13, %p10762_p10 }
  0x84   :  { %10772 = shalt.err (!%p10769_p0)
}
  0x85   :  { %191 = dma.hbm_to_vmem [thread:$0]  %s11575_s19, 3072, %s186_s15, [#allocation12], %s11478_s7, %s11478_s7, %s11479_s10  }
  0x86   :  { %s10781_s0 = scalar_lea.vmem %s208_s18, 3072  ;;  %p10786_p2 = scmp.lt.s32.totalorder %s208_s18, %s208_s18 }
  0x87   :  { %p10782_p1 = scmp.ne.s32.totalorder %s208_s18, %s10781_s0  ;;  %p10787_p3 = scmp.lt.s32.totalorder %s10781_s0, %s10781_s0 }
  0x89   :  { %p10788_p4 = por %p10787_p3, %p10786_p2 }
  0x8b   :  { %p10789_p5 = pnand %p10788_p4, %p10782_p1 }
  0x8d   :  { %10792 = shalt.err (!%p10789_p5)
}
  0x8e   :  { %213 = dma.hbm_to_vmem [thread:$0]  %s11585_s30, 3072, %s208_s18, [#allocation15], %s11478_s7, %s11478_s7, %s11479_s10  }
  0x8f   :  { %s11482_s8 = smov [#allocation17]   ;;  %s11483_s23 = smov [#allocation20]  }
  0x90   :  { %s229_s22 = sshll.u32 %s11482_s8, 4  ;;  %s251_s26 = sshll.u32 %s11483_s23, 4  ;;  %s230_s22 = int_to_ptr.vmem [resolvable:$true] %s229_s22  ;;  %s252_s26 = int_to_ptr.vmem [resolvable:$true] %s251_s26 }
  0x91   :  { %s10801_s28 = scalar_lea.vmem %s230_s22, 3072  ;;  %p10806_p7 = scmp.lt.s32.totalorder %s230_s22, %s230_s22 }
  0x92   :  { %p10802_p6 = scmp.ne.s32.totalorder %s230_s22, %s10801_s28  ;;  %p10807_p8 = scmp.lt.s32.totalorder %s10801_s28, %s10801_s28 }
  0x94   :  { %p10808_p9 = por %p10807_p8, %p10806_p7 }
  0x96   :  { %p10809_p10 = pnand %p10808_p9, %p10802_p6 }
  0x98   :  { %10812 = shalt.err (!%p10809_p10)
}
  0x99   :  { %235 = dma.hbm_to_vmem [thread:$0]  %s11595_s12, 3072, %s230_s22, [#allocation18], %s11478_s7, %s11478_s7, %s11479_s10  }
  0x9a   :  { %s10821_s19 = scalar_lea.vmem %s252_s26, 3072  ;;  %p10826_p12 = scmp.lt.s32.totalorder %s252_s26, %s252_s26 }
  0x9b   :  { %p10822_p11 = scmp.ne.s32.totalorder %s252_s26, %s10821_s19  ;;  %p10827_p13 = scmp.lt.s32.totalorder %s10821_s19, %s10821_s19 }
  0x9d   :  { %p10828_p0 = por %p10827_p13, %p10826_p12 }
  0x9f   :  { %p10829_p1 = pnand %p10828_p0, %p10822_p11 }
  0xa1   :  { %10832 = shalt.err (!%p10829_p1)
}
  0xa2   :  { %257 = dma.hbm_to_vmem [thread:$0]  %s11605_s27, 3072, %s252_s26, [#allocation21], %s11478_s7, %s11478_s7, %s11479_s10  }
  0xa3   :  { %s11484_s30 = smov [#allocation23]   ;;  %s11485_s2 = smov [#allocation26]  }
  0xa4   :  { %s273_s1 = sshll.u32 %s11484_s30, 4  ;;  %s300_s11 = sshll.u32 %s11485_s2, 4  ;;  %s274_s1 = int_to_ptr.vmem [resolvable:$true] %s273_s1  ;;  %s301_s11 = int_to_ptr.vmem [resolvable:$true] %s300_s11 }
  0xa5   :  { %s10841_s15 = scalar_lea.vmem %s274_s1, 7168  ;;  %p10846_p3 = scmp.lt.s32.totalorder %s274_s1, %s274_s1 }
  0xa6   :  { %p10842_p2 = scmp.ne.s32.totalorder %s274_s1, %s10841_s15  ;;  %p10847_p4 = scmp.lt.s32.totalorder %s10841_s15, %s10841_s15 }
  0xa8   :  { %p10848_p5 = por %p10847_p4, %p10846_p3 }
  0xaa   :  { %p10849_p6 = pnand %p10848_p5, %p10842_p2 }
  0xac   :  { %10852 = shalt.err (!%p10849_p6)
}
  0xad   :  { %279 = dma.hbm_to_vmem [thread:$0]  %s11615_s9, 7168, %s274_s1, [#allocation24], %s11478_s7, %s11478_s7, %s11479_s10  }
  0xae   :  { %s10861_s12 = scalar_lea.vmem %s301_s11, 16  ;;  %s10865_s27 = scalar_lea.vmem %s301_s11, 32 }
  0xaf   :  { %p10862_p7 = scmp.ne.s32.totalorder %s301_s11, %s10861_s12  ;;  %p10866_p8 = scmp.lt.s32.totalorder %s301_s11, %s301_s11 }
  0xb0   :  { %p10867_p9 = scmp.lt.s32.totalorder %s10865_s27, %s10861_s12 }
  0xb2   :  { %p10868_p10 = por %p10867_p9, %p10866_p8 }
  0xb4   :  { %p10869_p11 = pnand %p10868_p10, %p10862_p7 }
  0xb6   :  { %10872 = shalt.err (!%p10869_p11)
}
  0xb7   :  { %303 = dma.hbm_to_vmem [thread:$0]  %s11635_s5, 16, %s301_s11, [#allocation27]  }
  0xb8   :  { %s11486_s16 = smov [#allocation29]   ;;  %s11487_s25 = smov [#allocation32]  }
  0xb9   :  { %s322_s18 = sshll.u32 %s11486_s16, 4  ;;  %s344_s0 = sshll.u32 %s11487_s25, 4  ;;  %s323_s18 = int_to_ptr.vmem [resolvable:$true] %s322_s18  ;;  %s345_s0 = int_to_ptr.vmem [resolvable:$true] %s344_s0 }
  0xba   :  { %s10881_s8 = scalar_lea.vmem %s323_s18, 16  ;;  %s10885_s22 = scalar_lea.vmem %s323_s18, 32 }
  0xbb   :  { %p10882_p12 = scmp.ne.s32.totalorder %s323_s18, %s10881_s8  ;;  %p10886_p13 = scmp.lt.s32.totalorder %s323_s18, %s323_s18 }
  0xbc   :  { %p10887_p0 = scmp.lt.s32.totalorder %s10885_s22, %s10881_s8 }
  0xbe   :  { %p10888_p1 = por %p10887_p0, %p10886_p13 }
  0xc0   :  { %p10889_p2 = pnand %p10888_p1, %p10882_p12 }
  0xc2   :  { %10892 = shalt.err (!%p10889_p2)
}
  0xc3   :  { %325 = dma.hbm_to_vmem [thread:$0]  %s11645_s13, 16, %s323_s18, [#allocation30]  }
  0xc4   :  { %s10901_s9 = scalar_lea.vmem %s345_s0, 16  ;;  %s10905_s23 = scalar_lea.vmem %s345_s0, 32 }
  0xc5   :  { %p10902_p3 = scmp.ne.s32.totalorder %s345_s0, %s10901_s9  ;;  %p10906_p4 = scmp.lt.s32.totalorder %s345_s0, %s345_s0 }
  0xc6   :  { %p10907_p5 = scmp.lt.s32.totalorder %s10905_s23, %s10901_s9 }
  0xc8   :  { %p10908_p6 = por %p10907_p5, %p10906_p4 }
  0xca   :  { %p10909_p7 = pnand %p10908_p6, %p10902_p3 }
  0xcc   :  { %10912 = shalt.err (!%p10909_p7)
}
  0xcd   :  { %347 = dma.hbm_to_vmem [thread:$0]  %s11655_s4, 16, %s345_s0, [#allocation33]  }
  0xce   :  { %s11488_s5 = smov [#allocation35]   ;;  %s11489_s28 = smov [#allocation38]  }
  0xcf   :  { %s366_s26 = sshll.u32 %s11488_s5, 4  ;;  %s388_s19 = sshll.u32 %s11489_s28, 4  ;;  %s367_s26 = int_to_ptr.vmem [resolvable:$true] %s366_s26  ;;  %s389_s19 = int_to_ptr.vmem [resolvable:$true] %s388_s19 }
  0xd0   :  { %s10921_s30 = scalar_lea.vmem %s367_s26, 16  ;;  %s10925_s1 = scalar_lea.vmem %s367_s26, 32 }
  0xd1   :  { %p10922_p8 = scmp.ne.s32.totalorder %s367_s26, %s10921_s30  ;;  %p10926_p9 = scmp.lt.s32.totalorder %s367_s26, %s367_s26 }
  0xd2   :  { %p10927_p10 = scmp.lt.s32.totalorder %s10925_s1, %s10921_s30 }
  0xd4   :  { %p10928_p11 = por %p10927_p10, %p10926_p9 }
  0xd6   :  { %p10929_p12 = pnand %p10928_p11, %p10922_p8 }
  0xd8   :  { %10932 = shalt.err (!%p10929_p12)
}
  0xd9   :  { %369 = dma.hbm_to_vmem [thread:$0]  %s11665_s20, 16, %s367_s26, [#allocation36]  }
  0xda   :  { %s10941_s13 = scalar_lea.vmem %s389_s19, 16  ;;  %s10945_s2 = scalar_lea.vmem %s389_s19, 32 }
  0xdb   :  { %p10942_p13 = scmp.ne.s32.totalorder %s389_s19, %s10941_s13  ;;  %p10946_p0 = scmp.lt.s32.totalorder %s389_s19, %s389_s19 }
  0xdc   :  { %p10947_p1 = scmp.lt.s32.totalorder %s10945_s2, %s10941_s13 }
  0xde   :  { %p10948_p2 = por %p10947_p1, %p10946_p0 }
  0xe0   :  { %p10949_p3 = pnand %p10948_p2, %p10942_p13 }
  0xe2   :  { %10952 = shalt.err (!%p10949_p3)
}
  0xe3   :  { %391 = dma.hbm_to_vmem [thread:$0]  %s11675_s6, 16, %s389_s19, [#allocation39]  }
  0xe4   :  { %s11490_s4 = smov [#allocation41]   ;;  %s11491_s15 = smov [#allocation44]  }
  0xe5   :  { %s410_s11 = sshll.u32 %s11490_s4, 4  ;;  %s431_s12 = sshll.u32 %s11491_s15, 4  ;;  %s411_s11 = int_to_ptr.vmem [resolvable:$true] %s410_s11  ;;  %s432_s12 = int_to_ptr.vmem [resolvable:$true] %s431_s12 }
  0xe6   :  { %s10961_s27 = scalar_lea.vmem %s411_s11, 16  ;;  %s10965_s16 = scalar_lea.vmem %s411_s11, 32 }
  0xe7   :  { %p10962_p4 = scmp.ne.s32.totalorder %s411_s11, %s10961_s27  ;;  %p10966_p5 = scmp.lt.s32.totalorder %s411_s11, %s411_s11 }
  0xe8   :  { %p10967_p6 = scmp.lt.s32.totalorder %s10965_s16, %s10961_s27 }
  0xea   :  { %p10968_p7 = por %p10967_p6, %p10966_p5 }
  0xec   :  { %p10969_p8 = pnand %p10968_p7, %p10962_p4 }
  0xee   :  { %10972 = shalt.err (!%p10969_p8)
}
  0xef   :  { %413 = dma.hbm_to_vmem [thread:$0]  %s11685_s24, 16, %s411_s11, [#allocation42]  }
  0xf0   :  { %s10981_s20 = scalar_lea.vmem %s432_s12, 1024  ;;  %p10986_p10 = scmp.lt.s32.totalorder %s432_s12, %s432_s12 }
  0xf1   :  { %p10982_p9 = scmp.ne.s32.totalorder %s432_s12, %s10981_s20  ;;  %p10987_p11 = scmp.lt.s32.totalorder %s10981_s20, %s10981_s20 }
  0xf3   :  { %p10988_p12 = por %p10987_p11, %p10986_p10 }
  0xf5   :  { %p10989_p13 = pnand %p10988_p12, %p10982_p9 }
  0xf7   :  { %10992 = shalt.err (!%p10989_p13)
}
  0xf8   :  { %437 = dma.hbm_to_vmem [thread:$0]  %s11700_s29, 1024, %s432_s12, [#allocation45], %s11478_s7, %s11478_s7, %s11479_s10  }
  0xf9   :  { %s11492_s6 = smov [#allocation47]   ;;  %s11493_s25 = smov [#allocation50]  }
  0xfa   :  { %s459_s18 = sshll.u32 %s11492_s6, 4  ;;  %s487_s0 = sshll.u32 %s11493_s25, 4  ;;  %s460_s18 = int_to_ptr.vmem [resolvable:$true] %s459_s18  ;;  %s488_s0 = int_to_ptr.vmem [resolvable:$true] %s487_s0 }
  0xfb   :  { %s11001_s8 = scalar_lea.vmem %s460_s18, 1024  ;;  %p11006_p1 = scmp.lt.s32.totalorder %s460_s18, %s460_s18 }
  0xfc   :  { %p11002_p0 = scmp.ne.s32.totalorder %s460_s18, %s11001_s8  ;;  %p11007_p2 = scmp.lt.s32.totalorder %s11001_s8, %s11001_s8 }
  0xfe   :  { %p11008_p3 = por %p11007_p2, %p11006_p1 }
 0x100   :  { %p11009_p4 = pnand %p11008_p3, %p11002_p0 }
 0x102   :  { %11012 = shalt.err (!%p11009_p4)
}
 0x103   :  { %s14069_s24 = sld [smem:[#allocation97_spill]]  ;;  %s11021_s22 = scalar_lea.vmem %s488_s0, 1024 }
 0x104   :  { %p11022_p5 = scmp.ne.s32.totalorder %s488_s0, %s11021_s22  ;;  %p11026_p6 = scmp.lt.s32.totalorder %s488_s0, %s488_s0 }
 0x105   :  { %p11027_p7 = scmp.lt.s32.totalorder %s11021_s22, %s11021_s22 }
 0x107   :  { %p11028_p8 = por %p11027_p7, %p11026_p6 }
 0x109   :  { %465 = dma.hbm_to_vmem [thread:$0]  %s14069_s24, 1024, %s460_s18, [#allocation48], %s11478_s7, %s11478_s7, %s11479_s10  }
 0x10a   :  { %p11029_p9 = pnand %p11028_p8, %p11022_p5 }
 0x10c   :  { %11032 = shalt.err (!%p11029_p9)
}
 0x10d   :  { %s14070_s29 = sld [smem:[#allocation101_spill]]  ;;  %s11494_s9 = smov [#allocation2]  }
 0x10e   :  { %s130_s23 = sshll.u32 %s11494_s9, 4  ;;  %s11495_s5 = smov [#allocation7]   ;;  %s131_s23 = int_to_ptr.vmem [resolvable:$true] %s130_s23 }
 0x10f   :  { %s154_s26 = sshll.u32 %s11495_s5, 4  ;;  %s11041_s28 = scalar_lea.vmem %s131_s23, 16  ;;  %s155_s26 = int_to_ptr.vmem [resolvable:$true] %s154_s26 }
 0x110   :  { %p11042_p10 = scmp.ne.s32.totalorder %s131_s23, %s11041_s28  ;;  %s11045_s19 = scalar_lea.vmem %s131_s23, 32 }
 0x111   :  { %p11046_p11 = scmp.lt.s32.totalorder %s131_s23, %s131_s23  ;;  %p11047_p12 = scmp.lt.s32.totalorder %s11045_s19, %s11041_s28 }
 0x113   :  { %493 = dma.hbm_to_vmem [thread:$0]  %s14070_s29, 1024, %s488_s0, [#allocation51], %s11478_s7, %s11478_s7, %s11479_s10  }
 0x114   :  { %p11048_p13 = por %p11047_p12, %p11046_p11 }
 0x116   :  { %p11049_p0 = pnand %p11048_p13, %p11042_p10 }
 0x118   :  { %11052 = shalt.err (!%p11049_p0)
}
 0x119   :  { %s14071_s30 = sld [smem:[#allocation75_spill]]  ;;  %s11061_s1 = scalar_lea.vmem %s155_s26, 16 }
 0x11a   :  { %p11062_p1 = scmp.ne.s32.totalorder %s155_s26, %s11061_s1  ;;  %s11065_s13 = scalar_lea.vmem %s155_s26, 32 }
 0x11b   :  { %p11066_p2 = scmp.lt.s32.totalorder %s155_s26, %s155_s26  ;;  %p11067_p3 = scmp.lt.s32.totalorder %s11065_s13, %s11061_s1 }
 0x11d   :  { %p11068_p4 = por %p11067_p3, %p11066_p2 }
 0x11f   :  { %133 = dma.hbm_to_vmem [thread:$0]  %s14071_s30, 16, %s131_s23, [#allocation3]  }
 0x120   :  { %p11069_p5 = pnand %p11068_p4, %p11062_p1 }
 0x122   :  { %11072 = shalt.err (!%p11069_p5)
}
 0x123   :  { %s14072_s2 = sld [smem:[#allocation78_spill]]  ;;  %s11496_s4 = smov [#allocation10]  }
 0x124   :  { %s176_s11 = sshll.u32 %s11496_s4, 4  ;;  %s11497_s15 = smov [#allocation13]   ;;  %s177_s11 = int_to_ptr.vmem [resolvable:$true] %s176_s11 }
 0x125   :  { %s198_s12 = sshll.u32 %s11497_s15, 4  ;;  %s11081_s27 = scalar_lea.vmem %s177_s11, 16  ;;  %s199_s12 = int_to_ptr.vmem [resolvable:$true] %s198_s12 }
 0x126   :  { %p11082_p6 = scmp.ne.s32.totalorder %s177_s11, %s11081_s27  ;;  %s11085_s16 = scalar_lea.vmem %s177_s11, 32 }
 0x127   :  { %p11086_p7 = scmp.lt.s32.totalorder %s177_s11, %s177_s11  ;;  %p11087_p8 = scmp.lt.s32.totalorder %s11085_s16, %s11081_s27 }
 0x129   :  { %157 = dma.hbm_to_vmem [thread:$0]  %s14072_s2, 16, %s155_s26, [#allocation6]  }
 0x12a   :  { %p11088_p9 = por %p11087_p8, %p11086_p7 }
 0x12c   :  { %p11089_p10 = pnand %p11088_p9, %p11082_p6 }
 0x12e   :  { %11092 = shalt.err (!%p11089_p10)
}
 0x12f   :  { %s14073_s20 = sld [smem:[#allocation79_spill]]  ;;  %s11101_s6 = scalar_lea.vmem %s199_s12, 16 }
 0x130   :  { %p11102_p11 = scmp.ne.s32.totalorder %s199_s12, %s11101_s6  ;;  %s11105_s18 = scalar_lea.vmem %s199_s12, 32 }
 0x131   :  { %p11106_p12 = scmp.lt.s32.totalorder %s199_s12, %s199_s12  ;;  %p11107_p13 = scmp.lt.s32.totalorder %s11105_s18, %s11101_s6 }
 0x133   :  { %p11108_p0 = por %p11107_p13, %p11106_p12 }
 0x135   :  { %179 = dma.hbm_to_vmem [thread:$0]  %s14073_s20, 16, %s177_s11, [#allocation9]  }
 0x136   :  { %p11109_p1 = pnand %p11108_p0, %p11102_p11 }
 0x138   :  { %11112 = shalt.err (!%p11109_p1)
}
 0x139   :  { %s14074_s25 = sld [smem:[#allocation80_spill]]  ;;  %s11498_s0 = smov [#allocation16]  }
 0x13a   :  { %s220_s8 = sshll.u32 %s11498_s0, 4  ;;  %s11499_s24 = smov [#allocation19]   ;;  %s221_s8 = int_to_ptr.vmem [resolvable:$true] %s220_s8 }
 0x13b   :  { %s242_s22 = sshll.u32 %s11499_s24, 4  ;;  %s11121_s29 = scalar_lea.vmem %s221_s8, 16  ;;  %s243_s22 = int_to_ptr.vmem [resolvable:$true] %s242_s22 }
 0x13c   :  { %p11122_p2 = scmp.ne.s32.totalorder %s221_s8, %s11121_s29  ;;  %s11125_s9 = scalar_lea.vmem %s221_s8, 32 }
 0x13d   :  { %p11126_p3 = scmp.lt.s32.totalorder %s221_s8, %s221_s8  ;;  %p11127_p4 = scmp.lt.s32.totalorder %s11125_s9, %s11121_s29 }
 0x13f   :  { %201 = dma.hbm_to_vmem [thread:$0]  %s14074_s25, 16, %s199_s12, [#allocation12]  }
 0x140   :  { %p11128_p5 = por %p11127_p4, %p11126_p3 }
 0x142   :  { %p11129_p6 = pnand %p11128_p5, %p11122_p2 }
 0x144   :  { %11132 = shalt.err (!%p11129_p6)
}
 0x145   :  { %s14075_s23 = sld [smem:[#allocation81_spill]]  ;;  %s11141_s5 = scalar_lea.vmem %s243_s22, 16 }
 0x146   :  { %p11142_p7 = scmp.ne.s32.totalorder %s243_s22, %s11141_s5  ;;  %s11145_s26 = scalar_lea.vmem %s243_s22, 32 }
 0x147   :  { %p11146_p8 = scmp.lt.s32.totalorder %s243_s22, %s243_s22  ;;  %p11147_p9 = scmp.lt.s32.totalorder %s11145_s26, %s11141_s5 }
 0x149   :  { %p11148_p10 = por %p11147_p9, %p11146_p8 }
 0x14b   :  { %223 = dma.hbm_to_vmem [thread:$0]  %s14075_s23, 16, %s221_s8, [#allocation15]  }
 0x14c   :  { %p11149_p11 = pnand %p11148_p10, %p11142_p7 }
 0x14e   :  { %11152 = shalt.err (!%p11149_p11)
}
 0x14f   :  { %s14076_s28 = sld [smem:[#allocation82_spill]]  ;;  %s11500_s19 = smov [#allocation22]  }
 0x150   :  { %s264_s30 = sshll.u32 %s11500_s19, 4  ;;  %s11501_s1 = smov [#allocation25]   ;;  %s265_s30 = int_to_ptr.vmem [resolvable:$true] %s264_s30 }
 0x151   :  { %s288_s13 = sshll.u32 %s11501_s1, 4  ;;  %s11161_s2 = scalar_lea.vmem %s265_s30, 16  ;;  %s289_s13 = int_to_ptr.vmem [resolvable:$true] %s288_s13 }
 0x152   :  { %p11162_p12 = scmp.ne.s32.totalorder %s265_s30, %s11161_s2  ;;  %s11165_s4 = scalar_lea.vmem %s265_s30, 32 }
 0x153   :  { %p11166_p13 = scmp.lt.s32.totalorder %s265_s30, %s265_s30  ;;  %p11167_p0 = scmp.lt.s32.totalorder %s11165_s4, %s11161_s2 }
 0x155   :  { %245 = dma.hbm_to_vmem [thread:$0]  %s14076_s28, 16, %s243_s22, [#allocation18]  }
 0x156   :  { %p11168_p1 = por %p11167_p0, %p11166_p13 }
 0x158   :  { %p11169_p2 = pnand %p11168_p1, %p11162_p12 }
 0x15a   :  { %11172 = shalt.err (!%p11169_p2)
}
 0x15b   :  { %s14077_s11 = sld [smem:[#allocation83_spill]]  ;;  %s11181_s15 = scalar_lea.vmem %s289_s13, 16 }
 0x15c   :  { %p11182_p3 = scmp.ne.s32.totalorder %s289_s13, %s11181_s15  ;;  %s11185_s12 = scalar_lea.vmem %s289_s13, 32 }
 0x15d   :  { %p11186_p4 = scmp.lt.s32.totalorder %s289_s13, %s289_s13  ;;  %p11187_p5 = scmp.lt.s32.totalorder %s11185_s12, %s11181_s15 }
 0x15f   :  { %p11188_p6 = por %p11187_p5, %p11186_p4 }
 0x161   :  { %267 = dma.hbm_to_vmem [thread:$0]  %s14077_s11, 16, %s265_s30, [#allocation21]  }
 0x162   :  { %p11189_p7 = pnand %p11188_p6, %p11182_p3 }
 0x164   :  { %11192 = shalt.err (!%p11189_p7)
}
 0x165   :  { %s14078_s27 = sld [smem:[#allocation85_spill]]  ;;  %s11502_s16 = smov [#allocation28]  }
 0x166   :  { %s309_s20 = sshll.u32 %s11502_s16, 4  ;;  %s11503_s6 = smov [#allocation31]   ;;  %s310_s20 = int_to_ptr.vmem [resolvable:$true] %s309_s20 }
 0x167   :  { %s331_s18 = sshll.u32 %s11503_s6, 4  ;;  %s11201_s25 = scalar_lea.vmem %s310_s20, 1024  ;;  %s332_s18 = int_to_ptr.vmem [resolvable:$true] %s331_s18 }
 0x168   :  { %p11202_p8 = scmp.ne.s32.totalorder %s310_s20, %s11201_s25  ;;  %p11206_p9 = scmp.lt.s32.totalorder %s310_s20, %s310_s20 }
 0x169   :  { %p11207_p10 = scmp.lt.s32.totalorder %s11201_s25, %s11201_s25 }
 0x16b   :  { %291 = dma.hbm_to_vmem [thread:$0]  %s14078_s27, 16, %s289_s13, [#allocation24]  }
 0x16c   :  { %p11208_p11 = por %p11207_p10, %p11206_p9 }
 0x16e   :  { %p11209_p12 = pnand %p11208_p11, %p11202_p8 }
 0x170   :  { %11212 = shalt.err (!%p11209_p12)
}
 0x171   :  { %s14079_s0 = sld [smem:[#allocation87_spill]]  ;;  %s11221_s8 = scalar_lea.vmem %s332_s18, 1024 }
 0x172   :  { %p11222_p13 = scmp.ne.s32.totalorder %s332_s18, %s11221_s8  ;;  %p11226_p0 = scmp.lt.s32.totalorder %s332_s18, %s332_s18 }
 0x173   :  { %p11227_p1 = scmp.lt.s32.totalorder %s11221_s8, %s11221_s8 }
 0x175   :  { %p11228_p2 = por %p11227_p1, %p11226_p0 }
 0x177   :  { %315 = dma.hbm_to_vmem [thread:$0]  %s14079_s0, 1024, %s310_s20, [#allocation27], %s11478_s7, %s11478_s7, %s11479_s10  }
 0x178   :  { %p11229_p3 = pnand %p11228_p2, %p11222_p13 }
 0x17a   :  { %11232 = shalt.err (!%p11229_p3)
}
 0x17b   :  { %s14080_s24 = sld [smem:[#allocation88_spill]]  ;;  %s11504_s22 = smov [#allocation34]  }
 0x17c   :  { %s353_s29 = sshll.u32 %s11504_s22, 4  ;;  %s11505_s9 = smov [#allocation37]   ;;  %s354_s29 = int_to_ptr.vmem [resolvable:$true] %s353_s29 }
 0x17d   :  { %s375_s23 = sshll.u32 %s11505_s9, 4  ;;  %s11241_s5 = scalar_lea.vmem %s354_s29, 1024  ;;  %s376_s23 = int_to_ptr.vmem [resolvable:$true] %s375_s23 }
 0x17e   :  { %p11242_p4 = scmp.ne.s32.totalorder %s354_s29, %s11241_s5  ;;  %p11246_p5 = scmp.lt.s32.totalorder %s354_s29, %s354_s29 }
 0x17f   :  { %p11247_p6 = scmp.lt.s32.totalorder %s11241_s5, %s11241_s5 }
 0x181   :  { %337 = dma.hbm_to_vmem [thread:$0]  %s14080_s24, 1024, %s332_s18, [#allocation30], %s11478_s7, %s11478_s7, %s11479_s10  }
 0x182   :  { %p11248_p7 = por %p11247_p6, %p11246_p5 }
 0x184   :  { %p11249_p8 = pnand %p11248_p7, %p11242_p4 }
 0x186   :  { %11252 = shalt.err (!%p11249_p8)
}
 0x187   :  { %s14081_s26 = sld [smem:[#allocation89_spill]]  ;;  %s11261_s28 = scalar_lea.vmem %s376_s23, 1024 }
 0x188   :  { %p11262_p9 = scmp.ne.s32.totalorder %s376_s23, %s11261_s28  ;;  %p11266_p10 = scmp.lt.s32.totalorder %s376_s23, %s376_s23 }
 0x189   :  { %p11267_p11 = scmp.lt.s32.totalorder %s11261_s28, %s11261_s28 }
 0x18b   :  { %p11268_p12 = por %p11267_p11, %p11266_p10 }
 0x18d   :  { %359 = dma.hbm_to_vmem [thread:$0]  %s14081_s26, 1024, %s354_s29, [#allocation33], %s11478_s7, %s11478_s7, %s11479_s10  }
 0x18e   :  { %p11269_p13 = pnand %p11268_p12, %p11262_p9 }
 0x190   :  { %11272 = shalt.err (!%p11269_p13)
}
 0x191   :  { %s14082_s19 = sld [smem:[#allocation90_spill]]  ;;  %s11506_s30 = smov [#allocation40]  }
 0x192   :  { %s397_s1 = sshll.u32 %s11506_s30, 4  ;;  %s11507_s13 = smov [#allocation43]   ;;  %s398_s1 = int_to_ptr.vmem [resolvable:$true] %s397_s1 }
 0x193   :  { %s422_s2 = sshll.u32 %s11507_s13, 4  ;;  %s11281_s4 = scalar_lea.vmem %s398_s1, 1024  ;;  %s423_s2 = int_to_ptr.vmem [resolvable:$true] %s422_s2 }
 0x194   :  { %p11282_p0 = scmp.ne.s32.totalorder %s398_s1, %s11281_s4  ;;  %p11286_p1 = scmp.lt.s32.totalorder %s398_s1, %s398_s1 }
 0x195   :  { %p11287_p2 = scmp.lt.s32.totalorder %s11281_s4, %s11281_s4 }
 0x197   :  { %381 = dma.hbm_to_vmem [thread:$0]  %s14082_s19, 1024, %s376_s23, [#allocation36], %s11478_s7, %s11478_s7, %s11479_s10  }
 0x198   :  { %p11288_p3 = por %p11287_p2, %p11286_p1 }
 0x19a   :  { %p11289_p4 = pnand %p11288_p3, %p11282_p0 }
 0x19c   :  { %11292 = shalt.err (!%p11289_p4)
}
 0x19d   :  { %s14083_s11 = sld [smem:[#allocation91_spill]]  ;;  %s11301_s15 = scalar_lea.vmem %s423_s2, 16 }
 0x19e   :  { %p11302_p5 = scmp.ne.s32.totalorder %s423_s2, %s11301_s15  ;;  %s11305_s12 = scalar_lea.vmem %s423_s2, 32 }
 0x19f   :  { %p11306_p6 = scmp.lt.s32.totalorder %s423_s2, %s423_s2  ;;  %p11307_p7 = scmp.lt.s32.totalorder %s11305_s12, %s11301_s15 }
 0x1a1   :  { %p11308_p8 = por %p11307_p7, %p11306_p6 }
 0x1a3   :  { %403 = dma.hbm_to_vmem [thread:$0]  %s14083_s11, 1024, %s398_s1, [#allocation39], %s11478_s7, %s11478_s7, %s11479_s10  }
 0x1a4   :  { %p11309_p9 = pnand %p11308_p8, %p11302_p5 }
 0x1a6   :  { %11312 = shalt.err (!%p11309_p9)
}
 0x1a7   :  { %s14084_s27 = sld [smem:[#allocation93_spill]]  ;;  %s11508_s16 = smov [#allocation46]  }
 0x1a8   :  { %s445_s20 = sshll.u32 %s11508_s16, 4  ;;  %s11509_s6 = smov [#allocation49]   ;;  %s446_s20 = int_to_ptr.vmem [resolvable:$true] %s445_s20 }
 0x1a9   :  { %s473_s18 = sshll.u32 %s11509_s6, 4  ;;  %s11321_s25 = scalar_lea.vmem %s446_s20, 1024  ;;  %s474_s18 = int_to_ptr.vmem [resolvable:$true] %s473_s18 }
 0x1aa   :  { %p11322_p10 = scmp.ne.s32.totalorder %s446_s20, %s11321_s25  ;;  %p11326_p11 = scmp.lt.s32.totalorder %s446_s20, %s446_s20 }
 0x1ab   :  { %p11327_p12 = scmp.lt.s32.totalorder %s11321_s25, %s11321_s25 }
 0x1ad   :  { %425 = dma.hbm_to_vmem [thread:$0]  %s14084_s27, 16, %s423_s2, [#allocation42]  }
 0x1ae   :  { %p11328_p13 = por %p11327_p12, %p11326_p11 }
 0x1b0   :  { %p11329_p0 = pnand %p11328_p13, %p11322_p10 }
 0x1b2   :  { %11332 = shalt.err (!%p11329_p0)
}
 0x1b3   :  { %s14085_s0 = sld [smem:[#allocation95_spill]]  ;;  %s11341_s8 = scalar_lea.vmem %s474_s18, 1024 }
 0x1b4   :  { %p11342_p1 = scmp.ne.s32.totalorder %s474_s18, %s11341_s8  ;;  %p11346_p2 = scmp.lt.s32.totalorder %s474_s18, %s474_s18 }
 0x1b5   :  { %p11347_p3 = scmp.lt.s32.totalorder %s11341_s8, %s11341_s8 }
 0x1b7   :  { %p11348_p4 = por %p11347_p3, %p11346_p2 }
 0x1b9   :  { %451 = dma.hbm_to_vmem [thread:$0]  %s14085_s0, 1024, %s446_s20, [#allocation45], %s11478_s7, %s11478_s7, %s11479_s10  }
 0x1ba   :  { %p11349_p5 = pnand %p11348_p4, %p11342_p1 }
 0x1bc   :  { %11352 = shalt.err (!%p11349_p5)
}
 0x1bd   :  { %s14086_s24 = sld [smem:[#allocation99_spill]]  ;;  %s11510_s22 = smov [#allocation52]  }
 0x1be   :  { %s501_s29 = sshll.u32 %s11510_s22, 4  ;;  %s502_s29 = int_to_ptr.vmem [resolvable:$true] %s501_s29 }
 0x1bf   :  { %s11361_s9 = scalar_lea.vmem %s502_s29, 1024  ;;  %p11366_p7 = scmp.lt.s32.totalorder %s502_s29, %s502_s29 }
 0x1c0   :  { %p11362_p6 = scmp.ne.s32.totalorder %s502_s29, %s11361_s9  ;;  %p11367_p8 = scmp.lt.s32.totalorder %s11361_s9, %s11361_s9 }
 0x1c2   :  { %p11368_p9 = por %p11367_p8, %p11366_p7 }
 0x1c3   :  { %479 = dma.hbm_to_vmem [thread:$0]  %s14086_s24, 1024, %s474_s18, [#allocation48], %s11478_s7, %s11478_s7, %s11479_s10  }
 0x1c4   :  { %p11369_p10 = pnand %p11368_p9, %p11362_p6 }
 0x1c6   :  { %11372 = shalt.err (!%p11369_p10)
}
 0x1c7   :  { %507 = dma.hbm_to_vmem [thread:$0]  %s11750_s21, 1024, %s502_s29, [#allocation51], %s11478_s7, %s11478_s7, %s11479_s10  }
 0x1c8   :  { %11393 = dma.done.wait [#allocation3], 16  }
 0x1c9   :  { %11394 = vsyncadd [#allocation3], 4294967280 }
 0x1ca   :  { %11395 = dma.done.wait [#allocation6], 32  }
 0x1cb   :  { %11396 = vsyncadd [#allocation6], 4294967264 }
 0x1cc   :  { %11397 = dma.done.wait [#allocation9], 3088  }
 0x1cd   :  { %11398 = vsyncadd [#allocation9], 4294964208 }
 0x1ce   :  { %11399 = dma.done.wait [#allocation12], 3088  }
 0x1cf   :  { %11400 = vsyncadd [#allocation12], 4294964208 }
 0x1d0   :  { %11401 = dma.done.wait [#allocation15], 3088  }
 0x1d1   :  { %11402 = vsyncadd [#allocation15], 4294964208 }
 0x1d2   :  { %11403 = dma.done.wait [#allocation18], 3088  }
 0x1d3   :  { %11404 = vsyncadd [#allocation18], 4294964208 }
 0x1d4   :  { %11405 = dma.done.wait [#allocation21], 3088  }
 0x1d5   :  { %11406 = vsyncadd [#allocation21], 4294964208 }
 0x1d6   :  { %11407 = dma.done.wait [#allocation24], 7184  }
 0x1d7   :  { %11408 = vsyncadd [#allocation24], 4294960112 }
 0x1d8   :  { %11409 = dma.done.wait [#allocation27], 1040  }
 0x1d9   :  { %11410 = vsyncadd [#allocation27], 4294966256 }
 0x1da   :  { %11411 = dma.done.wait [#allocation30], 1040  }
 0x1db   :  { %11412 = vsyncadd [#allocation30], 4294966256 }
 0x1dc   :  { %11413 = dma.done.wait [#allocation33], 1040  }
 0x1dd   :  { %11414 = vsyncadd [#allocation33], 4294966256 }
 0x1de   :  { %11415 = dma.done.wait [#allocation36], 1040  }
 0x1df   :  { %11416 = vsyncadd [#allocation36], 4294966256 }
 0x1e0   :  { %11417 = dma.done.wait [#allocation39], 1040  }
 0x1e1   :  { %11418 = vsyncadd [#allocation39], 4294966256 }
 0x1e2   :  { %11419 = dma.done.wait [#allocation42], 32  }
 0x1e3   :  { %11420 = vsyncadd [#allocation42], 4294967264 }
 0x1e4   :  { %11421 = dma.done.wait [#allocation45], 2048  }
 0x1e5   :  { %11422 = vsyncadd [#allocation45], 4294965248 }
 0x1e6   :  { %11423 = dma.done.wait [#allocation48], 2048  }
 0x1e7   :  { %11424 = vsyncadd [#allocation48], 4294965248 }
 0x1e8   :  { %11425 = dma.done.wait [#allocation51], 2048  }
 0x1e9   :  { %11426 = vsyncadd [#allocation51], 4294965248  ;;  %s14087_s21 = sld [smem:[#allocation72_spill]]  ;;  %v11511_v0 = vmov 0   ;;  %v14037_v1 = vmov 0.0   ;;  %vm11513_vm0 = vmmov 0  }
 0x1ea   :  { %10398 = vset.pattern.permute.xlu1 %v11511_v0  ;;  %10397 = vset.pattern.permute.xlu0 %v11511_v0  ;;  %s14088_s7 = sld [smem:[#allocation76_spill]]  ;;  %v11909_v49 = vld [vmem:[#allocation2] ss:$0 sm:$0xff]  ;;  %vm5345_vm1 = vcmask 1041408   ;;  %vm5341_vm2 = vcmask 31744   ;;  %s11514_s4 = smov [#allocation53]  }
 0x1eb   :  { %8659 = vmatprep.subr.bf16.mxu0 %v14037_v1  ;;  %8751 = vmatprep.subr.bf16.mxu1 %v14037_v1  ;;  %s14089_s10 = sld [smem:[#allocation74_spill]]  ;;  %s7647_s11 = sshll.u32 %s11514_s4, 4  ;;  %s7648_s11 = int_to_ptr.vmem [resolvable:$true] %s7647_s11 }
 0x1ec   :  { %8675 = vmatprep.mubr.msk.bf16.mxu0 %vm11513_vm0, %v14037_v1  ;;  %8767 = vmatprep.mubr.msk.bf16.mxu1 %vm11513_vm0, %v14037_v1  ;;  %s14090_s23 = sld [smem:[#allocation77_spill]]  ;;  %p11378_p12 = scmp.lt.s32.totalorder %s7648_s11, %s7648_s11 }
 0x1ed   :  { %s14138_s5 = sld [smem:[#allocation84_spill]] }
 0x1ee   :  { %s14139_s26 = sld [smem:[#allocation73_spill]] }
 0x1ef   :  { %v612_v2 = vld [vmem:[%s14087_s21 + $0x10] sm:$0xff]  ;;  %v610_v3 = vld [vmem:[%s14087_s21] sm:$0xff]  ;;  %v613_v4 = vld [vmem:[%s14087_s21 + $0x18] sm:$0xff]  ;;  %s14140_s28 = sld [smem:[#allocation86_spill]] }
 0x1f0   :  { %661 = vperm.xlu1 %10398, %v612_v2   ;;  %651 = vperm.xlu0 %10397, %v610_v3   ;;  %v611_v5 = vld [vmem:[%s14087_s21 + $0x8] sm:$0xff]  ;;  %v614_v7 = vld [vmem:[%s14087_s21 + $0x20] sm:$0xff]  ;;  %v617_v8 = vld [vmem:[%s14087_s21 + $0x38] sm:$0xff]  ;;  %s14141_s19 = sld [smem:[#allocation92_spill]] }
 0x1f1   :  { %v615_v6 = vld [vmem:[%s14087_s21 + $0x28] sm:$0xff]  ;;  %v616_v9 = vld [vmem:[%s14087_s21 + $0x30] sm:$0xff]  ;;  %v10399_v11 = vld [vmem:[%s14088_s7 + $0x38] sm:$0xff]   ;;  %s14142_s30 = sld [smem:[#allocation94_spill]] }
 0x1f2   :  { %v619_v10 = vld [vmem:[%s14087_s21 + $0x48] sm:$0xff]  ;;  %v618_v12 = vld [vmem:[%s14087_s21 + $0x40] sm:$0xff]  ;;  %8660 = vmatpush3.bf16.msra.mxu0 %v10399_v11  ;;  %v10400_v13 = vld [vmem:[%s14088_s7 + $0x30] sm:$0xff]   ;;  %s14143_s1 = sld [smem:[#allocation96_spill]] }
 0x1f3   :  { %8661 = vmatprep.subr.bf16.mxu0 %v14037_v1  ;;  %v621_v14 = vld [vmem:[%s14087_s21 + $0x58] sm:$0xff]  ;;  %v620_v15 = vld [vmem:[%s14087_s21 + $0x50] sm:$0xff]  ;;  %v10401_v16 = vld [vmem:[%s14088_s7 + $0x28] sm:$0xff]   ;;  %s14144_s13 = sld [smem:[#allocation98_spill]] }
 0x1f4   :  { %666 = vperm.xlu1 %10398, %v613_v4   ;;  %656 = vperm.xlu0 %10397, %v611_v5   ;;  %v623_v17 = vld [vmem:[%s14087_s21 + $0x68] sm:$0xff]  ;;  %v622_v18 = vld [vmem:[%s14087_s21 + $0x60] sm:$0xff]  ;;  %v625_v20 = vld [vmem:[%s14087_s21 + $0x78] sm:$0xff]  ;;  %s14145_s2 = sld [smem:[#allocation100_spill]] }
 0x1f5   :  { %v10402_v19 = vld [vmem:[%s14088_s7 + $0x20] sm:$0xff]   ;;  %v624_v21 = vld [vmem:[%s14087_s21 + $0x70] sm:$0xff]  ;;  %v10403_v22 = vld [vmem:[%s14088_s7 + $0x18] sm:$0xff]  }
 0x1f6   :  { %8662 = vmatpush3.bf16.msra.mxu0 %v10400_v13  ;;  %v627_v23 = vld [vmem:[%s14087_s21 + $0x88] sm:$0xff]  ;;  %v626_v24 = vld [vmem:[%s14087_s21 + $0x80] sm:$0xff]  ;;  %v10404_v25 = vld [vmem:[%s14088_s7 + $0x10] sm:$0xff]  }
 0x1f7   :  { %8663 = vmatprep.subr.bf16.mxu0 %v14037_v1  ;;  %v629_v26 = vld [vmem:[%s14087_s21 + $0x98] sm:$0xff]  ;;  %v628_v27 = vld [vmem:[%s14087_s21 + $0x90] sm:$0xff]  ;;  %v10405_v28 = vld [vmem:[%s14088_s7 + $0x8] sm:$0xff]  }
 0x1f8   :  { %676 = vperm.xlu1 %10398, %v615_v6   ;;  %671 = vperm.xlu0 %10397, %v614_v7   ;;  %v631_v29 = vld [vmem:[%s14087_s21 + $0xa8] sm:$0xff]  ;;  %v630_v30 = vld [vmem:[%s14087_s21 + $0xa0] sm:$0xff]  ;;  %v633_v32 = vld [vmem:[%s14087_s21 + $0xb8] sm:$0xff] }
 0x1f9   :  { %v10406_v31 = vld [vmem:[%s14088_s7] sm:$0xff]   ;;  %v632_v33 = vld [vmem:[%s14087_s21 + $0xb0] sm:$0xff]  ;;  %v635_v34 = vld [vmem:[%s14087_s21 + $0xc8] sm:$0xff] }
 0x1fa   :  { %8664 = vmatpush3.bf16.msra.mxu0 %v10401_v16  ;;  %v634_v35 = vld [vmem:[%s14087_s21 + $0xc0] sm:$0xff]  ;;  %v637_v36 = vld [vmem:[%s14087_s21 + $0xd8] sm:$0xff]  ;;  %v636_v37 = vld [vmem:[%s14087_s21 + $0xd0] sm:$0xff] }
 0x1fb   :  { %8665 = vmatprep.subr.bf16.mxu0 %v14037_v1  ;;  %v639_v38 = vld [vmem:[%s14087_s21 + $0xe8] sm:$0xff]  ;;  %v638_v39 = vld [vmem:[%s14087_s21 + $0xe0] sm:$0xff]  ;;  %v641_v40 = vld [vmem:[%s14087_s21 + $0xf8] sm:$0xff] }
 0x1fc   :  { %686 = vperm.xlu1 %10398, %v617_v8   ;;  %681 = vperm.xlu0 %10397, %v616_v9   ;;  %v640_v41 = vld [vmem:[%s14087_s21 + $0xf0] sm:$0xff]  ;;  %v643_v42 = vld [vmem:[%s14087_s21 + $0x108] sm:$0xff]  ;;  %v642_v43 = vld [vmem:[%s14087_s21 + $0x100] sm:$0xff] }
 0x1fd   :  { %v645_v44 = vld [vmem:[%s14087_s21 + $0x118] sm:$0xff]  ;;  %v644_v45 = vld [vmem:[%s14087_s21 + $0x110] sm:$0xff]  ;;  %v647_v46 = vld [vmem:[%s14087_s21 + $0x128] sm:$0xff] }
 0x1fe   :  { %8666 = vmatpush3.bf16.msra.mxu0 %v10402_v19  ;;  %v646_v47 = vld [vmem:[%s14087_s21 + $0x120] sm:$0xff] }
 0x1ff   :  { %8667 = vmatprep.subr.bf16.mxu0 %v14037_v1  ;;  %v11907_v48 = vld [vmem:[%s14089_s10] ss:$0 sm:$0xff] }
 0x200   :  { %696 = vperm.xlu1 %10398, %v619_v10   ;;  %691 = vperm.xlu0 %10397, %v618_v12  }
 0x202   :  { %8668 = vmatpush3.bf16.msra.mxu0 %v10403_v22 }
 0x203   :  { %8669 = vmatprep.subr.bf16.mxu0 %v14037_v1 }
 0x204   :  { %706 = vperm.xlu1 %10398, %v621_v14   ;;  %701 = vperm.xlu0 %10397, %v620_v15  }
 0x206   :  { %8670 = vmatpush3.bf16.msra.mxu0 %v10404_v25  ;;  %v10407_v25 = vld [vmem:[%s14090_s23 + $0x78] sm:$0xff]  }
 0x207   :  { %8671 = vmatprep.subr.bf16.mxu0 %v14037_v1  ;;  %8752 = vmatpush3.bf16.msra.mxu1 %v10407_v25 }
 0x208   :  { %716 = vperm.xlu1 %10398, %v623_v17   ;;  %711 = vperm.xlu0 %10397, %v622_v18  }
 0x209   :  { %8753 = vmatprep.subr.bf16.mxu1 %v14037_v1 }
 0x20a   :  { %8672 = vmatpush3.bf16.msra.mxu0 %v10405_v28  ;;  %v10408_v28 = vld [vmem:[%s14090_s23 + $0x70] sm:$0xff]  }
 0x20b   :  { %8673 = vmatprep.subr.bf16.mxu0 %v14037_v1  ;;  %8754 = vmatpush3.bf16.msra.mxu1 %v10408_v28 }
 0x20c   :  { %726 = vperm.xlu1 %10398, %v625_v20   ;;  %721 = vperm.xlu0 %10397, %v624_v21  }
 0x20d   :  { %8755 = vmatprep.subr.bf16.mxu1 %v14037_v1 }
 0x20e   :  { %8674 = vmatpush3.bf16.msra.mxu0 %v10406_v31 }
 0x20f   :  { %8919 = vmatprep.subr.bf16.mxu0 %v14037_v1 }
 0x210   :  { %736 = vperm.xlu1 %10398, %v627_v23   ;;  %731 = vperm.xlu0 %10397, %v626_v24  }
 0x214   :  { %746 = vperm.xlu1 %10398, %v629_v26   ;;  %741 = vperm.xlu0 %10397, %v628_v27  }
 0x218   :  { %756 = vperm.xlu1 %10398, %v631_v29   ;;  %751 = vperm.xlu0 %10397, %v630_v30   ;;  %v10410_v29 = vld [vmem:[%s14090_s23 + $0xb8] sm:$0xff]  }
 0x21c   :  { %766 = vperm.xlu1 %10398, %v633_v32   ;;  %761 = vperm.xlu0 %10397, %v632_v33   ;;  %v10409_v32 = vld [vmem:[%s14090_s23 + $0x68] sm:$0xff]  }
 0x21d   :  { %8756 = vmatpush3.bf16.msra.mxu1 %v10409_v32 }
 0x21e   :  { %8757 = vmatprep.subr.bf16.mxu1 %v14037_v1 }
 0x220   :  { %776 = vperm.xlu1 %10398, %v635_v34   ;;  %771 = vperm.xlu0 %10397, %v634_v35  }
 0x224   :  { %786 = vperm.xlu1 %10398, %v637_v36   ;;  %781 = vperm.xlu0 %10397, %v636_v37  }
 0x228   :  { %796 = vperm.xlu1 %10398, %v639_v38   ;;  %791 = vperm.xlu0 %10397, %v638_v39   ;;  %v10411_v39 = vld [vmem:[%s14090_s23 + $0x60] sm:$0xff]  }
 0x229   :  { %8758 = vmatpush3.bf16.msra.mxu1 %v10411_v39  ;;  %v10416_v39 = vld [vmem:[%s14090_s23 + $0xa0] sm:$0xff]  }
 0x22a   :  { %8759 = vmatprep.subr.bf16.mxu1 %v14037_v1 }
 0x22c   :  { %806 = vperm.xlu1 %10398, %v641_v40   ;;  %801 = vperm.xlu0 %10397, %v640_v41  }
 0x230   :  { %816 = vperm.xlu1 %10398, %v643_v42   ;;  %811 = vperm.xlu0 %10397, %v642_v43  }
 0x234   :  { %826 = vperm.xlu1 %10398, %v645_v44   ;;  %821 = vperm.xlu0 %10397, %v644_v45  }
 0x238   :  { %836 = vperm.xlu1 %10398, %v647_v46   ;;  %831 = vperm.xlu0 %10397, %v646_v47  }
 0x26b   :  { %v662_v50 = vpop.permute.xlu1 %661  ;;  %v652_v51 = vpop.permute.xlu0 %651 }
 0x26c   :  { %v845_v52 = vmul.f32 %v11907_v48, %v652_v51  ;;  %v847_v55 = vmul.f32 %v11907_v48, %v662_v50 }
 0x26e   :  { %v890_v56 = vadd.f32 %v11909_v49, %v845_v52  ;;  %v892_v60 = vadd.f32 %v11909_v49, %v847_v55 }
 0x26f   :  { %v667_v53 = vpop.permute.xlu1 %666  ;;  %v657_v54 = vpop.permute.xlu0 %656 }
 0x270   :  { %v848_v57 = vmul.f32 %v11907_v48, %v667_v53  ;;  %v846_v58 = vmul.f32 %v11907_v48, %v657_v54  ;;  %v928_v61 = vmax.f32 %v890_v56, 0.0  ;;  %v930_v4 = vmax.f32 %v892_v60, 0.0 }
 0x272   :  { %v891_v59 = vadd.f32 %v11909_v49, %v846_v58  ;;  %v893_v62 = vadd.f32 %v11909_v49, %v848_v57 }
 0x273   :  { %v677_v0 = vpop.permute.xlu1 %676  ;;  %v672_v2 = vpop.permute.xlu0 %671 }
 0x274   :  { %v929_v63 = vmax.f32 %v891_v59, 0.0  ;;  %v931_v5 = vmax.f32 %v893_v62, 0.0  ;;  %v850_v6 = vmul.f32 %v11907_v48, %v677_v0  ;;  %v849_v7 = vmul.f32 %v11907_v48, %v672_v2 }
 0x276   :  { %v966_v3 = vpack.c.bf16 %v929_v63, %v928_v61  ;;  %v895_v9 = vadd.f32 %v11909_v49, %v850_v6  ;;  %v894_v10 = vadd.f32 %v11909_v49, %v849_v7  ;;  %v967_v12 = vpack.c.bf16 %v931_v5, %v930_v4 }
 0x277   :  { %v687_v8 = vpop.permute.xlu1 %686  ;;  %v682_v11 = vpop.permute.xlu0 %681 }
 0x278   :  { %8676 = vmatmul.mubr.bf16.vlgmr.msra.gmra.mxu0 %v966_v3  ;;  %v933_v13 = vmax.f32 %v895_v9, 0.0  ;;  %v932_v14 = vmax.f32 %v894_v10, 0.0  ;;  %v852_v15 = vmul.f32 %v11907_v48, %v687_v8  ;;  %v851_v16 = vmul.f32 %v11907_v48, %v682_v11 }
 0x279   :  { %8679 = vmatprep.mubr.msk.bf16.mxu0 %vm11513_vm0, %v14037_v1  ;;  %8920 = vmatpush3.bf16.msra.mxu0 %v10410_v29 }
 0x27a   :  { %v897_v19 = vadd.f32 %v11909_v49, %v852_v15  ;;  %v896_v20 = vadd.f32 %v11909_v49, %v851_v16  ;;  %v968_v22 = vpack.c.bf16 %v933_v13, %v932_v14  ;;  %8921 = vmatprep.subr.bf16.mxu0 %v14037_v1 }
 0x27b   :  { %v697_v17 = vpop.permute.xlu1 %696  ;;  %v692_v21 = vpop.permute.xlu0 %691 }
 0x27c   :  { %v854_v18 = vmul.f32 %v11907_v48, %v697_v17  ;;  %v853_v24 = vmul.f32 %v11907_v48, %v692_v21  ;;  %v935_v26 = vmax.f32 %v897_v19, 0.0  ;;  %v934_v27 = vmax.f32 %v896_v20, 0.0 }
 0x27e   :  { %v899_v23 = vadd.f32 %v11909_v49, %v854_v18  ;;  %v898_v31 = vadd.f32 %v11909_v49, %v853_v24  ;;  %v969_v35 = vpack.c.bf16 %v935_v26, %v934_v27 }
 0x27f   :  { %v707_v33 = vpop.permute.xlu1 %706  ;;  %v702_v34 = vpop.permute.xlu0 %701 }
 0x280   :  { %8680 = vmatmul.mubr.bf16.gmra.mxu0 %v967_v12  ;;  %v937_v30 = vmax.f32 %v899_v23, 0.0  ;;  %v936_v36 = vmax.f32 %v898_v31, 0.0  ;;  %v856_v37 = vmul.f32 %v11907_v48, %v707_v33  ;;  %v855_v38 = vmul.f32 %v11907_v48, %v702_v34  ;;  %v10412_v23 = vld [vmem:[%s14090_s23 + $0xb0] sm:$0xff]   ;;  %v10414_v31 = vld [vmem:[%s14090_s23 + $0xa8] sm:$0xff]  }
 0x281   :  { %8683 = vmatprep.mubr.msk.bf16.mxu0 %vm11513_vm0, %v14037_v1  ;;  %8922 = vmatpush3.bf16.msra.mxu0 %v10412_v23 }
 0x282   :  { %v901_v40 = vadd.f32 %v11909_v49, %v856_v37  ;;  %v900_v41 = vadd.f32 %v11909_v49, %v855_v38  ;;  %v970_v44 = vpack.c.bf16 %v937_v30, %v936_v36  ;;  %v10413_v30 = vld [vmem:[%s14090_s23 + $0x58] sm:$0xff]   ;;  %8923 = vmatprep.subr.bf16.mxu0 %v14037_v1  ;;  %v10415_v38 = vld [vmem:[%s14090_s23 + $0x50] sm:$0xff]  }
 0x283   :  { %v717_v42 = vpop.permute.xlu1 %716  ;;  %v712_v43 = vpop.permute.xlu0 %711  ;;  %8760 = vmatpush3.bf16.msra.mxu1 %v10413_v30 }
 0x284   :  { %v939_v45 = vmax.f32 %v901_v40, 0.0  ;;  %v938_v46 = vmax.f32 %v900_v41, 0.0  ;;  %v858_v47 = vmul.f32 %v11907_v48, %v717_v42  ;;  %v857_v50 = vmul.f32 %v11907_v48, %v712_v43  ;;  %8761 = vmatprep.subr.bf16.mxu1 %v14037_v1 }
 0x285   :  { %8924 = vmatpush3.bf16.msra.mxu0 %v10414_v31 }
 0x286   :  { %v903_v51 = vadd.f32 %v11909_v49, %v858_v47  ;;  %v902_v52 = vadd.f32 %v11909_v49, %v857_v50  ;;  %v971_v55 = vpack.c.bf16 %v939_v45, %v938_v46  ;;  %8925 = vmatprep.subr.bf16.mxu0 %v14037_v1  ;;  %v10418_v45 = vld [vmem:[%s14090_s23 + $0x98] sm:$0xff]  }
 0x287   :  { %v727_v53 = vpop.permute.xlu1 %726  ;;  %v722_v54 = vpop.permute.xlu0 %721  ;;  %8762 = vmatpush3.bf16.msra.mxu1 %v10415_v38 }
 0x288   :  { %8684 = vmatmul.mubr.bf16.gmra.mxu0 %v968_v22  ;;  %v941_v56 = vmax.f32 %v903_v51, 0.0  ;;  %v940_v57 = vmax.f32 %v902_v52, 0.0  ;;  %v860_v58 = vmul.f32 %v11907_v48, %v727_v53  ;;  %v859_v59 = vmul.f32 %v11907_v48, %v722_v54  ;;  %8763 = vmatprep.subr.bf16.mxu1 %v14037_v1 }
 0x289   :  { %8687 = vmatprep.mubr.msk.bf16.mxu0 %vm11513_vm0, %v14037_v1  ;;  %8926 = vmatpush3.bf16.msra.mxu0 %v10416_v39 }
 0x28a   :  { %v905_v61 = vadd.f32 %v11909_v49, %v860_v58  ;;  %v904_v62 = vadd.f32 %v11909_v49, %v859_v59  ;;  %v972_v0 = vpack.c.bf16 %v941_v56, %v940_v57  ;;  %8927 = vmatprep.subr.bf16.mxu0 %v14037_v1  ;;  %v10419_v56 = vld [vmem:[%s14090_s23 + $0x40] sm:$0xff]   ;;  %v10420_v57 = vld [vmem:[%s14090_s23 + $0x90] sm:$0xff]  }
 0x28b   :  { %v737_v60 = vpop.permute.xlu1 %736  ;;  %v732_v63 = vpop.permute.xlu0 %731 }
 0x28c   :  { %v943_v2 = vmax.f32 %v905_v61, 0.0  ;;  %v942_v3 = vmax.f32 %v904_v62, 0.0  ;;  %v862_v4 = vmul.f32 %v11907_v48, %v737_v60  ;;  %v861_v5 = vmul.f32 %v11907_v48, %v732_v63 }
 0x28d   :  { %8928 = vmatpush3.bf16.msra.mxu0 %v10418_v45 }
 0x28e   :  { %v907_v8 = vadd.f32 %v11909_v49, %v862_v4  ;;  %v906_v9 = vadd.f32 %v11909_v49, %v861_v5  ;;  %v973_v11 = vpack.c.bf16 %v943_v2, %v942_v3  ;;  %8929 = vmatprep.subr.bf16.mxu0 %v14037_v1  ;;  %v10423_v3 = vld [vmem:[%s14090_s23 + $0x80] sm:$0xff]  }
 0x28f   :  { %v747_v6 = vpop.permute.xlu1 %746  ;;  %v742_v7 = vpop.permute.xlu0 %741 }
 0x290   :  { %8688 = vmatmul.mubr.bf16.gmra.mxu0 %v969_v35  ;;  %v945_v12 = vmax.f32 %v907_v8, 0.0  ;;  %v944_v13 = vmax.f32 %v906_v9, 0.0  ;;  %v864_v14 = vmul.f32 %v11907_v48, %v747_v6  ;;  %v863_v15 = vmul.f32 %v11907_v48, %v742_v7  ;;  %v10711_v7 = vld [vmem:[%s14089_s10] ss:$0 sm:$0xff] }
 0x291   :  { %8691 = vmatprep.mubr.msk.bf16.mxu0 %vm11513_vm0, %v14037_v1  ;;  %8930 = vmatpush3.bf16.msra.mxu0 %v10420_v57 }
 0x292   :  { %v909_v17 = vadd.f32 %v11909_v49, %v864_v14  ;;  %v908_v18 = vadd.f32 %v11909_v49, %v863_v15  ;;  %v974_v22 = vpack.c.bf16 %v945_v12, %v944_v13  ;;  %8931 = vmatprep.subr.bf16.mxu0 %v14037_v1 }
 0x293   :  { %v757_v10 = vpop.permute.xlu1 %756  ;;  %v752_v16 = vpop.permute.xlu0 %751 }
 0x294   :  { %v866_v20 = vmul.f32 %v11907_v48, %v757_v10  ;;  %v865_v21 = vmul.f32 %v11907_v48, %v752_v16  ;;  %v947_v25 = vmax.f32 %v909_v17, 0.0  ;;  %v946_v26 = vmax.f32 %v908_v18, 0.0 }
 0x296   :  { %v911_v27 = vadd.f32 %v11909_v49, %v866_v20  ;;  %v910_v28 = vadd.f32 %v11909_v49, %v865_v21  ;;  %v975_v33 = vpack.c.bf16 %v947_v25, %v946_v26 }
 0x297   :  { %v767_v19 = vpop.permute.xlu1 %766  ;;  %v762_v24 = vpop.permute.xlu0 %761 }
 0x298   :  { %8692 = vmatmul.mubr.bf16.gmra.mxu0 %v970_v44  ;;  %v949_v34 = vmax.f32 %v911_v27, 0.0  ;;  %v948_v35 = vmax.f32 %v910_v28, 0.0  ;;  %v868_v36 = vmul.f32 %v11907_v48, %v767_v19  ;;  %v867_v37 = vmul.f32 %v11907_v48, %v762_v24  ;;  %v10417_v44 = vld [vmem:[%s14090_s23 + $0x48] sm:$0xff]   ;;  %v10712_v19 = vld [vmem:[#allocation2] ss:$0 sm:$0xff] }
 0x299   :  { %8695 = vmatprep.mubr.msk.bf16.mxu0 %vm11513_vm0, %v14037_v1  ;;  %8764 = vmatpush3.bf16.msra.mxu1 %v10417_v44 }
 0x29a   :  { %v913_v41 = vadd.f32 %v11909_v49, %v868_v36  ;;  %v912_v42 = vadd.f32 %v11909_v49, %v867_v37  ;;  %v976_v51 = vpack.c.bf16 %v949_v34, %v948_v35  ;;  %8765 = vmatprep.subr.bf16.mxu1 %v14037_v1 }
 0x29b   :  { %v777_v29 = vpop.permute.xlu1 %776  ;;  %v772_v32 = vpop.permute.xlu0 %771 }
 0x29c   :  { %v870_v43 = vmul.f32 %v11907_v48, %v777_v29  ;;  %v869_v46 = vmul.f32 %v11907_v48, %v772_v32  ;;  %v951_v52 = vmax.f32 %v913_v41, 0.0  ;;  %v950_v53 = vmax.f32 %v912_v42, 0.0 }
 0x29d   :  { %8766 = vmatpush3.bf16.msra.mxu1 %v10419_v56 }
 0x29e   :  { %v915_v54 = vadd.f32 %v11909_v49, %v870_v43  ;;  %v914_v58 = vadd.f32 %v11909_v49, %v869_v46  ;;  %8835 = vmatprep.subr.bf16.mxu1 %v14037_v1  ;;  %v977_v2 = vpack.c.bf16 %v951_v52, %v950_v53 }
 0x29f   :  { %v787_v40 = vpop.permute.xlu1 %786  ;;  %v782_v50 = vpop.permute.xlu0 %781 }
 0x2a0   :  { %8696 = vmatmul.mubr.bf16.gmra.mxu0 %v971_v55  ;;  %v872_v47 = vmul.f32 %v11907_v48, %v787_v40  ;;  %v871_v55 = vmul.f32 %v11907_v48, %v782_v50  ;;  %v953_v60 = vmax.f32 %v915_v54, 0.0  ;;  %v10422_v48 = vld [vmem:[%s14090_s23 + $0x88] sm:$0xff]   ;;  %v952_v62 = vmax.f32 %v914_v58, 0.0  ;;  %v12040_v54 = vld [vmem:[#allocation5] ss:$0 sm:$0xff] }
 0x2a1   :  { %8699 = vmatprep.mubr.msk.bf16.mxu0 %vm11513_vm0, %v14037_v1  ;;  %8932 = vmatpush3.bf16.msra.mxu0 %v10422_v48 }
 0x2a2   :  { %v917_v59 = vadd.f32 %v11909_v49, %v872_v47  ;;  %v916_v61 = vadd.f32 %v11909_v49, %v871_v55  ;;  %8933 = vmatprep.subr.bf16.mxu0 %v14037_v1  ;;  %v978_v4 = vpack.c.bf16 %v953_v60, %v952_v62 }
 0x2a3   :  { %v797_v5 = vpop.permute.xlu1 %796  ;;  %v792_v6 = vpop.permute.xlu0 %791 }
 0x2a4   :  { %v955_v63 = vmax.f32 %v917_v59, 0.0  ;;  %v874_v8 = vmul.f32 %v10711_v7, %v797_v5  ;;  %v873_v9 = vmul.f32 %v10711_v7, %v792_v6 }
 0x2a5   :  { %8934 = vmatpush3.bf16.msra.mxu0 %v10423_v3 }
 0x2a6   :  { %9079 = vmatprep.subr.bf16.mxu0 %v14037_v1  ;;  %v919_v10 = vadd.f32 %v11909_v49, %v874_v8 }
 0x2a7   :  { %v807_v13 = vpop.permute.xlu1 %806  ;;  %v802_v14 = vpop.permute.xlu0 %801 }
 0x2a8   :  { %8700 = vmatmul.mubr.bf16.gmra.mxu0 %v972_v0  ;;  %v954_v0 = vmax.f32 %v916_v61, 0.0  ;;  %v957_v15 = vmax.f32 %v919_v10, 0.0  ;;  %v876_v17 = vmul.f32 %v10711_v7, %v807_v13  ;;  %v875_v18 = vmul.f32 %v10711_v7, %v802_v14  ;;  %v10424_v14 = vld [vmem:[%s14090_s23 + $0x30] sm:$0xff]  }
 0x2a9   :  { %8703 = vmatprep.mubr.msk.bf16.mxu0 %vm11513_vm0, %v14037_v1 }
 0x2aa   :  { %v979_v12 = vpack.c.bf16 %v955_v63, %v954_v0  ;;  %v921_v20 = vadd.f32 %v10712_v19, %v876_v17  ;;  %v920_v21 = vadd.f32 %v10712_v19, %v875_v18 }
 0x2ab   :  { %v817_v23 = vpop.permute.xlu1 %816  ;;  %v812_v24 = vpop.permute.xlu0 %811 }
 0x2ac   :  { %v958_v25 = vmax.f32 %v920_v21, 0.0  ;;  %v878_v26 = vmul.f32 %v10711_v7, %v817_v23  ;;  %v877_v27 = vmul.f32 %v10711_v7, %v812_v24  ;;  %v10425_v21 = vld [vmem:[%s14090_s23 + $0x28] sm:$0xff]  }
 0x2ae   :  { %v923_v28 = vadd.f32 %v10712_v19, %v878_v26  ;;  %v922_v29 = vadd.f32 %v10712_v19, %v877_v27 }
 0x2af   :  { %v827_v31 = vpop.permute.xlu1 %826  ;;  %v822_v32 = vpop.permute.xlu0 %821 }
 0x2b0   :  { %8704 = vmatmul.mubr.bf16.gmra.mxu0 %v973_v11  ;;  %v918_v11 = vadd.f32 %v11909_v49, %v873_v9  ;;  %v959_v49 = vmax.f32 %v921_v20, 0.0  ;;  %v960_v34 = vmax.f32 %v922_v29, 0.0  ;;  %v880_v35 = vmul.f32 %v10711_v7, %v827_v31  ;;  %v10421_v9 = vld [vmem:[%s14090_s23 + $0x38] sm:$0xff]  }
 0x2b1   :  { %8707 = vmatprep.mubr.msk.bf16.mxu0 %vm11513_vm0, %v14037_v1  ;;  %v879_v36 = vmul.f32 %v10711_v7, %v822_v32  ;;  %v10427_v31 = vld [vmem:[%s14090_s23 + $0x18] sm:$0xff]  }
 0x2b2   :  { %v956_v16 = vmax.f32 %v918_v11, 0.0  ;;  %v981_v30 = vpack.c.bf16 %v959_v49, %v958_v25  ;;  %v925_v37 = vadd.f32 %v10712_v19, %v880_v35  ;;  %v10426_v25 = vld [vmem:[%s14090_s23 + $0x20] sm:$0xff]  }
 0x2b3   :  { %v924_v38 = vadd.f32 %v10712_v19, %v879_v36  ;;  %v837_v40 = vpop.permute.xlu1 %836  ;;  %v832_v41 = vpop.permute.xlu0 %831  ;;  %v10428_v36 = vld [vmem:[%s14090_s23 + $0x10] sm:$0xff]  }
 0x2b4   :  { %v963_v42 = vmax.f32 %v925_v37, 0.0  ;;  %v882_v44 = vmul.f32 %v10711_v7, %v837_v40  ;;  %v881_v45 = vmul.f32 %v10711_v7, %v832_v41 }
 0x2b5   :  { %v962_v43 = vmax.f32 %v924_v38, 0.0 }
 0x2b6   :  { %v927_v46 = vadd.f32 %v10712_v19, %v882_v44  ;;  %v926_v47 = vadd.f32 %v10712_v19, %v881_v45 }
 0x2b7   :  { %v983_v50 = vpack.c.bf16 %v963_v42, %v962_v43  ;;  %v10429_v42 = vld [vmem:[%s14090_s23 + $0x8] sm:$0xff]  }
 0x2b8   :  { %8708 = vmatmul.mubr.bf16.gmra.mxu0 %v974_v22  ;;  %v980_v22 = vpack.c.bf16 %v957_v15, %v956_v16  ;;  %v964_v52 = vmax.f32 %v926_v47, 0.0  ;;  %v10430_v47 = vld [vmem:[%s14090_s23] sm:$0xff]  }
 0x2b9   :  { %8711 = vmatprep.mubr.msk.bf16.mxu0 %vm11513_vm0, %v14037_v1 }
 0x2c0   :  { %8712 = vmatmul.mubr.bf16.gmra.mxu0 %v975_v33  ;;  %v961_v33 = vmax.f32 %v923_v28, 0.0 }
 0x2c1   :  { %8715 = vmatprep.mubr.msk.bf16.mxu0 %vm11513_vm0, %v14037_v1 }
 0x2c2   :  { %v982_v39 = vpack.c.bf16 %v961_v33, %v960_v34 }
 0x2c8   :  { %8716 = vmatmul.mubr.bf16.gmra.mxu0 %v976_v51  ;;  %v965_v51 = vmax.f32 %v927_v46, 0.0 }
 0x2c9   :  { %8719 = vmatprep.mubr.msk.bf16.mxu0 %vm11513_vm0, %v14037_v1 }
 0x2ca   :  { %v984_v53 = vpack.c.bf16 %v965_v51, %v964_v52 }
 0x2d0   :  { %8720 = vmatmul.mubr.bf16.gmra.mxu0 %v977_v2 }
 0x2d1   :  { %8723 = vmatprep.mubr.msk.bf16.mxu0 %vm11513_vm0, %v14037_v1 }
 0x2d8   :  { %8724 = vmatmul.mubr.bf16.gmra.mxu0 %v978_v4 }
 0x2d9   :  { %8727 = vmatprep.mubr.msk.bf16.mxu0 %vm11513_vm0, %v14037_v1 }
 0x2e0   :  { %8728 = vmatmul.mubr.bf16.gmra.mxu0 %v979_v12 }
 0x2e1   :  { %8731 = vmatprep.mubr.msk.bf16.mxu0 %vm11513_vm0, %v14037_v1 }
 0x2e8   :  { %8732 = vmatmul.mubr.bf16.gmra.mxu0 %v980_v22 }
 0x2e9   :  { %8735 = vmatprep.mubr.msk.bf16.mxu0 %vm11513_vm0, %v14037_v1 }
 0x2f0   :  { %8736 = vmatmul.mubr.bf16.gmra.mxu0 %v981_v30 }
 0x2f1   :  { %8739 = vmatprep.mubr.msk.bf16.mxu0 %vm11513_vm0, %v14037_v1 }
 0x2f8   :  { %8740 = vmatmul.mubr.bf16.gmra.mxu0 %v982_v39 }
 0x2f9   :  { %8743 = vmatprep.mubr.msk.bf16.mxu0 %vm11513_vm0, %v14037_v1 }
 0x300   :  { %8744 = vmatmul.mubr.bf16.gmra.mxu0 %v983_v50 }
 0x301   :  { %8747 = vmatprep.mubr.msk.bf16.mxu0 %vm11513_vm0, %v14037_v1 }
 0x308   :  { %8748 = vmatmul.mubr.bf16.gmra.mxu0 %v984_v53 }
 0x309   :  { %8935 = vmatprep.mubr.msk.bf16.mxu0 %vm11513_vm0, %v14037_v1 }
 0x338   :  { %v1090_v55 = vpop.f32.mrf.mxu0 }
 0x339   :  { %v1091_v57 = vadd.f32 %v12040_v54, %v1090_v55 }
 0x33a   :  { %v8677_v56 = vpop.f32.mrf.mxu0 }
 0x33b   :  { %v1241_v61 = vmax.f32 %v1091_v57, 0.0 }
 0x33c   :  { %v1093_v58 = vpop.f32.mrf.mxu0 }
 0x33d   :  { %v1094_v59 = vadd.f32 %v12040_v54, %v1093_v58 }
 0x33e   :  { %v8678_v60 = vpop.f32.mrf.mxu0 }
 0x33f   :  { %v1242_v48 = vmax.f32 %v1094_v59, 0.0 }
 0x340   :  { %v1098_v62 = vpop.f32.mrf.mxu0 }
 0x341   :  { %v12044_v63 = vpack.c.bf16 %v1242_v48, %v1241_v61  ;;  %v1099_v2 = vadd.f32 %v12040_v54, %v1098_v62 }
 0x342   :  { %v8681_v0 = vpop.f32.mrf.mxu0 }
 0x343   :  { %v1243_v6 = vmax.f32 %v1099_v2, 0.0 }
 0x344   :  { %v1101_v3 = vpop.f32.mrf.mxu0 }
 0x345   :  { %v1102_v4 = vadd.f32 %v12040_v54, %v1101_v3 }
 0x346   :  { %v8682_v5 = vpop.f32.mrf.mxu0 }
 0x347   :  { %v1244_v7 = vmax.f32 %v1102_v4, 0.0 }
 0x348   :  { %v1106_v8 = vpop.f32.mrf.mxu0 }
 0x349   :  { %v12049_v10 = vpack.c.bf16 %v1244_v7, %v1243_v6  ;;  %v1107_v12 = vadd.f32 %v12040_v54, %v1106_v8 }
 0x34a   :  { %v8685_v11 = vpop.f32.mrf.mxu0 }
 0x34b   :  { %8768 = vmatmul.mubr.bf16.vlgmr.msra.gmra.mxu1 %v12049_v10  ;;  %v1245_v17 = vmax.f32 %v1107_v12, 0.0 }
 0x34c   :  { %8836 = vmatpush3.bf16.msra.mxu1 %v10421_v9  ;;  %v1109_v13 = vpop.f32.mrf.mxu0  ;;  %8771 = vmatprep.mubr.msk.bf16.mxu1 %vm11513_vm0, %v14037_v1 }
 0x34d   :  { %v1110_v15 = vadd.f32 %v12040_v54, %v1109_v13  ;;  %8837 = vmatprep.subr.bf16.mxu1 %v14037_v1 }
 0x34e   :  { %v8686_v16 = vpop.f32.mrf.mxu0 }
 0x34f   :  { %v1246_v18 = vmax.f32 %v1110_v15, 0.0 }
 0x350   :  { %v1114_v19 = vpop.f32.mrf.mxu0  ;;  %8838 = vmatpush3.bf16.msra.mxu1 %v10424_v14 }
 0x351   :  { %v12058_v20 = vpack.c.bf16 %v1246_v18, %v1245_v17  ;;  %8839 = vmatprep.subr.bf16.mxu1 %v14037_v1  ;;  %v1115_v23 = vadd.f32 %v12040_v54, %v1114_v19 }
 0x352   :  { %v8689_v22 = vpop.f32.mrf.mxu0 }
 0x353   :  { %8772 = vmatmul.mubr.bf16.gmra.mxu1 %v12058_v20  ;;  %8936 = vmatmul.mubr.bf16.vlgmr.msra.gmra.mxu0 %v12058_v20  ;;  %v1247_v27 = vmax.f32 %v1115_v23, 0.0 }
 0x354   :  { %v1117_v24 = vpop.f32.mrf.mxu0  ;;  %8775 = vmatprep.mubr.msk.bf16.mxu1 %vm11513_vm0, %v14037_v1  ;;  %8939 = vmatprep.mubr.msk.bf16.mxu0 %vm11513_vm0, %v14037_v1 }
 0x355   :  { %v1118_v49 = vadd.f32 %v12040_v54, %v1117_v24  ;;  %8840 = vmatpush3.bf16.msra.mxu1 %v10425_v21 }
 0x356   :  { %v8690_v26 = vpop.f32.mrf.mxu0  ;;  %8841 = vmatprep.subr.bf16.mxu1 %v14037_v1 }
 0x357   :  { %v1248_v28 = vmax.f32 %v1118_v49, 0.0 }
 0x358   :  { %v1122_v29 = vpop.f32.mrf.mxu0 }
 0x359   :  { %v12072_v30 = vpack.c.bf16 %v1248_v28, %v1247_v27  ;;  %8842 = vmatpush3.bf16.msra.mxu1 %v10426_v25  ;;  %v1123_v33 = vadd.f32 %v12040_v54, %v1122_v29 }
 0x35a   :  { %v8693_v32 = vpop.f32.mrf.mxu0  ;;  %8843 = vmatprep.subr.bf16.mxu1 %v14037_v1 }
 0x35b   :  { %8776 = vmatmul.mubr.bf16.gmra.mxu1 %v12072_v30  ;;  %8940 = vmatmul.mubr.bf16.gmra.mxu0 %v12072_v30  ;;  %v1249_v38 = vmax.f32 %v1123_v33, 0.0 }
 0x35c   :  { %v1125_v34 = vpop.f32.mrf.mxu0  ;;  %8779 = vmatprep.mubr.msk.bf16.mxu1 %vm11513_vm0, %v14037_v1  ;;  %8943 = vmatprep.mubr.msk.bf16.mxu0 %vm11513_vm0, %v14037_v1 }
 0x35d   :  { %v1126_v35 = vadd.f32 %v12040_v54, %v1125_v34  ;;  %8844 = vmatpush3.bf16.msra.mxu1 %v10427_v31 }
 0x35e   :  { %v8694_v37 = vpop.f32.mrf.mxu0  ;;  %8845 = vmatprep.subr.bf16.mxu1 %v14037_v1 }
 0x35f   :  { %v1250_v39 = vmax.f32 %v1126_v35, 0.0 }
 0x360   :  { %v1130_v40 = vpop.f32.mrf.mxu0 }
 0x361   :  { %v12086_v41 = vpack.c.bf16 %v1250_v39, %v1249_v38  ;;  %8846 = vmatpush3.bf16.msra.mxu1 %v10428_v36  ;;  %v1131_v44 = vadd.f32 %v12040_v54, %v1130_v40 }
 0x362   :  { %v8697_v43 = vpop.f32.mrf.mxu0  ;;  %8847 = vmatprep.subr.bf16.mxu1 %v14037_v1 }
 0x363   :  { %8780 = vmatmul.mubr.bf16.gmra.mxu1 %v12086_v41  ;;  %8944 = vmatmul.mubr.bf16.gmra.mxu0 %v12086_v41  ;;  %v1251_v51 = vmax.f32 %v1131_v44, 0.0 }
 0x364   :  { %v1133_v45 = vpop.f32.mrf.mxu0  ;;  %8783 = vmatprep.mubr.msk.bf16.mxu1 %vm11513_vm0, %v14037_v1  ;;  %8947 = vmatprep.mubr.msk.bf16.mxu0 %vm11513_vm0, %v14037_v1 }
 0x365   :  { %v1134_v46 = vadd.f32 %v12040_v54, %v1133_v45  ;;  %8848 = vmatpush3.bf16.msra.mxu1 %v10429_v42 }
 0x366   :  { %v8698_v50 = vpop.f32.mrf.mxu0  ;;  %8849 = vmatprep.subr.bf16.mxu1 %v14037_v1 }
 0x367   :  { %v1252_v52 = vmax.f32 %v1134_v46, 0.0 }
 0x368   :  { %v1138_v53 = vpop.f32.mrf.mxu0 }
 0x369   :  { %v12100_v55 = vpack.c.bf16 %v1252_v52, %v1251_v51  ;;  %8850 = vmatpush3.bf16.msra.mxu1 %v10430_v47  ;;  %v1139_v57 = vadd.f32 %v12040_v54, %v1138_v53 }
 0x36a   :  { %v8701_v56 = vpop.f32.mrf.mxu0  ;;  %9003 = vmatprep.subr.bf16.mxu1 %v14037_v1 }
 0x36b   :  { %8784 = vmatmul.mubr.bf16.gmra.mxu1 %v12100_v55  ;;  %8948 = vmatmul.mubr.bf16.gmra.mxu0 %v12100_v55  ;;  %v1253_v61 = vmax.f32 %v1139_v57, 0.0 }
 0x36c   :  { %v1141_v58 = vpop.f32.mrf.mxu0  ;;  %8787 = vmatprep.mubr.msk.bf16.mxu1 %vm11513_vm0, %v14037_v1  ;;  %8951 = vmatprep.mubr.msk.bf16.mxu0 %vm11513_vm0, %v14037_v1 }
 0x36d   :  { %v1142_v59 = vadd.f32 %v12040_v54, %v1141_v58 }
 0x36e   :  { %v8702_v60 = vpop.f32.mrf.mxu0 }
 0x36f   :  { %v1254_v48 = vmax.f32 %v1142_v59, 0.0 }
 0x370   :  { %v1146_v62 = vpop.f32.mrf.mxu0 }
 0x371   :  { %v12111_v0 = vpack.c.bf16 %v1254_v48, %v1253_v61  ;;  %v1147_v3 = vadd.f32 %v12040_v54, %v1146_v62 }
 0x372   :  { %v8705_v2 = vpop.f32.mrf.mxu0 }
 0x373   :  { %8788 = vmatmul.mubr.bf16.gmra.mxu1 %v12111_v0  ;;  %8952 = vmatmul.mubr.bf16.gmra.mxu0 %v12111_v0  ;;  %v1255_v7 = vmax.f32 %v1147_v3, 0.0 }
 0x374   :  { %v1149_v4 = vpop.f32.mrf.mxu0  ;;  %8791 = vmatprep.mubr.msk.bf16.mxu1 %vm11513_vm0, %v14037_v1  ;;  %8955 = vmatprep.mubr.msk.bf16.mxu0 %vm11513_vm0, %v14037_v1 }
 0x375   :  { %v1150_v5 = vadd.f32 %v12040_v54, %v1149_v4 }
 0x376   :  { %v8706_v6 = vpop.f32.mrf.mxu0 }
 0x377   :  { %v1256_v8 = vmax.f32 %v1150_v5, 0.0 }
 0x378   :  { %v1154_v9 = vpop.f32.mrf.mxu0 }
 0x379   :  { %v12121_v11 = vpack.c.bf16 %v1256_v8, %v1255_v7  ;;  %v1155_v13 = vadd.f32 %v12040_v54, %v1154_v9 }
 0x37a   :  { %v8709_v12 = vpop.f32.mrf.mxu0 }
 0x37b   :  { %8792 = vmatmul.mubr.bf16.gmra.mxu1 %v12121_v11  ;;  %8956 = vmatmul.mubr.bf16.gmra.mxu0 %v12121_v11  ;;  %v1257_v17 = vmax.f32 %v1155_v13, 0.0 }
 0x37c   :  { %v1157_v14 = vpop.f32.mrf.mxu0  ;;  %8795 = vmatprep.mubr.msk.bf16.mxu1 %vm11513_vm0, %v14037_v1  ;;  %8959 = vmatprep.mubr.msk.bf16.mxu0 %vm11513_vm0, %v14037_v1 }
 0x37d   :  { %v1158_v15 = vadd.f32 %v12040_v54, %v1157_v14 }
 0x37e   :  { %v8710_v16 = vpop.f32.mrf.mxu0 }
 0x37f   :  { %v1258_v18 = vmax.f32 %v1158_v15, 0.0 }
 0x380   :  { %v1162_v19 = vpop.f32.mrf.mxu0 }
 0x381   :  { %v12131_v21 = vpack.c.bf16 %v1258_v18, %v1257_v17  ;;  %v1163_v23 = vadd.f32 %v12040_v54, %v1162_v19 }
 0x382   :  { %v8713_v22 = vpop.f32.mrf.mxu0 }
 0x383   :  { %8796 = vmatmul.mubr.bf16.gmra.mxu1 %v12131_v21  ;;  %8960 = vmatmul.mubr.bf16.gmra.mxu0 %v12131_v21  ;;  %v1259_v26 = vmax.f32 %v1163_v23, 0.0 }
 0x384   :  { %v1165_v24 = vpop.f32.mrf.mxu0  ;;  %8799 = vmatprep.mubr.msk.bf16.mxu1 %vm11513_vm0, %v14037_v1  ;;  %8963 = vmatprep.mubr.msk.bf16.mxu0 %vm11513_vm0, %v14037_v1 }
 0x385   :  { %v1166_v49 = vadd.f32 %v12040_v54, %v1165_v24 }
 0x386   :  { %v8714_v25 = vpop.f32.mrf.mxu0 }
 0x387   :  { %v1260_v27 = vmax.f32 %v1166_v49, 0.0 }
 0x388   :  { %v1170_v28 = vpop.f32.mrf.mxu0 }
 0x389   :  { %v12141_v29 = vpack.c.bf16 %v1260_v27, %v1259_v26  ;;  %v1171_v32 = vadd.f32 %v12040_v54, %v1170_v28 }
 0x38a   :  { %v8717_v31 = vpop.f32.mrf.mxu0 }
 0x38b   :  { %8800 = vmatmul.mubr.bf16.gmra.mxu1 %v12141_v29  ;;  %8964 = vmatmul.mubr.bf16.gmra.mxu0 %v12141_v29  ;;  %v1261_v36 = vmax.f32 %v1171_v32, 0.0 }
 0x38c   :  { %v1173_v33 = vpop.f32.mrf.mxu0  ;;  %8803 = vmatprep.mubr.msk.bf16.mxu1 %vm11513_vm0, %v14037_v1  ;;  %8967 = vmatprep.mubr.msk.bf16.mxu0 %vm11513_vm0, %v14037_v1 }
 0x38d   :  { %v1174_v34 = vadd.f32 %v12040_v54, %v1173_v33 }
 0x38e   :  { %v8718_v35 = vpop.f32.mrf.mxu0 }
 0x38f   :  { %v1262_v37 = vmax.f32 %v1174_v34, 0.0 }
 0x390   :  { %v1178_v38 = vpop.f32.mrf.mxu0 }
 0x391   :  { %v12151_v39 = vpack.c.bf16 %v1262_v37, %v1261_v36  ;;  %v1179_v42 = vadd.f32 %v12040_v54, %v1178_v38 }
 0x392   :  { %v8721_v40 = vpop.f32.mrf.mxu0 }
 0x393   :  { %8804 = vmatmul.mubr.bf16.gmra.mxu1 %v12151_v39  ;;  %8968 = vmatmul.mubr.bf16.gmra.mxu0 %v12151_v39  ;;  %v1263_v46 = vmax.f32 %v1179_v42, 0.0 }
 0x394   :  { %v1181_v43 = vpop.f32.mrf.mxu0  ;;  %8807 = vmatprep.mubr.msk.bf16.mxu1 %vm11513_vm0, %v14037_v1  ;;  %8971 = vmatprep.mubr.msk.bf16.mxu0 %vm11513_vm0, %v14037_v1 }
 0x395   :  { %v1182_v44 = vadd.f32 %v12040_v54, %v1181_v43 }
 0x396   :  { %v8722_v45 = vpop.f32.mrf.mxu0 }
 0x397   :  { %v1264_v47 = vmax.f32 %v1182_v44, 0.0 }
 0x398   :  { %v1186_v50 = vpop.f32.mrf.mxu0 }
 0x399   :  { %v12161_v51 = vpack.c.bf16 %v1264_v47, %v1263_v46  ;;  %v1187_v53 = vadd.f32 %v12040_v54, %v1186_v50 }
 0x39a   :  { %v8725_v52 = vpop.f32.mrf.mxu0 }
 0x39b   :  { %8808 = vmatmul.mubr.bf16.gmra.mxu1 %v12161_v51  ;;  %8972 = vmatmul.mubr.bf16.gmra.mxu0 %v12161_v51  ;;  %v1265_v59 = vmax.f32 %v1187_v53, 0.0 }
 0x39c   :  { %v1189_v56 = vpop.f32.mrf.mxu0  ;;  %8811 = vmatprep.mubr.msk.bf16.mxu1 %vm11513_vm0, %v14037_v1  ;;  %8975 = vmatprep.mubr.msk.bf16.mxu0 %vm11513_vm0, %v14037_v1 }
 0x39d   :  { %v1190_v57 = vadd.f32 %v12040_v54, %v1189_v56 }
 0x39e   :  { %v8726_v58 = vpop.f32.mrf.mxu0 }
 0x39f   :  { %v1266_v60 = vmax.f32 %v1190_v57, 0.0 }
 0x3a0   :  { %v1194_v61 = vpop.f32.mrf.mxu0 }
 0x3a1   :  { %v12171_v48 = vpack.c.bf16 %v1266_v60, %v1265_v59  ;;  %v1195_v2 = vadd.f32 %v12040_v54, %v1194_v61 }
 0x3a2   :  { %v8729_v62 = vpop.f32.mrf.mxu0 }
 0x3a3   :  { %8812 = vmatmul.mubr.bf16.gmra.mxu1 %v12171_v48  ;;  %8976 = vmatmul.mubr.bf16.gmra.mxu0 %v12171_v48  ;;  %v1267_v6 = vmax.f32 %v1195_v2, 0.0 }
 0x3a4   :  { %v1197_v3 = vpop.f32.mrf.mxu0  ;;  %8815 = vmatprep.mubr.msk.bf16.mxu1 %vm11513_vm0, %v14037_v1  ;;  %8979 = vmatprep.mubr.msk.bf16.mxu0 %vm11513_vm0, %v14037_v1 }
 0x3a5   :  { %v1198_v4 = vadd.f32 %v12040_v54, %v1197_v3 }
 0x3a6   :  { %v8730_v5 = vpop.f32.mrf.mxu0 }
 0x3a7   :  { %v1268_v7 = vmax.f32 %v1198_v4, 0.0  ;;  %v10431_v4 = vld [vmem:[#allocation8 + $0x78] sm:$0xff]  }
 0x3a8   :  { %v1202_v8 = vpop.f32.mrf.mxu0 }
 0x3a9   :  { %v12181_v9 = vpack.c.bf16 %v1268_v7, %v1267_v6  ;;  %v1203_v13 = vadd.f32 %v12040_v54, %v1202_v8  ;;  %v10432_v6 = vld [vmem:[#allocation8 + $0x70] sm:$0xff]   ;;  %v10435_v7 = vld [vmem:[#allocation8 + $0x58] sm:$0xff]   ;;  %v10440_v8 = vld [vmem:[#allocation8 + $0x28] sm:$0xff]  }
 0x3aa   :  { %v8733_v12 = vpop.f32.mrf.mxu0 }
 0x3ab   :  { %8816 = vmatmul.mubr.bf16.gmra.mxu1 %v12181_v9  ;;  %8980 = vmatmul.mubr.bf16.gmra.mxu0 %v12181_v9  ;;  %v1269_v17 = vmax.f32 %v1203_v13, 0.0  ;;  %v10441_v12 = vld [vmem:[#allocation8 + $0x20] sm:$0xff]  }
 0x3ac   :  { %v1205_v14 = vpop.f32.mrf.mxu0  ;;  %8819 = vmatprep.mubr.msk.bf16.mxu1 %vm11513_vm0, %v14037_v1  ;;  %8983 = vmatprep.mubr.msk.bf16.mxu0 %vm11513_vm0, %v14037_v1 }
 0x3ad   :  { %v1206_v15 = vadd.f32 %v12040_v54, %v1205_v14 }
 0x3ae   :  { %v8734_v16 = vpop.f32.mrf.mxu0 }
 0x3af   :  { %v1270_v18 = vmax.f32 %v1206_v15, 0.0  ;;  %v10442_v15 = vld [vmem:[#allocation8 + $0x18] sm:$0xff]  }
 0x3b0   :  { %v1210_v19 = vpop.f32.mrf.mxu0 }
 0x3b1   :  { %v12191_v22 = vpack.c.bf16 %v1270_v18, %v1269_v17  ;;  %v1211_v24 = vadd.f32 %v12040_v54, %v1210_v19  ;;  %v10443_v19 = vld [vmem:[#allocation8 + $0x10] sm:$0xff]  }
 0x3b2   :  { %v8737_v23 = vpop.f32.mrf.mxu0 }
 0x3b3   :  { %8820 = vmatmul.mubr.bf16.gmra.mxu1 %v12191_v22  ;;  %8984 = vmatmul.mubr.bf16.gmra.mxu0 %v12191_v22  ;;  %v1271_v27 = vmax.f32 %v1211_v24, 0.0 }
 0x3b4   :  { %v1213_v49 = vpop.f32.mrf.mxu0  ;;  %8823 = vmatprep.mubr.msk.bf16.mxu1 %vm11513_vm0, %v14037_v1  ;;  %8987 = vmatprep.mubr.msk.bf16.mxu0 %vm11513_vm0, %v14037_v1 }
 0x3b5   :  { %v1214_v25 = vadd.f32 %v12040_v54, %v1213_v49 }
 0x3b6   :  { %v8738_v26 = vpop.f32.mrf.mxu0 }
 0x3b7   :  { %v1272_v28 = vmax.f32 %v1214_v25, 0.0  ;;  %v10445_v25 = vld [vmem:[#allocation8 + $0x8] sm:$0xff]  }
 0x3b8   :  { %v1218_v31 = vpop.f32.mrf.mxu0 }
 0x3b9   :  { %v12201_v32 = vpack.c.bf16 %v1272_v28, %v1271_v27  ;;  %v1219_v34 = vadd.f32 %v12040_v54, %v1218_v31 }
 0x3ba   :  { %v8741_v33 = vpop.f32.mrf.mxu0 }
 0x3bb   :  { %8824 = vmatmul.mubr.bf16.gmra.mxu1 %v12201_v32  ;;  %8988 = vmatmul.mubr.bf16.gmra.mxu0 %v12201_v32  ;;  %v1273_v38 = vmax.f32 %v1219_v34, 0.0  ;;  %v10446_v33 = vld [vmem:[#allocation8] sm:$0xff]  }
 0x3bc   :  { %v1221_v35 = vpop.f32.mrf.mxu0  ;;  %8827 = vmatprep.mubr.msk.bf16.mxu1 %vm11513_vm0, %v14037_v1  ;;  %8991 = vmatprep.mubr.msk.bf16.mxu0 %vm11513_vm0, %v14037_v1 }
 0x3bd   :  { %v1222_v36 = vadd.f32 %v12040_v54, %v1221_v35 }
 0x3be   :  { %v8742_v37 = vpop.f32.mrf.mxu0 }
 0x3bf   :  { %v1274_v40 = vmax.f32 %v1222_v36, 0.0  ;;  %v10444_v36 = vld [vmem:[#allocation8 + $0x40] sm:$0xff]  }
 0x3c0   :  { %v1226_v42 = vpop.f32.mrf.mxu0 }
 0x3c1   :  { %v12211_v43 = vpack.c.bf16 %v1274_v40, %v1273_v38  ;;  %v1227_v45 = vadd.f32 %v12040_v54, %v1226_v42 }
 0x3c2   :  { %v8745_v44 = vpop.f32.mrf.mxu0 }
 0x3c3   :  { %8828 = vmatmul.mubr.bf16.gmra.mxu1 %v12211_v43  ;;  %8992 = vmatmul.mubr.bf16.gmra.mxu0 %v12211_v43  ;;  %v1275_v52 = vmax.f32 %v1227_v45, 0.0 }
 0x3c4   :  { %v1229_v46 = vpop.f32.mrf.mxu0  ;;  %8831 = vmatprep.mubr.msk.bf16.mxu1 %vm11513_vm0, %v14037_v1  ;;  %8995 = vmatprep.mubr.msk.bf16.mxu0 %vm11513_vm0, %v14037_v1 }
 0x3c5   :  { %v1230_v47 = vadd.f32 %v12040_v54, %v1229_v46 }
 0x3c6   :  { %v8746_v50 = vpop.f32.mrf.mxu0 }
 0x3c7   :  { %v1276_v53 = vmax.f32 %v1230_v47, 0.0 }
 0x3c8   :  { %v1234_v56 = vpop.f32.mrf.mxu0 }
 0x3c9   :  { %v1296_v57 = vpack.c.bf16 %v1276_v53, %v1275_v52  ;;  %v1235_v59 = vadd.f32 %v12040_v54, %v1234_v56 }
 0x3ca   :  { %v8749_v58 = vpop.f32.mrf.mxu0 }
 0x3cb   :  { %8832 = vmatmul.mubr.bf16.gmra.mxu1 %v1296_v57  ;;  %8996 = vmatmul.mubr.bf16.gmra.mxu0 %v1296_v57  ;;  %v1277_v2 = vmax.f32 %v1235_v59, 0.0 }
 0x3cc   :  { %v1237_v60 = vpop.f32.mrf.mxu0  ;;  %8851 = vmatprep.mubr.msk.bf16.mxu1 %vm11513_vm0, %v14037_v1  ;;  %8999 = vmatprep.mubr.msk.bf16.mxu0 %vm11513_vm0, %v14037_v1 }
 0x3cd   :  { %v1238_v61 = vadd.f32 %v12040_v54, %v1237_v60  ;;  %v10433_v54 = vld [vmem:[#allocation8 + $0x68] sm:$0xff]  }
 0x3ce   :  { %v8750_v62 = vpop.f32.mrf.mxu0 }
 0x3cf   :  { %v1278_v3 = vmax.f32 %v1238_v61, 0.0 }
 0x3d1   :  { %v1297_v5 = vpack.c.bf16 %v1278_v3, %v1277_v2 }
 0x3d3   :  { %8852 = vmatmul.mubr.bf16.vlgmr.msra.gmra.mxu1 %v12044_v63  ;;  %9000 = vmatmul.mubr.bf16.gmra.mxu0 %v1297_v5  ;;  %v10434_v63 = vld [vmem:[#allocation8 + $0x60] sm:$0xff]  }
 0x3d4   :  { %8855 = vmatprep.mubr.msk.bf16.mxu1 %vm11513_vm0, %v14037_v1  ;;  %9004 = vmatpush3.bf16.msra.mxu1 %v10431_v4 }
 0x3d5   :  { %9005 = vmatprep.subr.bf16.mxu1 %v14037_v1  ;;  %9095 = vmatprep.mubr.msk.bf16.mxu0 %vm11513_vm0, %v14037_v1 }
 0x3d8   :  { %9006 = vmatpush3.bf16.msra.mxu1 %v10432_v6 }
 0x3d9   :  { %9007 = vmatprep.subr.bf16.mxu1 %v14037_v1 }
 0x3db   :  { %8856 = vmatmul.mubr.bf16.gmra.mxu1 %v12049_v10  ;;  %v10436_v10 = vld [vmem:[#allocation8 + $0x50] sm:$0xff]  }
 0x3dc   :  { %8859 = vmatprep.mubr.msk.bf16.mxu1 %vm11513_vm0, %v14037_v1  ;;  %9008 = vmatpush3.bf16.msra.mxu1 %v10433_v54 }
 0x3dd   :  { %9009 = vmatprep.subr.bf16.mxu1 %v14037_v1 }
 0x3e0   :  { %9010 = vmatpush3.bf16.msra.mxu1 %v10434_v63 }
 0x3e1   :  { %9011 = vmatprep.subr.bf16.mxu1 %v14037_v1 }
 0x3e3   :  { %8860 = vmatmul.mubr.bf16.gmra.mxu1 %v12058_v20  ;;  %v10437_v20 = vld [vmem:[#allocation8 + $0x38] sm:$0xff]  }
 0x3e4   :  { %8863 = vmatprep.mubr.msk.bf16.mxu1 %vm11513_vm0, %v14037_v1  ;;  %9012 = vmatpush3.bf16.msra.mxu1 %v10435_v7 }
 0x3e5   :  { %9013 = vmatprep.subr.bf16.mxu1 %v14037_v1  ;;  %9080 = vmatpush3.bf16.msra.mxu0 %v10437_v20 }
 0x3e6   :  { %9081 = vmatprep.subr.bf16.mxu0 %v14037_v1 }
 0x3e8   :  { %9014 = vmatpush3.bf16.msra.mxu1 %v10436_v10 }
 0x3e9   :  { %9015 = vmatprep.subr.bf16.mxu1 %v14037_v1 }
 0x3eb   :  { %8864 = vmatmul.mubr.bf16.gmra.mxu1 %v12072_v30  ;;  %v10438_v30 = vld [vmem:[#allocation8 + $0x30] sm:$0xff]  }
 0x3ec   :  { %8867 = vmatprep.mubr.msk.bf16.mxu1 %vm11513_vm0, %v14037_v1  ;;  %9082 = vmatpush3.bf16.msra.mxu0 %v10438_v30 }
 0x3ed   :  { %9083 = vmatprep.subr.bf16.mxu0 %v14037_v1 }
 0x3f0   :  { %9084 = vmatpush3.bf16.msra.mxu0 %v10440_v8 }
 0x3f1   :  { %9085 = vmatprep.subr.bf16.mxu0 %v14037_v1 }
 0x3f3   :  { %8868 = vmatmul.mubr.bf16.gmra.mxu1 %v12086_v41  ;;  %v10439_v41 = vld [vmem:[#allocation8 + $0x48] sm:$0xff]  }
 0x3f4   :  { %8871 = vmatprep.mubr.msk.bf16.mxu1 %vm11513_vm0, %v14037_v1  ;;  %9016 = vmatpush3.bf16.msra.mxu1 %v10439_v41 }
 0x3f5   :  { %9017 = vmatprep.subr.bf16.mxu1 %v14037_v1  ;;  %9086 = vmatpush3.bf16.msra.mxu0 %v10441_v12 }
 0x3f6   :  { %9087 = vmatprep.subr.bf16.mxu0 %v14037_v1 }
 0x3f8   :  { %9018 = vmatpush3.bf16.msra.mxu1 %v10444_v36 }
 0x3f9   :  { %9088 = vmatpush3.bf16.msra.mxu0 %v10442_v15  ;;  %9155 = vmatprep.subr.bf16.mxu1 %v14037_v1 }
 0x3fa   :  { %9089 = vmatprep.subr.bf16.mxu0 %v14037_v1 }
 0x3fb   :  { %8872 = vmatmul.mubr.bf16.gmra.mxu1 %v12100_v55 }
 0x3fc   :  { %8875 = vmatprep.mubr.msk.bf16.mxu1 %vm11513_vm0, %v14037_v1 }
 0x3fd   :  { %9090 = vmatpush3.bf16.msra.mxu0 %v10443_v19 }
 0x3fe   :  { %9091 = vmatprep.subr.bf16.mxu0 %v14037_v1 }
 0x401   :  { %9092 = vmatpush3.bf16.msra.mxu0 %v10445_v25 }
 0x402   :  { %9093 = vmatprep.subr.bf16.mxu0 %v14037_v1 }
 0x403   :  { %8876 = vmatmul.mubr.bf16.gmra.mxu1 %v12111_v0 }
 0x404   :  { %8879 = vmatprep.mubr.msk.bf16.mxu1 %vm11513_vm0, %v14037_v1 }
 0x405   :  { %9094 = vmatpush3.bf16.msra.mxu0 %v10446_v33 }
 0x406   :  { %9231 = vmatprep.subr.bf16.mxu0 %v14037_v1 }
 0x40b   :  { %v12259_v55 = vpop.f32.mrf.mxu1  ;;  %8880 = vmatmul.mubr.bf16.gmra.mxu1 %v12121_v11 }
 0x40c   :  { %8883 = vmatprep.mubr.msk.bf16.mxu1 %vm11513_vm0, %v14037_v1 }
 0x40d   :  { %v8769_v0 = vpop.f32.mrf.mxu1 }
 0x40f   :  { %v12265_v13 = vpop.f32.mrf.mxu1 }
 0x411   :  { %v8770_v14 = vpop.f32.mrf.mxu1 }
 0x413   :  { %v12268_v16 = vpop.f32.mrf.mxu1  ;;  %8884 = vmatmul.mubr.bf16.gmra.mxu1 %v12131_v21  ;;  %v12271_v11 = vpop.f32.mrf.mxu0 }
 0x414   :  { %8887 = vmatprep.mubr.msk.bf16.mxu1 %vm11513_vm0, %v14037_v1 }
 0x415   :  { %v8773_v17 = vpop.f32.mrf.mxu1  ;;  %v8937_v18 = vpop.f32.mrf.mxu0 }
 0x417   :  { %v12276_v23 = vpop.f32.mrf.mxu1  ;;  %v12278_v24 = vpop.f32.mrf.mxu0 }
 0x419   :  { %v8774_v49 = vpop.f32.mrf.mxu1  ;;  %v8938_v21 = vpop.f32.mrf.mxu0 }
 0x41b   :  { %v12281_v26 = vpop.f32.mrf.mxu1  ;;  %8888 = vmatmul.mubr.bf16.gmra.mxu1 %v12141_v29  ;;  %v12284_v27 = vpop.f32.mrf.mxu0 }
 0x41c   :  { %8891 = vmatprep.mubr.msk.bf16.mxu1 %vm11513_vm0, %v14037_v1 }
 0x41d   :  { %v8777_v28 = vpop.f32.mrf.mxu1  ;;  %v8941_v31 = vpop.f32.mrf.mxu0 }
 0x41f   :  { %v12289_v34 = vpop.f32.mrf.mxu1  ;;  %v12291_v35 = vpop.f32.mrf.mxu0 }
 0x421   :  { %v8778_v29 = vpop.f32.mrf.mxu1  ;;  %v8942_v37 = vpop.f32.mrf.mxu0 }
 0x423   :  { %v12294_v38 = vpop.f32.mrf.mxu1  ;;  %8892 = vmatmul.mubr.bf16.gmra.mxu1 %v12151_v39  ;;  %v12297_v40 = vpop.f32.mrf.mxu0 }
 0x424   :  { %8895 = vmatprep.mubr.msk.bf16.mxu1 %vm11513_vm0, %v14037_v1 }
 0x425   :  { %v8781_v42 = vpop.f32.mrf.mxu1  ;;  %v8945_v44 = vpop.f32.mrf.mxu0 }
 0x427   :  { %v12302_v45 = vpop.f32.mrf.mxu1  ;;  %v12304_v46 = vpop.f32.mrf.mxu0 }
 0x429   :  { %v8782_v47 = vpop.f32.mrf.mxu1  ;;  %v8946_v50 = vpop.f32.mrf.mxu0 }
 0x42b   :  { %v12306_v52 = vpop.f32.mrf.mxu1  ;;  %8896 = vmatmul.mubr.bf16.gmra.mxu1 %v12161_v51  ;;  %v12309_v39 = vpop.f32.mrf.mxu0 }
 0x42c   :  { %8899 = vmatprep.mubr.msk.bf16.mxu1 %vm11513_vm0, %v14037_v1 }
 0x42d   :  { %v8785_v53 = vpop.f32.mrf.mxu1  ;;  %v8949_v56 = vpop.f32.mrf.mxu0 }
 0x42f   :  { %v12313_v57 = vpop.f32.mrf.mxu1  ;;  %v12315_v58 = vpop.f32.mrf.mxu0 }
 0x431   :  { %v8786_v59 = vpop.f32.mrf.mxu1  ;;  %v8950_v60 = vpop.f32.mrf.mxu0 }
 0x433   :  { %v12317_v61 = vpop.f32.mrf.mxu1  ;;  %8900 = vmatmul.mubr.bf16.gmra.mxu1 %v12171_v48  ;;  %v12320_v62 = vpop.f32.mrf.mxu0 }
 0x434   :  { %8903 = vmatprep.mubr.msk.bf16.mxu1 %vm11513_vm0, %v14037_v1 }
 0x435   :  { %v8789_v51 = vpop.f32.mrf.mxu1  ;;  %v8953_v2 = vpop.f32.mrf.mxu0 }
 0x437   :  { %v12324_v3 = vpop.f32.mrf.mxu1  ;;  %v12326_v4 = vpop.f32.mrf.mxu0 }
 0x439   :  { %v8790_v5 = vpop.f32.mrf.mxu1  ;;  %v8954_v6 = vpop.f32.mrf.mxu0 }
 0x43b   :  { %v12328_v54 = vpop.f32.mrf.mxu1  ;;  %8904 = vmatmul.mubr.bf16.gmra.mxu1 %v12181_v9  ;;  %v12331_v63 = vpop.f32.mrf.mxu0 }
 0x43c   :  { %8907 = vmatprep.mubr.msk.bf16.mxu1 %vm11513_vm0, %v14037_v1 }
 0x43d   :  { %v8793_v48 = vpop.f32.mrf.mxu1  ;;  %v8957_v7 = vpop.f32.mrf.mxu0 }
 0x43f   :  { %v12335_v10 = vpop.f32.mrf.mxu1  ;;  %v12337_v20 = vpop.f32.mrf.mxu0 }
 0x441   :  { %v8794_v30 = vpop.f32.mrf.mxu1  ;;  %v8958_v41 = vpop.f32.mrf.mxu0 }
 0x443   :  { %v12339_v8 = vpop.f32.mrf.mxu1  ;;  %8908 = vmatmul.mubr.bf16.gmra.mxu1 %v12191_v22  ;;  %v12342_v0 = vpop.f32.mrf.mxu0 }
 0x444   :  { %8911 = vmatprep.mubr.msk.bf16.mxu1 %vm11513_vm0, %v14037_v1 }
 0x445   :  { %v8797_v9 = vpop.f32.mrf.mxu1  ;;  %v8961_v12 = vpop.f32.mrf.mxu0 }
 0x447   :  { %v12346_v14 = vpop.f32.mrf.mxu1  ;;  %v12348_v15 = vpop.f32.mrf.mxu0 }
 0x449   :  { %v8798_v17 = vpop.f32.mrf.mxu1  ;;  %v8962_v18 = vpop.f32.mrf.mxu0 }
 0x44b   :  { %v12350_v19 = vpop.f32.mrf.mxu1  ;;  %8912 = vmatmul.mubr.bf16.gmra.mxu1 %v12201_v32  ;;  %v12353_v49 = vpop.f32.mrf.mxu0 }
 0x44c   :  { %8915 = vmatprep.mubr.msk.bf16.mxu1 %vm11513_vm0, %v14037_v1 }
 0x44d   :  { %v8801_v22 = vpop.f32.mrf.mxu1  ;;  %v8965_v21 = vpop.f32.mrf.mxu0 }
 0x44f   :  { %v12357_v25 = vpop.f32.mrf.mxu1  ;;  %v12359_v28 = vpop.f32.mrf.mxu0 }
 0x451   :  { %v8802_v31 = vpop.f32.mrf.mxu1  ;;  %v8966_v33 = vpop.f32.mrf.mxu0 }
 0x453   :  { %v12361_v36 = vpop.f32.mrf.mxu1  ;;  %8916 = vmatmul.mubr.bf16.gmra.mxu1 %v12211_v43  ;;  %v12364_v29 = vpop.f32.mrf.mxu0 }
 0x454   :  { %9019 = vmatprep.mubr.msk.bf16.mxu1 %vm11513_vm0, %v14037_v1 }
 0x455   :  { %v8805_v32 = vpop.f32.mrf.mxu1  ;;  %v8969_v37 = vpop.f32.mrf.mxu0 }
 0x457   :  { %v12368_v42 = vpop.f32.mrf.mxu1  ;;  %v12370_v44 = vpop.f32.mrf.mxu0 }
 0x459   :  { %v8806_v47 = vpop.f32.mrf.mxu1  ;;  %v8970_v50 = vpop.f32.mrf.mxu0 }
 0x45b   :  { %v12372_v53 = vpop.f32.mrf.mxu1  ;;  %v12374_v56 = vpop.f32.mrf.mxu0 }
 0x45d   :  { %v8809_v59 = vpop.f32.mrf.mxu1  ;;  %v8973_v60 = vpop.f32.mrf.mxu0 }
 0x45f   :  { %v12376_v43 = vpop.f32.mrf.mxu1  ;;  %v12378_v51 = vpop.f32.mrf.mxu0 }
 0x461   :  { %v8810_v2 = vpop.f32.mrf.mxu1  ;;  %v8974_v5 = vpop.f32.mrf.mxu0 }
 0x463   :  { %v12380_v6 = vpop.f32.mrf.mxu1  ;;  %v12382_v48 = vpop.f32.mrf.mxu0 }
 0x465   :  { %v8813_v7 = vpop.f32.mrf.mxu1  ;;  %v8977_v30 = vpop.f32.mrf.mxu0 }
 0x467   :  { %v12384_v41 = vpop.f32.mrf.mxu1  ;;  %v12386_v9 = vpop.f32.mrf.mxu0 }
 0x469   :  { %v8814_v12 = vpop.f32.mrf.mxu1  ;;  %v8978_v17 = vpop.f32.mrf.mxu0 }
 0x46b   :  { %v12388_v18 = vpop.f32.mrf.mxu1  ;;  %v12390_v22 = vpop.f32.mrf.mxu0 }
 0x46d   :  { %v8817_v21 = vpop.f32.mrf.mxu1  ;;  %v8981_v31 = vpop.f32.mrf.mxu0 }
 0x46f   :  { %v12392_v33 = vpop.f32.mrf.mxu1  ;;  %v12394_v32 = vpop.f32.mrf.mxu0 }
 0x470   :  { %14091 = vst [vmem:[#allocation102_spill] sm:$0xff] %v12392_v33 }
 0x471   :  { %v8818_v37 = vpop.f32.mrf.mxu1  ;;  %v8982_v47 = vpop.f32.mrf.mxu0 }
 0x473   :  { %v12396_v50 = vpop.f32.mrf.mxu1  ;;  %v12398_v59 = vpop.f32.mrf.mxu0 }
 0x474   :  { %14092 = vst [vmem:[#allocation103_spill] sm:$0xff] %v12396_v50  ;;  %14093 = vst [vmem:[#allocation104_spill] sm:$0xff] %v12398_v59 }
 0x475   :  { %v8821_v60 = vpop.f32.mrf.mxu1  ;;  %v8985_v2 = vpop.f32.mrf.mxu0 }
 0x477   :  { %v12400_v5 = vpop.f32.mrf.mxu1  ;;  %v12402_v7 = vpop.f32.mrf.mxu0 }
 0x478   :  { %14094 = vst [vmem:[#allocation105_spill] sm:$0xff] %v12400_v5  ;;  %14095 = vst [vmem:[#allocation106_spill] sm:$0xff] %v12402_v7 }
 0x479   :  { %v8822_v30 = vpop.f32.mrf.mxu1  ;;  %v8986_v12 = vpop.f32.mrf.mxu0 }
 0x47b   :  { %v12404_v17 = vpop.f32.mrf.mxu1  ;;  %v12406_v21 = vpop.f32.mrf.mxu0 }
 0x47c   :  { %14096 = vst [vmem:[#allocation107_spill] sm:$0xff] %v12404_v17  ;;  %14097 = vst [vmem:[#allocation108_spill] sm:$0xff] %v12406_v21 }
 0x47d   :  { %v8825_v31 = vpop.f32.mrf.mxu1  ;;  %v8989_v1 = vpop.f32.mrf.mxu0 }
 0x47f   :  { %v12408_v37 = vpop.f32.mrf.mxu1  ;;  %v12410_v47 = vpop.f32.mrf.mxu0 }
 0x480   :  { %14098 = vst [vmem:[#allocation109_spill] sm:$0xff] %v12408_v37  ;;  %14099 = vst [vmem:[#allocation110_spill] sm:$0xff] %v12410_v47 }
 0x481   :  { %v8826_v50 = vpop.f32.mrf.mxu1  ;;  %v8990_v33 = vpop.f32.mrf.mxu0 }
 0x483   :  { %v12412_v60 = vpop.f32.mrf.mxu1  ;;  %v12414_v2 = vpop.f32.mrf.mxu0 }
 0x484   :  { %14100 = vst [vmem:[#allocation111_spill] sm:$0xff] %v12412_v60  ;;  %14101 = vst [vmem:[#allocation112_spill] sm:$0xff] %v12414_v2 }
 0x485   :  { %v8829_v5 = vpop.f32.mrf.mxu1  ;;  %v8993_v7 = vpop.f32.mrf.mxu0 }
 0x487   :  { %v12416_v30 = vpop.f32.mrf.mxu1  ;;  %v12418_v12 = vpop.f32.mrf.mxu0 }
 0x488   :  { %14102 = vst [vmem:[#allocation113_spill] sm:$0xff] %v12416_v30  ;;  %14103 = vst [vmem:[#allocation114_spill] sm:$0xff] %v12418_v12 }
 0x489   :  { %v8830_v17 = vpop.f32.mrf.mxu1  ;;  %v8994_v21 = vpop.f32.mrf.mxu0 }
 0x48b   :  { %v12420_v31 = vpop.f32.mrf.mxu1  ;;  %v12422_v1 = vpop.f32.mrf.mxu0 }
 0x48c   :  { %14104 = vst [vmem:[#allocation115_spill] sm:$0xff] %v12420_v31  ;;  %14105 = vst [vmem:[#allocation116_spill] sm:$0xff] %v12422_v1  ;;  %v12432_v31 = vld [vmem:[#allocation7] ss:$0 sm:$0xff] }
 0x48d   :  { %v8833_v37 = vpop.f32.mrf.mxu1  ;;  %v8997_v47 = vpop.f32.mrf.mxu0 }
 0x48f   :  { %v12424_v50 = vpop.f32.mrf.mxu1  ;;  %v12426_v33 = vpop.f32.mrf.mxu0 }
 0x490   :  { %14106 = vst [vmem:[#allocation117_spill] sm:$0xff] %v12424_v50  ;;  %14107 = vst [vmem:[#allocation118_spill] sm:$0xff] %v12426_v33 }
 0x491   :  { %v8834_v60 = vpop.f32.mrf.mxu1  ;;  %v8998_v2 = vpop.f32.mrf.mxu0 }
 0x493   :  { %v1630_v5 = vpop.f32.mrf.mxu1  ;;  %v12428_v7 = vpop.f32.mrf.mxu0 }
 0x494   :  { %14108 = vst [vmem:[#allocation119_spill] sm:$0xff] %v12428_v7  ;;  %v1631_v30 = vadd.f32 %v1630_v5, %v12259_v55 }
 0x495   :  { %v8853_v12 = vpop.f32.mrf.mxu1  ;;  %v9001_v17 = vpop.f32.mrf.mxu0 }
 0x496   :  { %v1999_v21 = vadd.f32 %v12271_v11, %v1631_v30 }
 0x497   :  { %v1633_v1 = vpop.f32.mrf.mxu1  ;;  %v12434_v37 = vpop.f32.mrf.mxu0 }
 0x498   :  { %14109 = vst [vmem:[#allocation120_spill] sm:$0xff] %v12434_v37  ;;  %v1634_v47 = vadd.f32 %v1633_v1, %v12265_v13  ;;  %v2040_v60 = vadd.f32 %v12432_v31, %v1999_v21  ;;  %v14110_v21 = vmov 0.0  }
 0x499   :  { %v8854_v50 = vpop.f32.mrf.mxu1  ;;  %v9002_v33 = vpop.f32.mrf.mxu0 }
 0x49a   :  { %v2000_v2 = vadd.f32 %v12278_v24, %v1634_v47  ;;  %v2074_v11 = vmax.f32 %v2040_v60, 0.0 }
 0x49b   :  { %v1638_v7 = vpop.f32.mrf.mxu1 }
 0x49c   :  { %v2041_v55 = vadd.f32 %v12432_v31, %v2000_v2  ;;  %v1639_v12 = vadd.f32 %v1638_v7, %v12268_v16 }
 0x49d   :  { %v8857_v5 = vpop.f32.mrf.mxu1 }
 0x49e   :  { %v2075_v30 = vmax.f32 %v2041_v55, 0.0  ;;  %v2001_v17 = vadd.f32 %v12284_v27, %v1639_v12 }
 0x49f   :  { %v1641_v59 = vpop.f32.mrf.mxu1 }
 0x4a0   :  { %v2108_v37 = vpack.c.bf16 %v2075_v30, %v2074_v11  ;;  %v1642_v13 = vadd.f32 %v1641_v59, %v12276_v23  ;;  %v2042_v50 = vadd.f32 %v12432_v31, %v2001_v17  ;;  %v10447_v59 = vld [vmem:[#allocation8 + $0xb8] sm:$0xff]  }
 0x4a1   :  { %v8858_v1 = vpop.f32.mrf.mxu1 }
 0x4a2   :  { %v2002_v33 = vadd.f32 %v12291_v35, %v1642_v13  ;;  %9096 = vmatmul.mubr.bf16.vlgmr.msra.gmra.mxu0 %v2108_v37  ;;  %v2076_v27 = vmax.f32 %v2042_v50, 0.0 }
 0x4a3   :  { %v1646_v24 = vpop.f32.mrf.mxu1  ;;  %9099 = vmatprep.mubr.msk.bf16.mxu0 %vm11513_vm0, %v14110_v21 }
 0x4a4   :  { %v2043_v16 = vadd.f32 %v12432_v31, %v2002_v33  ;;  %v1647_v7 = vadd.f32 %v1646_v24, %v12281_v26  ;;  %v10448_v26 = vld [vmem:[#allocation8 + $0xb0] sm:$0xff]   ;;  %v10449_v24 = vld [vmem:[#allocation8 + $0xa8] sm:$0xff]  }
 0x4a5   :  { %v8861_v47 = vpop.f32.mrf.mxu1 }
 0x4a6   :  { %v2077_v60 = vmax.f32 %v2043_v16, 0.0  ;;  %v2003_v2 = vadd.f32 %v12297_v40, %v1647_v7 }
 0x4a7   :  { %v1649_v23 = vpop.f32.mrf.mxu1 }
 0x4a8   :  { %v2109_v55 = vpack.c.bf16 %v2077_v60, %v2076_v27  ;;  %v1650_v12 = vadd.f32 %v1649_v23, %v12289_v34  ;;  %v2044_v37 = vadd.f32 %v12432_v31, %v2003_v2  ;;  %v10450_v27 = vld [vmem:[#allocation8 + $0xa0] sm:$0xff]  }
 0x4a9   :  { %v8862_v35 = vpop.f32.mrf.mxu1 }
 0x4aa   :  { %v2004_v5 = vadd.f32 %v12304_v46, %v1650_v12  ;;  %9020 = vmatmul.mubr.bf16.vlgmr.msra.gmra.mxu1 %v2109_v55  ;;  %9100 = vmatmul.mubr.bf16.gmra.mxu0 %v2109_v55  ;;  %v2078_v17 = vmax.f32 %v2044_v37, 0.0  ;;  %v10451_v35 = vld [vmem:[#allocation8 + $0x98] sm:$0xff]  }
 0x4ab   :  { %9156 = vmatpush3.bf16.msra.mxu1 %v10447_v59  ;;  %v1654_v11 = vpop.f32.mrf.mxu1  ;;  %9023 = vmatprep.mubr.msk.bf16.mxu1 %vm11513_vm0, %v14110_v21 }
 0x4ac   :  { %v2045_v40 = vadd.f32 %v12432_v31, %v2004_v5  ;;  %v1655_v30 = vadd.f32 %v1654_v11, %v12294_v38  ;;  %9103 = vmatprep.mubr.msk.bf16.mxu0 %vm11513_vm0, %v14110_v21  ;;  %9157 = vmatprep.subr.bf16.mxu1 %v14110_v21 }
 0x4ad   :  { %v8865_v34 = vpop.f32.mrf.mxu1 }
 0x4ae   :  { %v2079_v46 = vmax.f32 %v2045_v40, 0.0  ;;  %v2005_v13 = vadd.f32 %v12309_v39, %v1655_v30 }
 0x4af   :  { %v1657_v1 = vpop.f32.mrf.mxu1  ;;  %9158 = vmatpush3.bf16.msra.mxu1 %v10448_v26  ;;  %v10452_v26 = vld [vmem:[#allocation8 + $0x90] sm:$0xff]  }
 0x4b0   :  { %v12461_v50 = vpack.c.bf16 %v2079_v46, %v2078_v17  ;;  %v1658_v33 = vadd.f32 %v1657_v1, %v12302_v45  ;;  %9159 = vmatprep.subr.bf16.mxu1 %v14110_v21  ;;  %v2046_v16 = vadd.f32 %v12432_v31, %v2005_v13  ;;  %v10453_v1 = vld [vmem:[#allocation8 + $0x88] sm:$0xff]  }
 0x4b1   :  { %v8866_v38 = vpop.f32.mrf.mxu1 }
 0x4b2   :  { %v2006_v7 = vadd.f32 %v12315_v58, %v1658_v33  ;;  %9024 = vmatmul.mubr.bf16.gmra.mxu1 %v12461_v50  ;;  %9104 = vmatmul.mubr.bf16.gmra.mxu0 %v12461_v50  ;;  %v2080_v58 = vmax.f32 %v2046_v16, 0.0  ;;  %v10454_v16 = vld [vmem:[#allocation8 + $0x80] sm:$0xff]  }
 0x4b3   :  { %v1662_v47 = vpop.f32.mrf.mxu1  ;;  %9027 = vmatprep.mubr.msk.bf16.mxu1 %vm11513_vm0, %v14110_v21  ;;  %9107 = vmatprep.mubr.msk.bf16.mxu0 %vm11513_vm0, %v14110_v21 }
 0x4b4   :  { %v2047_v45 = vadd.f32 %v12432_v31, %v2006_v7  ;;  %v1663_v39 = vadd.f32 %v1662_v47, %v12306_v52  ;;  %9160 = vmatpush3.bf16.msra.mxu1 %v10449_v24 }
 0x4b5   :  { %v8869_v60 = vpop.f32.mrf.mxu1  ;;  %9161 = vmatprep.subr.bf16.mxu1 %v14110_v21 }
 0x4b6   :  { %v2081_v2 = vmax.f32 %v2047_v45, 0.0  ;;  %v2007_v23 = vadd.f32 %v12320_v62, %v1663_v39 }
 0x4b7   :  { %v1665_v59 = vpop.f32.mrf.mxu1 }
 0x4b8   :  { %v12477_v55 = vpack.c.bf16 %v2081_v2, %v2080_v58  ;;  %v1666_v12 = vadd.f32 %v1665_v59, %v12313_v57  ;;  %9162 = vmatpush3.bf16.msra.mxu1 %v10450_v27  ;;  %v2048_v52 = vadd.f32 %v12432_v31, %v2007_v23 }
 0x4b9   :  { %v8870_v37 = vpop.f32.mrf.mxu1  ;;  %9163 = vmatprep.subr.bf16.mxu1 %v14110_v21 }
 0x4ba   :  { %v2008_v5 = vadd.f32 %v12326_v4, %v1666_v12  ;;  %9028 = vmatmul.mubr.bf16.gmra.mxu1 %v12477_v55  ;;  %9108 = vmatmul.mubr.bf16.gmra.mxu0 %v12477_v55  ;;  %v2082_v4 = vmax.f32 %v2048_v52, 0.0 }
 0x4bb   :  { %v1670_v11 = vpop.f32.mrf.mxu1  ;;  %9031 = vmatprep.mubr.msk.bf16.mxu1 %vm11513_vm0, %v14110_v21  ;;  %9111 = vmatprep.mubr.msk.bf16.mxu0 %vm11513_vm0, %v14110_v21 }
 0x4bc   :  { %v2049_v57 = vadd.f32 %v12432_v31, %v2008_v5  ;;  %v1671_v62 = vadd.f32 %v1670_v11, %v12317_v61  ;;  %9164 = vmatpush3.bf16.msra.mxu1 %v10451_v35 }
 0x4bd   :  { %v8873_v40 = vpop.f32.mrf.mxu1  ;;  %9165 = vmatprep.subr.bf16.mxu1 %v14110_v21 }
 0x4be   :  { %v2083_v30 = vmax.f32 %v2049_v57, 0.0  ;;  %v2009_v34 = vadd.f32 %v12331_v63, %v1671_v62 }
 0x4bf   :  { %v1673_v17 = vpop.f32.mrf.mxu1 }
 0x4c0   :  { %v12493_v46 = vpack.c.bf16 %v2083_v30, %v2082_v4  ;;  %v1674_v13 = vadd.f32 %v1673_v17, %v12324_v3  ;;  %9166 = vmatpush3.bf16.msra.mxu1 %v10452_v26  ;;  %v2050_v61 = vadd.f32 %v12432_v31, %v2009_v34 }
 0x4c1   :  { %v8874_v33 = vpop.f32.mrf.mxu1  ;;  %9167 = vmatprep.subr.bf16.mxu1 %v14110_v21 }
 0x4c2   :  { %v2010_v24 = vadd.f32 %v12337_v20, %v1674_v13  ;;  %9032 = vmatmul.mubr.bf16.gmra.mxu1 %v12493_v46  ;;  %9112 = vmatmul.mubr.bf16.gmra.mxu0 %v12493_v46  ;;  %v2084_v20 = vmax.f32 %v2050_v61, 0.0 }
 0x4c3   :  { %v1678_v38 = vpop.f32.mrf.mxu1  ;;  %9035 = vmatprep.mubr.msk.bf16.mxu1 %vm11513_vm0, %v14110_v21  ;;  %9115 = vmatprep.mubr.msk.bf16.mxu0 %vm11513_vm0, %v14110_v21 }
 0x4c4   :  { %v2051_v3 = vadd.f32 %v12432_v31, %v2010_v24  ;;  %v1679_v63 = vadd.f32 %v1678_v38, %v12328_v54  ;;  %9168 = vmatpush3.bf16.msra.mxu1 %v10453_v1 }
 0x4c5   :  { %v8877_v7 = vpop.f32.mrf.mxu1  ;;  %9169 = vmatprep.subr.bf16.mxu1 %v14110_v21 }
 0x4c6   :  { %v2085_v47 = vmax.f32 %v2051_v3, 0.0  ;;  %v2011_v45 = vadd.f32 %v12342_v0, %v1679_v63 }
 0x4c7   :  { %v1681_v39 = vpop.f32.mrf.mxu1 }
 0x4c8   :  { %v12509_v27 = vpack.c.bf16 %v2085_v47, %v2084_v20  ;;  %v1682_v60 = vadd.f32 %v1681_v39, %v12335_v10  ;;  %9170 = vmatpush3.bf16.msra.mxu1 %v10454_v16  ;;  %v2052_v54 = vadd.f32 %v12432_v31, %v2011_v45 }
 0x4c9   :  { %v8878_v58 = vpop.f32.mrf.mxu1  ;;  %9367 = vmatprep.subr.bf16.mxu1 %v14110_v21 }
 0x4ca   :  { %v2012_v2 = vadd.f32 %v12348_v15, %v1682_v60  ;;  %9036 = vmatmul.mubr.bf16.gmra.mxu1 %v12509_v27  ;;  %9116 = vmatmul.mubr.bf16.gmra.mxu0 %v12509_v27  ;;  %v2086_v12 = vmax.f32 %v2052_v54, 0.0 }
 0x4cb   :  { %v1686_v23 = vpop.f32.mrf.mxu1  ;;  %9039 = vmatprep.mubr.msk.bf16.mxu1 %vm11513_vm0, %v14110_v21  ;;  %9119 = vmatprep.mubr.msk.bf16.mxu0 %vm11513_vm0, %v14110_v21 }
 0x4cc   :  { %v2053_v10 = vadd.f32 %v12432_v31, %v2012_v2  ;;  %v1687_v0 = vadd.f32 %v1686_v23, %v12339_v8 }
 0x4cd   :  { %v8881_v59 = vpop.f32.mrf.mxu1 }
 0x4ce   :  { %v2087_v35 = vmax.f32 %v2053_v10, 0.0  ;;  %v2013_v15 = vadd.f32 %v12353_v49, %v1687_v0 }
 0x4cf   :  { %v1689_v37 = vpop.f32.mrf.mxu1 }
 0x4d0   :  { %v12524_v52 = vpack.c.bf16 %v2087_v35, %v2086_v12  ;;  %v1690_v5 = vadd.f32 %v1689_v37, %v12346_v14  ;;  %v2054_v57 = vadd.f32 %v12432_v31, %v2013_v15 }
 0x4d1   :  { %v8882_v11 = vpop.f32.mrf.mxu1 }
 0x4d2   :  { %v2014_v62 = vadd.f32 %v12359_v28, %v1690_v5  ;;  %9040 = vmatmul.mubr.bf16.gmra.mxu1 %v12524_v52  ;;  %9120 = vmatmul.mubr.bf16.gmra.mxu0 %v12524_v52  ;;  %v2088_v40 = vmax.f32 %v2054_v57, 0.0 }
 0x4d3   :  { %v1694_v8 = vpop.f32.mrf.mxu1  ;;  %9043 = vmatprep.mubr.msk.bf16.mxu1 %vm11513_vm0, %v14110_v21  ;;  %9123 = vmatprep.mubr.msk.bf16.mxu0 %vm11513_vm0, %v14110_v21 }
 0x4d4   :  { %v2055_v49 = vadd.f32 %v12432_v31, %v2014_v62  ;;  %v1695_v14 = vadd.f32 %v1694_v8, %v12350_v19 }
 0x4d5   :  { %v8885_v26 = vpop.f32.mrf.mxu1 }
 0x4d6   :  { %v2089_v4 = vmax.f32 %v2055_v49, 0.0  ;;  %v2015_v28 = vadd.f32 %v12364_v29, %v1695_v14  ;;  %v14111_v26 = vld [vmem:[#allocation104_spill] sm:$0xff] }
 0x4d7   :  { %v1697_v30 = vpop.f32.mrf.mxu1 }
 0x4d8   :  { %v12538_v34 = vpack.c.bf16 %v2089_v4, %v2088_v40  ;;  %v1698_v17 = vadd.f32 %v1697_v30, %v12357_v25  ;;  %v2056_v1 = vadd.f32 %v12432_v31, %v2015_v28  ;;  %v14112_v28 = vld [vmem:[#allocation102_spill] sm:$0xff] }
 0x4d9   :  { %v8886_v13 = vpop.f32.mrf.mxu1 }
 0x4da   :  { %v2016_v33 = vadd.f32 %v12370_v44, %v1698_v17  ;;  %9044 = vmatmul.mubr.bf16.gmra.mxu1 %v12538_v34  ;;  %9124 = vmatmul.mubr.bf16.gmra.mxu0 %v12538_v34  ;;  %v2090_v24 = vmax.f32 %v2056_v1, 0.0  ;;  %v14113_v1 = vld [vmem:[#allocation106_spill] sm:$0xff] }
 0x4db   :  { %v1702_v19 = vpop.f32.mrf.mxu1  ;;  %9047 = vmatprep.mubr.msk.bf16.mxu1 %vm11513_vm0, %v14110_v21  ;;  %9127 = vmatprep.mubr.msk.bf16.mxu0 %vm11513_vm0, %v14110_v21 }
 0x4dc   :  { %v2057_v29 = vadd.f32 %v12432_v31, %v2016_v33  ;;  %v1703_v25 = vadd.f32 %v1702_v19, %v12361_v36 }
 0x4dd   :  { %v8889_v61 = vpop.f32.mrf.mxu1 }
 0x4de   :  { %v2091_v38 = vmax.f32 %v2057_v29, 0.0  ;;  %v2017_v44 = vadd.f32 %v12374_v56, %v1703_v25  ;;  %v14114_v29 = vld [vmem:[#allocation103_spill] sm:$0xff] }
 0x4df   :  { %v1705_v3 = vpop.f32.mrf.mxu1 }
 0x4e0   :  { %v12552_v63 = vpack.c.bf16 %v2091_v38, %v2090_v24  ;;  %v1706_v16 = vadd.f32 %v1705_v3, %v12368_v42  ;;  %v2058_v20 = vadd.f32 %v12432_v31, %v2017_v44  ;;  %v14115_v44 = vld [vmem:[#allocation108_spill] sm:$0xff] }
 0x4e1   :  { %v8890_v7 = vpop.f32.mrf.mxu1 }
 0x4e2   :  { %v2018_v47 = vadd.f32 %v12378_v51, %v1706_v16  ;;  %9048 = vmatmul.mubr.bf16.gmra.mxu1 %v12552_v63  ;;  %9128 = vmatmul.mubr.bf16.gmra.mxu0 %v12552_v63  ;;  %v2092_v39 = vmax.f32 %v2058_v20, 0.0  ;;  %v10455_v7 = vld [vmem:[#allocation11 + $0x78] sm:$0xff]  }
 0x4e3   :  { %v1710_v36 = vpop.f32.mrf.mxu1  ;;  %9051 = vmatprep.mubr.msk.bf16.mxu1 %vm11513_vm0, %v14110_v21  ;;  %9131 = vmatprep.mubr.msk.bf16.mxu0 %vm11513_vm0, %v14110_v21 }
 0x4e4   :  { %v2059_v56 = vadd.f32 %v12432_v31, %v2018_v47  ;;  %v1711_v42 = vadd.f32 %v1710_v36, %v12372_v53  ;;  %v14116_v47 = vld [vmem:[#allocation105_spill] sm:$0xff]  ;;  %9232 = vmatpush3.bf16.msra.mxu0 %v10455_v7 }
 0x4e5   :  { %v8893_v45 = vpop.f32.mrf.mxu1  ;;  %9233 = vmatprep.subr.bf16.mxu0 %v14110_v21 }
 0x4e6   :  { %v2093_v60 = vmax.f32 %v2059_v56, 0.0  ;;  %v2019_v51 = vadd.f32 %v12382_v48, %v1711_v42  ;;  %v14117_v45 = vld [vmem:[#allocation110_spill] sm:$0xff] }
 0x4e7   :  { %v1713_v58 = vpop.f32.mrf.mxu1 }
 0x4e8   :  { %v12566_v54 = vpack.c.bf16 %v2093_v60, %v2092_v39  ;;  %v1714_v2 = vadd.f32 %v1713_v58, %v12376_v43  ;;  %v2060_v10 = vadd.f32 %v12432_v31, %v2019_v51  ;;  %v14118_v58 = vld [vmem:[#allocation107_spill] sm:$0xff] }
 0x4e9   :  { %v8894_v23 = vpop.f32.mrf.mxu1 }
 0x4ea   :  { %v2020_v0 = vadd.f32 %v12386_v9, %v1714_v2  ;;  %9052 = vmatmul.mubr.bf16.gmra.mxu1 %v12566_v54  ;;  %9132 = vmatmul.mubr.bf16.gmra.mxu0 %v12566_v54  ;;  %v2094_v12 = vmax.f32 %v2060_v10, 0.0 }
 0x4eb   :  { %v1718_v53 = vpop.f32.mrf.mxu1  ;;  %9055 = vmatprep.mubr.msk.bf16.mxu1 %vm11513_vm0, %v14110_v21  ;;  %9135 = vmatprep.mubr.msk.bf16.mxu0 %vm11513_vm0, %v14110_v21 }
 0x4ec   :  { %v2061_v48 = vadd.f32 %v12432_v31, %v2020_v0  ;;  %v1719_v43 = vadd.f32 %v1718_v53, %v12380_v6  ;;  %v14119_v53 = vld [vmem:[#allocation112_spill] sm:$0xff] }
 0x4ed   :  { %v8897_v59 = vpop.f32.mrf.mxu1 }
 0x4ee   :  { %v2095_v35 = vmax.f32 %v2061_v48, 0.0  ;;  %v2021_v9 = vadd.f32 %v12390_v22, %v1719_v43 }
 0x4ef   :  { %v1721_v15 = vpop.f32.mrf.mxu1 }
 0x4f0   :  { %v12580_v37 = vpack.c.bf16 %v2095_v35, %v2094_v12  ;;  %v1722_v5 = vadd.f32 %v1721_v15, %v12384_v41  ;;  %v2062_v57 = vadd.f32 %v12432_v31, %v2021_v9  ;;  %v14120_v12 = vld [vmem:[#allocation109_spill] sm:$0xff] }
 0x4f1   :  { %v8898_v11 = vpop.f32.mrf.mxu1 }
 0x4f2   :  { %v2022_v62 = vadd.f32 %v12394_v32, %v1722_v5  ;;  %9056 = vmatmul.mubr.bf16.gmra.mxu1 %v12580_v37  ;;  %9136 = vmatmul.mubr.bf16.gmra.mxu0 %v12580_v37  ;;  %v2096_v49 = vmax.f32 %v2062_v57, 0.0  ;;  %v14121_v5 = vld [vmem:[#allocation114_spill] sm:$0xff] }
 0x4f3   :  { %v1726_v6 = vpop.f32.mrf.mxu1  ;;  %9059 = vmatprep.mubr.msk.bf16.mxu1 %vm11513_vm0, %v14110_v21  ;;  %9139 = vmatprep.mubr.msk.bf16.mxu0 %vm11513_vm0, %v14110_v21 }
 0x4f4   :  { %v2063_v22 = vadd.f32 %v12432_v31, %v2022_v62  ;;  %v1727_v41 = vadd.f32 %v1726_v6, %v12388_v18  ;;  %v14122_v6 = vld [vmem:[#allocation111_spill] sm:$0xff] }
 0x4f5   :  { %v8901_v8 = vpop.f32.mrf.mxu1 }
 0x4f6   :  { %v2097_v14 = vmax.f32 %v2063_v22, 0.0  ;;  %v2023_v32 = vadd.f32 %v14111_v26, %v1727_v41 }
 0x4f7   :  { %v1729_v40 = vpop.f32.mrf.mxu1 }
 0x4f8   :  { %v12594_v4 = vpack.c.bf16 %v2097_v14, %v2096_v49  ;;  %v1730_v30 = vadd.f32 %v1729_v40, %v14112_v28  ;;  %v2064_v13 = vadd.f32 %v12432_v31, %v2023_v32  ;;  %v14123_v14 = vld [vmem:[#allocation116_spill] sm:$0xff]  ;;  %v10456_v40 = vld [vmem:[#allocation11 + $0x70] sm:$0xff]  }
 0x4f9   :  { %v8902_v17 = vpop.f32.mrf.mxu1  ;;  %9234 = vmatpush3.bf16.msra.mxu0 %v10456_v40 }
 0x4fa   :  { %v2024_v33 = vadd.f32 %v14113_v1, %v1730_v30  ;;  %9060 = vmatmul.mubr.bf16.gmra.mxu1 %v12594_v4  ;;  %9140 = vmatmul.mubr.bf16.gmra.mxu0 %v12594_v4  ;;  %v2098_v24 = vmax.f32 %v2064_v13, 0.0  ;;  %v14124_v30 = vld [vmem:[#allocation113_spill] sm:$0xff] }
 0x4fb   :  { %v1734_v18 = vpop.f32.mrf.mxu1  ;;  %9063 = vmatprep.mubr.msk.bf16.mxu1 %vm11513_vm0, %v14110_v21  ;;  %9143 = vmatprep.mubr.msk.bf16.mxu0 %vm11513_vm0, %v14110_v21 }
 0x4fc   :  { %v2065_v19 = vadd.f32 %v12432_v31, %v2024_v33  ;;  %v1735_v25 = vadd.f32 %v1734_v18, %v14114_v29  ;;  %v14125_v33 = vld [vmem:[#allocation118_spill] sm:$0xff]  ;;  %9235 = vmatprep.subr.bf16.mxu0 %v14110_v21 }
 0x4fd   :  { %v8905_v61 = vpop.f32.mrf.mxu1 }
 0x4fe   :  { %v2099_v38 = vmax.f32 %v2065_v19, 0.0  ;;  %v2025_v3 = vadd.f32 %v14115_v44, %v1735_v25  ;;  %v14126_v25 = vld [vmem:[#allocation115_spill] sm:$0xff] }
 0x4ff   :  { %v1737_v16 = vpop.f32.mrf.mxu1 }
 0x500   :  { %v12608_v20 = vpack.c.bf16 %v2099_v38, %v2098_v24  ;;  %v1738_v36 = vadd.f32 %v1737_v16, %v14116_v47  ;;  %v2066_v42 = vadd.f32 %v12432_v31, %v2025_v3  ;;  %v14127_v3 = vld [vmem:[#allocation119_spill] sm:$0xff] }
 0x501   :  { %v8906_v56 = vpop.f32.mrf.mxu1 }
 0x502   :  { %v2026_v39 = vadd.f32 %v14117_v45, %v1738_v36  ;;  %9064 = vmatmul.mubr.bf16.gmra.mxu1 %v12608_v20  ;;  %9144 = vmatmul.mubr.bf16.gmra.mxu0 %v12608_v20  ;;  %v2100_v10 = vmax.f32 %v2066_v42, 0.0  ;;  %v14128_v36 = vld [vmem:[#allocation117_spill] sm:$0xff] }
 0x503   :  { %v1742_v60 = vpop.f32.mrf.mxu1  ;;  %9067 = vmatprep.mubr.msk.bf16.mxu1 %vm11513_vm0, %v14110_v21  ;;  %9147 = vmatprep.mubr.msk.bf16.mxu0 %vm11513_vm0, %v14110_v21 }
 0x504   :  { %v2067_v51 = vadd.f32 %v12432_v31, %v2026_v39  ;;  %v1743_v2 = vadd.f32 %v1742_v60, %v14118_v58  ;;  %v14129_v39 = vld [vmem:[#allocation120_spill] sm:$0xff]  ;;  %v10457_v58 = vld [vmem:[#allocation11 + $0x68] sm:$0xff]  }
 0x505   :  { %v8909_v23 = vpop.f32.mrf.mxu1  ;;  %9236 = vmatpush3.bf16.msra.mxu0 %v10457_v58 }
 0x506   :  { %v2101_v0 = vmax.f32 %v2067_v51, 0.0  ;;  %v2027_v48 = vadd.f32 %v14119_v53, %v1743_v2  ;;  %9237 = vmatprep.subr.bf16.mxu0 %v14110_v21 }
 0x507   :  { %v1745_v43 = vpop.f32.mrf.mxu1 }
 0x508   :  { %v12623_v59 = vpack.c.bf16 %v2101_v0, %v2100_v10  ;;  %v1746_v35 = vadd.f32 %v1745_v43, %v14120_v12  ;;  %v2068_v15 = vadd.f32 %v12432_v31, %v2027_v48  ;;  %v10458_v0 = vld [vmem:[#allocation11 + $0x60] sm:$0xff]  }
 0x509   :  { %v8910_v9 = vpop.f32.mrf.mxu1  ;;  %9238 = vmatpush3.bf16.msra.mxu0 %v10458_v0  ;;  %v10466_v12 = vld [vmem:[#allocation11 + $0xa0] sm:$0xff]  }
 0x50a   :  { %v2028_v11 = vadd.f32 %v14121_v5, %v1746_v35  ;;  %9068 = vmatmul.mubr.bf16.gmra.mxu1 %v12623_v59  ;;  %9148 = vmatmul.mubr.bf16.gmra.mxu0 %v12623_v59  ;;  %v2102_v8 = vmax.f32 %v2068_v15, 0.0  ;;  %v10464_v15 = vld [vmem:[#allocation11 + $0x40] sm:$0xff]  }
 0x50b   :  { %v1750_v57 = vpop.f32.mrf.mxu1  ;;  %9071 = vmatprep.mubr.msk.bf16.mxu1 %vm11513_vm0, %v14110_v21  ;;  %9151 = vmatprep.mubr.msk.bf16.mxu0 %vm11513_vm0, %v14110_v21 }
 0x50c   :  { %v2069_v62 = vadd.f32 %v12432_v31, %v2028_v11  ;;  %v1751_v22 = vadd.f32 %v1750_v57, %v14122_v6  ;;  %9239 = vmatprep.subr.bf16.mxu0 %v14110_v21  ;;  %v10467_v57 = vld [vmem:[#allocation11 + $0x98] sm:$0xff]  }
 0x50d   :  { %v8913_v41 = vpop.f32.mrf.mxu1 }
 0x50e   :  { %v2103_v49 = vmax.f32 %v2069_v62, 0.0  ;;  %v2029_v26 = vadd.f32 %v14123_v14, %v1751_v22 }
 0x50f   :  { %v1753_v32 = vpop.f32.mrf.mxu1 }
 0x510   :  { %v12637_v28 = vpack.c.bf16 %v2103_v49, %v2102_v8  ;;  %v1754_v17 = vadd.f32 %v1753_v32, %v14124_v30  ;;  %v2070_v1 = vadd.f32 %v12432_v31, %v2029_v26  ;;  %v10468_v8 = vld [vmem:[#allocation11 + $0x90] sm:$0xff]   ;;  %v10470_v30 = vld [vmem:[#allocation11 + $0x88] sm:$0xff]  }
 0x511   :  { %v8914_v13 = vpop.f32.mrf.mxu1 }
 0x512   :  { %v2030_v18 = vadd.f32 %v14125_v33, %v1754_v17  ;;  %9072 = vmatmul.mubr.bf16.gmra.mxu1 %v12637_v28  ;;  %9152 = vmatmul.mubr.bf16.gmra.mxu0 %v12637_v28  ;;  %v2104_v38 = vmax.f32 %v2070_v1, 0.0 }
 0x513   :  { %v1758_v19 = vpop.f32.mrf.mxu1  ;;  %9075 = vmatprep.mubr.msk.bf16.mxu1 %vm11513_vm0, %v14110_v21  ;;  %9247 = vmatprep.mubr.msk.bf16.mxu0 %vm11513_vm0, %v14110_v21 }
 0x514   :  { %v2071_v29 = vadd.f32 %v12432_v31, %v2030_v18  ;;  %v1759_v61 = vadd.f32 %v1758_v19, %v14126_v25  ;;  %v10471_v18 = vld [vmem:[#allocation11 + $0x80] sm:$0xff]  }
 0x515   :  { %v8917_v24 = vpop.f32.mrf.mxu1 }
 0x516   :  { %v2105_v44 = vmax.f32 %v2071_v29, 0.0  ;;  %v2031_v16 = vadd.f32 %v14127_v3, %v1759_v61 }
 0x517   :  { %v1761_v7 = vpop.f32.mrf.mxu1 }
 0x518   :  { %v12652_v47 = vpack.c.bf16 %v2105_v44, %v2104_v38  ;;  %v1762_v56 = vadd.f32 %v1761_v7, %v14128_v36  ;;  %v2072_v45 = vadd.f32 %v12432_v31, %v2031_v16 }
 0x519   :  { %v8918_v42 = vpop.f32.mrf.mxu1 }
 0x51a   :  { %v2032_v60 = vadd.f32 %v14129_v39, %v1762_v56  ;;  %9076 = vmatmul.mubr.bf16.gmra.mxu1 %v12652_v47  ;;  %v2106_v2 = vmax.f32 %v2072_v45, 0.0 }
 0x51b   :  { %9171 = vmatprep.mubr.msk.bf16.mxu1 %vm11513_vm0, %v14110_v21 }
 0x51c   :  { %v2073_v51 = vadd.f32 %v12432_v31, %v2032_v60  ;;  %v10459_v31 = vld [vmem:[#allocation11 + $0x58] sm:$0xff]  }
 0x51d   :  { %9240 = vmatpush3.bf16.msra.mxu0 %v10459_v31 }
 0x51e   :  { %v2107_v23 = vmax.f32 %v2073_v51, 0.0  ;;  %9241 = vmatprep.subr.bf16.mxu0 %v14110_v21 }
 0x520   :  { %v12662_v10 = vpack.c.bf16 %v2107_v23, %v2106_v2 }
 0x522   :  { %9172 = vmatmul.mubr.bf16.vlgmr.msra.gmra.mxu1 %v12461_v50  ;;  %v10460_v50 = vld [vmem:[#allocation11 + $0x50] sm:$0xff]  }
 0x523   :  { %9175 = vmatprep.mubr.msk.bf16.mxu1 %vm11513_vm0, %v14110_v21  ;;  %9242 = vmatpush3.bf16.msra.mxu0 %v10460_v50 }
 0x524   :  { %9243 = vmatprep.subr.bf16.mxu0 %v14110_v21 }
 0x52a   :  { %9176 = vmatmul.mubr.bf16.gmra.mxu1 %v12477_v55  ;;  %v10461_v55 = vld [vmem:[#allocation11 + $0x48] sm:$0xff]  }
 0x52b   :  { %9179 = vmatprep.mubr.msk.bf16.mxu1 %vm11513_vm0, %v14110_v21  ;;  %9244 = vmatpush3.bf16.msra.mxu0 %v10461_v55 }
 0x52c   :  { %9245 = vmatprep.subr.bf16.mxu0 %v14110_v21 }
 0x52f   :  { %9246 = vmatpush3.bf16.msra.mxu0 %v10464_v15 }
 0x530   :  { %9299 = vmatprep.subr.bf16.mxu0 %v14110_v21 }
 0x532   :  { %9180 = vmatmul.mubr.bf16.gmra.mxu1 %v12493_v46  ;;  %v10462_v46 = vld [vmem:[#allocation11 + $0xb8] sm:$0xff]  }
 0x533   :  { %9183 = vmatprep.mubr.msk.bf16.mxu1 %vm11513_vm0, %v14110_v21  ;;  %9368 = vmatpush3.bf16.msra.mxu1 %v10462_v46 }
 0x534   :  { %9369 = vmatprep.subr.bf16.mxu1 %v14110_v21 }
 0x53a   :  { %9184 = vmatmul.mubr.bf16.gmra.mxu1 %v12509_v27 }
 0x53b   :  { %9187 = vmatprep.mubr.msk.bf16.mxu1 %vm11513_vm0, %v14110_v21 }
 0x542   :  { %9188 = vmatmul.mubr.bf16.gmra.mxu1 %v12524_v52  ;;  %v10463_v52 = vld [vmem:[#allocation11 + $0xb0] sm:$0xff]  }
 0x543   :  { %9191 = vmatprep.mubr.msk.bf16.mxu1 %vm11513_vm0, %v14110_v21  ;;  %9370 = vmatpush3.bf16.msra.mxu1 %v10463_v52 }
 0x544   :  { %9371 = vmatprep.subr.bf16.mxu1 %v14110_v21 }
 0x54a   :  { %9192 = vmatmul.mubr.bf16.gmra.mxu1 %v12538_v34 }
 0x54b   :  { %9195 = vmatprep.mubr.msk.bf16.mxu1 %vm11513_vm0, %v14110_v21 }
 0x552   :  { %9196 = vmatmul.mubr.bf16.gmra.mxu1 %v12552_v63 }
 0x553   :  { %9199 = vmatprep.mubr.msk.bf16.mxu1 %vm11513_vm0, %v14110_v21 }
 0x55a   :  { %9200 = vmatmul.mubr.bf16.gmra.mxu1 %v12566_v54  ;;  %v10465_v54 = vld [vmem:[#allocation11 + $0xa8] sm:$0xff]  }
 0x55b   :  { %9203 = vmatprep.mubr.msk.bf16.mxu1 %vm11513_vm0, %v14110_v21  ;;  %9372 = vmatpush3.bf16.msra.mxu1 %v10465_v54 }
 0x55c   :  { %9373 = vmatprep.subr.bf16.mxu1 %v14110_v21 }
 0x55f   :  { %9374 = vmatpush3.bf16.msra.mxu1 %v10466_v12 }
 0x560   :  { %9375 = vmatprep.subr.bf16.mxu1 %v14110_v21 }
 0x562   :  { %v2441_v27 = vpop.f32.mrf.mxu0  ;;  %9204 = vmatmul.mubr.bf16.gmra.mxu1 %v12580_v37 }
 0x563   :  { %9207 = vmatprep.mubr.msk.bf16.mxu1 %vm11513_vm0, %v14110_v21  ;;  %9376 = vmatpush3.bf16.msra.mxu1 %v10467_v57 }
 0x564   :  { %v9097_v34 = vpop.f32.mrf.mxu0  ;;  %9377 = vmatprep.subr.bf16.mxu1 %v14110_v21 }
 0x566   :  { %v2444_v63 = vpop.f32.mrf.mxu0 }
 0x567   :  { %9378 = vmatpush3.bf16.msra.mxu1 %v10468_v8 }
 0x568   :  { %v9098_v53 = vpop.f32.mrf.mxu0  ;;  %9379 = vmatprep.subr.bf16.mxu1 %v14110_v21 }
 0x56a   :  { %v2240_v48 = vpop.f32.mrf.mxu1  ;;  %v2449_v43 = vpop.f32.mrf.mxu0  ;;  %9208 = vmatmul.mubr.bf16.gmra.mxu1 %v12594_v4 }
 0x56b   :  { %v12699_v37 = vadd.f32 %v2441_v27, %v2240_v48  ;;  %9211 = vmatprep.mubr.msk.bf16.mxu1 %vm11513_vm0, %v14110_v21  ;;  %9380 = vmatpush3.bf16.msra.mxu1 %v10470_v30 }
 0x56c   :  { %v9021_v35 = vpop.f32.mrf.mxu1  ;;  %v9101_v9 = vpop.f32.mrf.mxu0  ;;  %9381 = vmatprep.subr.bf16.mxu1 %v14110_v21 }
 0x56e   :  { %v2243_v5 = vpop.f32.mrf.mxu1  ;;  %v2452_v11 = vpop.f32.mrf.mxu0 }
 0x56f   :  { %v12704_v62 = vadd.f32 %v2444_v63, %v2243_v5  ;;  %9382 = vmatpush3.bf16.msra.mxu1 %v10471_v18 }
 0x570   :  { %v9022_v6 = vpop.f32.mrf.mxu1  ;;  %v9102_v4 = vpop.f32.mrf.mxu0  ;;  %9495 = vmatprep.subr.bf16.mxu1 %v14110_v21 }
 0x572   :  { %v2248_v22 = vpop.f32.mrf.mxu1  ;;  %v2457_v41 = vpop.f32.mrf.mxu0  ;;  %9212 = vmatmul.mubr.bf16.gmra.mxu1 %v12608_v20 }
 0x573   :  { %v12709_v49 = vadd.f32 %v2449_v43, %v2248_v22  ;;  %9215 = vmatprep.mubr.msk.bf16.mxu1 %vm11513_vm0, %v14110_v21 }
 0x574   :  { %v9025_v14 = vpop.f32.mrf.mxu1  ;;  %v9105_v26 = vpop.f32.mrf.mxu0 }
 0x576   :  { %v2251_v32 = vpop.f32.mrf.mxu1  ;;  %v2460_v40 = vpop.f32.mrf.mxu0 }
 0x577   :  { %v12714_v17 = vadd.f32 %v2452_v11, %v2251_v32 }
 0x578   :  { %v9026_v13 = vpop.f32.mrf.mxu1  ;;  %v9106_v1 = vpop.f32.mrf.mxu0 }
 0x57a   :  { %v2256_v20 = vpop.f32.mrf.mxu1  ;;  %v2465_v33 = vpop.f32.mrf.mxu0  ;;  %9216 = vmatmul.mubr.bf16.gmra.mxu1 %v12623_v59 }
 0x57b   :  { %v12718_v19 = vadd.f32 %v2457_v41, %v2256_v20  ;;  %9219 = vmatprep.mubr.msk.bf16.mxu1 %vm11513_vm0, %v14110_v21 }
 0x57c   :  { %v9029_v29 = vpop.f32.mrf.mxu1  ;;  %v9109_v25 = vpop.f32.mrf.mxu0 }
 0x57e   :  { %v2259_v61 = vpop.f32.mrf.mxu1  ;;  %v2468_v24 = vpop.f32.mrf.mxu0 }
 0x57f   :  { %v12723_v38 = vadd.f32 %v2460_v40, %v2259_v61 }
 0x580   :  { %v9030_v44 = vpop.f32.mrf.mxu1  ;;  %v9110_v3 = vpop.f32.mrf.mxu0 }
 0x582   :  { %v2264_v16 = vpop.f32.mrf.mxu1  ;;  %v2473_v7 = vpop.f32.mrf.mxu0  ;;  %9220 = vmatmul.mubr.bf16.gmra.mxu1 %v12637_v28 }
 0x583   :  { %v12726_v59 = vadd.f32 %v2465_v33, %v2264_v16  ;;  %9223 = vmatprep.mubr.msk.bf16.mxu1 %vm11513_vm0, %v14110_v21 }
 0x584   :  { %v9033_v36 = vpop.f32.mrf.mxu1  ;;  %v9113_v56 = vpop.f32.mrf.mxu0 }
 0x586   :  { %v2267_v42 = vpop.f32.mrf.mxu1  ;;  %v2476_v45 = vpop.f32.mrf.mxu0 }
 0x587   :  { %v12730_v39 = vadd.f32 %v2468_v24, %v2267_v42 }
 0x588   :  { %v9034_v60 = vpop.f32.mrf.mxu1  ;;  %v9114_v51 = vpop.f32.mrf.mxu0 }
 0x58a   :  { %v2272_v58 = vpop.f32.mrf.mxu1  ;;  %v2481_v2 = vpop.f32.mrf.mxu0  ;;  %9224 = vmatmul.mubr.bf16.gmra.mxu1 %v12652_v47 }
 0x58b   :  { %v12733_v23 = vadd.f32 %v2473_v7, %v2272_v58  ;;  %9227 = vmatprep.mubr.msk.bf16.mxu1 %vm11513_vm0, %v14110_v21 }
 0x58c   :  { %v9037_v28 = vpop.f32.mrf.mxu1  ;;  %v9117_v0 = vpop.f32.mrf.mxu0 }
 0x58e   :  { %v2275_v31 = vpop.f32.mrf.mxu1  ;;  %v2484_v50 = vpop.f32.mrf.mxu0 }
 0x58f   :  { %v12737_v55 = vadd.f32 %v2476_v45, %v2275_v31 }
 0x590   :  { %v9038_v46 = vpop.f32.mrf.mxu1  ;;  %v9118_v27 = vpop.f32.mrf.mxu0 }
 0x592   :  { %v2280_v52 = vpop.f32.mrf.mxu1  ;;  %v2489_v34 = vpop.f32.mrf.mxu0  ;;  %9228 = vmatmul.mubr.bf16.gmra.mxu1 %v12662_v10 }
 0x593   :  { %v12740_v63 = vadd.f32 %v2481_v2, %v2280_v52  ;;  %9383 = vmatprep.mubr.msk.bf16.mxu1 %vm11513_vm0, %v14110_v21 }
 0x594   :  { %v9041_v47 = vpop.f32.mrf.mxu1  ;;  %v9121_v54 = vpop.f32.mrf.mxu0 }
 0x596   :  { %v2283_v53 = vpop.f32.mrf.mxu1  ;;  %v2492_v48 = vpop.f32.mrf.mxu0 }
 0x597   :  { %v12744_v43 = vadd.f32 %v2484_v50, %v2283_v53 }
 0x598   :  { %v9042_v12 = vpop.f32.mrf.mxu1  ;;  %v9122_v35 = vpop.f32.mrf.mxu0 }
 0x59a   :  { %v2288_v9 = vpop.f32.mrf.mxu1  ;;  %v2497_v15 = vpop.f32.mrf.mxu0 }
 0x59b   :  { %v12746_v5 = vadd.f32 %v2489_v34, %v2288_v9 }
 0x59c   :  { %v9045_v11 = vpop.f32.mrf.mxu1  ;;  %v9125_v57 = vpop.f32.mrf.mxu0 }
 0x59e   :  { %v2291_v10 = vpop.f32.mrf.mxu1  ;;  %v2500_v6 = vpop.f32.mrf.mxu0 }
 0x59f   :  { %v12748_v4 = vadd.f32 %v2492_v48, %v2291_v10 }
 0x5a0   :  { %v9046_v22 = vpop.f32.mrf.mxu1  ;;  %v9126_v41 = vpop.f32.mrf.mxu0 }
 0x5a2   :  { %v2296_v8 = vpop.f32.mrf.mxu1  ;;  %v2505_v14 = vpop.f32.mrf.mxu0 }
 0x5a3   :  { %v12750_v26 = vadd.f32 %v2497_v15, %v2296_v8 }
 0x5a4   :  { %v9049_v32 = vpop.f32.mrf.mxu1  ;;  %v9129_v40 = vpop.f32.mrf.mxu0 }
 0x5a6   :  { %v2299_v30 = vpop.f32.mrf.mxu1  ;;  %v2508_v13 = vpop.f32.mrf.mxu0 }
 0x5a7   :  { %v12752_v1 = vadd.f32 %v2500_v6, %v2299_v30 }
 0x5a8   :  { %v9050_v20 = vpop.f32.mrf.mxu1  ;;  %v9130_v33 = vpop.f32.mrf.mxu0 }
 0x5aa   :  { %v2304_v18 = vpop.f32.mrf.mxu1  ;;  %v2513_v29 = vpop.f32.mrf.mxu0 }
 0x5ab   :  { %v12754_v25 = vadd.f32 %v2505_v14, %v2304_v18 }
 0x5ac   :  { %v9053_v61 = vpop.f32.mrf.mxu1  ;;  %v9133_v24 = vpop.f32.mrf.mxu0 }
 0x5ae   :  { %v2307_v44 = vpop.f32.mrf.mxu1  ;;  %v2516_v3 = vpop.f32.mrf.mxu0 }
 0x5af   :  { %v12756_v16 = vadd.f32 %v2508_v13, %v2307_v44 }
 0x5b0   :  { %v9054_v7 = vpop.f32.mrf.mxu1  ;;  %v9134_v36 = vpop.f32.mrf.mxu0 }
 0x5b2   :  { %v2312_v56 = vpop.f32.mrf.mxu1  ;;  %v2521_v42 = vpop.f32.mrf.mxu0 }
 0x5b3   :  { %v12758_v45 = vadd.f32 %v2513_v29, %v2312_v56 }
 0x5b4   :  { %v9057_v60 = vpop.f32.mrf.mxu1  ;;  %v9137_v51 = vpop.f32.mrf.mxu0 }
 0x5b6   :  { %v2315_v58 = vpop.f32.mrf.mxu1  ;;  %v2524_v2 = vpop.f32.mrf.mxu0 }
 0x5b7   :  { %v12760_v28 = vadd.f32 %v2516_v3, %v2315_v58 }
 0x5b8   :  { %v9058_v0 = vpop.f32.mrf.mxu1  ;;  %v9138_v31 = vpop.f32.mrf.mxu0 }
 0x5ba   :  { %v2320_v50 = vpop.f32.mrf.mxu1  ;;  %v2529_v46 = vpop.f32.mrf.mxu0 }
 0x5bb   :  { %v12762_v27 = vadd.f32 %v2521_v42, %v2320_v50 }
 0x5bc   :  { %v9061_v52 = vpop.f32.mrf.mxu1  ;;  %v9141_v34 = vpop.f32.mrf.mxu0 }
 0x5be   :  { %v2323_v47 = vpop.f32.mrf.mxu1  ;;  %v2532_v54 = vpop.f32.mrf.mxu0 }
 0x5bf   :  { %v12764_v53 = vadd.f32 %v2524_v2, %v2323_v47 }
 0x5c0   :  { %v9062_v48 = vpop.f32.mrf.mxu1  ;;  %v9142_v12 = vpop.f32.mrf.mxu0 }
 0x5c2   :  { %v2328_v35 = vpop.f32.mrf.mxu1  ;;  %v2537_v9 = vpop.f32.mrf.mxu0 }
 0x5c3   :  { %v12766_v15 = vadd.f32 %v2529_v46, %v2328_v35 }
 0x5c4   :  { %v9065_v11 = vpop.f32.mrf.mxu1  ;;  %v9145_v57 = vpop.f32.mrf.mxu0 }
 0x5c6   :  { %v2331_v10 = vpop.f32.mrf.mxu1  ;;  %v2540_v6 = vpop.f32.mrf.mxu0 }
 0x5c7   :  { %v12768_v22 = vadd.f32 %v2532_v54, %v2331_v10  ;;  %v12783_v54 = vld [vmem:[#allocation10] ss:$0 sm:$0xff] }
 0x5c8   :  { %v9066_v41 = vpop.f32.mrf.mxu1  ;;  %v9146_v8 = vpop.f32.mrf.mxu0 }
 0x5ca   :  { %v2336_v14 = vpop.f32.mrf.mxu1  ;;  %v2545_v32 = vpop.f32.mrf.mxu0 }
 0x5cb   :  { %v12770_v40 = vadd.f32 %v2537_v9, %v2336_v14 }
 0x5cc   :  { %v9069_v30 = vpop.f32.mrf.mxu1  ;;  %v9149_v13 = vpop.f32.mrf.mxu0 }
 0x5ce   :  { %v2339_v20 = vpop.f32.mrf.mxu1  ;;  %v2548_v33 = vpop.f32.mrf.mxu0 }
 0x5cf   :  { %v12772_v18 = vadd.f32 %v2540_v6, %v2339_v20 }
 0x5d0   :  { %v9070_v29 = vpop.f32.mrf.mxu1  ;;  %v9150_v61 = vpop.f32.mrf.mxu0 }
 0x5d2   :  { %v2344_v24 = vpop.f32.mrf.mxu1  ;;  %v2553_v44 = vpop.f32.mrf.mxu0 }
 0x5d3   :  { %v12774_v3 = vadd.f32 %v2545_v32, %v2344_v24 }
 0x5d4   :  { %v9073_v7 = vpop.f32.mrf.mxu1  ;;  %v9153_v36 = vpop.f32.mrf.mxu0 }
 0x5d5   :  { %v10469_v7 = vld [vmem:[#allocation11 + $0x38] sm:$0xff]  }
 0x5d6   :  { %v2347_v56 = vpop.f32.mrf.mxu1  ;;  %v2556_v42 = vpop.f32.mrf.mxu0 }
 0x5d7   :  { %v12776_v60 = vadd.f32 %v2548_v33, %v2347_v56 }
 0x5d8   :  { %v9074_v51 = vpop.f32.mrf.mxu1  ;;  %v9154_v58 = vpop.f32.mrf.mxu0 }
 0x5d9   :  { %v10472_v51 = vld [vmem:[#allocation11 + $0x30] sm:$0xff]  }
 0x5da   :  { %v2352_v2 = vpop.f32.mrf.mxu1 }
 0x5db   :  { %v12778_v0 = vadd.f32 %v2553_v44, %v2352_v2 }
 0x5dc   :  { %v9077_v31 = vpop.f32.mrf.mxu1 }
 0x5de   :  { %v2355_v50 = vpop.f32.mrf.mxu1 }
 0x5df   :  { %v12780_v46 = vadd.f32 %v2556_v42, %v2355_v50 }
 0x5e0   :  { %v9078_v52 = vpop.f32.mrf.mxu1 }
 0x5e2   :  { %v2659_v34 = vpop.f32.mrf.mxu1 }
 0x5e3   :  { %v2778_v47 = vadd.f32 %v2659_v34, %v12699_v37  ;;  %v10473_v34 = vld [vmem:[#allocation11 + $0x28] sm:$0xff]  }
 0x5e4   :  { %v9173_v48 = vpop.f32.mrf.mxu1 }
 0x5e5   :  { %v2815_v35 = vadd.f32 %v12783_v54, %v2778_v47 }
 0x5e6   :  { %v2662_v12 = vpop.f32.mrf.mxu1 }
 0x5e7   :  { %v2779_v9 = vadd.f32 %v2662_v12, %v12704_v62  ;;  %v2845_v6 = vmax.f32 %v2815_v35, 0.0 }
 0x5e8   :  { %v9174_v11 = vpop.f32.mrf.mxu1 }
 0x5e9   :  { %v2816_v57 = vadd.f32 %v12783_v54, %v2779_v9  ;;  %v10474_v9 = vld [vmem:[#allocation11 + $0x20] sm:$0xff]  }
 0x5ea   :  { %v2667_v10 = vpop.f32.mrf.mxu1 }
 0x5eb   :  { %v2846_v41 = vmax.f32 %v2816_v57, 0.0  ;;  %v2780_v8 = vadd.f32 %v2667_v10, %v12709_v49 }
 0x5ec   :  { %v9177_v14 = vpop.f32.mrf.mxu1 }
 0x5ed   :  { %v12789_v32 = vpack.c.bf16 %v2846_v41, %v2845_v6  ;;  %v2817_v30 = vadd.f32 %v12783_v54, %v2780_v8  ;;  %v10475_v8 = vld [vmem:[#allocation11 + $0x18] sm:$0xff]  }
 0x5ee   :  { %v2670_v37 = vpop.f32.mrf.mxu1 }
 0x5ef   :  { %v2781_v13 = vadd.f32 %v2670_v37, %v12714_v17  ;;  %v2847_v29 = vmax.f32 %v2817_v30, 0.0 }
 0x5f0   :  { %v9178_v20 = vpop.f32.mrf.mxu1 }
 0x5f1   :  { %v2818_v33 = vadd.f32 %v12783_v54, %v2781_v13  ;;  %v10476_v20 = vld [vmem:[#allocation11 + $0x10] sm:$0xff]  }
 0x5f2   :  { %v2675_v62 = vpop.f32.mrf.mxu1 }
 0x5f3   :  { %v2848_v61 = vmax.f32 %v2818_v33, 0.0  ;;  %v2782_v24 = vadd.f32 %v2675_v62, %v12718_v19 }
 0x5f4   :  { %v9181_v44 = vpop.f32.mrf.mxu1 }
 0x5f5   :  { %v12795_v36 = vpack.c.bf16 %v2848_v61, %v2847_v29  ;;  %v2819_v56 = vadd.f32 %v12783_v54, %v2782_v24  ;;  %v10477_v44 = vld [vmem:[#allocation11 + $0x8] sm:$0xff]  }
 0x5f6   :  { %v2678_v49 = vpop.f32.mrf.mxu1 }
 0x5f7   :  { %v2783_v42 = vadd.f32 %v2678_v49, %v12723_v38  ;;  %9248 = vmatmul.mubr.bf16.vlgmr.msra.gmra.mxu0 %v12795_v36  ;;  %v2849_v2 = vmax.f32 %v2819_v56, 0.0 }
 0x5f8   :  { %9300 = vmatpush3.bf16.msra.mxu0 %v10469_v7  ;;  %v9182_v17 = vpop.f32.mrf.mxu1  ;;  %9251 = vmatprep.mubr.msk.bf16.mxu0 %vm11513_vm0, %v14110_v21 }
 0x5f9   :  { %v2820_v58 = vadd.f32 %v12783_v54, %v2783_v42  ;;  %9301 = vmatprep.subr.bf16.mxu0 %v14110_v21  ;;  %v10478_v17 = vld [vmem:[#allocation11] sm:$0xff]  }
 0x5fa   :  { %v2683_v19 = vpop.f32.mrf.mxu1 }
 0x5fb   :  { %v2850_v31 = vmax.f32 %v2820_v58, 0.0  ;;  %v2784_v50 = vadd.f32 %v2683_v19, %v12726_v59 }
 0x5fc   :  { %v9185_v52 = vpop.f32.mrf.mxu1  ;;  %9302 = vmatpush3.bf16.msra.mxu0 %v10472_v51 }
 0x5fd   :  { %v12805_v38 = vpack.c.bf16 %v2850_v31, %v2849_v2  ;;  %9303 = vmatprep.subr.bf16.mxu0 %v14110_v21  ;;  %v2821_v48 = vadd.f32 %v12783_v54, %v2784_v50 }
 0x5fe   :  { %v2686_v47 = vpop.f32.mrf.mxu1 }
 0x5ff   :  { %v2785_v12 = vadd.f32 %v2686_v47, %v12730_v39  ;;  %9252 = vmatmul.mubr.bf16.gmra.mxu0 %v12805_v38  ;;  %9384 = vmatmul.mubr.bf16.vlgmr.msra.gmra.mxu1 %v12805_v38  ;;  %v2851_v57 = vmax.f32 %v2821_v48, 0.0 }
 0x600   :  { %v9186_v35 = vpop.f32.mrf.mxu1  ;;  %9255 = vmatprep.mubr.msk.bf16.mxu0 %vm11513_vm0, %v14110_v21  ;;  %9387 = vmatprep.mubr.msk.bf16.mxu1 %vm11513_vm0, %v14110_v21 }
 0x601   :  { %v2822_v59 = vadd.f32 %v12783_v54, %v2785_v12  ;;  %9304 = vmatpush3.bf16.msra.mxu0 %v10473_v34 }
 0x602   :  { %v2691_v11 = vpop.f32.mrf.mxu1  ;;  %9305 = vmatprep.subr.bf16.mxu0 %v14110_v21 }
 0x603   :  { %v2852_v39 = vmax.f32 %v2822_v59, 0.0  ;;  %v2786_v10 = vadd.f32 %v2691_v11, %v12733_v23 }
 0x604   :  { %v9189_v6 = vpop.f32.mrf.mxu1 }
 0x605   :  { %v12819_v41 = vpack.c.bf16 %v2852_v39, %v2851_v57  ;;  %9306 = vmatpush3.bf16.msra.mxu0 %v10474_v9  ;;  %v2823_v37 = vadd.f32 %v12783_v54, %v2786_v10 }
 0x606   :  { %v2694_v14 = vpop.f32.mrf.mxu1  ;;  %9307 = vmatprep.subr.bf16.mxu0 %v14110_v21 }
 0x607   :  { %v2787_v30 = vadd.f32 %v2694_v14, %v12737_v55  ;;  %9256 = vmatmul.mubr.bf16.gmra.mxu0 %v12819_v41  ;;  %9388 = vmatmul.mubr.bf16.gmra.mxu1 %v12819_v41  ;;  %v2853_v62 = vmax.f32 %v2823_v37, 0.0 }
 0x608   :  { %v9190_v13 = vpop.f32.mrf.mxu1  ;;  %9259 = vmatprep.mubr.msk.bf16.mxu0 %vm11513_vm0, %v14110_v21  ;;  %9391 = vmatprep.mubr.msk.bf16.mxu1 %vm11513_vm0, %v14110_v21 }
 0x609   :  { %v2824_v23 = vadd.f32 %v12783_v54, %v2787_v30  ;;  %9308 = vmatpush3.bf16.msra.mxu0 %v10475_v8 }
 0x60a   :  { %v2699_v33 = vpop.f32.mrf.mxu1  ;;  %9309 = vmatprep.subr.bf16.mxu0 %v14110_v21 }
 0x60b   :  { %v2854_v55 = vmax.f32 %v2824_v23, 0.0  ;;  %v2788_v29 = vadd.f32 %v2699_v33, %v12740_v63 }
 0x60c   :  { %v9193_v61 = vpop.f32.mrf.mxu1 }
 0x60d   :  { %v12833_v24 = vpack.c.bf16 %v2854_v55, %v2853_v62  ;;  %9310 = vmatpush3.bf16.msra.mxu0 %v10476_v20  ;;  %v2825_v49 = vadd.f32 %v12783_v54, %v2788_v29 }
 0x60e   :  { %v2702_v7 = vpop.f32.mrf.mxu1  ;;  %9311 = vmatprep.subr.bf16.mxu0 %v14110_v21 }
 0x60f   :  { %v2789_v56 = vadd.f32 %v2702_v7, %v12744_v43  ;;  %9260 = vmatmul.mubr.bf16.gmra.mxu0 %v12833_v24  ;;  %9392 = vmatmul.mubr.bf16.gmra.mxu1 %v12833_v24  ;;  %v2855_v58 = vmax.f32 %v2825_v49, 0.0 }
 0x610   :  { %v9194_v42 = vpop.f32.mrf.mxu1  ;;  %9263 = vmatprep.mubr.msk.bf16.mxu0 %vm11513_vm0, %v14110_v21  ;;  %9395 = vmatprep.mubr.msk.bf16.mxu1 %vm11513_vm0, %v14110_v21 }
 0x611   :  { %v2826_v63 = vadd.f32 %v12783_v54, %v2789_v56  ;;  %9312 = vmatpush3.bf16.msra.mxu0 %v10477_v44 }
 0x612   :  { %v2707_v51 = vpop.f32.mrf.mxu1  ;;  %9313 = vmatprep.subr.bf16.mxu0 %v14110_v21 }
 0x613   :  { %v2856_v43 = vmax.f32 %v2826_v63, 0.0  ;;  %v2790_v19 = vadd.f32 %v2707_v51, %v12746_v5 }
 0x614   :  { %v9197_v2 = vpop.f32.mrf.mxu1 }
 0x615   :  { %v12847_v31 = vpack.c.bf16 %v2856_v43, %v2855_v58  ;;  %9314 = vmatpush3.bf16.msra.mxu0 %v10478_v17  ;;  %v2827_v52 = vadd.f32 %v12783_v54, %v2790_v19 }
 0x616   :  { %v2710_v50 = vpop.f32.mrf.mxu1  ;;  %9435 = vmatprep.subr.bf16.mxu0 %v14110_v21 }
 0x617   :  { %v2791_v34 = vadd.f32 %v2710_v50, %v12748_v4  ;;  %9264 = vmatmul.mubr.bf16.gmra.mxu0 %v12847_v31  ;;  %9396 = vmatmul.mubr.bf16.gmra.mxu1 %v12847_v31  ;;  %v2857_v12 = vmax.f32 %v2827_v52, 0.0 }
 0x618   :  { %v9198_v47 = vpop.f32.mrf.mxu1  ;;  %9267 = vmatprep.mubr.msk.bf16.mxu0 %vm11513_vm0, %v14110_v21  ;;  %9399 = vmatprep.mubr.msk.bf16.mxu1 %vm11513_vm0, %v14110_v21 }
 0x619   :  { %v2828_v5 = vadd.f32 %v12783_v54, %v2791_v34 }
 0x61a   :  { %v2715_v48 = vpop.f32.mrf.mxu1 }
 0x61b   :  { %v2858_v35 = vmax.f32 %v2828_v5, 0.0  ;;  %v2792_v59 = vadd.f32 %v2715_v48, %v12750_v26 }
 0x61c   :  { %v9201_v9 = vpop.f32.mrf.mxu1 }
 0x61d   :  { %v12860_v4 = vpack.c.bf16 %v2858_v35, %v2857_v12  ;;  %v2829_v57 = vadd.f32 %v12783_v54, %v2792_v59 }
 0x61e   :  { %v2718_v11 = vpop.f32.mrf.mxu1 }
 0x61f   :  { %v2793_v39 = vadd.f32 %v2718_v11, %v12752_v1  ;;  %9268 = vmatmul.mubr.bf16.gmra.mxu0 %v12860_v4  ;;  %9400 = vmatmul.mubr.bf16.gmra.mxu1 %v12860_v4  ;;  %v2859_v8 = vmax.f32 %v2829_v57, 0.0 }
 0x620   :  { %v9202_v10 = vpop.f32.mrf.mxu1  ;;  %9271 = vmatprep.mubr.msk.bf16.mxu0 %vm11513_vm0, %v14110_v21  ;;  %9403 = vmatprep.mubr.msk.bf16.mxu1 %vm11513_vm0, %v14110_v21 }
 0x621   :  { %v2830_v26 = vadd.f32 %v12783_v54, %v2793_v39 }
 0x622   :  { %v2723_v6 = vpop.f32.mrf.mxu1 }
 0x623   :  { %v2860_v14 = vmax.f32 %v2830_v26, 0.0  ;;  %v2794_v37 = vadd.f32 %v2723_v6, %v12754_v25 }
 0x624   :  { %v9205_v30 = vpop.f32.mrf.mxu1 }
 0x625   :  { %v12872_v1 = vpack.c.bf16 %v2860_v14, %v2859_v8  ;;  %v2831_v23 = vadd.f32 %v12783_v54, %v2794_v37 }
 0x626   :  { %v2726_v13 = vpop.f32.mrf.mxu1 }
 0x627   :  { %v2795_v20 = vadd.f32 %v2726_v13, %v12756_v16  ;;  %9272 = vmatmul.mubr.bf16.gmra.mxu0 %v12872_v1  ;;  %9404 = vmatmul.mubr.bf16.gmra.mxu1 %v12872_v1  ;;  %v2861_v55 = vmax.f32 %v2831_v23, 0.0 }
 0x628   :  { %v9206_v33 = vpop.f32.mrf.mxu1  ;;  %9275 = vmatprep.mubr.msk.bf16.mxu0 %vm11513_vm0, %v14110_v21  ;;  %9407 = vmatprep.mubr.msk.bf16.mxu1 %vm11513_vm0, %v14110_v21 }
 0x629   :  { %v2832_v25 = vadd.f32 %v12783_v54, %v2795_v20 }
 0x62a   :  { %v2731_v62 = vpop.f32.mrf.mxu1 }
 0x62b   :  { %v2862_v29 = vmax.f32 %v2832_v25, 0.0  ;;  %v2796_v61 = vadd.f32 %v2731_v62, %v12758_v45 }
 0x62c   :  { %v9209_v44 = vpop.f32.mrf.mxu1 }
 0x62d   :  { %v12884_v16 = vpack.c.bf16 %v2862_v29, %v2861_v55  ;;  %v2833_v49 = vadd.f32 %v12783_v54, %v2796_v61 }
 0x62e   :  { %v2734_v7 = vpop.f32.mrf.mxu1 }
 0x62f   :  { %v2797_v56 = vadd.f32 %v2734_v7, %v12760_v28  ;;  %9276 = vmatmul.mubr.bf16.gmra.mxu0 %v12884_v16  ;;  %9408 = vmatmul.mubr.bf16.gmra.mxu1 %v12884_v16  ;;  %v2863_v17 = vmax.f32 %v2833_v49, 0.0 }
 0x630   :  { %v9210_v42 = vpop.f32.mrf.mxu1  ;;  %9279 = vmatprep.mubr.msk.bf16.mxu0 %vm11513_vm0, %v14110_v21  ;;  %9411 = vmatprep.mubr.msk.bf16.mxu1 %vm11513_vm0, %v14110_v21 }
 0x631   :  { %v2834_v45 = vadd.f32 %v12783_v54, %v2797_v56 }
 0x632   :  { %v2739_v63 = vpop.f32.mrf.mxu1 }
 0x633   :  { %v2864_v51 = vmax.f32 %v2834_v45, 0.0  ;;  %v2798_v58 = vadd.f32 %v2739_v63, %v12762_v27 }
 0x634   :  { %v9213_v43 = vpop.f32.mrf.mxu1 }
 0x635   :  { %v12896_v28 = vpack.c.bf16 %v2864_v51, %v2863_v17  ;;  %v2835_v2 = vadd.f32 %v12783_v54, %v2798_v58 }
 0x636   :  { %v2742_v19 = vpop.f32.mrf.mxu1 }
 0x637   :  { %v2799_v50 = vadd.f32 %v2742_v19, %v12764_v53  ;;  %9280 = vmatmul.mubr.bf16.gmra.mxu0 %v12896_v28  ;;  %9412 = vmatmul.mubr.bf16.gmra.mxu1 %v12896_v28  ;;  %v2865_v47 = vmax.f32 %v2835_v2, 0.0  ;;  %v10479_v19 = vld [vmem:[#allocation14 + $0x78] sm:$0xff]  }
 0x638   :  { %v9214_v52 = vpop.f32.mrf.mxu1  ;;  %9283 = vmatprep.mubr.msk.bf16.mxu0 %vm11513_vm0, %v14110_v21  ;;  %9415 = vmatprep.mubr.msk.bf16.mxu1 %vm11513_vm0, %v14110_v21 }
 0x639   :  { %v2836_v27 = vadd.f32 %v12783_v54, %v2799_v50  ;;  %v10489_v50 = vld [vmem:[#allocation14 + $0x48] sm:$0xff]   ;;  %v10490_v52 = vld [vmem:[#allocation14 + $0x18] sm:$0xff]  }
 0x63a   :  { %v2747_v34 = vpop.f32.mrf.mxu1 }
 0x63b   :  { %v2866_v5 = vmax.f32 %v2836_v27, 0.0  ;;  %v2800_v48 = vadd.f32 %v2747_v34, %v12766_v15  ;;  %v10492_v27 = vld [vmem:[#allocation14 + $0x8] sm:$0xff]   ;;  %v10493_v34 = vld [vmem:[#allocation14 + $0x40] sm:$0xff]  }
 0x63c   :  { %v9217_v12 = vpop.f32.mrf.mxu1 }
 0x63d   :  { %v12908_v53 = vpack.c.bf16 %v2866_v5, %v2865_v47  ;;  %v2837_v59 = vadd.f32 %v12783_v54, %v2800_v48 }
 0x63e   :  { %v2750_v35 = vpop.f32.mrf.mxu1 }
 0x63f   :  { %v2801_v9 = vadd.f32 %v2750_v35, %v12768_v22  ;;  %9284 = vmatmul.mubr.bf16.gmra.mxu0 %v12908_v53  ;;  %9416 = vmatmul.mubr.bf16.gmra.mxu1 %v12908_v53  ;;  %v2867_v39 = vmax.f32 %v2837_v59, 0.0 }
 0x640   :  { %v9218_v11 = vpop.f32.mrf.mxu1  ;;  %9287 = vmatprep.mubr.msk.bf16.mxu0 %vm11513_vm0, %v14110_v21  ;;  %9419 = vmatprep.mubr.msk.bf16.mxu1 %vm11513_vm0, %v14110_v21 }
 0x641   :  { %v2838_v15 = vadd.f32 %v12783_v54, %v2801_v9 }
 0x642   :  { %v2755_v57 = vpop.f32.mrf.mxu1 }
 0x643   :  { %v2868_v10 = vmax.f32 %v2838_v15, 0.0  ;;  %v2802_v26 = vadd.f32 %v2755_v57, %v12770_v40 }
 0x644   :  { %v9221_v6 = vpop.f32.mrf.mxu1 }
 0x645   :  { %v12920_v22 = vpack.c.bf16 %v2868_v10, %v2867_v39  ;;  %v2839_v14 = vadd.f32 %v12783_v54, %v2802_v26 }
 0x646   :  { %v2758_v8 = vpop.f32.mrf.mxu1 }
 0x647   :  { %v2803_v37 = vadd.f32 %v2758_v8, %v12772_v18  ;;  %9288 = vmatmul.mubr.bf16.gmra.mxu0 %v12920_v22  ;;  %9420 = vmatmul.mubr.bf16.gmra.mxu1 %v12920_v22  ;;  %v2869_v23 = vmax.f32 %v2839_v14, 0.0 }
 0x648   :  { %v9222_v30 = vpop.f32.mrf.mxu1  ;;  %9291 = vmatprep.mubr.msk.bf16.mxu0 %vm11513_vm0, %v14110_v21  ;;  %9423 = vmatprep.mubr.msk.bf16.mxu1 %vm11513_vm0, %v14110_v21 }
 0x649   :  { %v2840_v40 = vadd.f32 %v12783_v54, %v2803_v37 }
 0x64a   :  { %v2763_v13 = vpop.f32.mrf.mxu1 }
 0x64b   :  { %v2870_v20 = vmax.f32 %v2840_v40, 0.0  ;;  %v2804_v33 = vadd.f32 %v2763_v13, %v12774_v3 }
 0x64c   :  { %v9225_v25 = vpop.f32.mrf.mxu1 }
 0x64d   :  { %v12932_v18 = vpack.c.bf16 %v2870_v20, %v2869_v23  ;;  %v2841_v55 = vadd.f32 %v12783_v54, %v2804_v33 }
 0x64e   :  { %v2766_v62 = vpop.f32.mrf.mxu1 }
 0x64f   :  { %v2805_v29 = vadd.f32 %v2766_v62, %v12776_v60  ;;  %9292 = vmatmul.mubr.bf16.gmra.mxu0 %v12932_v18  ;;  %9424 = vmatmul.mubr.bf16.gmra.mxu1 %v12932_v18  ;;  %v2871_v7 = vmax.f32 %v2841_v55, 0.0 }
 0x650   :  { %v9226_v61 = vpop.f32.mrf.mxu1  ;;  %9295 = vmatprep.mubr.msk.bf16.mxu0 %vm11513_vm0, %v14110_v21  ;;  %9427 = vmatprep.mubr.msk.bf16.mxu1 %vm11513_vm0, %v14110_v21 }
 0x651   :  { %v2842_v3 = vadd.f32 %v12783_v54, %v2805_v29 }
 0x652   :  { %v2771_v44 = vpop.f32.mrf.mxu1 }
 0x653   :  { %v2872_v49 = vmax.f32 %v2842_v3, 0.0  ;;  %v2806_v56 = vadd.f32 %v2771_v44, %v12778_v0 }
 0x654   :  { %v9229_v42 = vpop.f32.mrf.mxu1 }
 0x655   :  { %v2888_v60 = vpack.c.bf16 %v2872_v49, %v2871_v7  ;;  %v2843_v63 = vadd.f32 %v12783_v54, %v2806_v56 }
 0x656   :  { %v2774_v45 = vpop.f32.mrf.mxu1 }
 0x657   :  { %v2807_v17 = vadd.f32 %v2774_v45, %v12780_v46  ;;  %9296 = vmatmul.mubr.bf16.gmra.mxu0 %v2888_v60  ;;  %9428 = vmatmul.mubr.bf16.gmra.mxu1 %v2888_v60  ;;  %v2873_v43 = vmax.f32 %v2843_v63, 0.0  ;;  %v10480_v46 = vld [vmem:[#allocation14 + $0x70] sm:$0xff]  }
 0x658   :  { %v9230_v51 = vpop.f32.mrf.mxu1  ;;  %9315 = vmatprep.mubr.msk.bf16.mxu0 %vm11513_vm0, %v14110_v21  ;;  %9431 = vmatprep.mubr.msk.bf16.mxu1 %vm11513_vm0, %v14110_v21 }
 0x659   :  { %v2844_v58 = vadd.f32 %v12783_v54, %v2807_v17  ;;  %v10481_v54 = vld [vmem:[#allocation14 + $0x68] sm:$0xff]  }
 0x65b   :  { %v2874_v0 = vmax.f32 %v2844_v58, 0.0 }
 0x65d   :  { %v2889_v2 = vpack.c.bf16 %v2874_v0, %v2873_v43 }
 0x65f   :  { %9316 = vmatmul.mubr.bf16.vlgmr.msra.gmra.mxu0 %v12789_v32  ;;  %9432 = vmatmul.mubr.bf16.gmra.mxu1 %v2889_v2  ;;  %v10482_v32 = vld [vmem:[#allocation14 + $0x60] sm:$0xff]  }
 0x660   :  { %9319 = vmatprep.mubr.msk.bf16.mxu0 %vm11513_vm0, %v14110_v21  ;;  %9436 = vmatpush3.bf16.msra.mxu0 %v10479_v19 }
 0x661   :  { %9437 = vmatprep.subr.bf16.mxu0 %v14110_v21  ;;  %9511 = vmatprep.mubr.msk.bf16.mxu1 %vm11513_vm0, %v14110_v21 }
 0x664   :  { %9438 = vmatpush3.bf16.msra.mxu0 %v10480_v46 }
 0x665   :  { %9439 = vmatprep.subr.bf16.mxu0 %v14110_v21 }
 0x667   :  { %9320 = vmatmul.mubr.bf16.gmra.mxu0 %v12795_v36  ;;  %v10483_v36 = vld [vmem:[#allocation14 + $0x58] sm:$0xff]  }
 0x668   :  { %9323 = vmatprep.mubr.msk.bf16.mxu0 %vm11513_vm0, %v14110_v21  ;;  %9440 = vmatpush3.bf16.msra.mxu0 %v10481_v54 }
 0x669   :  { %9441 = vmatprep.subr.bf16.mxu0 %v14110_v21 }
 0x66c   :  { %9442 = vmatpush3.bf16.msra.mxu0 %v10482_v32 }
 0x66d   :  { %9443 = vmatprep.subr.bf16.mxu0 %v14110_v21 }
 0x66f   :  { %9324 = vmatmul.mubr.bf16.gmra.mxu0 %v12805_v38  ;;  %v10485_v38 = vld [vmem:[#allocation14 + $0x38] sm:$0xff]  }
 0x670   :  { %9327 = vmatprep.mubr.msk.bf16.mxu0 %vm11513_vm0, %v14110_v21  ;;  %9444 = vmatpush3.bf16.msra.mxu0 %v10483_v36 }
 0x671   :  { %9445 = vmatprep.subr.bf16.mxu0 %v14110_v21  ;;  %9496 = vmatpush3.bf16.msra.mxu1 %v10485_v38 }
 0x672   :  { %9497 = vmatprep.subr.bf16.mxu1 %v14110_v21 }
 0x677   :  { %9328 = vmatmul.mubr.bf16.gmra.mxu0 %v12819_v41  ;;  %v10484_v41 = vld [vmem:[#allocation14 + $0x50] sm:$0xff]  }
 0x678   :  { %9331 = vmatprep.mubr.msk.bf16.mxu0 %vm11513_vm0, %v14110_v21  ;;  %9446 = vmatpush3.bf16.msra.mxu0 %v10484_v41 }
 0x679   :  { %9447 = vmatprep.subr.bf16.mxu0 %v14110_v21 }
 0x67c   :  { %9448 = vmatpush3.bf16.msra.mxu0 %v10489_v50 }
 0x67d   :  { %9449 = vmatprep.subr.bf16.mxu0 %v14110_v21 }
 0x67f   :  { %9332 = vmatmul.mubr.bf16.gmra.mxu0 %v12833_v24  ;;  %v10486_v24 = vld [vmem:[#allocation14 + $0x30] sm:$0xff]  }
 0x680   :  { %9335 = vmatprep.mubr.msk.bf16.mxu0 %vm11513_vm0, %v14110_v21  ;;  %9498 = vmatpush3.bf16.msra.mxu1 %v10486_v24 }
 0x681   :  { %9499 = vmatprep.subr.bf16.mxu1 %v14110_v21  ;;  %9450 = vmatpush3.bf16.msra.mxu0 %v10493_v34 }
 0x682   :  { %9555 = vmatprep.subr.bf16.mxu0 %v14110_v21 }
 0x687   :  { %9336 = vmatmul.mubr.bf16.gmra.mxu0 %v12847_v31  ;;  %v10487_v31 = vld [vmem:[#allocation14 + $0x28] sm:$0xff]  }
 0x688   :  { %9339 = vmatprep.mubr.msk.bf16.mxu0 %vm11513_vm0, %v14110_v21  ;;  %9500 = vmatpush3.bf16.msra.mxu1 %v10487_v31 }
 0x689   :  { %9501 = vmatprep.subr.bf16.mxu1 %v14110_v21 }
 0x68f   :  { %9340 = vmatmul.mubr.bf16.gmra.mxu0 %v12860_v4  ;;  %v10488_v4 = vld [vmem:[#allocation14 + $0x20] sm:$0xff]  }
 0x690   :  { %9343 = vmatprep.mubr.msk.bf16.mxu0 %vm11513_vm0, %v14110_v21  ;;  %9502 = vmatpush3.bf16.msra.mxu1 %v10488_v4 }
 0x691   :  { %9503 = vmatprep.subr.bf16.mxu1 %v14110_v21 }
 0x694   :  { %9504 = vmatpush3.bf16.msra.mxu1 %v10490_v52 }
 0x695   :  { %9505 = vmatprep.subr.bf16.mxu1 %v14110_v21 }
 0x697   :  { %9344 = vmatmul.mubr.bf16.gmra.mxu0 %v12872_v1  ;;  %v10491_v1 = vld [vmem:[#allocation14 + $0x10] sm:$0xff]  }
 0x698   :  { %9347 = vmatprep.mubr.msk.bf16.mxu0 %vm11513_vm0, %v14110_v21  ;;  %9506 = vmatpush3.bf16.msra.mxu1 %v10491_v1 }
 0x699   :  { %9507 = vmatprep.subr.bf16.mxu1 %v14110_v21 }
 0x69c   :  { %9508 = vmatpush3.bf16.msra.mxu1 %v10492_v27 }
 0x69d   :  { %9509 = vmatprep.subr.bf16.mxu1 %v14110_v21 }
 0x69f   :  { %9348 = vmatmul.mubr.bf16.gmra.mxu0 %v12884_v16  ;;  %v10494_v16 = vld [vmem:[#allocation14] sm:$0xff]  }
 0x6a0   :  { %9351 = vmatprep.mubr.msk.bf16.mxu0 %vm11513_vm0, %v14110_v21  ;;  %9510 = vmatpush3.bf16.msra.mxu1 %v10494_v16 }
 0x6a1   :  { %9615 = vmatprep.subr.bf16.mxu1 %v14110_v21 }
 0x6a7   :  { %9352 = vmatmul.mubr.bf16.gmra.mxu0 %v12896_v28 }
 0x6a8   :  { %9355 = vmatprep.mubr.msk.bf16.mxu0 %vm11513_vm0, %v14110_v21 }
 0x6af   :  { %9356 = vmatmul.mubr.bf16.gmra.mxu0 %v12908_v53 }
 0x6b0   :  { %9359 = vmatprep.mubr.msk.bf16.mxu0 %vm11513_vm0, %v14110_v21 }
 0x6b7   :  { %v13002_v28 = vpop.f32.mrf.mxu0  ;;  %9360 = vmatmul.mubr.bf16.gmra.mxu0 %v12920_v22 }
 0x6b8   :  { %9363 = vmatprep.mubr.msk.bf16.mxu0 %vm11513_vm0, %v14110_v21 }
 0x6b9   :  { %v9249_v47 = vpop.f32.mrf.mxu0 }
 0x6bb   :  { %v13007_v5 = vpop.f32.mrf.mxu0 }
 0x6bd   :  { %v9250_v48 = vpop.f32.mrf.mxu0 }
 0x6bf   :  { %v13009_v12 = vpop.f32.mrf.mxu0  ;;  %9364 = vmatmul.mubr.bf16.gmra.mxu0 %v12932_v18  ;;  %v13012_v53 = vpop.f32.mrf.mxu1 }
 0x6c0   :  { %9451 = vmatprep.mubr.msk.bf16.mxu0 %vm11513_vm0, %v14110_v21 }
 0x6c1   :  { %v9253_v35 = vpop.f32.mrf.mxu0  ;;  %v9385_v59 = vpop.f32.mrf.mxu1 }
 0x6c3   :  { %v13016_v9 = vpop.f32.mrf.mxu0  ;;  %v13018_v11 = vpop.f32.mrf.mxu1 }
 0x6c5   :  { %v9254_v15 = vpop.f32.mrf.mxu0  ;;  %v9386_v57 = vpop.f32.mrf.mxu1 }
 0x6c7   :  { %v13020_v39 = vpop.f32.mrf.mxu0  ;;  %v13022_v10 = vpop.f32.mrf.mxu1 }
 0x6c9   :  { %v9257_v26 = vpop.f32.mrf.mxu0  ;;  %v9389_v6 = vpop.f32.mrf.mxu1 }
 0x6cb   :  { %v13024_v22 = vpop.f32.mrf.mxu0  ;;  %v13026_v8 = vpop.f32.mrf.mxu1 }
 0x6cd   :  { %v9258_v14 = vpop.f32.mrf.mxu0  ;;  %v9390_v37 = vpop.f32.mrf.mxu1 }
 0x6cf   :  { %v13028_v30 = vpop.f32.mrf.mxu0  ;;  %v13030_v40 = vpop.f32.mrf.mxu1 }
 0x6d1   :  { %v9261_v13 = vpop.f32.mrf.mxu0  ;;  %v9393_v23 = vpop.f32.mrf.mxu1 }
 0x6d3   :  { %v13032_v20 = vpop.f32.mrf.mxu0  ;;  %v13034_v33 = vpop.f32.mrf.mxu1 }
 0x6d5   :  { %v9262_v25 = vpop.f32.mrf.mxu0  ;;  %v9394_v18 = vpop.f32.mrf.mxu1 }
 0x6d7   :  { %v13036_v62 = vpop.f32.mrf.mxu0  ;;  %v13038_v55 = vpop.f32.mrf.mxu1 }
 0x6d9   :  { %v9265_v29 = vpop.f32.mrf.mxu0  ;;  %v9397_v61 = vpop.f32.mrf.mxu1 }
 0x6db   :  { %v13040_v3 = vpop.f32.mrf.mxu0  ;;  %v13042_v44 = vpop.f32.mrf.mxu1 }
 0x6dd   :  { %v9266_v7 = vpop.f32.mrf.mxu0  ;;  %v9398_v49 = vpop.f32.mrf.mxu1 }
 0x6df   :  { %v13044_v56 = vpop.f32.mrf.mxu0  ;;  %v13046_v42 = vpop.f32.mrf.mxu1 }
 0x6e1   :  { %v9269_v60 = vpop.f32.mrf.mxu0  ;;  %v9401_v45 = vpop.f32.mrf.mxu1 }
 0x6e3   :  { %v13048_v63 = vpop.f32.mrf.mxu0  ;;  %v13050_v17 = vpop.f32.mrf.mxu1 }
 0x6e5   :  { %v9270_v51 = vpop.f32.mrf.mxu0  ;;  %v9402_v58 = vpop.f32.mrf.mxu1 }
 0x6e7   :  { %v13052_v43 = vpop.f32.mrf.mxu0  ;;  %v13054_v0 = vpop.f32.mrf.mxu1 }
 0x6e9   :  { %v9273_v19 = vpop.f32.mrf.mxu0  ;;  %v9405_v2 = vpop.f32.mrf.mxu1 }
 0x6eb   :  { %v13056_v46 = vpop.f32.mrf.mxu0  ;;  %v13058_v54 = vpop.f32.mrf.mxu1 }
 0x6ed   :  { %v9274_v32 = vpop.f32.mrf.mxu0  ;;  %v9406_v36 = vpop.f32.mrf.mxu1 }
 0x6ef   :  { %v13060_v38 = vpop.f32.mrf.mxu0  ;;  %v13062_v41 = vpop.f32.mrf.mxu1 }
 0x6f1   :  { %v9277_v24 = vpop.f32.mrf.mxu0  ;;  %v9409_v31 = vpop.f32.mrf.mxu1 }
 0x6f3   :  { %v13064_v4 = vpop.f32.mrf.mxu0  ;;  %v13066_v50 = vpop.f32.mrf.mxu1 }
 0x6f5   :  { %v9278_v52 = vpop.f32.mrf.mxu0  ;;  %v9410_v1 = vpop.f32.mrf.mxu1 }
 0x6f7   :  { %v13068_v27 = vpop.f32.mrf.mxu0  ;;  %v13070_v16 = vpop.f32.mrf.mxu1 }
 0x6f9   :  { %v9281_v34 = vpop.f32.mrf.mxu0  ;;  %v9413_v47 = vpop.f32.mrf.mxu1 }
 0x6fb   :  { %v13072_v48 = vpop.f32.mrf.mxu0  ;;  %v13074_v35 = vpop.f32.mrf.mxu1 }
 0x6fd   :  { %v9282_v59 = vpop.f32.mrf.mxu0  ;;  %v9414_v15 = vpop.f32.mrf.mxu1 }
 0x6ff   :  { %v13076_v57 = vpop.f32.mrf.mxu0  ;;  %v13078_v26 = vpop.f32.mrf.mxu1 }
 0x701   :  { %v9285_v6 = vpop.f32.mrf.mxu0  ;;  %v9417_v14 = vpop.f32.mrf.mxu1 }
 0x703   :  { %v13080_v37 = vpop.f32.mrf.mxu0  ;;  %v13082_v13 = vpop.f32.mrf.mxu1 }
 0x705   :  { %v9286_v23 = vpop.f32.mrf.mxu0  ;;  %v9418_v25 = vpop.f32.mrf.mxu1 }
 0x707   :  { %v13084_v18 = vpop.f32.mrf.mxu0  ;;  %v13086_v29 = vpop.f32.mrf.mxu1 }
 0x709   :  { %v9289_v61 = vpop.f32.mrf.mxu0  ;;  %v9421_v7 = vpop.f32.mrf.mxu1 }
 0x70b   :  { %v13088_v49 = vpop.f32.mrf.mxu0  ;;  %v13090_v60 = vpop.f32.mrf.mxu1 }
 0x70d   :  { %v9290_v45 = vpop.f32.mrf.mxu0  ;;  %v9422_v51 = vpop.f32.mrf.mxu1 }
 0x70f   :  { %v13092_v58 = vpop.f32.mrf.mxu0  ;;  %v13094_v19 = vpop.f32.mrf.mxu1 }
 0x711   :  { %v9293_v2 = vpop.f32.mrf.mxu0  ;;  %v9425_v32 = vpop.f32.mrf.mxu1 }
 0x712   :  { %v13112_v32 = vld [vmem:[#allocation13] ss:$0 sm:$0xff] }
 0x713   :  { %v13096_v36 = vpop.f32.mrf.mxu0  ;;  %v13098_v24 = vpop.f32.mrf.mxu1 }
 0x715   :  { %v9294_v31 = vpop.f32.mrf.mxu0  ;;  %v9426_v52 = vpop.f32.mrf.mxu1 }
 0x717   :  { %v13100_v1 = vpop.f32.mrf.mxu0  ;;  %v13102_v34 = vpop.f32.mrf.mxu1 }
 0x718   :  { %14130 = vst [vmem:[#allocation104_spill] sm:$0xff] %v13100_v1 }
 0x719   :  { %v9297_v47 = vpop.f32.mrf.mxu0  ;;  %v9429_v59 = vpop.f32.mrf.mxu1 }
 0x71b   :  { %v13104_v15 = vpop.f32.mrf.mxu0  ;;  %v13106_v6 = vpop.f32.mrf.mxu1 }
 0x71c   :  { %14131 = vst [vmem:[#allocation102_spill] sm:$0xff] %v13104_v15 }
 0x71d   :  { %v9298_v14 = vpop.f32.mrf.mxu0  ;;  %v9430_v23 = vpop.f32.mrf.mxu1 }
 0x71f   :  { %v3190_v25 = vpop.f32.mrf.mxu0  ;;  %v13108_v61 = vpop.f32.mrf.mxu1 }
 0x720   :  { %14132 = vst [vmem:[#allocation106_spill] sm:$0xff] %v13108_v61  ;;  %v3191_v7 = vadd.f32 %v3190_v25, %v13002_v28 }
 0x721   :  { %v9317_v45 = vpop.f32.mrf.mxu0  ;;  %v9433_v51 = vpop.f32.mrf.mxu1 }
 0x722   :  { %v3495_v2 = vadd.f32 %v13012_v53, %v3191_v7 }
 0x723   :  { %v3193_v31 = vpop.f32.mrf.mxu0  ;;  %v13114_v52 = vpop.f32.mrf.mxu1 }
 0x724   :  { %14133 = vst [vmem:[#allocation103_spill] sm:$0xff] %v13114_v52  ;;  %v3194_v47 = vadd.f32 %v3193_v31, %v13007_v5  ;;  %v3528_v14 = vadd.f32 %v13112_v32, %v3495_v2 }
 0x725   :  { %v9318_v59 = vpop.f32.mrf.mxu0  ;;  %v9434_v15 = vpop.f32.mrf.mxu1 }
 0x726   :  { %v3496_v23 = vadd.f32 %v13018_v11, %v3194_v47  ;;  %v3554_v53 = vmax.f32 %v3528_v14, 0.0 }
 0x727   :  { %v3198_v61 = vpop.f32.mrf.mxu0 }
 0x728   :  { %v3529_v28 = vadd.f32 %v13112_v32, %v3496_v23  ;;  %v3199_v25 = vadd.f32 %v3198_v61, %v13009_v12 }
 0x729   :  { %v9321_v45 = vpop.f32.mrf.mxu0 }
 0x72a   :  { %v3555_v7 = vmax.f32 %v3529_v28, 0.0  ;;  %v3497_v51 = vadd.f32 %v13022_v10, %v3199_v25 }
 0x72b   :  { %v3201_v1 = vpop.f32.mrf.mxu0 }
 0x72c   :  { %v3580_v52 = vpack.c.bf16 %v3555_v7, %v3554_v53  ;;  %v3202_v5 = vadd.f32 %v3201_v1, %v13016_v9  ;;  %v3530_v15 = vadd.f32 %v13112_v32, %v3497_v51  ;;  %v10495_v1 = vld [vmem:[#allocation14 + $0xb8] sm:$0xff]  }
 0x72d   :  { %v9322_v31 = vpop.f32.mrf.mxu0 }
 0x72e   :  { %v3498_v2 = vadd.f32 %v13026_v8, %v3202_v5  ;;  %9512 = vmatmul.mubr.bf16.vlgmr.msra.gmra.mxu1 %v3580_v52  ;;  %v3556_v10 = vmax.f32 %v3530_v15, 0.0 }
 0x72f   :  { %v3206_v11 = vpop.f32.mrf.mxu0  ;;  %9515 = vmatprep.mubr.msk.bf16.mxu1 %vm11513_vm0, %v14110_v21 }
 0x730   :  { %v3531_v12 = vadd.f32 %v13112_v32, %v3498_v2  ;;  %v3207_v61 = vadd.f32 %v3206_v11, %v13020_v39  ;;  %v10496_v39 = vld [vmem:[#allocation14 + $0xb0] sm:$0xff]   ;;  %v10497_v2 = vld [vmem:[#allocation14 + $0xa8] sm:$0xff]  }
 0x731   :  { %v9325_v47 = vpop.f32.mrf.mxu0 }
 0x732   :  { %v3557_v59 = vmax.f32 %v3531_v12, 0.0  ;;  %v3499_v14 = vadd.f32 %v13030_v40, %v3207_v61  ;;  %v10498_v47 = vld [vmem:[#allocation14 + $0xa0] sm:$0xff]  }
 0x733   :  { %v3209_v9 = vpop.f32.mrf.mxu0 }
 0x734   :  { %v3581_v23 = vpack.c.bf16 %v3557_v59, %v3556_v10  ;;  %v3210_v28 = vadd.f32 %v3209_v9, %v13024_v22  ;;  %v3532_v52 = vadd.f32 %v13112_v32, %v3499_v14 }
 0x735   :  { %v9326_v8 = vpop.f32.mrf.mxu0 }
 0x736   :  { %v3500_v25 = vadd.f32 %v13034_v33, %v3210_v28  ;;  %9452 = vmatmul.mubr.bf16.vlgmr.msra.gmra.mxu0 %v3581_v23  ;;  %9516 = vmatmul.mubr.bf16.gmra.mxu1 %v3581_v23  ;;  %v3558_v7 = vmax.f32 %v3532_v52, 0.0  ;;  %v10499_v28 = vld [vmem:[#allocation14 + $0x98] sm:$0xff]  }
 0x737   :  { %9556 = vmatpush3.bf16.msra.mxu0 %v10495_v1  ;;  %v3214_v45 = vpop.f32.mrf.mxu0  ;;  %9455 = vmatprep.mubr.msk.bf16.mxu0 %vm11513_vm0, %v14110_v21 }
 0x738   :  { %v3533_v40 = vadd.f32 %v13112_v32, %v3500_v25  ;;  %v3215_v53 = vadd.f32 %v3214_v45, %v13028_v30  ;;  %9519 = vmatprep.mubr.msk.bf16.mxu1 %vm11513_vm0, %v14110_v21  ;;  %9557 = vmatprep.subr.bf16.mxu0 %v14110_v21  ;;  %v10500_v45 = vld [vmem:[#allocation14 + $0x90] sm:$0xff]  }
 0x739   :  { %v9329_v22 = vpop.f32.mrf.mxu0 }
 0x73a   :  { %v3559_v33 = vmax.f32 %v3533_v40, 0.0  ;;  %v3501_v51 = vadd.f32 %v13038_v55, %v3215_v53 }
 0x73b   :  { %v3217_v5 = vpop.f32.mrf.mxu0  ;;  %9558 = vmatpush3.bf16.msra.mxu0 %v10496_v39 }
 0x73c   :  { %v13141_v31 = vpack.c.bf16 %v3559_v33, %v3558_v7  ;;  %v3218_v15 = vadd.f32 %v3217_v5, %v13032_v20  ;;  %9559 = vmatprep.subr.bf16.mxu0 %v14110_v21  ;;  %v3534_v11 = vadd.f32 %v13112_v32, %v3501_v51  ;;  %v10501_v51 = vld [vmem:[#allocation14 + $0x88] sm:$0xff]  }
 0x73d   :  { %v9330_v30 = vpop.f32.mrf.mxu0 }
 0x73e   :  { %v3502_v12 = vadd.f32 %v13042_v44, %v3218_v15  ;;  %9456 = vmatmul.mubr.bf16.gmra.mxu0 %v13141_v31  ;;  %9520 = vmatmul.mubr.bf16.gmra.mxu1 %v13141_v31  ;;  %v3560_v44 = vmax.f32 %v3534_v11, 0.0  ;;  %v10502_v30 = vld [vmem:[#allocation14 + $0x80] sm:$0xff]  }
 0x73f   :  { %v3222_v61 = vpop.f32.mrf.mxu0  ;;  %9459 = vmatprep.mubr.msk.bf16.mxu0 %vm11513_vm0, %v14110_v21  ;;  %9523 = vmatprep.mubr.msk.bf16.mxu1 %vm11513_vm0, %v14110_v21 }
 0x740   :  { %v3535_v20 = vadd.f32 %v13112_v32, %v3502_v12  ;;  %v3223_v55 = vadd.f32 %v3222_v61, %v13036_v62  ;;  %9560 = vmatpush3.bf16.msra.mxu0 %v10497_v2 }
 0x741   :  { %v9333_v10 = vpop.f32.mrf.mxu0  ;;  %9561 = vmatprep.subr.bf16.mxu0 %v14110_v21 }
 0x742   :  { %v3561_v59 = vmax.f32 %v3535_v20, 0.0  ;;  %v3503_v14 = vadd.f32 %v13046_v42, %v3223_v55 }
 0x743   :  { %v3225_v9 = vpop.f32.mrf.mxu0 }
 0x744   :  { %v13157_v1 = vpack.c.bf16 %v3561_v59, %v3560_v44  ;;  %v3226_v23 = vadd.f32 %v3225_v9, %v13040_v3  ;;  %9562 = vmatpush3.bf16.msra.mxu0 %v10498_v47  ;;  %v3536_v62 = vadd.f32 %v13112_v32, %v3503_v14 }
 0x745   :  { %v9334_v8 = vpop.f32.mrf.mxu0  ;;  %9563 = vmatprep.subr.bf16.mxu0 %v14110_v21 }
 0x746   :  { %v3504_v52 = vadd.f32 %v13050_v17, %v3226_v23  ;;  %9460 = vmatmul.mubr.bf16.gmra.mxu0 %v13157_v1  ;;  %9524 = vmatmul.mubr.bf16.gmra.mxu1 %v13157_v1  ;;  %v3562_v17 = vmax.f32 %v3536_v62, 0.0 }
 0x747   :  { %v3230_v25 = vpop.f32.mrf.mxu0  ;;  %9463 = vmatprep.mubr.msk.bf16.mxu0 %vm11513_vm0, %v14110_v21  ;;  %9527 = vmatprep.mubr.msk.bf16.mxu1 %vm11513_vm0, %v14110_v21 }
 0x748   :  { %v3537_v3 = vadd.f32 %v13112_v32, %v3504_v52  ;;  %v3231_v42 = vadd.f32 %v3230_v25, %v13044_v56  ;;  %9564 = vmatpush3.bf16.msra.mxu0 %v10499_v28 }
 0x749   :  { %v9337_v39 = vpop.f32.mrf.mxu0  ;;  %9565 = vmatprep.subr.bf16.mxu0 %v14110_v21 }
 0x74a   :  { %v3563_v40 = vmax.f32 %v3537_v3, 0.0  ;;  %v3505_v53 = vadd.f32 %v13054_v0, %v3231_v42 }
 0x74b   :  { %v3233_v22 = vpop.f32.mrf.mxu0 }
 0x74c   :  { %v13173_v7 = vpack.c.bf16 %v3563_v40, %v3562_v17  ;;  %v3234_v33 = vadd.f32 %v3233_v22, %v13048_v63  ;;  %9566 = vmatpush3.bf16.msra.mxu0 %v10500_v45  ;;  %v3538_v56 = vadd.f32 %v13112_v32, %v3505_v53 }
 0x74d   :  { %v9338_v5 = vpop.f32.mrf.mxu0  ;;  %9567 = vmatprep.subr.bf16.mxu0 %v14110_v21 }
 0x74e   :  { %v3506_v15 = vadd.f32 %v13058_v54, %v3234_v33  ;;  %9464 = vmatmul.mubr.bf16.gmra.mxu0 %v13173_v7  ;;  %9528 = vmatmul.mubr.bf16.gmra.mxu1 %v13173_v7  ;;  %v3564_v54 = vmax.f32 %v3538_v56, 0.0 }
 0x74f   :  { %v3238_v2 = vpop.f32.mrf.mxu0  ;;  %9467 = vmatprep.mubr.msk.bf16.mxu0 %vm11513_vm0, %v14110_v21  ;;  %9531 = vmatprep.mubr.msk.bf16.mxu1 %vm11513_vm0, %v14110_v21 }
 0x750   :  { %v3539_v63 = vadd.f32 %v13112_v32, %v3506_v15  ;;  %v3239_v0 = vadd.f32 %v3238_v2, %v13052_v43  ;;  %9568 = vmatpush3.bf16.msra.mxu0 %v10501_v51 }
 0x751   :  { %v9341_v11 = vpop.f32.mrf.mxu0  ;;  %9569 = vmatprep.subr.bf16.mxu0 %v14110_v21 }
 0x752   :  { %v3565_v12 = vmax.f32 %v3539_v63, 0.0  ;;  %v3507_v61 = vadd.f32 %v13062_v41, %v3239_v0 }
 0x753   :  { %v3241_v20 = vpop.f32.mrf.mxu0 }
 0x754   :  { %v13189_v55 = vpack.c.bf16 %v3565_v12, %v3564_v54  ;;  %v3242_v47 = vadd.f32 %v3241_v20, %v13056_v46  ;;  %9570 = vmatpush3.bf16.msra.mxu0 %v10502_v30  ;;  %v3540_v43 = vadd.f32 %v13112_v32, %v3507_v61 }
 0x755   :  { %v9342_v10 = vpop.f32.mrf.mxu0  ;;  %9719 = vmatprep.subr.bf16.mxu0 %v14110_v21 }
 0x756   :  { %v3508_v44 = vadd.f32 %v13066_v50, %v3242_v47  ;;  %9468 = vmatmul.mubr.bf16.gmra.mxu0 %v13189_v55  ;;  %9532 = vmatmul.mubr.bf16.gmra.mxu1 %v13189_v55  ;;  %v3566_v9 = vmax.f32 %v3540_v43, 0.0 }
 0x757   :  { %v3246_v59 = vpop.f32.mrf.mxu0  ;;  %9471 = vmatprep.mubr.msk.bf16.mxu0 %vm11513_vm0, %v14110_v21  ;;  %9535 = vmatprep.mubr.msk.bf16.mxu1 %vm11513_vm0, %v14110_v21 }
 0x758   :  { %v3541_v46 = vadd.f32 %v13112_v32, %v3508_v44  ;;  %v3247_v41 = vadd.f32 %v3246_v59, %v13060_v38 }
 0x759   :  { %v9345_v14 = vpop.f32.mrf.mxu0 }
 0x75a   :  { %v3567_v23 = vmax.f32 %v3541_v46, 0.0  ;;  %v3509_v50 = vadd.f32 %v13070_v16, %v3247_v41 }
 0x75b   :  { %v3249_v28 = vpop.f32.mrf.mxu0 }
 0x75c   :  { %v13204_v8 = vpack.c.bf16 %v3567_v23, %v3566_v9  ;;  %v3250_v62 = vadd.f32 %v3249_v28, %v13064_v4  ;;  %v3542_v25 = vadd.f32 %v13112_v32, %v3509_v50 }
 0x75d   :  { %v9346_v52 = vpop.f32.mrf.mxu0 }
 0x75e   :  { %v3510_v3 = vadd.f32 %v13074_v35, %v3250_v62  ;;  %9472 = vmatmul.mubr.bf16.gmra.mxu0 %v13204_v8  ;;  %9536 = vmatmul.mubr.bf16.gmra.mxu1 %v13204_v8  ;;  %v3568_v45 = vmax.f32 %v3542_v25, 0.0 }
 0x75f   :  { %v3254_v38 = vpop.f32.mrf.mxu0  ;;  %9475 = vmatprep.mubr.msk.bf16.mxu0 %vm11513_vm0, %v14110_v21  ;;  %9539 = vmatprep.mubr.msk.bf16.mxu1 %vm11513_vm0, %v14110_v21 }
 0x760   :  { %v3543_v16 = vadd.f32 %v13112_v32, %v3510_v3  ;;  %v3255_v4 = vadd.f32 %v3254_v38, %v13068_v27  ;;  %v14134_v3 = vld [vmem:[#allocation104_spill] sm:$0xff] }
 0x761   :  { %v9349_v42 = vpop.f32.mrf.mxu0 }
 0x762   :  { %v3569_v39 = vmax.f32 %v3543_v16, 0.0  ;;  %v3511_v35 = vadd.f32 %v13078_v26, %v3255_v4  ;;  %v14135_v42 = vld [vmem:[#allocation106_spill] sm:$0xff] }
 0x763   :  { %v3257_v17 = vpop.f32.mrf.mxu0 }
 0x764   :  { %v13218_v40 = vpack.c.bf16 %v3569_v39, %v3568_v45  ;;  %v3258_v53 = vadd.f32 %v3257_v17, %v13072_v48  ;;  %v3544_v33 = vadd.f32 %v13112_v32, %v3511_v35  ;;  %v14136_v35 = vld [vmem:[#allocation102_spill] sm:$0xff] }
 0x765   :  { %v9350_v22 = vpop.f32.mrf.mxu0 }
 0x766   :  { %v3512_v51 = vadd.f32 %v13082_v13, %v3258_v53  ;;  %9476 = vmatmul.mubr.bf16.gmra.mxu0 %v13218_v40  ;;  %9540 = vmatmul.mubr.bf16.gmra.mxu1 %v13218_v40  ;;  %v3570_v56 = vmax.f32 %v3544_v33, 0.0  ;;  %v14137_v33 = vld [vmem:[#allocation103_spill] sm:$0xff] }
 0x767   :  { %v3262_v27 = vpop.f32.mrf.mxu0  ;;  %9479 = vmatprep.mubr.msk.bf16.mxu0 %vm11513_vm0, %v14110_v21  ;;  %9543 = vmatprep.mubr.msk.bf16.mxu1 %vm11513_vm0, %v14110_v21 }
 0x768   :  { %v3545_v26 = vadd.f32 %v13112_v32, %v3512_v51  ;;  %v3263_v48 = vadd.f32 %v3262_v27, %v13076_v57 }
 0x769   :  { %v9353_v5 = vpop.f32.mrf.mxu0 }
 0x76a   :  { %v3571_v15 = vmax.f32 %v3545_v26, 0.0  ;;  %v3513_v13 = vadd.f32 %v13086_v29, %v3263_v48  ;;  %v10503_v5 = vld [vmem:[#allocation17 + $0x78] sm:$0xff]  }
 0x76b   :  { %v3265_v2 = vpop.f32.mrf.mxu0  ;;  %9616 = vmatpush3.bf16.msra.mxu1 %v10503_v5 }
 0x76c   :  { %v13232_v63 = vpack.c.bf16 %v3571_v15, %v3570_v56  ;;  %v3266_v0 = vadd.f32 %v3265_v2, %v13080_v37  ;;  %v3546_v11 = vadd.f32 %v13112_v32, %v3513_v13  ;;  %9617 = vmatprep.subr.bf16.mxu1 %v14110_v21  ;;  %v10504_v15 = vld [vmem:[#allocation17 + $0x70] sm:$0xff]   ;;  %v10512_v13 = vld [vmem:[#allocation17 + $0xa8] sm:$0xff]   ;;  %v10514_v2 = vld [vmem:[#allocation17 + $0xa0] sm:$0xff]  }
 0x76d   :  { %v9354_v30 = vpop.f32.mrf.mxu0 }
 0x76e   :  { %v3514_v54 = vadd.f32 %v13090_v60, %v3266_v0  ;;  %9480 = vmatmul.mubr.bf16.gmra.mxu0 %v13232_v63  ;;  %9544 = vmatmul.mubr.bf16.gmra.mxu1 %v13232_v63  ;;  %v3572_v61 = vmax.f32 %v3546_v11, 0.0  ;;  %v10513_v0 = vld [vmem:[#allocation17 + $0x40] sm:$0xff]   ;;  %v10516_v30 = vld [vmem:[#allocation17 + $0x90] sm:$0xff]   ;;  %v10518_v11 = vld [vmem:[#allocation17 + $0x88] sm:$0xff]  }
 0x76f   :  { %v3270_v57 = vpop.f32.mrf.mxu0  ;;  %9483 = vmatprep.mubr.msk.bf16.mxu0 %vm11513_vm0, %v14110_v21  ;;  %9547 = vmatprep.mubr.msk.bf16.mxu1 %vm11513_vm0, %v14110_v21 }
 0x770   :  { %v3547_v29 = vadd.f32 %v13112_v32, %v3514_v54  ;;  %v3271_v37 = vadd.f32 %v3270_v57, %v13084_v18  ;;  %9618 = vmatpush3.bf16.msra.mxu1 %v10504_v15  ;;  %v10519_v54 = vld [vmem:[#allocation17 + $0x80] sm:$0xff]  }
 0x771   :  { %v9357_v12 = vpop.f32.mrf.mxu0  ;;  %9619 = vmatprep.subr.bf16.mxu1 %v14110_v21 }
 0x772   :  { %v3573_v20 = vmax.f32 %v3547_v29, 0.0  ;;  %v3515_v60 = vadd.f32 %v13094_v19, %v3271_v37 }
 0x773   :  { %v3273_v47 = vpop.f32.mrf.mxu0 }
 0x774   :  { %v13246_v10 = vpack.c.bf16 %v3573_v20, %v3572_v61  ;;  %v3274_v43 = vadd.f32 %v3273_v47, %v13088_v49  ;;  %v3548_v59 = vadd.f32 %v13112_v32, %v3515_v60 }
 0x775   :  { %v9358_v44 = vpop.f32.mrf.mxu0 }
 0x776   :  { %v3516_v46 = vadd.f32 %v13098_v24, %v3274_v43  ;;  %9484 = vmatmul.mubr.bf16.gmra.mxu0 %v13246_v10  ;;  %9548 = vmatmul.mubr.bf16.gmra.mxu1 %v13246_v10  ;;  %v3574_v14 = vmax.f32 %v3548_v59, 0.0 }
 0x777   :  { %v3278_v18 = vpop.f32.mrf.mxu0  ;;  %9487 = vmatprep.mubr.msk.bf16.mxu0 %vm11513_vm0, %v14110_v21  ;;  %9551 = vmatprep.mubr.msk.bf16.mxu1 %vm11513_vm0, %v14110_v21 }
 0x778   :  { %v3549_v19 = vadd.f32 %v13112_v32, %v3516_v46  ;;  %v3279_v49 = vadd.f32 %v3278_v18, %v13092_v58 }
 0x779   :  { %v9361_v41 = vpop.f32.mrf.mxu0 }
 0x77a   :  { %v3575_v9 = vmax.f32 %v3549_v19, 0.0  ;;  %v3517_v24 = vadd.f32 %v13102_v34, %v3279_v49 }
 0x77b   :  { %v3281_v23 = vpop.f32.mrf.mxu0 }
 0x77c   :  { %v13260_v50 = vpack.c.bf16 %v3575_v9, %v3574_v14  ;;  %v3282_v28 = vadd.f32 %v3281_v23, %v13096_v36  ;;  %v3550_v52 = vadd.f32 %v13112_v32, %v3517_v24 }
 0x77d   :  { %v9362_v62 = vpop.f32.mrf.mxu0 }
 0x77e   :  { %v3518_v25 = vadd.f32 %v13106_v6, %v3282_v28  ;;  %9488 = vmatmul.mubr.bf16.gmra.mxu0 %v13260_v50  ;;  %9552 = vmatmul.mubr.bf16.gmra.mxu1 %v13260_v50  ;;  %v3576_v16 = vmax.f32 %v3550_v52, 0.0 }
 0x77f   :  { %v3286_v58 = vpop.f32.mrf.mxu0  ;;  %9491 = vmatprep.mubr.msk.bf16.mxu0 %vm11513_vm0, %v14110_v21  ;;  %9631 = vmatprep.mubr.msk.bf16.mxu1 %vm11513_vm0, %v14110_v21 }
 0x780   :  { %v3551_v34 = vadd.f32 %v13112_v32, %v3518_v25  ;;  %v3287_v36 = vadd.f32 %v3286_v58, %v14134_v3 }
 0x781   :  { %v9365_v38 = vpop.f32.mrf.mxu0 }
 0x782   :  { %v3577_v4 = vmax.f32 %v3551_v34, 0.0  ;;  %v3519_v6 = vadd.f32 %v14135_v42, %v3287_v36 }
 0x783   :  { %v3289_v45 = vpop.f32.mrf.mxu0 }
 0x784   :  { %v3591_v39 = vpack.c.bf16 %v3577_v4, %v3576_v16  ;;  %v3290_v17 = vadd.f32 %v3289_v45, %v14136_v35  ;;  %v3552_v22 = vadd.f32 %v13112_v32, %v3519_v6 }
 0x785   :  { %v9366_v53 = vpop.f32.mrf.mxu0 }
 0x786   :  { %v3520_v51 = vadd.f32 %v14137_v33, %v3290_v17  ;;  %9492 = vmatmul.mubr.bf16.gmra.mxu0 %v3591_v39  ;;  %v3578_v26 = vmax.f32 %v3552_v22, 0.0 }
 0x787   :  { %9571 = vmatprep.mubr.msk.bf16.mxu0 %vm11513_vm0, %v14110_v21 }
 0x788   :  { %v3553_v27 = vadd.f32 %v13112_v32, %v3520_v51  ;;  %v10505_v32 = vld [vmem:[#allocation17 + $0x68] sm:$0xff]  }
 0x789   :  { %9620 = vmatpush3.bf16.msra.mxu1 %v10505_v32 }
 0x78a   :  { %v3579_v48 = vmax.f32 %v3553_v27, 0.0  ;;  %9621 = vmatprep.subr.bf16.mxu1 %v14110_v21 }
 0x78c   :  { %v3592_v56 = vpack.c.bf16 %v3579_v48, %v3578_v26 }
 0x78e   :  { %9572 = vmatmul.mubr.bf16.vlgmr.msra.gmra.mxu0 %v13141_v31  ;;  %v10506_v31 = vld [vmem:[#allocation17 + $0x60] sm:$0xff]  }
 0x78f   :  { %9575 = vmatprep.mubr.msk.bf16.mxu0 %vm11513_vm0, %v14110_v21  ;;  %9622 = vmatpush3.bf16.msra.mxu1 %v10506_v31 }
 0x790   :  { %9623 = vmatprep.subr.bf16.mxu1 %v14110_v21 }
 0x796   :  { %9576 = vmatmul.mubr.bf16.gmra.mxu0 %v13157_v1  ;;  %v10507_v1 = vld [vmem:[#allocation17 + $0x58] sm:$0xff]  }
 0x797   :  { %9579 = vmatprep.mubr.msk.bf16.mxu0 %vm11513_vm0, %v14110_v21  ;;  %9624 = vmatpush3.bf16.msra.mxu1 %v10507_v1 }
 0x798   :  { %9625 = vmatprep.subr.bf16.mxu1 %v14110_v21 }
 0x79e   :  { %9580 = vmatmul.mubr.bf16.gmra.mxu0 %v13173_v7  ;;  %v10508_v7 = vld [vmem:[#allocation17 + $0x50] sm:$0xff]  }
 0x79f   :  { %9583 = vmatprep.mubr.msk.bf16.mxu0 %vm11513_vm0, %v14110_v21  ;;  %9626 = vmatpush3.bf16.msra.mxu1 %v10508_v7 }
 0x7a0   :  { %9627 = vmatprep.subr.bf16.mxu1 %v14110_v21 }
 0x7a6   :  { %9584 = vmatmul.mubr.bf16.gmra.mxu0 %v13189_v55  ;;  %v10509_v55 = vld [vmem:[#allocation17 + $0xb8] sm:$0xff]  }
 0x7a7   :  { %9587 = vmatprep.mubr.msk.bf16.mxu0 %vm11513_vm0, %v14110_v21  ;;  %9720 = vmatpush3.bf16.msra.mxu0 %v10509_v55 }
 0x7a8   :  { %9721 = vmatprep.subr.bf16.mxu0 %v14110_v21 }
 0x7ae   :  { %9588 = vmatmul.mubr.bf16.gmra.mxu0 %v13204_v8  ;;  %v10510_v8 = vld [vmem:[#allocation17 + $0x48] sm:$0xff]  }
 0x7af   :  { %9591 = vmatprep.mubr.msk.bf16.mxu0 %vm11513_vm0, %v14110_v21  ;;  %9628 = vmatpush3.bf16.msra.mxu1 %v10510_v8 }
 0x7b0   :  { %9629 = vmatprep.subr.bf16.mxu1 %v14110_v21 }
 0x7b3   :  { %9630 = vmatpush3.bf16.msra.mxu1 %v10513_v0 }
 0x7b4   :  { %9667 = vmatprep.subr.bf16.mxu1 %v14110_v21 }
 0x7b6   :  { %9592 = vmatmul.mubr.bf16.gmra.mxu0 %v13218_v40  ;;  %v10511_v40 = vld [vmem:[#allocation17 + $0xb0] sm:$0xff]  }
 0x7b7   :  { %9595 = vmatprep.mubr.msk.bf16.mxu0 %vm11513_vm0, %v14110_v21  ;;  %9722 = vmatpush3.bf16.msra.mxu0 %v10511_v40 }
 0x7b8   :  { %9723 = vmatprep.subr.bf16.mxu0 %v14110_v21 }
 0x7bb   :  { %9724 = vmatpush3.bf16.msra.mxu0 %v10512_v13 }
 0x7bc   :  { %9725 = vmatprep.subr.bf16.mxu0 %v14110_v21 }
 0x7be   :  { %9596 = vmatmul.mubr.bf16.gmra.mxu0 %v13232_v63  ;;  %v10515_v63 = vld [vmem:[#allocation17 + $0x98] sm:$0xff]  }
 0x7bf   :  { %9599 = vmatprep.mubr.msk.bf16.mxu0 %vm11513_vm0, %v14110_v21  ;;  %9726 = vmatpush3.bf16.msra.mxu0 %v10514_v2 }
 0x7c0   :  { %9727 = vmatprep.subr.bf16.mxu0 %v14110_v21 }
 0x7c3   :  { %9728 = vmatpush3.bf16.msra.mxu0 %v10515_v63 }
 0x7c4   :  { %9729 = vmatprep.subr.bf16.mxu0 %v14110_v21 }
 0x7c6   :  { %9600 = vmatmul.mubr.bf16.gmra.mxu0 %v13246_v10 }
 0x7c7   :  { %9603 = vmatprep.mubr.msk.bf16.mxu0 %vm11513_vm0, %v14110_v21  ;;  %9730 = vmatpush3.bf16.msra.mxu0 %v10516_v30 }
 0x7c8   :  { %9731 = vmatprep.subr.bf16.mxu0 %v14110_v21 }
 0x7cb   :  { %9732 = vmatpush3.bf16.msra.mxu0 %v10518_v11 }
 0x7cc   :  { %9733 = vmatprep.subr.bf16.mxu0 %v14110_v21 }
 0x7ce   :  { %9604 = vmatmul.mubr.bf16.gmra.mxu0 %v13260_v50 }
 0x7cf   :  { %9607 = vmatprep.mubr.msk.bf16.mxu0 %vm11513_vm0, %v14110_v21  ;;  %9734 = vmatpush3.bf16.msra.mxu0 %v10519_v54 }
 0x7d0   :  { %9815 = vmatprep.subr.bf16.mxu0 %v14110_v21 }
 0x7d6   :  { %9608 = vmatmul.mubr.bf16.gmra.mxu0 %v3591_v39 }
 0x7d7   :  { %9611 = vmatprep.mubr.msk.bf16.mxu0 %vm11513_vm0, %v14110_v21 }
 0x7de   :  { %9612 = vmatmul.mubr.bf16.gmra.mxu0 %v3592_v56 }
 0x7df   :  { %9735 = vmatprep.mubr.msk.bf16.mxu0 %vm11513_vm0, %v14110_v21 }
 0x7ee   :  { %v3877_v57 = vpop.f32.mrf.mxu1 }
 0x7f0   :  { %v9513_v29 = vpop.f32.mrf.mxu1 }
 0x7f2   :  { %v3880_v37 = vpop.f32.mrf.mxu1 }
 0x7f4   :  { %v9514_v12 = vpop.f32.mrf.mxu1 }
 0x7f6   :  { %v3708_v61 = vpop.f32.mrf.mxu0  ;;  %v3885_v20 = vpop.f32.mrf.mxu1 }
 0x7f7   :  { %v13327_v60 = vadd.f32 %v3877_v57, %v3708_v61 }
 0x7f8   :  { %v9453_v47 = vpop.f32.mrf.mxu0  ;;  %v9517_v10 = vpop.f32.mrf.mxu1 }
 0x7fa   :  { %v3711_v43 = vpop.f32.mrf.mxu0  ;;  %v3888_v44 = vpop.f32.mrf.mxu1 }
 0x7fb   :  { %v13329_v59 = vadd.f32 %v3880_v37, %v3711_v43 }
 0x7fc   :  { %v9454_v46 = vpop.f32.mrf.mxu0  ;;  %v9518_v18 = vpop.f32.mrf.mxu1 }
 0x7fe   :  { %v3716_v19 = vpop.f32.mrf.mxu0  ;;  %v3893_v49 = vpop.f32.mrf.mxu1 }
 0x7ff   :  { %v13331_v41 = vadd.f32 %v3885_v20, %v3716_v19 }
 0x800   :  { %v9457_v14 = vpop.f32.mrf.mxu0  ;;  %v9521_v9 = vpop.f32.mrf.mxu1 }
 0x802   :  { %v3719_v24 = vpop.f32.mrf.mxu0  ;;  %v3896_v23 = vpop.f32.mrf.mxu1 }
 0x803   :  { %v13333_v50 = vadd.f32 %v3888_v44, %v3719_v24 }
 0x804   :  { %v9458_v28 = vpop.f32.mrf.mxu0  ;;  %v9522_v62 = vpop.f32.mrf.mxu1 }
 0x806   :  { %v3724_v52 = vpop.f32.mrf.mxu0  ;;  %v3901_v25 = vpop.f32.mrf.mxu1 }
 0x807   :  { %v13335_v58 = vadd.f32 %v3893_v49, %v3724_v52 }
 0x808   :  { %v9461_v34 = vpop.f32.mrf.mxu0  ;;  %v9525_v3 = vpop.f32.mrf.mxu1 }
 0x80a   :  { %v3727_v36 = vpop.f32.mrf.mxu0  ;;  %v3904_v38 = vpop.f32.mrf.mxu1 }
 0x80b   :  { %v13337_v16 = vadd.f32 %v3896_v23, %v3727_v36 }
 0x80c   :  { %v9462_v4 = vpop.f32.mrf.mxu0  ;;  %v9526_v42 = vpop.f32.mrf.mxu1 }
 0x80e   :  { %v3732_v6 = vpop.f32.mrf.mxu0  ;;  %v3909_v45 = vpop.f32.mrf.mxu1 }
 0x80f   :  { %v13339_v39 = vadd.f32 %v3901_v25, %v3732_v6 }
 0x810   :  { %v9465_v35 = vpop.f32.mrf.mxu0  ;;  %v9529_v17 = vpop.f32.mrf.mxu1 }
 0x812   :  { %v3735_v53 = vpop.f32.mrf.mxu0  ;;  %v3912_v22 = vpop.f32.mrf.mxu1 }
 0x813   :  { %v13341_v33 = vadd.f32 %v3904_v38, %v3735_v53 }
 0x814   :  { %v9466_v51 = vpop.f32.mrf.mxu0  ;;  %v9530_v27 = vpop.f32.mrf.mxu1 }
 0x816   :  { %v3740_v26 = vpop.f32.mrf.mxu0  ;;  %v3917_v48 = vpop.f32.mrf.mxu1 }
 0x817   :  { %v13343_v5 = vadd.f32 %v3909_v45, %v3740_v26 }
 0x818   :  { %v9469_v56 = vpop.f32.mrf.mxu0  ;;  %v9533_v15 = vpop.f32.mrf.mxu1 }
 0x81a   :  { %v3743_v32 = vpop.f32.mrf.mxu0  ;;  %v3920_v31 = vpop.f32.mrf.mxu1 }
 0x81b   :  { %v13345_v1 = vadd.f32 %v3912_v22, %v3743_v32 }
 0x81c   :  { %v9470_v7 = vpop.f32.mrf.mxu0  ;;  %v9534_v55 = vpop.f32.mrf.mxu1 }
 0x81e   :  { %v3748_v8 = vpop.f32.mrf.mxu0  ;;  %v3925_v40 = vpop.f32.mrf.mxu1 }
 0x81f   :  { %v13347_v13 = vadd.f32 %v3917_v48, %v3748_v8 }
 0x820   :  { %v9473_v2 = vpop.f32.mrf.mxu0  ;;  %v9537_v63 = vpop.f32.mrf.mxu1 }
 0x822   :  { %v3751_v0 = vpop.f32.mrf.mxu0  ;;  %v3928_v30 = vpop.f32.mrf.mxu1 }
 0x823   :  { %v13349_v11 = vadd.f32 %v3920_v31, %v3751_v0 }
 0x824   :  { %v9474_v54 = vpop.f32.mrf.mxu0  ;;  %v9538_v57 = vpop.f32.mrf.mxu1 }
 0x826   :  { %v3756_v29 = vpop.f32.mrf.mxu0  ;;  %v3933_v37 = vpop.f32.mrf.mxu1 }
 0x827   :  { %v13351_v12 = vadd.f32 %v3925_v40, %v3756_v29 }
 0x828   :  { %v9477_v61 = vpop.f32.mrf.mxu0  ;;  %v9541_v20 = vpop.f32.mrf.mxu1 }
 0x82a   :  { %v3759_v47 = vpop.f32.mrf.mxu0  ;;  %v3936_v10 = vpop.f32.mrf.mxu1 }
 0x82b   :  { %v13353_v43 = vadd.f32 %v3928_v30, %v3759_v47  ;;  %v13372_v30 = vld [vmem:[#allocation16] ss:$0 sm:$0xff] }
 0x82c   :  { %v9478_v44 = vpop.f32.mrf.mxu0  ;;  %v9542_v46 = vpop.f32.mrf.mxu1 }
 0x82e   :  { %v3764_v18 = vpop.f32.mrf.mxu0  ;;  %v3941_v19 = vpop.f32.mrf.mxu1 }
 0x82f   :  { %v13355_v49 = vadd.f32 %v3933_v37, %v3764_v18 }
 0x830   :  { %v9481_v14 = vpop.f32.mrf.mxu0  ;;  %v9545_v9 = vpop.f32.mrf.mxu1 }
 0x832   :  { %v3767_v24 = vpop.f32.mrf.mxu0  ;;  %v3944_v23 = vpop.f32.mrf.mxu1 }
 0x833   :  { %v13357_v28 = vadd.f32 %v3936_v10, %v3767_v24 }
 0x834   :  { %v9482_v62 = vpop.f32.mrf.mxu0  ;;  %v9546_v52 = vpop.f32.mrf.mxu1 }
 0x836   :  { %v3772_v25 = vpop.f32.mrf.mxu0  ;;  %v3949_v34 = vpop.f32.mrf.mxu1 }
 0x837   :  { %v13359_v3 = vadd.f32 %v3941_v19, %v3772_v25 }
 0x838   :  { %v9485_v36 = vpop.f32.mrf.mxu0  ;;  %v9549_v38 = vpop.f32.mrf.mxu1 }
 0x839   :  { %v10517_v36 = vld [vmem:[#allocation17 + $0x38] sm:$0xff]  }
 0x83a   :  { %v3775_v4 = vpop.f32.mrf.mxu0  ;;  %v3952_v42 = vpop.f32.mrf.mxu1 }
 0x83b   :  { %v13361_v6 = vadd.f32 %v3944_v23, %v3775_v4 }
 0x83c   :  { %v9486_v45 = vpop.f32.mrf.mxu0  ;;  %v9550_v35 = vpop.f32.mrf.mxu1 }
 0x83d   :  { %v10520_v45 = vld [vmem:[#allocation17 + $0x30] sm:$0xff]  }
 0x83e   :  { %v3780_v17 = vpop.f32.mrf.mxu0  ;;  %v3957_v53 = vpop.f32.mrf.mxu1 }
 0x83f   :  { %v13363_v22 = vadd.f32 %v3949_v34, %v3780_v17 }
 0x840   :  { %v9489_v51 = vpop.f32.mrf.mxu0  ;;  %v9553_v27 = vpop.f32.mrf.mxu1 }
 0x842   :  { %v3783_v26 = vpop.f32.mrf.mxu0  ;;  %v3960_v48 = vpop.f32.mrf.mxu1 }
 0x843   :  { %v13365_v56 = vadd.f32 %v3952_v42, %v3783_v26  ;;  %v10521_v26 = vld [vmem:[#allocation17 + $0x28] sm:$0xff]  }
 0x844   :  { %v9490_v15 = vpop.f32.mrf.mxu0  ;;  %v9554_v32 = vpop.f32.mrf.mxu1 }
 0x846   :  { %v3788_v31 = vpop.f32.mrf.mxu0 }
 0x847   :  { %v13367_v7 = vadd.f32 %v3957_v53, %v3788_v31 }
 0x848   :  { %v9493_v55 = vpop.f32.mrf.mxu0 }
 0x849   :  { %v10522_v55 = vld [vmem:[#allocation17 + $0x20] sm:$0xff]  }
 0x84a   :  { %v3791_v8 = vpop.f32.mrf.mxu0 }
 0x84b   :  { %v13369_v40 = vadd.f32 %v3960_v48, %v3791_v8 }
 0x84c   :  { %v9494_v2 = vpop.f32.mrf.mxu0 }
 0x84e   :  { %v4063_v63 = vpop.f32.mrf.mxu0 }
 0x84f   :  { %v4150_v0 = vadd.f32 %v4063_v63, %v13327_v60 }
 0x850   :  { %v9573_v54 = vpop.f32.mrf.mxu0 }
 0x851   :  { %v4179_v29 = vadd.f32 %v13372_v30, %v4150_v0 }
 0x852   :  { %v4066_v57 = vpop.f32.mrf.mxu0 }
 0x853   :  { %v4151_v37 = vadd.f32 %v4066_v57, %v13329_v59  ;;  %v4201_v10 = vmax.f32 %v4179_v29, 0.0  ;;  %v10523_v57 = vld [vmem:[#allocation17 + $0x18] sm:$0xff]  }
 0x854   :  { %v9574_v61 = vpop.f32.mrf.mxu0 }
 0x855   :  { %v4180_v20 = vadd.f32 %v13372_v30, %v4151_v37 }
 0x856   :  { %v4071_v47 = vpop.f32.mrf.mxu0 }
 0x857   :  { %v4202_v44 = vmax.f32 %v4180_v20, 0.0  ;;  %v4152_v46 = vadd.f32 %v4071_v47, %v13331_v41  ;;  %v10524_v47 = vld [vmem:[#allocation17 + $0x10] sm:$0xff]  }
 0x858   :  { %v9577_v18 = vpop.f32.mrf.mxu0 }
 0x859   :  { %v13378_v19 = vpack.c.bf16 %v4202_v44, %v4201_v10  ;;  %v4181_v14 = vadd.f32 %v13372_v30, %v4152_v46 }
 0x85a   :  { %v4074_v60 = vpop.f32.mrf.mxu0 }
 0x85b   :  { %v4153_v9 = vadd.f32 %v4074_v60, %v13333_v50  ;;  %v4203_v62 = vmax.f32 %v4181_v14, 0.0  ;;  %v10525_v14 = vld [vmem:[#allocation17 + $0x8] sm:$0xff]  }
 0x85c   :  { %v9578_v24 = vpop.f32.mrf.mxu0 }
 0x85d   :  { %v4182_v23 = vadd.f32 %v13372_v30, %v4153_v9 }
 0x85e   :  { %v4079_v59 = vpop.f32.mrf.mxu0 }
 0x85f   :  { %v4204_v52 = vmax.f32 %v4182_v23, 0.0  ;;  %v4154_v25 = vadd.f32 %v4079_v59, %v13335_v58 }
 0x860   :  { %v9581_v34 = vpop.f32.mrf.mxu0 }
 0x861   :  { %v13384_v38 = vpack.c.bf16 %v4204_v52, %v4203_v62  ;;  %v4183_v4 = vadd.f32 %v13372_v30, %v4154_v25  ;;  %v10526_v62 = vld [vmem:[#allocation17] sm:$0xff]  }
 0x862   :  { %v4082_v41 = vpop.f32.mrf.mxu0 }
 0x863   :  { %v4155_v42 = vadd.f32 %v4082_v41, %v13337_v16  ;;  %9632 = vmatmul.mubr.bf16.vlgmr.msra.gmra.mxu1 %v13384_v38  ;;  %v4205_v17 = vmax.f32 %v4183_v4, 0.0 }
 0x864   :  { %9668 = vmatpush3.bf16.msra.mxu1 %v10517_v36  ;;  %v9582_v50 = vpop.f32.mrf.mxu0  ;;  %9635 = vmatprep.mubr.msk.bf16.mxu1 %vm11513_vm0, %v14110_v21 }
 0x865   :  { %v4184_v35 = vadd.f32 %v13372_v30, %v4155_v42  ;;  %9669 = vmatprep.subr.bf16.mxu1 %v14110_v21 }
 0x866   :  { %v4087_v58 = vpop.f32.mrf.mxu0 }
 0x867   :  { %v4206_v53 = vmax.f32 %v4184_v35, 0.0  ;;  %v4156_v51 = vadd.f32 %v4087_v58, %v13339_v39 }
 0x868   :  { %v9585_v27 = vpop.f32.mrf.mxu0  ;;  %9670 = vmatpush3.bf16.msra.mxu1 %v10520_v45 }
 0x869   :  { %v13394_v16 = vpack.c.bf16 %v4206_v53, %v4205_v17  ;;  %9671 = vmatprep.subr.bf16.mxu1 %v14110_v21  ;;  %v4185_v15 = vadd.f32 %v13372_v30, %v4156_v51 }
 0x86a   :  { %v4090_v48 = vpop.f32.mrf.mxu0 }
 0x86b   :  { %v4157_v32 = vadd.f32 %v4090_v48, %v13341_v33  ;;  %9636 = vmatmul.mubr.bf16.gmra.mxu1 %v13394_v16  ;;  %9736 = vmatmul.mubr.bf16.vlgmr.msra.gmra.mxu0 %v13394_v16  ;;  %v4207_v2 = vmax.f32 %v4185_v15, 0.0 }
 0x86c   :  { %v9586_v31 = vpop.f32.mrf.mxu0  ;;  %9639 = vmatprep.mubr.msk.bf16.mxu1 %vm11513_vm0, %v14110_v21  ;;  %9739 = vmatprep.mubr.msk.bf16.mxu0 %vm11513_vm0, %v14110_v21 }
 0x86d   :  { %v4186_v39 = vadd.f32 %v13372_v30, %v4157_v32  ;;  %9672 = vmatpush3.bf16.msra.mxu1 %v10521_v26 }
 0x86e   :  { %v4095_v8 = vpop.f32.mrf.mxu0  ;;  %9673 = vmatprep.subr.bf16.mxu1 %v14110_v21 }
 0x86f   :  { %v4208_v33 = vmax.f32 %v4186_v39, 0.0  ;;  %v4158_v63 = vadd.f32 %v4095_v8, %v13343_v5 }
 0x870   :  { %v9589_v0 = vpop.f32.mrf.mxu0 }
 0x871   :  { %v13408_v54 = vpack.c.bf16 %v4208_v33, %v4207_v2  ;;  %9674 = vmatpush3.bf16.msra.mxu1 %v10522_v55  ;;  %v4187_v37 = vadd.f32 %v13372_v30, %v4158_v63 }
 0x872   :  { %v4098_v29 = vpop.f32.mrf.mxu0  ;;  %9675 = vmatprep.subr.bf16.mxu1 %v14110_v21 }
 0x873   :  { %v4159_v61 = vadd.f32 %v4098_v29, %v13345_v1  ;;  %9640 = vmatmul.mubr.bf16.gmra.mxu1 %v13408_v54  ;;  %9740 = vmatmul.mubr.bf16.gmra.mxu0 %v13408_v54  ;;  %v4209_v44 = vmax.f32 %v4187_v37, 0.0 }
 0x874   :  { %v9590_v20 = vpop.f32.mrf.mxu0  ;;  %9643 = vmatprep.mubr.msk.bf16.mxu1 %vm11513_vm0, %v14110_v21  ;;  %9743 = vmatprep.mubr.msk.bf16.mxu0 %vm11513_vm0, %v14110_v21 }
 0x875   :  { %v4188_v5 = vadd.f32 %v13372_v30, %v4159_v61  ;;  %9676 = vmatpush3.bf16.msra.mxu1 %v10523_v57 }
 0x876   :  { %v4103_v10 = vpop.f32.mrf.mxu0  ;;  %9677 = vmatprep.subr.bf16.mxu1 %v14110_v21 }
 0x877   :  { %v4210_v1 = vmax.f32 %v4188_v5, 0.0  ;;  %v4160_v46 = vadd.f32 %v4103_v10, %v13347_v13 }
 0x878   :  { %v9593_v18 = vpop.f32.mrf.mxu0 }
 0x879   :  { %v13422_v60 = vpack.c.bf16 %v4210_v1, %v4209_v44  ;;  %9678 = vmatpush3.bf16.msra.mxu1 %v10524_v47  ;;  %v4189_v24 = vadd.f32 %v13372_v30, %v4160_v46 }
 0x87a   :  { %v4106_v9 = vpop.f32.mrf.mxu0  ;;  %9679 = vmatprep.subr.bf16.mxu1 %v14110_v21 }
 0x87b   :  { %v4161_v23 = vadd.f32 %v4106_v9, %v13349_v11  ;;  %9644 = vmatmul.mubr.bf16.gmra.mxu1 %v13422_v60  ;;  %9744 = vmatmul.mubr.bf16.gmra.mxu0 %v13422_v60  ;;  %v4211_v25 = vmax.f32 %v4189_v24, 0.0 }
 0x87c   :  { %v9594_v59 = vpop.f32.mrf.mxu0  ;;  %9647 = vmatprep.mubr.msk.bf16.mxu1 %vm11513_vm0, %v14110_v21  ;;  %9747 = vmatprep.mubr.msk.bf16.mxu0 %vm11513_vm0, %v14110_v21 }
 0x87d   :  { %v4190_v13 = vadd.f32 %v13372_v30, %v4161_v23  ;;  %9680 = vmatpush3.bf16.msra.mxu1 %v10525_v14 }
 0x87e   :  { %v4111_v52 = vpop.f32.mrf.mxu0  ;;  %9681 = vmatprep.subr.bf16.mxu1 %v14110_v21 }
 0x87f   :  { %v4212_v11 = vmax.f32 %v4190_v13, 0.0  ;;  %v4162_v34 = vadd.f32 %v4111_v52, %v13351_v12 }
 0x880   :  { %v9597_v36 = vpop.f32.mrf.mxu0 }
 0x881   :  { %v13436_v41 = vpack.c.bf16 %v4212_v11, %v4211_v25  ;;  %9682 = vmatpush3.bf16.msra.mxu1 %v10526_v62  ;;  %v4191_v42 = vadd.f32 %v13372_v30, %v4162_v34  ;;  %v10534_v11 = vld [vmem:[#allocation20 + $0x28] sm:$0xff]   ;;  %v10536_v34 = vld [vmem:[#allocation20 + $0x20] sm:$0xff]   ;;  %v10535_v36 = vld [vmem:[#allocation20 + $0x50] sm:$0xff]  }
 0x882   :  { %v4114_v4 = vpop.f32.mrf.mxu0  ;;  %9771 = vmatprep.subr.bf16.mxu1 %v14110_v21 }
 0x883   :  { %v4163_v50 = vadd.f32 %v4114_v4, %v13353_v43  ;;  %9648 = vmatmul.mubr.bf16.gmra.mxu1 %v13436_v41  ;;  %9748 = vmatmul.mubr.bf16.gmra.mxu0 %v13436_v41  ;;  %v4213_v58 = vmax.f32 %v4191_v42, 0.0  ;;  %v10538_v4 = vld [vmem:[#allocation20 + $0x10] sm:$0xff]   ;;  %v10540_v42 = vld [vmem:[#allocation20 + $0x8] sm:$0xff]  }
 0x884   :  { %v9598_v45 = vpop.f32.mrf.mxu0  ;;  %9651 = vmatprep.mubr.msk.bf16.mxu1 %vm11513_vm0, %v14110_v21  ;;  %9751 = vmatprep.mubr.msk.bf16.mxu0 %vm11513_vm0, %v14110_v21 }
 0x885   :  { %v4192_v12 = vadd.f32 %v13372_v30, %v4163_v50  ;;  %v10541_v50 = vld [vmem:[#allocation20] sm:$0xff]   ;;  %v10539_v45 = vld [vmem:[#allocation20 + $0x48] sm:$0xff]  }
 0x886   :  { %v4119_v35 = vpop.f32.mrf.mxu0 }
 0x887   :  { %v4214_v17 = vmax.f32 %v4192_v12, 0.0  ;;  %v4164_v53 = vadd.f32 %v4119_v35, %v13355_v49  ;;  %v10542_v12 = vld [vmem:[#allocation20 + $0x40] sm:$0xff]  }
 0x888   :  { %v9601_v51 = vpop.f32.mrf.mxu0 }
 0x889   :  { %v13449_v43 = vpack.c.bf16 %v4214_v17, %v4213_v58  ;;  %v4193_v26 = vadd.f32 %v13372_v30, %v4164_v53 }
 0x88a   :  { %v4122_v27 = vpop.f32.mrf.mxu0 }
 0x88b   :  { %v4165_v48 = vadd.f32 %v4122_v27, %v13357_v28  ;;  %9652 = vmatmul.mubr.bf16.gmra.mxu1 %v13449_v43  ;;  %9752 = vmatmul.mubr.bf16.gmra.mxu0 %v13449_v43  ;;  %v4215_v31 = vmax.f32 %v4193_v26, 0.0 }
 0x88c   :  { %v9602_v15 = vpop.f32.mrf.mxu0  ;;  %9655 = vmatprep.mubr.msk.bf16.mxu1 %vm11513_vm0, %v14110_v21  ;;  %9755 = vmatprep.mubr.msk.bf16.mxu0 %vm11513_vm0, %v14110_v21 }
 0x88d   :  { %v4194_v49 = vadd.f32 %v13372_v30, %v4165_v48 }
 0x88e   :  { %v4127_v32 = vpop.f32.mrf.mxu0 }
 0x88f   :  { %v4216_v39 = vmax.f32 %v4194_v49, 0.0  ;;  %v4166_v55 = vadd.f32 %v4127_v32, %v13359_v3 }
 0x890   :  { %v9605_v8 = vpop.f32.mrf.mxu0 }
 0x891   :  { %v13461_v28 = vpack.c.bf16 %v4216_v39, %v4215_v31  ;;  %v4195_v33 = vadd.f32 %v13372_v30, %v4166_v55 }
 0x892   :  { %v4130_v2 = vpop.f32.mrf.mxu0 }
 0x893   :  { %v4167_v63 = vadd.f32 %v4130_v2, %v13361_v6  ;;  %9656 = vmatmul.mubr.bf16.gmra.mxu1 %v13461_v28  ;;  %9756 = vmatmul.mubr.bf16.gmra.mxu0 %v13461_v28  ;;  %v4217_v29 = vmax.f32 %v4195_v33, 0.0 }
 0x894   :  { %v9606_v0 = vpop.f32.mrf.mxu0  ;;  %9659 = vmatprep.mubr.msk.bf16.mxu1 %vm11513_vm0, %v14110_v21  ;;  %9759 = vmatprep.mubr.msk.bf16.mxu0 %vm11513_vm0, %v14110_v21 }
 0x895   :  { %v4196_v3 = vadd.f32 %v13372_v30, %v4167_v63 }
 0x896   :  { %v4135_v57 = vpop.f32.mrf.mxu0 }
 0x897   :  { %v4218_v37 = vmax.f32 %v4196_v3, 0.0  ;;  %v4168_v61 = vadd.f32 %v4135_v57, %v13363_v22 }
 0x898   :  { %v9609_v20 = vpop.f32.mrf.mxu0 }
 0x899   :  { %v13473_v6 = vpack.c.bf16 %v4218_v37, %v4217_v29  ;;  %v4197_v47 = vadd.f32 %v13372_v30, %v4168_v61 }
 0x89a   :  { %v4138_v5 = vpop.f32.mrf.mxu0 }
 0x89b   :  { %v4169_v10 = vadd.f32 %v4138_v5, %v13365_v56  ;;  %9660 = vmatmul.mubr.bf16.gmra.mxu1 %v13473_v6  ;;  %9760 = vmatmul.mubr.bf16.gmra.mxu0 %v13473_v6  ;;  %v4219_v46 = vmax.f32 %v4197_v47, 0.0 }
 0x89c   :  { %v9610_v44 = vpop.f32.mrf.mxu0  ;;  %9663 = vmatprep.mubr.msk.bf16.mxu1 %vm11513_vm0, %v14110_v21  ;;  %9763 = vmatprep.mubr.msk.bf16.mxu0 %vm11513_vm0, %v14110_v21 }
 0x89d   :  { %v4198_v22 = vadd.f32 %v13372_v30, %v4169_v10 }
 0x89e   :  { %v4143_v1 = vpop.f32.mrf.mxu0 }
 0x89f   :  { %v4220_v18 = vmax.f32 %v4198_v22, 0.0  ;;  %v4170_v14 = vadd.f32 %v4143_v1, %v13367_v7 }
 0x8a0   :  { %v9613_v9 = vpop.f32.mrf.mxu0 }
 0x8a1   :  { %v4232_v56 = vpack.c.bf16 %v4220_v18, %v4219_v46  ;;  %v4199_v23 = vadd.f32 %v13372_v30, %v4170_v14 }
 0x8a2   :  { %v4146_v24 = vpop.f32.mrf.mxu0 }
 0x8a3   :  { %v4171_v59 = vadd.f32 %v4146_v24, %v13369_v40  ;;  %9664 = vmatmul.mubr.bf16.gmra.mxu1 %v4232_v56  ;;  %9764 = vmatmul.mubr.bf16.gmra.mxu0 %v4232_v56  ;;  %v4221_v52 = vmax.f32 %v4199_v23, 0.0  ;;  %v10527_v40 = vld [vmem:[#allocation20 + $0x78] sm:$0xff]  }
 0x8a4   :  { %v9614_v13 = vpop.f32.mrf.mxu0  ;;  %9683 = vmatprep.mubr.msk.bf16.mxu1 %vm11513_vm0, %v14110_v21  ;;  %9767 = vmatprep.mubr.msk.bf16.mxu0 %vm11513_vm0, %v14110_v21 }
 0x8a5   :  { %v4200_v62 = vadd.f32 %v13372_v30, %v4171_v59  ;;  %v10528_v30 = vld [vmem:[#allocation20 + $0x70] sm:$0xff]  }
 0x8a7   :  { %v4222_v7 = vmax.f32 %v4200_v62, 0.0 }
 0x8a9   :  { %v4233_v25 = vpack.c.bf16 %v4222_v7, %v4221_v52 }
 0x8ab   :  { %9684 = vmatmul.mubr.bf16.vlgmr.msra.gmra.mxu1 %v13378_v19  ;;  %9768 = vmatmul.mubr.bf16.gmra.mxu0 %v4233_v25  ;;  %v10529_v19 = vld [vmem:[#allocation20 + $0x68] sm:$0xff]  }
 0x8ac   :  { %9687 = vmatprep.mubr.msk.bf16.mxu1 %vm11513_vm0, %v14110_v21  ;;  %9831 = vmatprep.mubr.msk.bf16.mxu0 %vm11513_vm0, %v14110_v21 }
 0x8ad   :  { %9772 = vmatpush3.bf16.msra.mxu1 %v10527_v40 }
 0x8ae   :  { %9773 = vmatprep.subr.bf16.mxu1 %v14110_v21 }
 0x8b1   :  { %9774 = vmatpush3.bf16.msra.mxu1 %v10528_v30 }
 0x8b2   :  { %9775 = vmatprep.subr.bf16.mxu1 %v14110_v21 }
 0x8b3   :  { %9688 = vmatmul.mubr.bf16.gmra.mxu1 %v13384_v38  ;;  %v10530_v38 = vld [vmem:[#allocation20 + $0x60] sm:$0xff]  }
 0x8b4   :  { %9691 = vmatprep.mubr.msk.bf16.mxu1 %vm11513_vm0, %v14110_v21 }
 0x8b5   :  { %9776 = vmatpush3.bf16.msra.mxu1 %v10529_v19 }
 0x8b6   :  { %9777 = vmatprep.subr.bf16.mxu1 %v14110_v21 }
 0x8b9   :  { %9778 = vmatpush3.bf16.msra.mxu1 %v10530_v38 }
 0x8ba   :  { %9779 = vmatprep.subr.bf16.mxu1 %v14110_v21 }
 0x8bb   :  { %9692 = vmatmul.mubr.bf16.gmra.mxu1 %v13394_v16  ;;  %v10531_v16 = vld [vmem:[#allocation20 + $0x38] sm:$0xff]  }
 0x8bc   :  { %9695 = vmatprep.mubr.msk.bf16.mxu1 %vm11513_vm0, %v14110_v21  ;;  %9816 = vmatpush3.bf16.msra.mxu0 %v10531_v16 }
 0x8bd   :  { %9817 = vmatprep.subr.bf16.mxu0 %v14110_v21 }
 0x8c3   :  { %9696 = vmatmul.mubr.bf16.gmra.mxu1 %v13408_v54  ;;  %v10532_v54 = vld [vmem:[#allocation20 + $0x58] sm:$0xff]  }
 0x8c4   :  { %9699 = vmatprep.mubr.msk.bf16.mxu1 %vm11513_vm0, %v14110_v21  ;;  %9780 = vmatpush3.bf16.msra.mxu1 %v10532_v54 }
 0x8c5   :  { %9781 = vmatprep.subr.bf16.mxu1 %v14110_v21 }
 0x8c8   :  { %9782 = vmatpush3.bf16.msra.mxu1 %v10535_v36 }
 0x8c9   :  { %9783 = vmatprep.subr.bf16.mxu1 %v14110_v21 }
 0x8cb   :  { %9700 = vmatmul.mubr.bf16.gmra.mxu1 %v13422_v60  ;;  %v10533_v60 = vld [vmem:[#allocation20 + $0x30] sm:$0xff]  }
 0x8cc   :  { %9703 = vmatprep.mubr.msk.bf16.mxu1 %vm11513_vm0, %v14110_v21  ;;  %9818 = vmatpush3.bf16.msra.mxu0 %v10533_v60 }
 0x8cd   :  { %9819 = vmatprep.subr.bf16.mxu0 %v14110_v21  ;;  %9784 = vmatpush3.bf16.msra.mxu1 %v10539_v45 }
 0x8ce   :  { %9785 = vmatprep.subr.bf16.mxu1 %v14110_v21 }
 0x8d0   :  { %9820 = vmatpush3.bf16.msra.mxu0 %v10534_v11 }
 0x8d1   :  { %9821 = vmatprep.subr.bf16.mxu0 %v14110_v21  ;;  %9786 = vmatpush3.bf16.msra.mxu1 %v10542_v12 }
 0x8d2   :  { %9859 = vmatprep.subr.bf16.mxu1 %v14110_v21 }
 0x8d3   :  { %9704 = vmatmul.mubr.bf16.gmra.mxu1 %v13436_v41  ;;  %v10537_v41 = vld [vmem:[#allocation20 + $0x18] sm:$0xff]  }
 0x8d4   :  { %9707 = vmatprep.mubr.msk.bf16.mxu1 %vm11513_vm0, %v14110_v21  ;;  %9822 = vmatpush3.bf16.msra.mxu0 %v10536_v34 }
 0x8d5   :  { %9823 = vmatprep.subr.bf16.mxu0 %v14110_v21 }
 0x8d8   :  { %9824 = vmatpush3.bf16.msra.mxu0 %v10537_v41 }
 0x8d9   :  { %9825 = vmatprep.subr.bf16.mxu0 %v14110_v21 }
 0x8db   :  { %9708 = vmatmul.mubr.bf16.gmra.mxu1 %v13449_v43 }
 0x8dc   :  { %9711 = vmatprep.mubr.msk.bf16.mxu1 %vm11513_vm0, %v14110_v21  ;;  %9826 = vmatpush3.bf16.msra.mxu0 %v10538_v4 }
 0x8dd   :  { %9827 = vmatprep.subr.bf16.mxu0 %v14110_v21 }
 0x8e0   :  { %9828 = vmatpush3.bf16.msra.mxu0 %v10540_v42 }
 0x8e1   :  { %9829 = vmatprep.subr.bf16.mxu0 %v14110_v21 }
 0x8e3   :  { %9712 = vmatmul.mubr.bf16.gmra.mxu1 %v13461_v28 }
 0x8e4   :  { %9715 = vmatprep.mubr.msk.bf16.mxu1 %vm11513_vm0, %v14110_v21  ;;  %9830 = vmatpush3.bf16.msra.mxu0 %v10541_v50 }
 0x8e5   :  { %9903 = vmatprep.subr.bf16.mxu0 %v14110_v21 }
 0x8eb   :  { %9716 = vmatmul.mubr.bf16.gmra.mxu1 %v13473_v6 }
 0x8ec   :  { %9787 = vmatprep.mubr.msk.bf16.mxu1 %vm11513_vm0, %v14110_v21 }
 0x923   :  { %v13537_v35 = vpop.f32.mrf.mxu1 }
 0x925   :  { %v9633_v58 = vpop.f32.mrf.mxu1 }
 0x927   :  { %v13539_v17 = vpop.f32.mrf.mxu1 }
 0x929   :  { %v9634_v53 = vpop.f32.mrf.mxu1 }
 0x92b   :  { %v13541_v51 = vpop.f32.mrf.mxu1  ;;  %v13543_v43 = vpop.f32.mrf.mxu0 }
 0x92d   :  { %v9637_v27 = vpop.f32.mrf.mxu1  ;;  %v9737_v26 = vpop.f32.mrf.mxu0 }
 0x92f   :  { %v13545_v48 = vpop.f32.mrf.mxu1  ;;  %v13547_v15 = vpop.f32.mrf.mxu0 }
 0x931   :  { %v9638_v49 = vpop.f32.mrf.mxu1  ;;  %v9738_v32 = vpop.f32.mrf.mxu0 }
 0x933   :  { %v13549_v31 = vpop.f32.mrf.mxu1  ;;  %v13551_v39 = vpop.f32.mrf.mxu0 }
 0x935   :  { %v9641_v55 = vpop.f32.mrf.mxu1  ;;  %v9741_v8 = vpop.f32.mrf.mxu0 }
 0x937   :  { %v13553_v28 = vpop.f32.mrf.mxu1  ;;  %v13555_v2 = vpop.f32.mrf.mxu0 }
 0x939   :  { %v9642_v33 = vpop.f32.mrf.mxu1  ;;  %v9742_v63 = vpop.f32.mrf.mxu0 }
 0x93b   :  { %v13557_v0 = vpop.f32.mrf.mxu1  ;;  %v13559_v3 = vpop.f32.mrf.mxu0 }
 0x93d   :  { %v9645_v57 = vpop.f32.mrf.mxu1  ;;  %v9745_v29 = vpop.f32.mrf.mxu0 }
 0x93e   :  { %v13609_v29 = vld [vmem:[#allocation19] ss:$0 sm:$0xff] }
 0x93f   :  { %v13561_v37 = vpop.f32.mrf.mxu1  ;;  %v13563_v61 = vpop.f32.mrf.mxu0 }
 0x941   :  { %v9646_v20 = vpop.f32.mrf.mxu1  ;;  %v9746_v6 = vpop.f32.mrf.mxu0 }
 0x943   :  { %v13565_v5 = vpop.f32.mrf.mxu1  ;;  %v13567_v47 = vpop.f32.mrf.mxu0 }
 0x945   :  { %v9649_v10 = vpop.f32.mrf.mxu1  ;;  %v9749_v44 = vpop.f32.mrf.mxu0 }
 0x947   :  { %v13569_v22 = vpop.f32.mrf.mxu1  ;;  %v13571_v1 = vpop.f32.mrf.mxu0 }
 0x949   :  { %v9650_v46 = vpop.f32.mrf.mxu1  ;;  %v9750_v18 = vpop.f32.mrf.mxu0 }
 0x94b   :  { %v13573_v14 = vpop.f32.mrf.mxu1  ;;  %v13575_v9 = vpop.f32.mrf.mxu0 }
 0x94d   :  { %v9653_v56 = vpop.f32.mrf.mxu1  ;;  %v9753_v24 = vpop.f32.mrf.mxu0 }
 0x94f   :  { %v13577_v23 = vpop.f32.mrf.mxu1  ;;  %v13579_v59 = vpop.f32.mrf.mxu0 }
 0x951   :  { %v9654_v13 = vpop.f32.mrf.mxu1  ;;  %v9754_v62 = vpop.f32.mrf.mxu0 }
 0x953   :  { %v13581_v52 = vpop.f32.mrf.mxu1  ;;  %v13583_v7 = vpop.f32.mrf.mxu0 }
 0x955   :  { %v9657_v25 = vpop.f32.mrf.mxu1  ;;  %v9757_v40 = vpop.f32.mrf.mxu0 }
 0x957   :  { %v13585_v30 = vpop.f32.mrf.mxu1  ;;  %v13587_v19 = vpop.f32.mrf.mxu0 }
 0x959   :  { %v9658_v38 = vpop.f32.mrf.mxu1  ;;  %v9758_v16 = vpop.f32.mrf.mxu0 }
 0x95b   :  { %v13589_v54 = vpop.f32.mrf.mxu1  ;;  %v13591_v60 = vpop.f32.mrf.mxu0 }
 0x95d   :  { %v9661_v11 = vpop.f32.mrf.mxu1  ;;  %v9761_v34 = vpop.f32.mrf.mxu0 }
 0x95f   :  { %v13593_v36 = vpop.f32.mrf.mxu1  ;;  %v13595_v41 = vpop.f32.mrf.mxu0 }
 0x961   :  { %v9662_v4 = vpop.f32.mrf.mxu1  ;;  %v9762_v42 = vpop.f32.mrf.mxu0 }
 0x963   :  { %v13597_v50 = vpop.f32.mrf.mxu1  ;;  %v13599_v45 = vpop.f32.mrf.mxu0 }
 0x965   :  { %v9665_v12 = vpop.f32.mrf.mxu1  ;;  %v9765_v58 = vpop.f32.mrf.mxu0 }
 0x967   :  { %v13601_v53 = vpop.f32.mrf.mxu1  ;;  %v13603_v27 = vpop.f32.mrf.mxu0 }
 0x969   :  { %v9666_v26 = vpop.f32.mrf.mxu1  ;;  %v9766_v49 = vpop.f32.mrf.mxu0 }
 0x96b   :  { %v4502_v32 = vpop.f32.mrf.mxu1  ;;  %v13605_v55 = vpop.f32.mrf.mxu0 }
 0x96c   :  { %v4503_v8 = vadd.f32 %v4502_v32, %v13537_v35 }
 0x96d   :  { %v9685_v33 = vpop.f32.mrf.mxu1  ;;  %v9769_v63 = vpop.f32.mrf.mxu0 }
 0x96e   :  { %v4743_v57 = vadd.f32 %v13543_v43, %v4503_v8  ;;  %v5333_v43 = vld [vmem:[%s14138_s5] sm:$0x3]  ;;  %v10543_v8 = vld [vmem:[#allocation20 + $0xb8] sm:$0xff]  }
 0x96f   :  { %v4505_v20 = vpop.f32.mrf.mxu1  ;;  %v13611_v6 = vpop.f32.mrf.mxu0  ;;  %v5347_v34 = vsel %vm5345_vm1, %v5333_v43, 0 }
 0x970   :  { %v4506_v10 = vadd.f32 %v4505_v20, %v13539_v17  ;;  %v4768_v18 = vadd.f32 %v13609_v29, %v4743_v57 }
 0x971   :  { %v9686_v44 = vpop.f32.mrf.mxu1  ;;  %v9770_v46 = vpop.f32.mrf.mxu0 }
 0x972   :  { %v4744_v56 = vadd.f32 %v13547_v15, %v4506_v10  ;;  %v4786_v25 = vmax.f32 %v4768_v18, 0.0  ;;  %v10544_v10 = vld [vmem:[#allocation20 + $0xb0] sm:$0xff]  }
 0x973   :  { %v4510_v24 = vpop.f32.mrf.mxu1 }
 0x974   :  { %v4769_v35 = vadd.f32 %v13609_v29, %v4744_v56  ;;  %v4511_v13 = vadd.f32 %v4510_v24, %v13541_v51  ;;  %v10545_v24 = vld [vmem:[#allocation20 + $0xa8] sm:$0xff]  }
 0x975   :  { %v9689_v62 = vpop.f32.mrf.mxu1 }
 0x976   :  { %v4787_v40 = vmax.f32 %v4769_v35, 0.0  ;;  %v4745_v38 = vadd.f32 %v13551_v39, %v4511_v13 }
 0x977   :  { %v4513_v16 = vpop.f32.mrf.mxu1 }
 0x978   :  { %v4804_v17 = vpack.c.bf16 %v4787_v40, %v4786_v25  ;;  %v4514_v11 = vadd.f32 %v4513_v16, %v13545_v48  ;;  %v4770_v15 = vadd.f32 %v13609_v29, %v4745_v38 }
 0x979   :  { %v9690_v4 = vpop.f32.mrf.mxu1 }
 0x97a   :  { %v4746_v42 = vadd.f32 %v13555_v2, %v4514_v11  ;;  %9832 = vmatmul.mubr.bf16.vlgmr.msra.gmra.mxu0 %v4804_v17  ;;  %v4788_v48 = vmax.f32 %v4770_v15, 0.0  ;;  %v10547_v15 = vld [vmem:[#allocation20 + $0x98] sm:$0xff]  }
 0x97b   :  { %v4518_v12 = vpop.f32.mrf.mxu1  ;;  %9835 = vmatprep.mubr.msk.bf16.mxu0 %vm11513_vm0, %v14110_v21  ;;  %9904 = vmatpush3.bf16.msra.mxu0 %v5347_v34 }
 0x97c   :  { %v4771_v51 = vadd.f32 %v13609_v29, %v4746_v42  ;;  %v4519_v39 = vadd.f32 %v4518_v12, %v13549_v31  ;;  %9909 = vmatprep.subr.bf16.mxu0 %v14110_v21 }
 0x97d   :  { %v9693_v58 = vpop.f32.mrf.mxu1 }
 0x97e   :  { %v4789_v26 = vmax.f32 %v4771_v51, 0.0  ;;  %v4747_v49 = vadd.f32 %v13559_v3, %v4519_v39  ;;  %v10548_v39 = vld [vmem:[#allocation20 + $0x90] sm:$0xff]  }
 0x97f   :  { %v4521_v32 = vpop.f32.mrf.mxu1 }
 0x980   :  { %v4805_v2 = vpack.c.bf16 %v4789_v26, %v4788_v48  ;;  %v4522_v33 = vadd.f32 %v4521_v32, %v13553_v28  ;;  %v4772_v57 = vadd.f32 %v13609_v29, %v4747_v49 }
 0x981   :  { %v9694_v63 = vpop.f32.mrf.mxu1 }
 0x982   :  { %v4748_v20 = vadd.f32 %v13563_v61, %v4522_v33  ;;  %9788 = vmatmul.mubr.bf16.vlgmr.msra.gmra.mxu1 %v4805_v2  ;;  %9836 = vmatmul.mubr.bf16.gmra.mxu0 %v4805_v2  ;;  %v4790_v46 = vmax.f32 %v4772_v57, 0.0  ;;  %v10549_v2 = vld [vmem:[#allocation20 + $0x88] sm:$0xff]  }
 0x983   :  { %9860 = vmatpush3.bf16.msra.mxu1 %v10543_v8  ;;  %v4526_v31 = vpop.f32.mrf.mxu1  ;;  %9791 = vmatprep.mubr.msk.bf16.mxu1 %vm11513_vm0, %v14110_v21 }
 0x984   :  { %v4773_v3 = vadd.f32 %v13609_v29, %v4748_v20  ;;  %v4527_v44 = vadd.f32 %v4526_v31, %v13557_v0  ;;  %9861 = vmatprep.subr.bf16.mxu1 %v14110_v21  ;;  %9839 = vmatprep.mubr.msk.bf16.mxu0 %vm11513_vm0, %v14110_v21  ;;  %v10550_v20 = vld [vmem:[#allocation20 + $0x80] sm:$0xff]  }
 0x985   :  { %v9697_v28 = vpop.f32.mrf.mxu1 }
 0x986   :  { %v4791_v61 = vmax.f32 %v4773_v3, 0.0  ;;  %v4749_v18 = vadd.f32 %v13567_v47, %v4527_v44  ;;  %v10546_v47 = vld [vmem:[#allocation20 + $0xa0] sm:$0xff]  }
 0x987   :  { %v4529_v56 = vpop.f32.mrf.mxu1  ;;  %9862 = vmatpush3.bf16.msra.mxu1 %v10544_v10 }
 0x988   :  { %v13640_v35 = vpack.c.bf16 %v4791_v61, %v4790_v46  ;;  %v4530_v13 = vadd.f32 %v4529_v56, %v13561_v37  ;;  %9863 = vmatprep.subr.bf16.mxu1 %v14110_v21  ;;  %v4774_v62 = vadd.f32 %v13609_v29, %v4749_v18 }
 0x989   :  { %v9698_v0 = vpop.f32.mrf.mxu1 }
 0x98a   :  { %v4750_v43 = vadd.f32 %v13571_v1, %v4530_v13  ;;  %9792 = vmatmul.mubr.bf16.gmra.mxu1 %v13640_v35  ;;  %9840 = vmatmul.mubr.bf16.gmra.mxu0 %v13640_v35  ;;  %v4792_v38 = vmax.f32 %v4774_v62, 0.0 }
 0x98b   :  { %v4534_v25 = vpop.f32.mrf.mxu1  ;;  %9864 = vmatpush3.bf16.msra.mxu1 %v10545_v24  ;;  %9795 = vmatprep.mubr.msk.bf16.mxu1 %vm11513_vm0, %v14110_v21 }
 0x98c   :  { %v4775_v40 = vadd.f32 %v13609_v29, %v4750_v43  ;;  %v4535_v37 = vadd.f32 %v4534_v25, %v13565_v5  ;;  %9843 = vmatprep.mubr.msk.bf16.mxu0 %vm11513_vm0, %v14110_v21  ;;  %9865 = vmatprep.subr.bf16.mxu1 %v14110_v21 }
 0x98d   :  { %v9701_v1 = vpop.f32.mrf.mxu1 }
 0x98e   :  { %v4793_v16 = vmax.f32 %v4775_v40, 0.0  ;;  %v4751_v17 = vadd.f32 %v13575_v9, %v4535_v37 }
 0x98f   :  { %v4537_v11 = vpop.f32.mrf.mxu1  ;;  %9866 = vmatpush3.bf16.msra.mxu1 %v10546_v47 }
 0x990   :  { %v13656_v34 = vpack.c.bf16 %v4793_v16, %v4792_v38  ;;  %v4538_v4 = vadd.f32 %v4537_v11, %v13569_v22  ;;  %9867 = vmatprep.subr.bf16.mxu1 %v14110_v21  ;;  %v4776_v42 = vadd.f32 %v13609_v29, %v4751_v17 }
 0x991   :  { %v9702_v5 = vpop.f32.mrf.mxu1 }
 0x992   :  { %v4752_v12 = vadd.f32 %v13579_v59, %v4538_v4  ;;  %9796 = vmatmul.mubr.bf16.gmra.mxu1 %v13656_v34  ;;  %9844 = vmatmul.mubr.bf16.gmra.mxu0 %v13656_v34  ;;  %v4794_v59 = vmax.f32 %v4776_v42, 0.0  ;;  %v5331_v5 = vld [vmem:[%s14139_s26 + $0x8] sm:$0xff] }
 0x993   :  { %v4542_v51 = vpop.f32.mrf.mxu1  ;;  %9799 = vmatprep.mubr.msk.bf16.mxu1 %vm11513_vm0, %v14110_v21  ;;  %9847 = vmatprep.mubr.msk.bf16.mxu0 %vm11513_vm0, %v14110_v21 }
 0x994   :  { %v4777_v22 = vadd.f32 %v13609_v29, %v4752_v12  ;;  %v4543_v9 = vadd.f32 %v4542_v51, %v13573_v14  ;;  %9868 = vmatpush3.bf16.msra.mxu1 %v10547_v15  ;;  %v5330_v15 = vld [vmem:[%s14139_s26] sm:$0xff] }
 0x995   :  { %v9705_v58 = vpop.f32.mrf.mxu1  ;;  %9869 = vmatprep.subr.bf16.mxu1 %v14110_v21  ;;  %v5332_v42 = vpack.c.bf16 %v5331_v5, %v5330_v15 }
 0x996   :  { %v4795_v48 = vmax.f32 %v4777_v22, 0.0  ;;  %v4753_v26 = vadd.f32 %v13583_v7, %v4543_v9  ;;  %v10552_v22 = vld [vmem:[#allocation23 + $0x30] sm:$0xff]   ;;  %v10554_v9 = vld [vmem:[#allocation23 + $0x28] sm:$0xff]  }
 0x997   :  { %v4545_v49 = vpop.f32.mrf.mxu1  ;;  %v10556_v58 = vld [vmem:[#allocation23 + $0x70] sm:$0xff]  }
 0x998   :  { %v13672_v32 = vpack.c.bf16 %v4795_v48, %v4794_v59  ;;  %v4546_v8 = vadd.f32 %v4545_v49, %v13577_v23  ;;  %9870 = vmatpush3.bf16.msra.mxu1 %v10548_v39  ;;  %v4778_v14 = vadd.f32 %v13609_v29, %v4753_v26  ;;  %v10555_v39 = vld [vmem:[#allocation23 + $0x20] sm:$0xff]   ;;  %v10557_v59 = vld [vmem:[#allocation23 + $0x18] sm:$0xff]   ;;  %v10558_v48 = vld [vmem:[#allocation23 + $0x68] sm:$0xff]  }
 0x999   :  { %v9706_v33 = vpop.f32.mrf.mxu1  ;;  %9871 = vmatprep.subr.bf16.mxu1 %v14110_v21  ;;  %v10559_v26 = vld [vmem:[#allocation23 + $0x10] sm:$0xff]   ;;  %v10560_v49 = vld [vmem:[#allocation23 + $0x60] sm:$0xff]  }
 0x99a   :  { %v4754_v63 = vadd.f32 %v13587_v19, %v4546_v8  ;;  %9800 = vmatmul.mubr.bf16.gmra.mxu1 %v13672_v32  ;;  %9848 = vmatmul.mubr.bf16.gmra.mxu0 %v13672_v32  ;;  %v4796_v19 = vmax.f32 %v4778_v14, 0.0  ;;  %v10562_v8 = vld [vmem:[#allocation23 + $0x58] sm:$0xff]   ;;  %v10564_v33 = vld [vmem:[#allocation23 + $0x50] sm:$0xff]   ;;  %v10565_v14 = vld [vmem:[#allocation23 + $0x48] sm:$0xff]  }
 0x99b   :  { %v4550_v57 = vpop.f32.mrf.mxu1  ;;  %9803 = vmatprep.mubr.msk.bf16.mxu1 %vm11513_vm0, %v14110_v21  ;;  %9851 = vmatprep.mubr.msk.bf16.mxu0 %vm11513_vm0, %v14110_v21 }
 0x99c   :  { %v4779_v23 = vadd.f32 %v13609_v29, %v4754_v63  ;;  %v4551_v7 = vadd.f32 %v4550_v57, %v13581_v52  ;;  %9872 = vmatpush3.bf16.msra.mxu1 %v10549_v2  ;;  %v10563_v2 = vld [vmem:[#allocation23] sm:$0xff]  }
 0x99d   :  { %v9709_v31 = vpop.f32.mrf.mxu1  ;;  %9873 = vmatprep.subr.bf16.mxu1 %v14110_v21  ;;  %v10567_v63 = vld [vmem:[#allocation23 + $0x40] sm:$0xff]  }
 0x99e   :  { %v4797_v10 = vmax.f32 %v4779_v23, 0.0  ;;  %v4755_v3 = vadd.f32 %v13591_v60, %v4551_v7 }
 0x99f   :  { %v4553_v44 = vpop.f32.mrf.mxu1 }
 0x9a0   :  { %v4809_v28 = vpack.c.bf16 %v4797_v10, %v4796_v19  ;;  %v4554_v46 = vadd.f32 %v4553_v44, %v13585_v30  ;;  %9874 = vmatpush3.bf16.msra.mxu1 %v10550_v20  ;;  %v4780_v18 = vadd.f32 %v13609_v29, %v4755_v3 }
 0x9a1   :  { %v9710_v61 = vpop.f32.mrf.mxu1  ;;  %9929 = vmatprep.subr.bf16.mxu1 %v14110_v21 }
 0x9a2   :  { %v4756_v52 = vadd.f32 %v13595_v41, %v4554_v46  ;;  %9804 = vmatmul.mubr.bf16.gmra.mxu1 %v4809_v28  ;;  %9852 = vmatmul.mubr.bf16.gmra.mxu0 %v4809_v28  ;;  %v4798_v13 = vmax.f32 %v4780_v18, 0.0 }
 0x9a3   :  { %v4558_v56 = vpop.f32.mrf.mxu1  ;;  %9807 = vmatprep.mubr.msk.bf16.mxu1 %vm11513_vm0, %v14110_v21  ;;  %9855 = vmatprep.mubr.msk.bf16.mxu0 %vm11513_vm0, %v14110_v21 }
 0x9a4   :  { %v4781_v60 = vadd.f32 %v13609_v29, %v4756_v52  ;;  %v4559_v30 = vadd.f32 %v4558_v56, %v13589_v54 }
 0x9a5   :  { %v9713_v24 = vpop.f32.mrf.mxu1 }
 0x9a6   :  { %v4799_v0 = vmax.f32 %v4781_v60, 0.0  ;;  %v4757_v62 = vadd.f32 %v13599_v45, %v4559_v30 }
 0x9a7   :  { %v4561_v43 = vpop.f32.mrf.mxu1 }
 0x9a8   :  { %v4810_v41 = vpack.c.bf16 %v4799_v0, %v4798_v13  ;;  %v4562_v25 = vadd.f32 %v4561_v43, %v13593_v36  ;;  %v4782_v40 = vadd.f32 %v13609_v29, %v4757_v62 }
 0x9a9   :  { %v9714_v47 = vpop.f32.mrf.mxu1 }
 0x9aa   :  { %v4758_v37 = vadd.f32 %v13603_v27, %v4562_v25  ;;  %9808 = vmatmul.mubr.bf16.gmra.mxu1 %v4810_v41  ;;  %9856 = vmatmul.mubr.bf16.gmra.mxu0 %v4810_v41  ;;  %v4800_v38 = vmax.f32 %v4782_v40, 0.0 }
 0x9ab   :  { %v4566_v1 = vpop.f32.mrf.mxu1  ;;  %9811 = vmatprep.mubr.msk.bf16.mxu1 %vm11513_vm0, %v14110_v21  ;;  %9905 = vmatprep.mubr.msk.bf16.mxu0 %vm11513_vm0, %v14110_v21 }
 0x9ac   :  { %v4783_v54 = vadd.f32 %v13609_v29, %v4758_v37 }
 0x9ad   :  { %v9717_v45 = vpop.f32.mrf.mxu1 }
 0x9ae   :  { %v4801_v16 = vmax.f32 %v4783_v54, 0.0 }
 0x9af   :  { %v4569_v36 = vpop.f32.mrf.mxu1 }
 0x9b0   :  { %v4811_v17 = vpack.c.bf16 %v4801_v16, %v4800_v38  ;;  %v4570_v27 = vadd.f32 %v4569_v36, %v13601_v53  ;;  %v10551_v53 = vld [vmem:[#allocation23 + $0x38] sm:$0xff]  }
 0x9b1   :  { %v9718_v11 = vpop.f32.mrf.mxu1 }
 0x9b2   :  { %9812 = vmatmul.mubr.bf16.gmra.mxu1 %v4811_v17  ;;  %9906 = vmatmul.mubr.msk.bf16.vlgmr.msra.gmra.mxu0 %vm5341_vm2, %v5332_v42 }
 0x9b3   :  { %9875 = vmatprep.mubr.msk.bf16.mxu1 %vm11513_vm0, %v14110_v21  ;;  %9925 = vmatprep.mubr.msk.bf16.mxu0 %vm11513_vm0, %v14110_v21 }
 0x9b4   :  { %9910 = vmatpush3.bf16.msra.mxu0 %v10551_v53 }
 0x9b5   :  { %9911 = vmatprep.subr.bf16.mxu0 %v14110_v21 }
 0x9b8   :  { %9912 = vmatpush3.bf16.msra.mxu0 %v10552_v22 }
 0x9b9   :  { %9913 = vmatprep.subr.bf16.mxu0 %v14110_v21 }
 0x9ba   :  { %9876 = vmatmul.mubr.bf16.vlgmr.msra.gmra.mxu1 %v13640_v35  ;;  %v4567_v35 = vadd.f32 %v4566_v1, %v13597_v50 }
 0x9bb   :  { %9879 = vmatprep.mubr.msk.bf16.mxu1 %vm11513_vm0, %v14110_v21 }
 0x9bc   :  { %v4759_v4 = vadd.f32 %v13605_v55, %v4567_v35  ;;  %9914 = vmatpush3.bf16.msra.mxu0 %v10554_v9 }
 0x9bd   :  { %9915 = vmatprep.subr.bf16.mxu0 %v14110_v21 }
 0x9be   :  { %v4784_v51 = vadd.f32 %v13609_v29, %v4759_v4 }
 0x9c0   :  { %9916 = vmatpush3.bf16.msra.mxu0 %v10555_v39 }
 0x9c1   :  { %9917 = vmatprep.subr.bf16.mxu0 %v14110_v21 }
 0x9c2   :  { %9880 = vmatmul.mubr.bf16.gmra.mxu1 %v13656_v34  ;;  %v4760_v34 = vadd.f32 %v13611_v6, %v4570_v27  ;;  %v4802_v6 = vmax.f32 %v4784_v51, 0.0 }
 0x9c3   :  { %9883 = vmatprep.mubr.msk.bf16.mxu1 %vm11513_vm0, %v14110_v21 }
 0x9c4   :  { %v4785_v12 = vadd.f32 %v13609_v29, %v4760_v34  ;;  %v10553_v29 = vld [vmem:[#allocation23 + $0x78] sm:$0xff]   ;;  %9918 = vmatpush3.bf16.msra.mxu0 %v10557_v59 }
 0x9c5   :  { %9930 = vmatpush3.bf16.msra.mxu1 %v10553_v29  ;;  %9919 = vmatprep.subr.bf16.mxu0 %v14110_v21 }
 0x9c6   :  { %v4803_v50 = vmax.f32 %v4785_v12, 0.0  ;;  %9931 = vmatprep.subr.bf16.mxu1 %v14110_v21 }
 0x9c8   :  { %v4812_v55 = vpack.c.bf16 %v4803_v50, %v4802_v6  ;;  %9920 = vmatpush3.bf16.msra.mxu0 %v10559_v26 }
 0x9c9   :  { %9932 = vmatpush3.bf16.msra.mxu1 %v10556_v58  ;;  %9921 = vmatprep.subr.bf16.mxu0 %v14110_v21 }
 0x9ca   :  { %9884 = vmatmul.mubr.bf16.gmra.mxu1 %v13672_v32  ;;  %9933 = vmatprep.subr.bf16.mxu1 %v14110_v21  ;;  %v10561_v32 = vld [vmem:[#allocation23 + $0x8] sm:$0xff]  }
 0x9cb   :  { %9887 = vmatprep.mubr.msk.bf16.mxu1 %vm11513_vm0, %v14110_v21 }
 0x9cc   :  { %9922 = vmatpush3.bf16.msra.mxu0 %v10561_v32 }
 0x9cd   :  { %9934 = vmatpush3.bf16.msra.mxu1 %v10558_v48  ;;  %9923 = vmatprep.subr.bf16.mxu0 %v14110_v21 }
 0x9ce   :  { %9935 = vmatprep.subr.bf16.mxu1 %v14110_v21 }
 0x9d0   :  { %9924 = vmatpush3.bf16.msra.mxu0 %v10563_v2 }
 0x9d1   :  { %9936 = vmatpush3.bf16.msra.mxu1 %v10560_v49  ;;  %9949 = vmatprep.subr.bf16.mxu0 %v14110_v21 }
 0x9d2   :  { %9888 = vmatmul.mubr.bf16.gmra.mxu1 %v4809_v28  ;;  %9937 = vmatprep.subr.bf16.mxu1 %v14110_v21 }
 0x9d3   :  { %9891 = vmatprep.mubr.msk.bf16.mxu1 %vm11513_vm0, %v14110_v21 }
 0x9d5   :  { %9938 = vmatpush3.bf16.msra.mxu1 %v10562_v8 }
 0x9d6   :  { %9939 = vmatprep.subr.bf16.mxu1 %v14110_v21 }
 0x9d9   :  { %9940 = vmatpush3.bf16.msra.mxu1 %v10564_v33 }
 0x9da   :  { %9892 = vmatmul.mubr.bf16.gmra.mxu1 %v4810_v41  ;;  %9941 = vmatprep.subr.bf16.mxu1 %v14110_v21 }
 0x9db   :  { %9895 = vmatprep.mubr.msk.bf16.mxu1 %vm11513_vm0, %v14110_v21 }
 0x9dd   :  { %9942 = vmatpush3.bf16.msra.mxu1 %v10565_v14 }
 0x9de   :  { %9943 = vmatprep.subr.bf16.mxu1 %v14110_v21 }
 0x9e1   :  { %9944 = vmatpush3.bf16.msra.mxu1 %v10567_v63 }
 0x9e2   :  { %9896 = vmatmul.mubr.bf16.gmra.mxu1 %v4811_v17  ;;  %9969 = vmatprep.subr.bf16.mxu1 %v14110_v21 }
 0x9e3   :  { %9899 = vmatprep.mubr.msk.bf16.mxu1 %vm11513_vm0, %v14110_v21 }
 0x9ea   :  { %9900 = vmatmul.mubr.bf16.gmra.mxu1 %v4812_v55 }
 0x9eb   :  { %9945 = vmatprep.mubr.msk.bf16.mxu1 %vm11513_vm0, %v14110_v21 }
 0xa3a   :  { %v13752_v57 = vpop.f32.mrf.mxu0 }
 0xa3c   :  { %v9833_v23 = vpop.f32.mrf.mxu0 }
 0xa3e   :  { %v13754_v7 = vpop.f32.mrf.mxu0 }
 0xa40   :  { %v9834_v20 = vpop.f32.mrf.mxu0 }
 0xa42   :  { %v4928_v31 = vpop.f32.mrf.mxu1  ;;  %v13756_v19 = vpop.f32.mrf.mxu0 }
 0xa44   :  { %v9789_v10 = vpop.f32.mrf.mxu1  ;;  %v9837_v3 = vpop.f32.mrf.mxu0 }
 0xa45   :  { %v5066_v3 = vadd.f32 %v13752_v57, %v4928_v31 }
 0xa46   :  { %v13758_v44 = vpop.f32.mrf.mxu1  ;;  %v13760_v28 = vpop.f32.mrf.mxu0 }
 0xa48   :  { %v9790_v46 = vpop.f32.mrf.mxu1  ;;  %v9838_v61 = vpop.f32.mrf.mxu0 }
 0xa4a   :  { %v13762_v18 = vpop.f32.mrf.mxu1  ;;  %v5081_v52 = vpop.f32.mrf.mxu0 }
 0xa4c   :  { %v9793_v56 = vpop.f32.mrf.mxu1  ;;  %v9841_v60 = vpop.f32.mrf.mxu0 }
 0xa4d   :  { %v5069_v60 = vadd.f32 %v13754_v7, %v13758_v44 }
 0xa4e   :  { %v13764_v30 = vpop.f32.mrf.mxu1  ;;  %v5084_v24 = vpop.f32.mrf.mxu0 }
 0xa50   :  { %v9794_v13 = vpop.f32.mrf.mxu1  ;;  %v9842_v0 = vpop.f32.mrf.mxu0 }
 0xa52   :  { %v4944_v62 = vpop.f32.mrf.mxu1  ;;  %v5089_v43 = vpop.f32.mrf.mxu0 }
 0xa53   :  { %v13766_v41 = vadd.f32 %v5081_v52, %v4944_v62  ;;  %v13787_v52 = vld [vmem:[#allocation22] ss:$0 sm:$0xff] }
 0xa54   :  { %v9797_v25 = vpop.f32.mrf.mxu1  ;;  %v9845_v47 = vpop.f32.mrf.mxu0 }
 0xa56   :  { %v4947_v40 = vpop.f32.mrf.mxu1  ;;  %v5092_v37 = vpop.f32.mrf.mxu0 }
 0xa57   :  { %v13768_v1 = vadd.f32 %v5084_v24, %v4947_v40 }
 0xa58   :  { %v9798_v54 = vpop.f32.mrf.mxu1  ;;  %v9846_v45 = vpop.f32.mrf.mxu0 }
 0xa59   :  { %v10566_v54 = vld [vmem:[#allocation23 + $0xb8] sm:$0xff]   ;;  %v5077_v45 = vadd.f32 %v13760_v28, %v13764_v30 }
 0xa5a   :  { %v4952_v38 = vpop.f32.mrf.mxu1  ;;  %v5097_v16 = vpop.f32.mrf.mxu0 }
 0xa5b   :  { %v13770_v36 = vadd.f32 %v5089_v43, %v4952_v38  ;;  %v5074_v43 = vadd.f32 %v13756_v19, %v13762_v18  ;;  %v10568_v19 = vld [vmem:[#allocation23 + $0xb0] sm:$0xff]  }
 0xa5c   :  { %v9801_v17 = vpop.f32.mrf.mxu1  ;;  %v9849_v11 = vpop.f32.mrf.mxu0 }
 0xa5e   :  { %v4955_v27 = vpop.f32.mrf.mxu1  ;;  %v5100_v35 = vpop.f32.mrf.mxu0 }
 0xa5f   :  { %v13772_v34 = vadd.f32 %v5092_v37, %v4955_v27 }
 0xa60   :  { %v9802_v4 = vpop.f32.mrf.mxu1  ;;  %v9850_v15 = vpop.f32.mrf.mxu0 }
 0xa61   :  { %v10569_v4 = vld [vmem:[#allocation23 + $0xa8] sm:$0xff]   ;;  %v10570_v15 = vld [vmem:[#allocation23 + $0xf8] sm:$0xff]  }
 0xa62   :  { %v4960_v5 = vpop.f32.mrf.mxu1  ;;  %v5105_v42 = vpop.f32.mrf.mxu0 }
 0xa63   :  { %v13774_v12 = vadd.f32 %v5097_v16, %v4960_v5 }
 0xa64   :  { %v9805_v51 = vpop.f32.mrf.mxu1  ;;  %v9853_v50 = vpop.f32.mrf.mxu0 }
 0xa66   :  { %v4963_v53 = vpop.f32.mrf.mxu1  ;;  %v5108_v6 = vpop.f32.mrf.mxu0 }
 0xa67   :  { %v13776_v55 = vadd.f32 %v5100_v35, %v4963_v53 }
 0xa68   :  { %v9806_v22 = vpop.f32.mrf.mxu1  ;;  %v9854_v29 = vpop.f32.mrf.mxu0 }
 0xa69   :  { %v10572_v22 = vld [vmem:[#allocation23 + $0xf0] sm:$0xff]  }
 0xa6a   :  { %v4968_v9 = vpop.f32.mrf.mxu1  ;;  %v5113_v39 = vpop.f32.mrf.mxu0 }
 0xa6b   :  { %v13778_v58 = vadd.f32 %v5105_v42, %v4968_v9 }
 0xa6c   :  { %v9809_v59 = vpop.f32.mrf.mxu1  ;;  %v9857_v48 = vpop.f32.mrf.mxu0 }
 0xa6d   :  { %v10573_v48 = vld [vmem:[#allocation23 + $0x98] sm:$0xff]  }
 0xa6e   :  { %v4971_v26 = vpop.f32.mrf.mxu1  ;;  %v5116_v49 = vpop.f32.mrf.mxu0 }
 0xa6f   :  { %v13780_v32 = vadd.f32 %v5108_v6, %v4971_v26  ;;  %v10571_v6 = vld [vmem:[#allocation23 + $0xa0] sm:$0xff]   ;;  %v10574_v26 = vld [vmem:[#allocation23 + $0xe8] sm:$0xff]  }
 0xa70   :  { %v9810_v8 = vpop.f32.mrf.mxu1  ;;  %v9858_v2 = vpop.f32.mrf.mxu0 }
 0xa72   :  { %v4976_v33 = vpop.f32.mrf.mxu1 }
 0xa73   :  { %v13782_v14 = vadd.f32 %v5113_v39, %v4976_v33 }
 0xa74   :  { %v9813_v63 = vpop.f32.mrf.mxu1 }
 0xa76   :  { %v4979_v23 = vpop.f32.mrf.mxu1 }
 0xa77   :  { %v13784_v20 = vadd.f32 %v5116_v49, %v4979_v23  ;;  %v10575_v23 = vld [vmem:[#allocation23 + $0x90] sm:$0xff]  }
 0xa78   :  { %v9814_v10 = vpop.f32.mrf.mxu1 }
 0xa7a   :  { %v5219_v46 = vpop.f32.mrf.mxu1 }
 0xa7b   :  { %v5274_v61 = vadd.f32 %v5219_v46, %v5066_v3 }
 0xa7c   :  { %v9877_v56 = vpop.f32.mrf.mxu1 }
 0xa7d   :  { %v5295_v13 = vadd.f32 %v13787_v52, %v5274_v61 }
 0xa7e   :  { %v5222_v24 = vpop.f32.mrf.mxu1 }
 0xa7f   :  { %v5275_v0 = vadd.f32 %v5222_v24, %v5069_v60  ;;  %v5309_v57 = vmax.f32 %v5295_v13, 0.0  ;;  %v10578_v24 = vld [vmem:[#allocation23 + $0xd8] sm:$0xff]  }
 0xa80   :  { %v9878_v62 = vpop.f32.mrf.mxu1 }
 0xa81   :  { %v5296_v25 = vadd.f32 %v13787_v52, %v5275_v0 }
 0xa82   :  { %v5227_v47 = vpop.f32.mrf.mxu1 }
 0xa83   :  { %v5310_v31 = vmax.f32 %v5296_v25, 0.0  ;;  %v5276_v40 = vadd.f32 %v5227_v47, %v5074_v43  ;;  %v10579_v47 = vld [vmem:[#allocation23 + $0x80] sm:$0xff]  }
 0xa84   :  { %v9881_v37 = vpop.f32.mrf.mxu1 }
 0xa85   :  { %v5323_v7 = vpack.c.bf16 %v5310_v31, %v5309_v57  ;;  %v5297_v38 = vadd.f32 %v13787_v52, %v5276_v40  ;;  %v13827_v31 = vpop.f32.mrf.mxu0 }
 0xa86   :  { %v5230_v44 = vpop.f32.mrf.mxu1 }
 0xa87   :  { %v5277_v16 = vadd.f32 %v5230_v44, %v5077_v45  ;;  %9926 = vmatmul.mubr.bf16.vlgmr.msra.gmra.mxu0 %v5323_v7  ;;  %v5311_v27 = vmax.f32 %v5297_v38, 0.0  ;;  %v9907_v7 = vpop.f32.mrf.mxu0  ;;  %v10581_v44 = vld [vmem:[#allocation23 + $0xc8] sm:$0xff]   ;;  %v10582_v38 = vld [vmem:[#allocation23 + $0x138] sm:$0xff]  }
 0xa88   :  { %9950 = vmatpush3.bf16.msra.mxu0 %v10566_v54  ;;  %v9882_v17 = vpop.f32.mrf.mxu1  ;;  %9965 = vmatprep.mubr.msk.bf16.mxu0 %vm11513_vm0, %v14110_v21  ;;  %v10619_v7 = vld [vmem:[#allocation28 + $0x18] sm:$0xff]  }
 0xa89   :  { %v5298_v18 = vadd.f32 %v13787_v52, %v5277_v16  ;;  %9951 = vmatprep.subr.bf16.mxu0 %v14110_v21 }
 0xa8a   :  { %v5235_v11 = vpop.f32.mrf.mxu1 }
 0xa8b   :  { %v5312_v35 = vmax.f32 %v5298_v18, 0.0  ;;  %v5278_v28 = vadd.f32 %v5235_v11, %v13766_v41 }
 0xa8c   :  { %9952 = vmatpush3.bf16.msra.mxu0 %v10568_v19  ;;  %v9885_v30 = vpop.f32.mrf.mxu1  ;;  %v13835_v19 = vpop.f32.mrf.mxu0 }
 0xa8d   :  { %v5324_v5 = vpack.c.bf16 %v5312_v35, %v5311_v27  ;;  %9953 = vmatprep.subr.bf16.mxu0 %v14110_v21  ;;  %v5299_v51 = vadd.f32 %v13787_v52, %v5278_v28  ;;  %v10583_v35 = vld [vmem:[#allocation23 + $0xc0] sm:$0xff]   ;;  %v10584_v28 = vld [vmem:[#allocation23 + $0x130] sm:$0xff]  }
 0xa8e   :  { %v5238_v42 = vpop.f32.mrf.mxu1 }
 0xa8f   :  { %v5279_v50 = vadd.f32 %v5238_v42, %v13768_v1  ;;  %9946 = vmatmul.mubr.bf16.vlgmr.msra.gmra.mxu1 %v5324_v5  ;;  %v5313_v9 = vmax.f32 %v5299_v51, 0.0  ;;  %v10585_v51 = vld [vmem:[#allocation23 + $0x128] sm:$0xff]  }
 0xa90   :  { %9954 = vmatpush3.bf16.msra.mxu0 %v10569_v4  ;;  %9970 = vmatpush3.bf16.msra.mxu1 %v10570_v15  ;;  %v9886_v53 = vpop.f32.mrf.mxu1 }
 0xa91   :  { %v5300_v41 = vadd.f32 %v13787_v52, %v5279_v50  ;;  %9955 = vmatprep.subr.bf16.mxu0 %v14110_v21  ;;  %9971 = vmatprep.subr.bf16.mxu1 %v14110_v21  ;;  %v10586_v50 = vld [vmem:[#allocation23 + $0x178] sm:$0xff]  }
 0xa92   :  { %v5243_v29 = vpop.f32.mrf.mxu1  ;;  %9985 = vmatprep.mubr.msk.bf16.mxu1 %vm11513_vm0, %v14110_v21 }
 0xa93   :  { %v5314_v39 = vmax.f32 %v5300_v41, 0.0  ;;  %v5280_v1 = vadd.f32 %v5243_v29, %v13770_v36  ;;  %v10576_v36 = vld [vmem:[#allocation23 + $0xe0] sm:$0xff]  }
 0xa94   :  { %9956 = vmatpush3.bf16.msra.mxu0 %v10571_v6  ;;  %9972 = vmatpush3.bf16.msra.mxu1 %v10572_v22  ;;  %v9889_v59 = vpop.f32.mrf.mxu1 }
 0xa95   :  { %v5325_v49 = vpack.c.bf16 %v5314_v39, %v5313_v9  ;;  %9957 = vmatprep.subr.bf16.mxu0 %v14110_v21  ;;  %9973 = vmatprep.subr.bf16.mxu1 %v14110_v21  ;;  %v5301_v2 = vadd.f32 %v13787_v52, %v5280_v1  ;;  %v10588_v9 = vld [vmem:[#allocation23 + $0x170] sm:$0xff]  }
 0xa96   :  { %v5246_v8 = vpop.f32.mrf.mxu1 }
 0xa97   :  { %v5281_v33 = vadd.f32 %v5246_v8, %v13772_v34  ;;  %v5315_v46 = vmax.f32 %v5301_v2, 0.0  ;;  %v10577_v34 = vld [vmem:[#allocation23 + $0x88] sm:$0xff]   ;;  %v10594_v2 = vld [vmem:[#allocation23 + $0x158] sm:$0xff]  }
 0xa98   :  { %9958 = vmatpush3.bf16.msra.mxu0 %v10573_v48  ;;  %9974 = vmatpush3.bf16.msra.mxu1 %v10574_v26  ;;  %v9890_v63 = vpop.f32.mrf.mxu1  ;;  %v10590_v48 = vld [vmem:[#allocation23 + $0x168] sm:$0xff]  }
 0xa99   :  { %v5302_v10 = vadd.f32 %v13787_v52, %v5281_v33  ;;  %9959 = vmatprep.subr.bf16.mxu0 %v14110_v21  ;;  %9975 = vmatprep.subr.bf16.mxu1 %v14110_v21  ;;  %v10593_v8 = vld [vmem:[#allocation23 + $0x108] sm:$0xff]   ;;  %v10595_v33 = vld [vmem:[#allocation23 + $0x100] sm:$0xff]   ;;  %v10596_v63 = vld [vmem:[#allocation23 + $0x150] sm:$0xff]  }
 0xa9a   :  { %v5251_v3 = vpop.f32.mrf.mxu1 }
 0xa9b   :  { %v5316_v61 = vmax.f32 %v5302_v10, 0.0  ;;  %v5282_v56 = vadd.f32 %v5251_v3, %v13774_v12  ;;  %v10580_v12 = vld [vmem:[#allocation23 + $0xd0] sm:$0xff]   ;;  %v10599_v10 = vld [vmem:[#allocation23 + $0x140] sm:$0xff]  }
 0xa9c   :  { %9960 = vmatpush3.bf16.msra.mxu0 %v10575_v23  ;;  %9976 = vmatpush3.bf16.msra.mxu1 %v10576_v36  ;;  %v9893_v60 = vpop.f32.mrf.mxu1  ;;  %v10597_v23 = vld [vmem:[#allocation23 + $0x148] sm:$0xff]   ;;  %v10598_v36 = vld [vmem:[#allocation23 + $0x1b8] sm:$0xff]   ;;  %v10600_v3 = vld [vmem:[#allocation23 + $0x1b0] sm:$0xff]  }
 0xa9d   :  { %v5326_v13 = vpack.c.bf16 %v5316_v61, %v5315_v46  ;;  %v5303_v0 = vadd.f32 %v13787_v52, %v5282_v56  ;;  %9961 = vmatprep.subr.bf16.mxu0 %v14110_v21  ;;  %9977 = vmatprep.subr.bf16.mxu1 %v14110_v21  ;;  %v10601_v46 = vld [vmem:[#allocation23 + $0x1a8] sm:$0xff]   ;;  %v10602_v61 = vld [vmem:[#allocation23 + $0x1a0] sm:$0xff]   ;;  %v10603_v56 = vld [vmem:[#allocation23 + $0x198] sm:$0xff]  }
 0xa9e   :  { %v5254_v62 = vpop.f32.mrf.mxu1  ;;  %v10604_v60 = vld [vmem:[#allocation23 + $0x190] sm:$0xff]  }
 0xa9f   :  { %v5283_v43 = vadd.f32 %v5254_v62, %v13776_v55  ;;  %v5317_v37 = vmax.f32 %v5303_v0, 0.0  ;;  %v10608_v0 = vld [vmem:[%s14140_s28 + $0x30] sm:$0xff]   ;;  %v10609_v62 = vld [vmem:[%s14140_s28 + $0x28] sm:$0xff]  }
 0xaa0   :  { %9962 = vmatpush3.bf16.msra.mxu0 %v10577_v34  ;;  %9978 = vmatpush3.bf16.msra.mxu1 %v10578_v24  ;;  %v9894_v25 = vpop.f32.mrf.mxu1  ;;  %v10605_v34 = vld [vmem:[#allocation23 + $0x188] sm:$0xff]   ;;  %v10606_v24 = vld [vmem:[#allocation23 + $0x180] sm:$0xff]  }
 0xaa1   :  { %v5304_v57 = vadd.f32 %v13787_v52, %v5283_v43  ;;  %9963 = vmatprep.subr.bf16.mxu0 %v14110_v21  ;;  %9979 = vmatprep.subr.bf16.mxu1 %v14110_v21  ;;  %v10610_v43 = vld [vmem:[%s14140_s28 + $0x20] sm:$0xff]   ;;  %v10611_v25 = vld [vmem:[%s14140_s28 + $0x18] sm:$0xff]  }
 0xaa2   :  { %v5259_v40 = vpop.f32.mrf.mxu1 }
 0xaa3   :  { %v5318_v54 = vmax.f32 %v5304_v57, 0.0  ;;  %v5284_v45 = vadd.f32 %v5259_v40, %v13778_v58  ;;  %v9908_v58 = vpop.f32.mrf.mxu0  ;;  %v10614_v57 = vld [vmem:[%s14140_s28] sm:$0xff]   ;;  %v10615_v40 = vld [vmem:[#allocation28 + $0x38] sm:$0xff]  }
 0xaa4   :  { %9964 = vmatpush3.bf16.msra.mxu0 %v10579_v47  ;;  %9980 = vmatpush3.bf16.msra.mxu1 %v10580_v12  ;;  %v9897_v55 = vpop.f32.mrf.mxu1  ;;  %v10612_v47 = vld [vmem:[%s14140_s28 + $0x10] sm:$0xff]   ;;  %v10613_v12 = vld [vmem:[%s14140_s28 + $0x8] sm:$0xff]  }
 0xaa5   :  { %v13830_v16 = vpack.c.bf16 %v5318_v54, %v5317_v37  ;;  %v5305_v17 = vadd.f32 %v13787_v52, %v5284_v45  ;;  %9981 = vmatprep.subr.bf16.mxu1 %v14110_v21  ;;  %9989 = vmatprep.subr.bf16.mxu0 %v14110_v21  ;;  %v10616_v37 = vld [vmem:[#allocation28 + $0x30] sm:$0xff]   ;;  %v10617_v54 = vld [vmem:[#allocation28 + $0x28] sm:$0xff]   ;;  %v10618_v45 = vld [vmem:[#allocation28 + $0x20] sm:$0xff]  }
 0xaa6   :  { %v5262_v18 = vpop.f32.mrf.mxu1  ;;  %v7915_v55 = vld [vmem:[#allocation25] ss:$0 sm:$0xff] }
 0xaa7   :  { %v5285_v11 = vadd.f32 %v5262_v18, %v13780_v32  ;;  %9966 = vmatmul.mubr.bf16.vlgmr.msra.gmra.mxu0 %v5325_v49  ;;  %v5319_v15 = vmax.f32 %v5305_v17, 0.0  ;;  %v10592_v49 = vld [vmem:[#allocation23 + $0x160] sm:$0xff]   ;;  %v5387_v18 = vadd.f32 %v7915_v55, %v13835_v19 }
 0xaa8   :  { %9982 = vmatpush3.bf16.msra.mxu1 %v10581_v44  ;;  %9990 = vmatpush3.bf16.msra.mxu0 %v10582_v38  ;;  %v9898_v27 = vpop.f32.mrf.mxu1  ;;  %v5384_v44 = vadd.f32 %v7915_v55, %v13827_v31 }
 0xaa9   :  { %v5306_v30 = vadd.f32 %v13787_v52, %v5285_v11  ;;  %9983 = vmatprep.subr.bf16.mxu1 %v14110_v21  ;;  %9991 = vmatprep.subr.bf16.mxu0 %v14110_v21 }
 0xaaa   :  { %v5267_v4 = vpop.f32.mrf.mxu1  ;;  %10005 = vmatprep.mubr.msk.bf16.mxu0 %vm11513_vm0, %v14110_v21 }
 0xaab   :  { %v5320_v5 = vmax.f32 %v5306_v30, 0.0  ;;  %v5286_v32 = vadd.f32 %v5267_v4, %v13782_v14  ;;  %v10587_v14 = vld [vmem:[#allocation23 + $0x120] sm:$0xff]  }
 0xaac   :  { %9984 = vmatpush3.bf16.msra.mxu1 %v10583_v35  ;;  %9992 = vmatpush3.bf16.msra.mxu0 %v10584_v28  ;;  %v9901_v42 = vpop.f32.mrf.mxu1 }
 0xaad   :  { %v5328_v53 = vpack.c.bf16 %v5320_v5, %v5319_v15  ;;  %v5307_v6 = vadd.f32 %v13787_v52, %v5286_v32  ;;  %9993 = vmatprep.subr.bf16.mxu0 %v14110_v21  ;;  %10009 = vmatprep.subr.bf16.mxu1 %v14110_v21 }
 0xaae   :  { %v5270_v22 = vpop.f32.mrf.mxu1 }
 0xaaf   :  { %v5287_v41 = vadd.f32 %v5270_v22, %v13784_v20  ;;  %9986 = vmatmul.mubr.bf16.vlgmr.msra.gmra.mxu1 %v5326_v13  ;;  %v5321_v1 = vmax.f32 %v5307_v6, 0.0  ;;  %v10589_v20 = vld [vmem:[#allocation23 + $0x118] sm:$0xff]   ;;  %v10607_v13 = vld [vmem:[%s14140_s28 + $0x38] sm:$0xff]  }
 0xab0   :  { %9994 = vmatpush3.bf16.msra.mxu0 %v10585_v51  ;;  %10010 = vmatpush3.bf16.msra.mxu1 %v10586_v50  ;;  %v9902_v29 = vpop.f32.mrf.mxu1 }
 0xab1   :  { %v5308_v39 = vadd.f32 %v13787_v52, %v5287_v41  ;;  %9995 = vmatprep.subr.bf16.mxu0 %v14110_v21  ;;  %10011 = vmatprep.subr.bf16.mxu1 %v14110_v21  ;;  %v10591_v52 = vld [vmem:[#allocation23 + $0x110] sm:$0xff]  }
 0xab2   :  { %10025 = vmatprep.mubr.msk.bf16.mxu1 %vm11513_vm0, %v14110_v21 }
 0xab3   :  { %v5322_v59 = vmax.f32 %v5308_v39, 0.0 }
 0xab4   :  { %9996 = vmatpush3.bf16.msra.mxu0 %v10587_v14  ;;  %10012 = vmatpush3.bf16.msra.mxu1 %v10588_v9 }
 0xab5   :  { %v5329_v26 = vpack.c.bf16 %v5322_v59, %v5321_v1  ;;  %9997 = vmatprep.subr.bf16.mxu0 %v14110_v21  ;;  %10013 = vmatprep.subr.bf16.mxu1 %v14110_v21 }
 0xab8   :  { %9998 = vmatpush3.bf16.msra.mxu0 %v10589_v20  ;;  %10014 = vmatpush3.bf16.msra.mxu1 %v10590_v48 }
 0xab9   :  { %9999 = vmatprep.subr.bf16.mxu0 %v14110_v21  ;;  %10015 = vmatprep.subr.bf16.mxu1 %v14110_v21 }
 0xabc   :  { %10000 = vmatpush3.bf16.msra.mxu0 %v10591_v52  ;;  %10016 = vmatpush3.bf16.msra.mxu1 %v10592_v49 }
 0xabd   :  { %10001 = vmatprep.subr.bf16.mxu0 %v14110_v21  ;;  %10017 = vmatprep.subr.bf16.mxu1 %v14110_v21 }
 0xac0   :  { %10002 = vmatpush3.bf16.msra.mxu0 %v10593_v8  ;;  %10018 = vmatpush3.bf16.msra.mxu1 %v10594_v2 }
 0xac1   :  { %10003 = vmatprep.subr.bf16.mxu0 %v14110_v21  ;;  %10019 = vmatprep.subr.bf16.mxu1 %v14110_v21 }
 0xac4   :  { %10004 = vmatpush3.bf16.msra.mxu0 %v10595_v33  ;;  %10020 = vmatpush3.bf16.msra.mxu1 %v10596_v63 }
 0xac5   :  { %10021 = vmatprep.subr.bf16.mxu1 %v14110_v21  ;;  %10029 = vmatprep.subr.bf16.mxu0 %v14110_v21 }
 0xac7   :  { %10006 = vmatmul.mubr.bf16.vlgmr.msra.gmra.mxu0 %v13830_v16 }
 0xac8   :  { %10022 = vmatpush3.bf16.msra.mxu1 %v10597_v23  ;;  %10030 = vmatpush3.bf16.msra.mxu0 %v10598_v36 }
 0xac9   :  { %10023 = vmatprep.subr.bf16.mxu1 %v14110_v21  ;;  %10031 = vmatprep.subr.bf16.mxu0 %v14110_v21 }
 0xaca   :  { %10045 = vmatprep.mubr.msk.bf16.mxu0 %vm11513_vm0, %v14110_v21 }
 0xacc   :  { %10024 = vmatpush3.bf16.msra.mxu1 %v10599_v10  ;;  %10032 = vmatpush3.bf16.msra.mxu0 %v10600_v3 }
 0xacd   :  { %10033 = vmatprep.subr.bf16.mxu0 %v14110_v21  ;;  %10049 = vmatprep.subr.bf16.mxu1 %v14110_v21 }
 0xacf   :  { %10026 = vmatmul.mubr.bf16.vlgmr.msra.gmra.mxu1 %v5328_v53 }
 0xad0   :  { %10034 = vmatpush3.bf16.msra.mxu0 %v10601_v46  ;;  %10065 = vmatprep.mubr.msk.bf16.mxu1 %vm11513_vm0, %v14110_v21 }
 0xad1   :  { %10035 = vmatprep.subr.bf16.mxu0 %v14110_v21  ;;  %10050 = vmatpush3.bf16.msra.mxu1 %v10607_v13  ;;  %v10622_v13 = vld [vmem:[#allocation28] sm:$0xff]  }
 0xad2   :  { %10051 = vmatprep.subr.bf16.mxu1 %v14110_v21 }
 0xad4   :  { %10036 = vmatpush3.bf16.msra.mxu0 %v10602_v61 }
 0xad5   :  { %10037 = vmatprep.subr.bf16.mxu0 %v14110_v21  ;;  %10052 = vmatpush3.bf16.msra.mxu1 %v10608_v0  ;;  %v10623_v0 = vld [vmem:[#allocation31 + $0x38] sm:$0xff]  }
 0xad6   :  { %10053 = vmatprep.subr.bf16.mxu1 %v14110_v21 }
 0xad8   :  { %10038 = vmatpush3.bf16.msra.mxu0 %v10603_v56 }
 0xad9   :  { %10039 = vmatprep.subr.bf16.mxu0 %v14110_v21  ;;  %10054 = vmatpush3.bf16.msra.mxu1 %v10609_v62  ;;  %v10624_v62 = vld [vmem:[#allocation31 + $0x30] sm:$0xff]  }
 0xada   :  { %10055 = vmatprep.subr.bf16.mxu1 %v14110_v21 }
 0xadc   :  { %10040 = vmatpush3.bf16.msra.mxu0 %v10604_v60 }
 0xadd   :  { %10041 = vmatprep.subr.bf16.mxu0 %v14110_v21  ;;  %10056 = vmatpush3.bf16.msra.mxu1 %v10610_v43  ;;  %v10625_v43 = vld [vmem:[#allocation31 + $0x28] sm:$0xff]  }
 0xade   :  { %10057 = vmatprep.subr.bf16.mxu1 %v14110_v21 }
 0xae0   :  { %10042 = vmatpush3.bf16.msra.mxu0 %v10605_v34  ;;  %v10620_v34 = vld [vmem:[#allocation28 + $0x10] sm:$0xff]  }
 0xae1   :  { %10043 = vmatprep.subr.bf16.mxu0 %v14110_v21  ;;  %10058 = vmatpush3.bf16.msra.mxu1 %v10611_v25  ;;  %v10626_v25 = vld [vmem:[#allocation31 + $0x20] sm:$0xff]  }
 0xae2   :  { %10059 = vmatprep.subr.bf16.mxu1 %v14110_v21 }
 0xae4   :  { %10044 = vmatpush3.bf16.msra.mxu0 %v10606_v24  ;;  %v10621_v24 = vld [vmem:[#allocation28 + $0x8] sm:$0xff]  }
 0xae5   :  { %10069 = vmatprep.subr.bf16.mxu0 %v14110_v21  ;;  %10060 = vmatpush3.bf16.msra.mxu1 %v10612_v47  ;;  %v10627_v47 = vld [vmem:[#allocation31 + $0x18] sm:$0xff]  }
 0xae6   :  { %10061 = vmatprep.subr.bf16.mxu1 %v14110_v21 }
 0xae7   :  { %10046 = vmatmul.mubr.bf16.vlgmr.msra.gmra.mxu0 %v5329_v26 }
 0xae8   :  { %10085 = vmatprep.mubr.msk.bf16.mxu0 %vm11513_vm0, %v14110_v21  ;;  %10070 = vmatpush3.bf16.msra.mxu0 %v10615_v40 }
 0xae9   :  { %10062 = vmatpush3.bf16.msra.mxu1 %v10613_v12  ;;  %10071 = vmatprep.subr.bf16.mxu0 %v14110_v21  ;;  %v7973_v12 = vld [vmem:[#allocation26] ss:$0 sm:$0xff] }
 0xaea   :  { %10063 = vmatprep.subr.bf16.mxu1 %v14110_v21 }
 0xaec   :  { %10072 = vmatpush3.bf16.msra.mxu0 %v10616_v37 }
 0xaed   :  { %10064 = vmatpush3.bf16.msra.mxu1 %v10614_v57  ;;  %10073 = vmatprep.subr.bf16.mxu0 %v14110_v21 }
 0xaee   :  { %10089 = vmatprep.subr.bf16.mxu1 %v14110_v21 }
 0xaf0   :  { %10074 = vmatpush3.bf16.msra.mxu0 %v10617_v54 }
 0xaf1   :  { %10075 = vmatprep.subr.bf16.mxu0 %v14110_v21 }
 0xaf4   :  { %10076 = vmatpush3.bf16.msra.mxu0 %v10618_v45 }
 0xaf5   :  { %10077 = vmatprep.subr.bf16.mxu0 %v14110_v21 }
 0xaf8   :  { %10078 = vmatpush3.bf16.msra.mxu0 %v10619_v7 }
 0xaf9   :  { %10079 = vmatprep.subr.bf16.mxu0 %v14110_v21 }
 0xafc   :  { %10080 = vmatpush3.bf16.msra.mxu0 %v10620_v34 }
 0xafd   :  { %10081 = vmatprep.subr.bf16.mxu0 %v14110_v21 }
 0xb00   :  { %10082 = vmatpush3.bf16.msra.mxu0 %v10621_v24 }
 0xb01   :  { %10083 = vmatprep.subr.bf16.mxu0 %v14110_v21 }
 0xb04   :  { %10084 = vmatpush3.bf16.msra.mxu0 %v10622_v13 }
 0xb05   :  { %10109 = vmatprep.subr.bf16.mxu0 %v14110_v21 }
 0xb47   :  { %v5488_v38 = vpop.f32.mrf.mxu0 }
 0xb48   :  { %v5495_v16 = vadd.f32 %v5488_v38, %v5384_v44 }
 0xb49   :  { %v9927_v17 = vpop.f32.mrf.mxu0 }
 0xb4a   :  { %v10629_v17 = vld [vmem:[#allocation31 + $0x8] sm:$0xff]  }
 0xb4b   :  { %v5491_v11 = vpop.f32.mrf.mxu0 }
 0xb4c   :  { %v5496_v58 = vadd.f32 %v5491_v11, %v5387_v18  ;;  %v10630_v18 = vld [vmem:[#allocation31] sm:$0xff]  }
 0xb4d   :  { %v9928_v27 = vpop.f32.mrf.mxu0  ;;  %v10631_v11 = vld [vmem:[#allocation34 + $0x38] sm:$0xff]  }
 0xb4e   :  { %v10633_v27 = vld [vmem:[#allocation34 + $0x28] sm:$0xff]  }
 0xb4f   :  { %v5596_v35 = vpop.f32.mrf.mxu1 }
 0xb50   :  { %v5603_v28 = vadd.f32 %v5596_v35, %v5495_v16  ;;  %v10628_v16 = vld [vmem:[#allocation31 + $0x10] sm:$0xff]   ;;  %v10634_v35 = vld [vmem:[#allocation34 + $0x20] sm:$0xff]  }
 0xb51   :  { %v9947_v30 = vpop.f32.mrf.mxu1 }
 0xb52   :  { %v7982_v30 = vld [vmem:[#allocation29] ss:$0 sm:$0xff] }
 0xb53   :  { %v5599_v4 = vpop.f32.mrf.mxu1 }
 0xb54   :  { %v5604_v15 = vadd.f32 %v5599_v4, %v5496_v58  ;;  %v10632_v58 = vld [vmem:[#allocation34 + $0x30] sm:$0xff]  }
 0xb55   :  { %v9948_v5 = vpop.f32.mrf.mxu1 }
 0xb67   :  { %v5704_v32 = vpop.f32.mrf.mxu0 }
 0xb68   :  { %v5711_v20 = vadd.f32 %v5704_v32, %v5603_v28  ;;  %v10635_v28 = vld [vmem:[#allocation34 + $0x18] sm:$0xff]  }
 0xb69   :  { %v9967_v42 = vpop.f32.mrf.mxu0 }
 0xb6b   :  { %v5707_v51 = vpop.f32.mrf.mxu0 }
 0xb6c   :  { %v5712_v48 = vadd.f32 %v5707_v51, %v5604_v15 }
 0xb6d   :  { %v9968_v50 = vpop.f32.mrf.mxu0 }
 0xb6f   :  { %v5812_v53 = vpop.f32.mrf.mxu1 }
 0xb70   :  { %v5819_v26 = vadd.f32 %v5812_v53, %v5711_v20 }
 0xb71   :  { %v9987_v31 = vpop.f32.mrf.mxu1 }
 0xb73   :  { %v5815_v6 = vpop.f32.mrf.mxu1 }
 0xb74   :  { %v5820_v52 = vadd.f32 %v5815_v6, %v5712_v48  ;;  %v10636_v6 = vld [vmem:[#allocation34 + $0x10] sm:$0xff]  }
 0xb75   :  { %v9988_v22 = vpop.f32.mrf.mxu1 }
 0xb76   :  { %v10637_v22 = vld [vmem:[#allocation34 + $0x8] sm:$0xff]  }
 0xb87   :  { %v5920_v41 = vpop.f32.mrf.mxu0 }
 0xb88   :  { %v5927_v49 = vadd.f32 %v5920_v41, %v5819_v26  ;;  %v10638_v41 = vld [vmem:[#allocation34] sm:$0xff]  }
 0xb89   :  { %v10007_v29 = vpop.f32.mrf.mxu0 }
 0xb8a   :  { %v10639_v29 = vld [vmem:[#allocation37 + $0x38] sm:$0xff]  }
 0xb8b   :  { %v5923_v19 = vpop.f32.mrf.mxu0 }
 0xb8c   :  { %v5928_v2 = vadd.f32 %v5923_v19, %v5820_v52  ;;  %v10640_v19 = vld [vmem:[#allocation37 + $0x30] sm:$0xff]  }
 0xb8d   :  { %v10008_v14 = vpop.f32.mrf.mxu0 }
 0xb8e   :  { %v10641_v14 = vld [vmem:[#allocation37 + $0x28] sm:$0xff]  }
 0xb8f   :  { %v6028_v9 = vpop.f32.mrf.mxu1 }
 0xb90   :  { %v6035_v33 = vadd.f32 %v6028_v9, %v5927_v49  ;;  %v10642_v9 = vld [vmem:[#allocation37 + $0x20] sm:$0xff]  }
 0xb91   :  { %v10027_v39 = vpop.f32.mrf.mxu1 }
 0xb92   :  { %v10643_v39 = vld [vmem:[#allocation37 + $0x18] sm:$0xff]  }
 0xb93   :  { %v6031_v1 = vpop.f32.mrf.mxu1 }
 0xb94   :  { %v6036_v23 = vadd.f32 %v6031_v1, %v5928_v2  ;;  %v7991_v1 = vld [vmem:[#allocation32] ss:$0 sm:$0xff] }
 0xb95   :  { %v10028_v59 = vpop.f32.mrf.mxu1 }
 0xba7   :  { %v6136_v8 = vpop.f32.mrf.mxu0 }
 0xba8   :  { %v6143_v36 = vadd.f32 %v6136_v8, %v6035_v33 }
 0xba9   :  { %v10047_v63 = vpop.f32.mrf.mxu0 }
 0xbaa   :  { %v6145_v61 = vmax.f32 %v6143_v36, 0.0  ;;  %v10644_v63 = vld [vmem:[#allocation37 + $0x10] sm:$0xff]   ;;  %v10646_v36 = vld [vmem:[#allocation37] sm:$0xff]  }
 0xbab   :  { %v6139_v10 = vpop.f32.mrf.mxu0 }
 0xbac   :  { %v6144_v3 = vadd.f32 %v6139_v10, %v6036_v23  ;;  %v10645_v23 = vld [vmem:[#allocation37 + $0x8] sm:$0xff]   ;;  %v10647_v10 = vld [vmem:[#allocation40 + $0x38] sm:$0xff]  }
 0xbad   :  { %v10048_v46 = vpop.f32.mrf.mxu0 }
 0xbae   :  { %v6146_v56 = vmax.f32 %v6144_v3, 0.0  ;;  %v10648_v3 = vld [vmem:[#allocation40 + $0x30] sm:$0xff]   ;;  %v10649_v46 = vld [vmem:[#allocation40 + $0x28] sm:$0xff]  }
 0xbb0   :  { %v6147_v60 = vpack.c.bf16 %v6146_v56, %v6145_v61  ;;  %v10650_v61 = vld [vmem:[#allocation40 + $0x20] sm:$0xff]   ;;  %v10651_v56 = vld [vmem:[#allocation40 + $0x18] sm:$0xff]  }
 0xbb2   :  { %10066 = vmatmul.mubr.bf16.vlgmr.msra.gmra.mxu1 %v6147_v60  ;;  %v8000_v60 = vld [vmem:[#allocation35] ss:$0 sm:$0xff] }
 0xbb3   :  { %10105 = vmatprep.mubr.msk.bf16.mxu1 %vm11513_vm0, %v14110_v21  ;;  %10090 = vmatpush3.bf16.msra.mxu1 %v10623_v0 }
 0xbb4   :  { %10091 = vmatprep.subr.bf16.mxu1 %v14110_v21 }
 0xbb7   :  { %10092 = vmatpush3.bf16.msra.mxu1 %v10624_v62 }
 0xbb8   :  { %10093 = vmatprep.subr.bf16.mxu1 %v14110_v21 }
 0xbbb   :  { %10094 = vmatpush3.bf16.msra.mxu1 %v10625_v43 }
 0xbbc   :  { %10095 = vmatprep.subr.bf16.mxu1 %v14110_v21 }
 0xbbf   :  { %10096 = vmatpush3.bf16.msra.mxu1 %v10626_v25 }
 0xbc0   :  { %10097 = vmatprep.subr.bf16.mxu1 %v14110_v21 }
 0xbc3   :  { %10098 = vmatpush3.bf16.msra.mxu1 %v10627_v47 }
 0xbc4   :  { %10099 = vmatprep.subr.bf16.mxu1 %v14110_v21 }
 0xbc7   :  { %10100 = vmatpush3.bf16.msra.mxu1 %v10628_v16 }
 0xbc8   :  { %10101 = vmatprep.subr.bf16.mxu1 %v14110_v21 }
 0xbcb   :  { %10102 = vmatpush3.bf16.msra.mxu1 %v10629_v17 }
 0xbcc   :  { %10103 = vmatprep.subr.bf16.mxu1 %v14110_v21 }
 0xbcf   :  { %10104 = vmatpush3.bf16.msra.mxu1 %v10630_v18 }
 0xbd0   :  { %10129 = vmatprep.subr.bf16.mxu1 %v14110_v21 }
 0xc72   :  { %v6253_v57 = vpop.f32.mrf.mxu1 }
 0xc73   :  { %v6254_v37 = vadd.f32 %v7973_v12, %v6253_v57  ;;  %v10652_v57 = vld [vmem:[#allocation40 + $0x10] sm:$0xff]  }
 0xc74   :  { %v10067_v40 = vpop.f32.mrf.mxu1 }
 0xc75   :  { %v6260_v55 = vmax.f32 %v6254_v37, 0.0  ;;  %v10653_v40 = vld [vmem:[#allocation40 + $0x8] sm:$0xff]   ;;  %v10654_v37 = vld [vmem:[#allocation40] sm:$0xff]  }
 0xc76   :  { %v6256_v54 = vpop.f32.mrf.mxu1 }
 0xc77   :  { %v6257_v45 = vadd.f32 %v7973_v12, %v6256_v54  ;;  %v10655_v54 = vld [vmem:[%s14141_s19 + $0x38] sm:$0xff]  }
 0xc78   :  { %v10068_v7 = vpop.f32.mrf.mxu1 }
 0xc79   :  { %v6261_v44 = vmax.f32 %v6257_v45, 0.0  ;;  %v10656_v45 = vld [vmem:[%s14141_s19 + $0x30] sm:$0xff]   ;;  %v10657_v7 = vld [vmem:[%s14141_s19 + $0x28] sm:$0xff]  }
 0xc7b   :  { %v6262_v38 = vpack.c.bf16 %v6261_v44, %v6260_v55  ;;  %v10658_v55 = vld [vmem:[%s14141_s19 + $0x20] sm:$0xff]   ;;  %v10659_v44 = vld [vmem:[%s14141_s19 + $0x18] sm:$0xff]  }
 0xc7d   :  { %10086 = vmatmul.mubr.bf16.vlgmr.msra.gmra.mxu0 %v6262_v38  ;;  %v8009_v38 = vld [vmem:[#allocation38] ss:$0 sm:$0xff] }
 0xc7e   :  { %10125 = vmatprep.mubr.msk.bf16.mxu0 %vm11513_vm0, %v14110_v21  ;;  %10110 = vmatpush3.bf16.msra.mxu0 %v10631_v11 }
 0xc7f   :  { %10111 = vmatprep.subr.bf16.mxu0 %v14110_v21 }
 0xc82   :  { %10112 = vmatpush3.bf16.msra.mxu0 %v10632_v58 }
 0xc83   :  { %10113 = vmatprep.subr.bf16.mxu0 %v14110_v21 }
 0xc86   :  { %10114 = vmatpush3.bf16.msra.mxu0 %v10633_v27 }
 0xc87   :  { %10115 = vmatprep.subr.bf16.mxu0 %v14110_v21 }
 0xc8a   :  { %10116 = vmatpush3.bf16.msra.mxu0 %v10634_v35 }
 0xc8b   :  { %10117 = vmatprep.subr.bf16.mxu0 %v14110_v21 }
 0xc8e   :  { %10118 = vmatpush3.bf16.msra.mxu0 %v10635_v28 }
 0xc8f   :  { %10119 = vmatprep.subr.bf16.mxu0 %v14110_v21 }
 0xc92   :  { %10120 = vmatpush3.bf16.msra.mxu0 %v10636_v6 }
 0xc93   :  { %10121 = vmatprep.subr.bf16.mxu0 %v14110_v21 }
 0xc96   :  { %10122 = vmatpush3.bf16.msra.mxu0 %v10637_v22 }
 0xc97   :  { %10123 = vmatprep.subr.bf16.mxu0 %v14110_v21 }
 0xc9a   :  { %10124 = vmatpush3.bf16.msra.mxu0 %v10638_v41 }
 0xc9b   :  { %10149 = vmatprep.subr.bf16.mxu0 %v14110_v21 }
 0xd3d   :  { %v6368_v4 = vpop.f32.mrf.mxu0 }
 0xd3e   :  { %v6369_v5 = vadd.f32 %v7982_v30, %v6368_v4  ;;  %v10660_v4 = vld [vmem:[%s14141_s19 + $0x10] sm:$0xff]  }
 0xd3f   :  { %v10087_v15 = vpop.f32.mrf.mxu0 }
 0xd40   :  { %v6375_v50 = vmax.f32 %v6369_v5, 0.0  ;;  %v10661_v15 = vld [vmem:[%s14141_s19 + $0x8] sm:$0xff]   ;;  %v10662_v5 = vld [vmem:[%s14141_s19] sm:$0xff]  }
 0xd41   :  { %v6371_v32 = vpop.f32.mrf.mxu0 }
 0xd42   :  { %v6372_v42 = vadd.f32 %v7982_v30, %v6371_v32  ;;  %v10663_v32 = vld [vmem:[#allocation44 + $0x38] sm:$0xff]  }
 0xd43   :  { %v10088_v51 = vpop.f32.mrf.mxu0 }
 0xd44   :  { %v6376_v53 = vmax.f32 %v6372_v42, 0.0  ;;  %v10664_v42 = vld [vmem:[#allocation44 + $0x30] sm:$0xff]   ;;  %v10665_v51 = vld [vmem:[#allocation44 + $0x28] sm:$0xff]  }
 0xd46   :  { %v6377_v31 = vpack.c.bf16 %v6376_v53, %v6375_v50  ;;  %v10666_v50 = vld [vmem:[#allocation44 + $0x20] sm:$0xff]   ;;  %v10667_v53 = vld [vmem:[#allocation44 + $0x18] sm:$0xff]  }
 0xd48   :  { %10106 = vmatmul.mubr.bf16.vlgmr.msra.gmra.mxu1 %v6377_v31  ;;  %v8018_v31 = vld [vmem:[#allocation41] ss:$0 sm:$0xff] }
 0xd49   :  { %10145 = vmatprep.mubr.msk.bf16.mxu1 %vm11513_vm0, %v14110_v21  ;;  %10130 = vmatpush3.bf16.msra.mxu1 %v10639_v29 }
 0xd4a   :  { %10131 = vmatprep.subr.bf16.mxu1 %v14110_v21 }
 0xd4d   :  { %10132 = vmatpush3.bf16.msra.mxu1 %v10640_v19 }
 0xd4e   :  { %10133 = vmatprep.subr.bf16.mxu1 %v14110_v21 }
 0xd51   :  { %10134 = vmatpush3.bf16.msra.mxu1 %v10641_v14 }
 0xd52   :  { %10135 = vmatprep.subr.bf16.mxu1 %v14110_v21 }
 0xd55   :  { %10136 = vmatpush3.bf16.msra.mxu1 %v10642_v9 }
 0xd56   :  { %10137 = vmatprep.subr.bf16.mxu1 %v14110_v21 }
 0xd59   :  { %10138 = vmatpush3.bf16.msra.mxu1 %v10643_v39 }
 0xd5a   :  { %10139 = vmatprep.subr.bf16.mxu1 %v14110_v21 }
 0xd5d   :  { %10140 = vmatpush3.bf16.msra.mxu1 %v10644_v63 }
 0xd5e   :  { %10141 = vmatprep.subr.bf16.mxu1 %v14110_v21 }
 0xd61   :  { %10142 = vmatpush3.bf16.msra.mxu1 %v10645_v23 }
 0xd62   :  { %10143 = vmatprep.subr.bf16.mxu1 %v14110_v21 }
 0xd65   :  { %10144 = vmatpush3.bf16.msra.mxu1 %v10646_v36 }
 0xd66   :  { %10169 = vmatprep.subr.bf16.mxu1 %v14110_v21 }
 0xe08   :  { %v6483_v59 = vpop.f32.mrf.mxu1 }
 0xe09   :  { %v6484_v48 = vadd.f32 %v7991_v1, %v6483_v59  ;;  %v10668_v59 = vld [vmem:[#allocation44 + $0x10] sm:$0xff]  }
 0xe0a   :  { %v10107_v20 = vpop.f32.mrf.mxu1 }
 0xe0b   :  { %v6490_v8 = vmax.f32 %v6484_v48, 0.0  ;;  %v10669_v20 = vld [vmem:[#allocation44 + $0x8] sm:$0xff]   ;;  %v10670_v48 = vld [vmem:[#allocation44] sm:$0xff]  }
 0xe0c   :  { %v6486_v26 = vpop.f32.mrf.mxu1 }
 0xe0d   :  { %v6487_v52 = vadd.f32 %v7991_v1, %v6486_v26  ;;  %v10671_v26 = vld [vmem:[#allocation46 + $0x38] sm:$0xff]  }
 0xe0e   :  { %v10108_v49 = vpop.f32.mrf.mxu1 }
 0xe0f   :  { %v6491_v2 = vmax.f32 %v6487_v52, 0.0  ;;  %v10672_v52 = vld [vmem:[#allocation46 + $0x30] sm:$0xff]   ;;  %v10673_v49 = vld [vmem:[#allocation46 + $0x28] sm:$0xff]  }
 0xe11   :  { %v6492_v33 = vpack.c.bf16 %v6491_v2, %v6490_v8  ;;  %v10674_v8 = vld [vmem:[#allocation46 + $0x20] sm:$0xff]   ;;  %v10675_v2 = vld [vmem:[#allocation46 + $0x18] sm:$0xff]  }
 0xe13   :  { %10126 = vmatmul.mubr.bf16.vlgmr.msra.gmra.mxu0 %v6492_v33  ;;  %v8027_v33 = vld [vmem:[#allocation43] ss:$0 sm:$0xff] }
 0xe14   :  { %10165 = vmatprep.mubr.msk.bf16.mxu0 %vm11513_vm0, %v14110_v21  ;;  %10150 = vmatpush3.bf16.msra.mxu0 %v10647_v10 }
 0xe15   :  { %10151 = vmatprep.subr.bf16.mxu0 %v14110_v21 }
 0xe18   :  { %10152 = vmatpush3.bf16.msra.mxu0 %v10648_v3 }
 0xe19   :  { %10153 = vmatprep.subr.bf16.mxu0 %v14110_v21 }
 0xe1c   :  { %10154 = vmatpush3.bf16.msra.mxu0 %v10649_v46 }
 0xe1d   :  { %10155 = vmatprep.subr.bf16.mxu0 %v14110_v21 }
 0xe20   :  { %10156 = vmatpush3.bf16.msra.mxu0 %v10650_v61 }
 0xe21   :  { %10157 = vmatprep.subr.bf16.mxu0 %v14110_v21 }
 0xe24   :  { %10158 = vmatpush3.bf16.msra.mxu0 %v10651_v56 }
 0xe25   :  { %10159 = vmatprep.subr.bf16.mxu0 %v14110_v21 }
 0xe28   :  { %10160 = vmatpush3.bf16.msra.mxu0 %v10652_v57 }
 0xe29   :  { %10161 = vmatprep.subr.bf16.mxu0 %v14110_v21 }
 0xe2c   :  { %10162 = vmatpush3.bf16.msra.mxu0 %v10653_v40 }
 0xe2d   :  { %10163 = vmatprep.subr.bf16.mxu0 %v14110_v21 }
 0xe30   :  { %10164 = vmatpush3.bf16.msra.mxu0 %v10654_v37 }
 0xe31   :  { %10189 = vmatprep.subr.bf16.mxu0 %v14110_v21 }
 0xed3   :  { %v6598_v34 = vpop.f32.mrf.mxu0 }
 0xed4   :  { %v6599_v13 = vadd.f32 %v8000_v60, %v6598_v34  ;;  %v10676_v34 = vld [vmem:[#allocation46 + $0x10] sm:$0xff]  }
 0xed5   :  { %v10127_v24 = vpop.f32.mrf.mxu0 }
 0xed6   :  { %v6605_v25 = vmax.f32 %v6599_v13, 0.0  ;;  %v10677_v24 = vld [vmem:[#allocation46 + $0x8] sm:$0xff]   ;;  %v10678_v13 = vld [vmem:[#allocation46] sm:$0xff]  }
 0xed7   :  { %v6601_v0 = vpop.f32.mrf.mxu0 }
 0xed8   :  { %v6602_v62 = vadd.f32 %v8000_v60, %v6601_v0  ;;  %v10679_v0 = vld [vmem:[#allocation47 + $0x38] sm:$0xff]  }
 0xed9   :  { %v10128_v43 = vpop.f32.mrf.mxu0 }
 0xeda   :  { %v6606_v47 = vmax.f32 %v6602_v62, 0.0  ;;  %v10680_v62 = vld [vmem:[#allocation47 + $0x30] sm:$0xff]   ;;  %v10681_v43 = vld [vmem:[#allocation47 + $0x28] sm:$0xff]  }
 0xedc   :  { %v6607_v12 = vpack.c.bf16 %v6606_v47, %v6605_v25  ;;  %v10682_v25 = vld [vmem:[#allocation47 + $0x20] sm:$0xff]   ;;  %v10683_v47 = vld [vmem:[#allocation47 + $0x18] sm:$0xff]  }
 0xede   :  { %10146 = vmatmul.mubr.bf16.vlgmr.msra.gmra.mxu1 %v6607_v12  ;;  %v8036_v12 = vld [vmem:[%s14142_s30] ss:$0 sm:$0xff] }
 0xedf   :  { %10185 = vmatprep.mubr.msk.bf16.mxu1 %vm11513_vm0, %v14110_v21  ;;  %10170 = vmatpush3.bf16.msra.mxu1 %v10655_v54 }
 0xee0   :  { %10171 = vmatprep.subr.bf16.mxu1 %v14110_v21 }
 0xee3   :  { %10172 = vmatpush3.bf16.msra.mxu1 %v10656_v45 }
 0xee4   :  { %10173 = vmatprep.subr.bf16.mxu1 %v14110_v21 }
 0xee7   :  { %10174 = vmatpush3.bf16.msra.mxu1 %v10657_v7 }
 0xee8   :  { %10175 = vmatprep.subr.bf16.mxu1 %v14110_v21 }
 0xeeb   :  { %10176 = vmatpush3.bf16.msra.mxu1 %v10658_v55 }
 0xeec   :  { %10177 = vmatprep.subr.bf16.mxu1 %v14110_v21 }
 0xeef   :  { %10178 = vmatpush3.bf16.msra.mxu1 %v10659_v44 }
 0xef0   :  { %10179 = vmatprep.subr.bf16.mxu1 %v14110_v21 }
 0xef3   :  { %10180 = vmatpush3.bf16.msra.mxu1 %v10660_v4 }
 0xef4   :  { %10181 = vmatprep.subr.bf16.mxu1 %v14110_v21 }
 0xef7   :  { %10182 = vmatpush3.bf16.msra.mxu1 %v10661_v15 }
 0xef8   :  { %10183 = vmatprep.subr.bf16.mxu1 %v14110_v21 }
 0xefb   :  { %10184 = vmatpush3.bf16.msra.mxu1 %v10662_v5 }
 0xefc   :  { %10209 = vmatprep.subr.bf16.mxu1 %v14110_v21 }
 0xf9e   :  { %v6713_v16 = vpop.f32.mrf.mxu1 }
 0xf9f   :  { %v6714_v18 = vadd.f32 %v8009_v38, %v6713_v16  ;;  %v10684_v16 = vld [vmem:[#allocation47 + $0x10] sm:$0xff]  }
 0xfa0   :  { %v10147_v17 = vpop.f32.mrf.mxu1 }
 0xfa1   :  { %v6720_v35 = vmax.f32 %v6714_v18, 0.0  ;;  %v10685_v17 = vld [vmem:[#allocation47 + $0x8] sm:$0xff]   ;;  %v10686_v18 = vld [vmem:[#allocation47] sm:$0xff]  }
 0xfa2   :  { %v6716_v11 = vpop.f32.mrf.mxu1 }
 0xfa3   :  { %v6717_v58 = vadd.f32 %v8009_v38, %v6716_v11  ;;  %v10687_v11 = vld [vmem:[#allocation49 + $0x38] sm:$0xff]  }
 0xfa4   :  { %v10148_v27 = vpop.f32.mrf.mxu1 }
 0xfa5   :  { %v6721_v28 = vmax.f32 %v6717_v58, 0.0  ;;  %v10688_v58 = vld [vmem:[#allocation49 + $0x30] sm:$0xff]   ;;  %v10689_v27 = vld [vmem:[#allocation49 + $0x28] sm:$0xff]  }
 0xfa7   :  { %v6722_v30 = vpack.c.bf16 %v6721_v28, %v6720_v35  ;;  %v10690_v35 = vld [vmem:[#allocation49 + $0x20] sm:$0xff]   ;;  %v10691_v28 = vld [vmem:[#allocation49 + $0x18] sm:$0xff]  }
 0xfa9   :  { %10166 = vmatmul.mubr.bf16.vlgmr.msra.gmra.mxu0 %v6722_v30  ;;  %v8045_v30 = vld [vmem:[%s14143_s1] ss:$0 sm:$0xff] }
 0xfaa   :  { %10205 = vmatprep.mubr.msk.bf16.mxu0 %vm11513_vm0, %v14110_v21  ;;  %10190 = vmatpush3.bf16.msra.mxu0 %v10663_v32 }
 0xfab   :  { %10191 = vmatprep.subr.bf16.mxu0 %v14110_v21 }
 0xfae   :  { %10192 = vmatpush3.bf16.msra.mxu0 %v10664_v42 }
 0xfaf   :  { %10193 = vmatprep.subr.bf16.mxu0 %v14110_v21 }
 0xfb2   :  { %10194 = vmatpush3.bf16.msra.mxu0 %v10665_v51 }
 0xfb3   :  { %10195 = vmatprep.subr.bf16.mxu0 %v14110_v21 }
 0xfb6   :  { %10196 = vmatpush3.bf16.msra.mxu0 %v10666_v50 }
 0xfb7   :  { %10197 = vmatprep.subr.bf16.mxu0 %v14110_v21 }
 0xfba   :  { %10198 = vmatpush3.bf16.msra.mxu0 %v10667_v53 }
 0xfbb   :  { %10199 = vmatprep.subr.bf16.mxu0 %v14110_v21 }
 0xfbe   :  { %10200 = vmatpush3.bf16.msra.mxu0 %v10668_v59 }
 0xfbf   :  { %10201 = vmatprep.subr.bf16.mxu0 %v14110_v21 }
 0xfc2   :  { %10202 = vmatpush3.bf16.msra.mxu0 %v10669_v20 }
 0xfc3   :  { %10203 = vmatprep.subr.bf16.mxu0 %v14110_v21 }
 0xfc6   :  { %10204 = vmatpush3.bf16.msra.mxu0 %v10670_v48 }
 0xfc7   :  { %10229 = vmatprep.subr.bf16.mxu0 %v14110_v21 }
0x1069   :  { %v6828_v6 = vpop.f32.mrf.mxu0 }
0x106a   :  { %v6829_v41 = vadd.f32 %v8018_v31, %v6828_v6  ;;  %v10692_v6 = vld [vmem:[#allocation49 + $0x10] sm:$0xff]  }
0x106b   :  { %v10167_v22 = vpop.f32.mrf.mxu0 }
0x106c   :  { %v6835_v9 = vmax.f32 %v6829_v41, 0.0  ;;  %v10693_v22 = vld [vmem:[#allocation49 + $0x8] sm:$0xff]   ;;  %v10694_v41 = vld [vmem:[#allocation49] sm:$0xff]  }
0x106d   :  { %v6831_v29 = vpop.f32.mrf.mxu0 }
0x106e   :  { %v6832_v19 = vadd.f32 %v8018_v31, %v6831_v29  ;;  %v10695_v29 = vld [vmem:[#allocation50 + $0x38] sm:$0xff]  }
0x106f   :  { %v10168_v14 = vpop.f32.mrf.mxu0 }
0x1070   :  { %v6836_v39 = vmax.f32 %v6832_v19, 0.0  ;;  %v10696_v19 = vld [vmem:[#allocation50 + $0x30] sm:$0xff]   ;;  %v10697_v14 = vld [vmem:[#allocation50 + $0x28] sm:$0xff]  }
0x1072   :  { %v6837_v1 = vpack.c.bf16 %v6836_v39, %v6835_v9  ;;  %v10698_v9 = vld [vmem:[#allocation50 + $0x20] sm:$0xff]   ;;  %v10699_v39 = vld [vmem:[#allocation50 + $0x18] sm:$0xff]  }
0x1074   :  { %10186 = vmatmul.mubr.bf16.vlgmr.msra.gmra.mxu1 %v6837_v1  ;;  %v8054_v1 = vld [vmem:[%s14144_s13] ss:$0 sm:$0xff] }
0x1075   :  { %10225 = vmatprep.mubr.msk.bf16.mxu1 %vm11513_vm0, %v14110_v21  ;;  %10210 = vmatpush3.bf16.msra.mxu1 %v10671_v26 }
0x1076   :  { %10211 = vmatprep.subr.bf16.mxu1 %v14110_v21 }
0x1079   :  { %10212 = vmatpush3.bf16.msra.mxu1 %v10672_v52 }
0x107a   :  { %10213 = vmatprep.subr.bf16.mxu1 %v14110_v21 }
0x107d   :  { %10214 = vmatpush3.bf16.msra.mxu1 %v10673_v49 }
0x107e   :  { %10215 = vmatprep.subr.bf16.mxu1 %v14110_v21 }
0x1081   :  { %10216 = vmatpush3.bf16.msra.mxu1 %v10674_v8 }
0x1082   :  { %10217 = vmatprep.subr.bf16.mxu1 %v14110_v21 }
0x1085   :  { %10218 = vmatpush3.bf16.msra.mxu1 %v10675_v2 }
0x1086   :  { %10219 = vmatprep.subr.bf16.mxu1 %v14110_v21 }
0x1089   :  { %10220 = vmatpush3.bf16.msra.mxu1 %v10676_v34 }
0x108a   :  { %10221 = vmatprep.subr.bf16.mxu1 %v14110_v21 }
0x108d   :  { %10222 = vmatpush3.bf16.msra.mxu1 %v10677_v24 }
0x108e   :  { %10223 = vmatprep.subr.bf16.mxu1 %v14110_v21 }
0x1091   :  { %10224 = vmatpush3.bf16.msra.mxu1 %v10678_v13 }
0x1092   :  { %10249 = vmatprep.subr.bf16.mxu1 %v14110_v21 }
0x1134   :  { %v6943_v63 = vpop.f32.mrf.mxu1 }
0x1135   :  { %v6944_v36 = vadd.f32 %v8027_v33, %v6943_v63  ;;  %v10700_v63 = vld [vmem:[#allocation50 + $0x10] sm:$0xff]  }
0x1136   :  { %v10187_v23 = vpop.f32.mrf.mxu1 }
0x1137   :  { %v6950_v61 = vmax.f32 %v6944_v36, 0.0  ;;  %v10701_v23 = vld [vmem:[#allocation50 + $0x8] sm:$0xff]   ;;  %v10702_v36 = vld [vmem:[#allocation50] sm:$0xff]  }
0x1138   :  { %v6946_v10 = vpop.f32.mrf.mxu1 }
0x1139   :  { %v6947_v3 = vadd.f32 %v8027_v33, %v6946_v10  ;;  %v10703_v10 = vld [vmem:[#allocation52 + $0x38] sm:$0xff]  }
0x113a   :  { %v10188_v46 = vpop.f32.mrf.mxu1 }
0x113b   :  { %v6951_v56 = vmax.f32 %v6947_v3, 0.0  ;;  %v10704_v3 = vld [vmem:[#allocation52 + $0x30] sm:$0xff]   ;;  %v10705_v46 = vld [vmem:[#allocation52 + $0x28] sm:$0xff]  }
0x113d   :  { %v6952_v60 = vpack.c.bf16 %v6951_v56, %v6950_v61  ;;  %v10706_v61 = vld [vmem:[#allocation52 + $0x20] sm:$0xff]   ;;  %v10707_v56 = vld [vmem:[#allocation52 + $0x18] sm:$0xff]  }
0x113f   :  { %10206 = vmatmul.mubr.bf16.vlgmr.msra.gmra.mxu0 %v6952_v60  ;;  %v8063_v60 = vld [vmem:[%s14145_s2] ss:$0 sm:$0xff] }
0x1140   :  { %10245 = vmatprep.mubr.msk.bf16.mxu0 %vm11513_vm0, %v14110_v21  ;;  %10230 = vmatpush3.bf16.msra.mxu0 %v10679_v0 }
0x1141   :  { %10231 = vmatprep.subr.bf16.mxu0 %v14110_v21 }
0x1144   :  { %10232 = vmatpush3.bf16.msra.mxu0 %v10680_v62 }
0x1145   :  { %10233 = vmatprep.subr.bf16.mxu0 %v14110_v21 }
0x1148   :  { %10234 = vmatpush3.bf16.msra.mxu0 %v10681_v43 }
0x1149   :  { %10235 = vmatprep.subr.bf16.mxu0 %v14110_v21 }
0x114c   :  { %10236 = vmatpush3.bf16.msra.mxu0 %v10682_v25 }
0x114d   :  { %10237 = vmatprep.subr.bf16.mxu0 %v14110_v21 }
0x1150   :  { %10238 = vmatpush3.bf16.msra.mxu0 %v10683_v47 }
0x1151   :  { %10239 = vmatprep.subr.bf16.mxu0 %v14110_v21 }
0x1154   :  { %10240 = vmatpush3.bf16.msra.mxu0 %v10684_v16 }
0x1155   :  { %10241 = vmatprep.subr.bf16.mxu0 %v14110_v21 }
0x1158   :  { %10242 = vmatpush3.bf16.msra.mxu0 %v10685_v17 }
0x1159   :  { %10243 = vmatprep.subr.bf16.mxu0 %v14110_v21 }
0x115c   :  { %10244 = vmatpush3.bf16.msra.mxu0 %v10686_v18 }
0x115d   :  { %10269 = vmatprep.subr.bf16.mxu0 %v14110_v21 }
0x11ff   :  { %v7058_v57 = vpop.f32.mrf.mxu0 }
0x1200   :  { %v7059_v37 = vadd.f32 %v8036_v12, %v7058_v57  ;;  %v10708_v57 = vld [vmem:[#allocation52 + $0x10] sm:$0xff]  }
0x1201   :  { %v10207_v40 = vpop.f32.mrf.mxu0 }
0x1202   :  { %v7065_v55 = vmax.f32 %v7059_v37, 0.0  ;;  %v10709_v40 = vld [vmem:[#allocation52 + $0x8] sm:$0xff]   ;;  %v10710_v37 = vld [vmem:[#allocation52] sm:$0xff]  }
0x1203   :  { %v7061_v54 = vpop.f32.mrf.mxu0 }
0x1204   :  { %v7062_v45 = vadd.f32 %v8036_v12, %v7061_v54  ;;  %v8072_v54 = vld [vmem:[%s11745_s3] ss:$0 sm:$0xff]  ;;  %s11373_s3 = scalar_lea.vmem %s7648_s11, 256 }
0x1205   :  { %v10208_v7 = vpop.f32.mrf.mxu0  ;;  %p11374_p11 = scmp.ne.s32.totalorder %s7648_s11, %s11373_s3  ;;  %p11379_p13 = scmp.lt.s32.totalorder %s11373_s3, %s11373_s3 }
0x1206   :  { %v7066_v44 = vmax.f32 %v7062_v45, 0.0 }
0x1207   :  { %p11380_p0 = por %p11379_p13, %p11378_p12 }
0x1208   :  { %v7067_v38 = vpack.c.bf16 %v7066_v44, %v7065_v55 }
0x1209   :  { %p11381_p1 = pnand %p11380_p0, %p11374_p11 }
0x120a   :  { %10226 = vmatmul.mubr.bf16.vlgmr.msra.gmra.mxu1 %v7067_v38 }
0x120b   :  { %10265 = vmatprep.mubr.msk.bf16.mxu1 %vm11513_vm0, %v14110_v21  ;;  %10250 = vmatpush3.bf16.msra.mxu1 %v10687_v11 }
0x120c   :  { %10251 = vmatprep.subr.bf16.mxu1 %v14110_v21 }
0x120f   :  { %10252 = vmatpush3.bf16.msra.mxu1 %v10688_v58  ;;  %v8081_v58 = vld [vmem:[%s11755_s14] ss:$0 sm:$0xff] }
0x1210   :  { %10253 = vmatprep.subr.bf16.mxu1 %v14110_v21 }
0x1213   :  { %10254 = vmatpush3.bf16.msra.mxu1 %v10689_v27 }
0x1214   :  { %10255 = vmatprep.subr.bf16.mxu1 %v14110_v21 }
0x1217   :  { %10256 = vmatpush3.bf16.msra.mxu1 %v10690_v35 }
0x1218   :  { %10257 = vmatprep.subr.bf16.mxu1 %v14110_v21 }
0x121b   :  { %10258 = vmatpush3.bf16.msra.mxu1 %v10691_v28 }
0x121c   :  { %10259 = vmatprep.subr.bf16.mxu1 %v14110_v21 }
0x121f   :  { %10260 = vmatpush3.bf16.msra.mxu1 %v10692_v6 }
0x1220   :  { %10261 = vmatprep.subr.bf16.mxu1 %v14110_v21 }
0x1223   :  { %10262 = vmatpush3.bf16.msra.mxu1 %v10693_v22 }
0x1224   :  { %10263 = vmatprep.subr.bf16.mxu1 %v14110_v21 }
0x1227   :  { %10264 = vmatpush3.bf16.msra.mxu1 %v10694_v41 }
0x1228   :  { %10289 = vmatprep.subr.bf16.mxu1 %v14110_v21 }
0x12ca   :  { %v7173_v4 = vpop.f32.mrf.mxu1 }
0x12cb   :  { %v7174_v5 = vadd.f32 %v8045_v30, %v7173_v4 }
0x12cc   :  { %v10227_v15 = vpop.f32.mrf.mxu1 }
0x12cd   :  { %v7180_v50 = vmax.f32 %v7174_v5, 0.0 }
0x12ce   :  { %v7176_v32 = vpop.f32.mrf.mxu1 }
0x12cf   :  { %v7177_v42 = vadd.f32 %v8045_v30, %v7176_v32 }
0x12d0   :  { %v10228_v51 = vpop.f32.mrf.mxu1 }
0x12d1   :  { %v7181_v53 = vmax.f32 %v7177_v42, 0.0 }
0x12d3   :  { %v7182_v31 = vpack.c.bf16 %v7181_v53, %v7180_v50 }
0x12d5   :  { %10246 = vmatmul.mubr.bf16.vlgmr.msra.gmra.mxu0 %v7182_v31 }
0x12d6   :  { %10285 = vmatprep.mubr.msk.bf16.mxu0 %vm11513_vm0, %v14110_v21  ;;  %10270 = vmatpush3.bf16.msra.mxu0 %v10695_v29 }
0x12d7   :  { %10271 = vmatprep.subr.bf16.mxu0 %v14110_v21 }
0x12da   :  { %10272 = vmatpush3.bf16.msra.mxu0 %v10696_v19 }
0x12db   :  { %10273 = vmatprep.subr.bf16.mxu0 %v14110_v21 }
0x12de   :  { %10274 = vmatpush3.bf16.msra.mxu0 %v10697_v14 }
0x12df   :  { %10275 = vmatprep.subr.bf16.mxu0 %v14110_v21 }
0x12e2   :  { %10276 = vmatpush3.bf16.msra.mxu0 %v10698_v9 }
0x12e3   :  { %10277 = vmatprep.subr.bf16.mxu0 %v14110_v21 }
0x12e6   :  { %10278 = vmatpush3.bf16.msra.mxu0 %v10699_v39 }
0x12e7   :  { %10279 = vmatprep.subr.bf16.mxu0 %v14110_v21 }
0x12ea   :  { %10280 = vmatpush3.bf16.msra.mxu0 %v10700_v63 }
0x12eb   :  { %10281 = vmatprep.subr.bf16.mxu0 %v14110_v21 }
0x12ee   :  { %10282 = vmatpush3.bf16.msra.mxu0 %v10701_v23 }
0x12ef   :  { %10283 = vmatprep.subr.bf16.mxu0 %v14110_v21 }
0x12f2   :  { %10284 = vmatpush3.bf16.msra.mxu0 %v10702_v36 }
0x1395   :  { %v7288_v59 = vpop.f32.mrf.mxu0 }
0x1396   :  { %v7289_v48 = vadd.f32 %v8054_v1, %v7288_v59 }
0x1397   :  { %v10247_v20 = vpop.f32.mrf.mxu0 }
0x1398   :  { %v7295_v8 = vmax.f32 %v7289_v48, 0.0 }
0x1399   :  { %v7291_v26 = vpop.f32.mrf.mxu0 }
0x139a   :  { %v7292_v52 = vadd.f32 %v8054_v1, %v7291_v26 }
0x139b   :  { %v10248_v49 = vpop.f32.mrf.mxu0 }
0x139c   :  { %v7296_v2 = vmax.f32 %v7292_v52, 0.0 }
0x139e   :  { %v7297_v33 = vpack.c.bf16 %v7296_v2, %v7295_v8 }
0x13a0   :  { %10266 = vmatmul.mubr.bf16.vlgmr.msra.gmra.mxu1 %v7297_v33 }
0x13a1   :  { %10305 = vmatprep.mubr.msk.bf16.mxu1 %vm11513_vm0, %v14110_v21  ;;  %10290 = vmatpush3.bf16.msra.mxu1 %v10703_v10 }
0x13a2   :  { %10291 = vmatprep.subr.bf16.mxu1 %v14110_v21 }
0x13a5   :  { %10292 = vmatpush3.bf16.msra.mxu1 %v10704_v3 }
0x13a6   :  { %10293 = vmatprep.subr.bf16.mxu1 %v14110_v21 }
0x13a9   :  { %10294 = vmatpush3.bf16.msra.mxu1 %v10705_v46 }
0x13aa   :  { %10295 = vmatprep.subr.bf16.mxu1 %v14110_v21 }
0x13ad   :  { %10296 = vmatpush3.bf16.msra.mxu1 %v10706_v61 }
0x13ae   :  { %10297 = vmatprep.subr.bf16.mxu1 %v14110_v21 }
0x13b1   :  { %10298 = vmatpush3.bf16.msra.mxu1 %v10707_v56 }
0x13b2   :  { %10299 = vmatprep.subr.bf16.mxu1 %v14110_v21 }
0x13b5   :  { %10300 = vmatpush3.bf16.msra.mxu1 %v10708_v57 }
0x13b6   :  { %10301 = vmatprep.subr.bf16.mxu1 %v14110_v21 }
0x13b9   :  { %10302 = vmatpush3.bf16.msra.mxu1 %v10709_v40 }
0x13ba   :  { %10303 = vmatprep.subr.bf16.mxu1 %v14110_v21 }
0x13bd   :  { %10304 = vmatpush3.bf16.msra.mxu1 %v10710_v37 }
0x1460   :  { %v7403_v34 = vpop.f32.mrf.mxu1 }
0x1461   :  { %v7404_v13 = vadd.f32 %v8063_v60, %v7403_v34 }
0x1462   :  { %v10267_v24 = vpop.f32.mrf.mxu1 }
0x1463   :  { %v7410_v25 = vmax.f32 %v7404_v13, 0.0 }
0x1464   :  { %v7406_v0 = vpop.f32.mrf.mxu1 }
0x1465   :  { %v7407_v62 = vadd.f32 %v8063_v60, %v7406_v0 }
0x1466   :  { %v10268_v43 = vpop.f32.mrf.mxu1 }
0x1467   :  { %v7411_v47 = vmax.f32 %v7407_v62, 0.0 }
0x1469   :  { %v7412_v12 = vpack.c.bf16 %v7411_v47, %v7410_v25 }
0x146b   :  { %10286 = vmatmul.mubr.bf16.vlgmr.msra.gmra.mxu0 %v7412_v12 }
0x152b   :  { %v7518_v45 = vpop.f32.mrf.mxu0 }
0x152c   :  { %v7519_v55 = vadd.f32 %v8072_v54, %v7518_v45 }
0x152d   :  { %v10287_v7 = vpop.f32.mrf.mxu0 }
0x152e   :  { %v7525_v17 = vmax.f32 %v7519_v55, 0.0 }
0x152f   :  { %v7521_v44 = vpop.f32.mrf.mxu0 }
0x1530   :  { %v7522_v38 = vadd.f32 %v8072_v54, %v7521_v44 }
0x1531   :  { %v10288_v16 = vpop.f32.mrf.mxu0 }
0x1532   :  { %v7526_v18 = vmax.f32 %v7522_v38, 0.0 }
0x1534   :  { %v7527_v11 = vpack.c.bf16 %v7526_v18, %v7525_v17 }
0x1536   :  { %10306 = vmatmul.mubr.bf16.vlgmr.msra.gmra.mxu1 %v7527_v11 }
0x15f6   :  { %v7633_v27 = vpop.f32.mrf.mxu1 }
0x15f7   :  { %v7634_v35 = vadd.f32 %v8081_v58, %v7633_v27 }
0x15f8   :  { %v10307_v28 = vpop.f32.mrf.mxu1 }
0x15f9   :  { %7640 = vst [vmem:[#allocation53] sm:$0xff] %v7634_v35 }
0x15fa   :  { %v7636_v21 = vpop.f32.mrf.mxu1 }
0x15fb   :  { %v7637_v30 = vadd.f32 %v8081_v58, %v7636_v21 }
0x15fc   :  { %v10308_v4 = vpop.f32.mrf.mxu1 }
0x15fd   :  { %7641 = vst [vmem:[#allocation53 + $0x8] sm:$0xff] %v7637_v30 }
0x15fe   :  { %11384 = shalt.err (!%p11381_p1)
}
0x15ff   :  { %s11515_s15 = smov 128   ;;  %s11516_s14 = smov 8  }
0x1600   :  { %7653 = dma.vmem_to_hbm [thread:$0]  %s7648_s11, 256, %s11760_s17, [#allocation4], %s11515_s15, %s11515_s15, %s11516_s14  }
0x1601   :  { %11427 = dma.done.wait [#allocation4], 256  }
0x1602   :  { %11428 = vsyncadd [#allocation4], 4294967040 }
0x1603   :  { %7657 = vsyncpa [#allocation3], 1 }
0x1604   :  { %7658 = vsyncpa [#allocation6], 1 }
0x1605   :  { %7659 = vsyncpa [#allocation9], 1 }
0x1606   :  { %7660 = vsyncpa [#allocation12], 1 }
0x1607   :  { %7661 = vsyncpa [#allocation15], 1 }
0x1608   :  { %7662 = vsyncpa [#allocation18], 1 }
0x1609   :  { %7663 = vsyncpa [#allocation21], 1 }
0x160a   :  { %7664 = vsyncpa [#allocation24], 1 }
0x160b   :  { %7665 = vsyncpa [#allocation27], 1 }
0x160c   :  { %7666 = vsyncpa [#allocation30], 1 }
0x160d   :  { %7667 = vsyncpa [#allocation33], 1 }
0x160e   :  { %7668 = vsyncpa [#allocation36], 1 }
0x160f   :  { %7669 = vsyncpa [#allocation39], 1 }
0x1610   :  { %7670 = vsyncpa [#allocation42], 1 }
0x1611   :  { %7671 = vsyncpa [#allocation45], 1 }
0x1612   :  { %7672 = vsyncpa [#allocation48], 1 }
0x1613   :  { %7673 = vsyncpa [#allocation51], 1 }
0x1614   :  { %7674 = vsyncpa [#allocation4], 1 }

</bundles_post_ra>
